<compile_context>
chip_gen: v6e
topology: v6e:2x2x1
jax: 0.10.0
libtpu: 0.0.40
codegen_flags: <defaults>
</compile_context>

<pallas_src>
import functools
import math

import jax
import jax.numpy as jnp
from jax.experimental import pallas as pl
from jax.experimental.pallas import tpu as pltpu


# ---------------------------------------------------------------------------
# Fused Pallas kernel: entire autoencoder forward pass
# ---------------------------------------------------------------------------

def lstm_autoencoder_kernel(
    x_ref,                                   # (T*B, I)  time-major, flattened input
    wih_e0, whf_e0, whb_e0, b_e0,            # encoder layer 0
    wih_e1, whf_e1, whb_e1, b_e1,            # encoder layer 1
    wih_d0, whf_d0, whb_d0, b_d0,            # decoder layer 0
    wih_d1, whf_d1, whb_d1, b_d1,            # decoder layer 1
    w_out_ref, b_out_ref,                    # output Linear
    out_ref,                                 # (T*B, I)
    *, seq_len, batch, hidden,
):
    T, B, H = seq_len, batch, hidden
    G = 4 * H                                # fused gate width per direction
    f32 = jnp.float32

    def lstm_dir(proj_rows, whh_ref, reverse):
        """One direction of one layer.

        proj_rows[t] : (B, 4H) = x_t @ W_ih^T + (b_ih + b_hh), precomputed (hoisted).
        Gate order along 4H is (i, f, g, o), matching PyTorch.
        """
        w = whh_ref[...]                     # (H, 4H) bf16; loaded once, reused every step
        h = jnp.zeros((B, H), f32)
        c = jnp.zeros((B, H), f32)
        outs = [None] * T
        steps = range(T - 1, -1, -1) if reverse else range(T)
        for t in steps:                      # static unroll (T is small & known)
            gates = proj_rows[t] + jnp.dot(h.astype(w.dtype), w,
                                           preferred_element_type=f32)   # (B, 4H)
            i_g = jax.nn.sigmoid(gates[:, 0:H])
            f_g = jax.nn.sigmoid(gates[:, H:2 * H])
            g_g = jnp.tanh(gates[:, 2 * H:3 * H])
            o_g = jax.nn.sigmoid(gates[:, 3 * H:4 * H])
            c = f_g * c + i_g * g_g
            h = o_g * jnp.tanh(c)
            outs[t] = h
        return outs, h                       # outs in time order; h = final hidden state

    def bilstm(proj_f_rows, proj_b_rows, whh_f_ref, whh_b_ref):
        outs_f, hf_fin = lstm_dir(proj_f_rows, whh_f_ref, reverse=False)
        outs_b, hb_fin = lstm_dir(proj_b_rows, whh_b_ref, reverse=True)
        rows = [jnp.concatenate([outs_f[t], outs_b[t]], axis=-1) for t in range(T)]
        return jnp.concatenate(rows, axis=0), hf_fin, hb_fin      # (T*B, 2H)

    def input_proj(x_flat, wih_ref, b_ref):
        """Hoisted input projection: ONE (T*B, I) @ (I, 8H) matmul for all steps & dirs."""
        proj = jnp.dot(x_flat, wih_ref[...], preferred_element_type=f32) + b_ref[...]
        pf = [proj[t * B:(t + 1) * B, 0:G] for t in range(T)]      # fw half  (128-lane aligned)
        pb = [proj[t * B:(t + 1) * B, G:2 * G] for t in range(T)]  # bw half
        return pf, pb

    # ---------------- encoder ----------------
    x0 = x_ref[...]                                               # (T*B, I)
    pf, pb = input_proj(x0, wih_e0, b_e0)
    e0_seq, _, _ = bilstm(pf, pb, whf_e0, whb_e0)                 # (T*B, 2H)

    pf, pb = input_proj(e0_seq, wih_e1, b_e1)
    _, hf_fin, hb_fin = bilstm(pf, pb, whf_e1, whb_e1)

    # context = cat(hidden[-2], hidden[-1]) = (fw final h, bw final h) of last encoder layer
    context = jnp.concatenate([hf_fin, hb_fin], axis=-1)          # (B, 2H)

    # ---------------- decoder ----------------
    # Decoder layer 0 sees the same context at every timestep -> project it once and reuse.
    proj_ctx = jnp.dot(context, wih_d0[...], preferred_element_type=f32) + b_d0[...]
    pf = [proj_ctx[:, 0:G]] * T
    pb = [proj_ctx[:, G:2 * G]] * T
    d0_seq, _, _ = bilstm(pf, pb, whf_d0, whb_d0)                 # (T*B, 2H)

    pf, pb = input_proj(d0_seq, wih_d1, b_d1)
    d1_seq, _, _ = bilstm(pf, pb, whf_d1, whb_d1)                 # (T*B, 2H)

    # ---------------- output linear ----------------
    y = jnp.dot(d1_seq, w_out_ref[...], preferred_element_type=f32) + b_out_ref[...]
    out_ref[...] = y.astype(out_ref.dtype)


# ---------------------------------------------------------------------------
# Wrapper around pallas_call
# ---------------------------------------------------------------------------

def lstm_autoencoder_forward(params, x_btf, hidden_size):
    """x_btf: (B, T, input_size) -> reconstruction (B, T, input_size)."""
    B, T, I = x_btf.shape
    H = hidden_size

    # Time-major and flattened to (T*B, I) so each layer's input projection is one matmul.
    x_flat = jnp.transpose(x_btf, (1, 0, 2)).reshape(T * B, I)

    args = [x_flat]
    for name in ("enc_l0", "enc_l1", "dec_l0", "dec_l1"):
        lay = params[name]
        args += [lay["wih"], lay["whh_f"], lay["whh_b"], lay["b"]]
    args += [params["w_out"], params["b_out"]]

    kernel = functools.partial(lstm_autoencoder_kernel, seq_len=T, batch=B, hidden=H)
    y_flat = pl.pallas_call(
        kernel,
        out_shape=jax.ShapeDtypeStruct((T * B, I), jnp.float32),
        in_specs=[pl.BlockSpec(memory_space=pltpu.MemorySpace.VMEM)] * len(args),
        out_specs=pl.BlockSpec(memory_space=pltpu.MemorySpace.VMEM),
    )(*args)

    return jnp.transpose(y_flat.reshape(T, B, I), (1, 0, 2))     # back to (B, T, I)


# ---------------------------------------------------------------------------
# Parameter construction (deterministic, PyTorch-style uniform(-1/sqrt(H), 1/sqrt(H)))
# ---------------------------------------------------------------------------

def init_bilstm_layer(key, in_size, hidden_size):
    """Gate order (i, f, g, o) along the 4H axis; fw|bw fused along the 8H lane axis."""
    H = hidden_size
    k = 1.0 / math.sqrt(H)
    ks = jax.random.split(key, 8)
    u = lambda kk, shape: jax.random.uniform(kk, shape, jnp.float32, -k, k)
    wih_f, wih_b = u(ks[0], (in_size, 4 * H)), u(ks[1], (in_size, 4 * H))
    whh_f, whh_b = u(ks[2], (H, 4 * H)), u(ks[3], (H, 4 * H))
    b_f = u(ks[4], (4 * H,)) + u(ks[5], (4 * H,))        # b_ih + b_hh folded
    b_b = u(ks[6], (4 * H,)) + u(ks[7], (4 * H,))
    return {
        "wih": jnp.concatenate([wih_f, wih_b], axis=1),            # (in, 8H)  f32
        "whh_f": whh_f.astype(jnp.bfloat16),                       # (H, 4H)   bf16 (MXU path)
        "whh_b": whh_b.astype(jnp.bfloat16),                       # (H, 4H)   bf16
        "b": jnp.concatenate([b_f, b_b])[None, :],                 # (1, 8H)   f32
    }


def init_params(key, input_size, hidden_size):
    H = hidden_size
    keys = jax.random.split(key, 6)
    params = {
        "enc_l0": init_bilstm_layer(keys[0], input_size, H),
        "enc_l1": init_bilstm_layer(keys[1], 2 * H, H),
        "dec_l0": init_bilstm_layer(keys[2], 2 * H, H),
        "dec_l1": init_bilstm_layer(keys[3], 2 * H, H),
    }
    k_lin = 1.0 / math.sqrt(2 * H)
    params["w_out"] = jax.random.uniform(keys[4], (2 * H, input_size), jnp.float32, -k_lin, k_lin)
    params["b_out"] = jax.random.uniform(keys[5], (1, input_size), jnp.float32, -k_lin, k_lin)
    return params


# ---------------------------------------------------------------------------
# Main
# ---------------------------------------------------------------------------

if __name__ == "__main__":
    INPUT_SIZE = 1
    HIDDEN_SIZE = 32
    BATCH = 2
    SEQ_LEN = 8

    key = jax.random.PRNGKey(0)
    k_params, k_x = jax.random.split(key)
    params = init_params(k_params, INPUT_SIZE, HIDDEN_SIZE)
    x = jax.random.normal(k_x, (BATCH, SEQ_LEN, INPUT_SIZE), dtype=jnp.float32)

    fwd = jax.jit(lambda p, xx: lstm_autoencoder_forward(p, xx, HIDDEN_SIZE))
    out = jax.block_until_ready(fwd(params, x))

    assert out.shape == (BATCH, SEQ_LEN, INPUT_SIZE), out.shape
    assert out.dtype == jnp.float32
    assert bool(jnp.all(jnp.isfinite(out)))
    print("KERNEL_OK")
</pallas_src>

<mosaic_0001>
module attributes {stable_mosaic.version = 11 : i64} {
  func.func @lstm_autoencoder_kernel(%arg0: memref<16x1xf32, #tpu.memory_space<vmem>>, %arg1: memref<1x256xf32, #tpu.memory_space<vmem>>, %arg2: memref<32x128xbf16, #tpu.memory_space<vmem>>, %arg3: memref<32x128xbf16, #tpu.memory_space<vmem>>, %arg4: memref<1x256xf32, #tpu.memory_space<vmem>>, %arg5: memref<64x256xf32, #tpu.memory_space<vmem>>, %arg6: memref<32x128xbf16, #tpu.memory_space<vmem>>, %arg7: memref<32x128xbf16, #tpu.memory_space<vmem>>, %arg8: memref<1x256xf32, #tpu.memory_space<vmem>>, %arg9: memref<64x256xf32, #tpu.memory_space<vmem>>, %arg10: memref<32x128xbf16, #tpu.memory_space<vmem>>, %arg11: memref<32x128xbf16, #tpu.memory_space<vmem>>, %arg12: memref<1x256xf32, #tpu.memory_space<vmem>>, %arg13: memref<64x256xf32, #tpu.memory_space<vmem>>, %arg14: memref<32x128xbf16, #tpu.memory_space<vmem>>, %arg15: memref<32x128xbf16, #tpu.memory_space<vmem>>, %arg16: memref<1x256xf32, #tpu.memory_space<vmem>>, %arg17: memref<64x1xf32, #tpu.memory_space<vmem>>, %arg18: memref<1x1xf32, #tpu.memory_space<vmem>>, %arg19: memref<16x1xf32, #tpu.memory_space<vmem>>) attributes {dimension_semantics = [], scalar_prefetch = 0 : i64, scratch_operands = 0 : i64, tpu.core_type = #tpu.core_type<tc>} {
    %c0 = arith.constant 0 : index
    %c0_0 = arith.constant 0 : index
    %0 = vector.load %arg0[%c0, %c0_0] : memref<16x1xf32, #tpu.memory_space<vmem>>, vector<16x1xf32>
    %c0_1 = arith.constant 0 : index
    %c0_2 = arith.constant 0 : index
    %1 = vector.load %arg1[%c0_1, %c0_2] : memref<1x256xf32, #tpu.memory_space<vmem>>, vector<1x256xf32>
    %cst = arith.constant dense<0.000000e+00> : vector<16x256xf32>
    %2 = tpu.matmul %0, %1, %cst {dimension_numbers = #tpu.dot_dimension_numbers<[1], [0], [0], [1], [0, 0, 1, 1], [], []>} : vector<16x1xf32>, vector<1x256xf32>, vector<16x256xf32> -> vector<16x256xf32>
    %c0_3 = arith.constant 0 : index
    %c0_4 = arith.constant 0 : index
    %3 = vector.load %arg4[%c0_3, %c0_4] : memref<1x256xf32, #tpu.memory_space<vmem>>, vector<1x256xf32>
    %4 = vector.broadcast %3 : vector<1x256xf32> to vector<16x256xf32>
    %5 = arith.addf %2, %4 : vector<16x256xf32>
    %6 = vector.extract_strided_slice %5 {offsets = [0, 0], sizes = [2, 128], strides = [1, 1]} : vector<16x256xf32> to vector<2x128xf32>
    %7 = vector.extract_strided_slice %5 {offsets = [2, 0], sizes = [2, 128], strides = [1, 1]} : vector<16x256xf32> to vector<2x128xf32>
    %8 = vector.extract_strided_slice %5 {offsets = [4, 0], sizes = [2, 128], strides = [1, 1]} : vector<16x256xf32> to vector<2x128xf32>
    %9 = vector.extract_strided_slice %5 {offsets = [6, 0], sizes = [2, 128], strides = [1, 1]} : vector<16x256xf32> to vector<2x128xf32>
    %10 = vector.extract_strided_slice %5 {offsets = [8, 0], sizes = [2, 128], strides = [1, 1]} : vector<16x256xf32> to vector<2x128xf32>
    %11 = vector.extract_strided_slice %5 {offsets = [10, 0], sizes = [2, 128], strides = [1, 1]} : vector<16x256xf32> to vector<2x128xf32>
    %12 = vector.extract_strided_slice %5 {offsets = [12, 0], sizes = [2, 128], strides = [1, 1]} : vector<16x256xf32> to vector<2x128xf32>
    %13 = vector.extract_strided_slice %5 {offsets = [14, 0], sizes = [2, 128], strides = [1, 1]} : vector<16x256xf32> to vector<2x128xf32>
    %14 = vector.extract_strided_slice %5 {offsets = [0, 128], sizes = [2, 128], strides = [1, 1]} : vector<16x256xf32> to vector<2x128xf32>
    %15 = vector.extract_strided_slice %5 {offsets = [2, 128], sizes = [2, 128], strides = [1, 1]} : vector<16x256xf32> to vector<2x128xf32>
    %16 = vector.extract_strided_slice %5 {offsets = [4, 128], sizes = [2, 128], strides = [1, 1]} : vector<16x256xf32> to vector<2x128xf32>
    %17 = vector.extract_strided_slice %5 {offsets = [6, 128], sizes = [2, 128], strides = [1, 1]} : vector<16x256xf32> to vector<2x128xf32>
    %18 = vector.extract_strided_slice %5 {offsets = [8, 128], sizes = [2, 128], strides = [1, 1]} : vector<16x256xf32> to vector<2x128xf32>
    %19 = vector.extract_strided_slice %5 {offsets = [10, 128], sizes = [2, 128], strides = [1, 1]} : vector<16x256xf32> to vector<2x128xf32>
    %20 = vector.extract_strided_slice %5 {offsets = [12, 128], sizes = [2, 128], strides = [1, 1]} : vector<16x256xf32> to vector<2x128xf32>
    %21 = vector.extract_strided_slice %5 {offsets = [14, 128], sizes = [2, 128], strides = [1, 1]} : vector<16x256xf32> to vector<2x128xf32>
    %c0_5 = arith.constant 0 : index
    %c0_6 = arith.constant 0 : index
    %22 = vector.load %arg2[%c0_5, %c0_6] : memref<32x128xbf16, #tpu.memory_space<vmem>>, vector<32x128xbf16>
    %cst_7 = arith.constant 0.000000e+00 : f32
    %23 = vector.broadcast %cst_7 : f32 to vector<2x32xf32>
    %cst_8 = arith.constant 0.000000e+00 : f32
    %24 = vector.broadcast %cst_8 : f32 to vector<2x32xf32>
    %25 = arith.truncf %23 : vector<2x32xf32> to vector<2x32xbf16>
    %cst_9 = arith.constant dense<0.000000e+00> : vector<2x128xf32>
    %26 = tpu.matmul %25, %22, %cst_9 {dimension_numbers = #tpu.dot_dimension_numbers<[1], [0], [0], [1], [0, 0, 1, 1], [], []>} : vector<2x32xbf16>, vector<32x128xbf16>, vector<2x128xf32> -> vector<2x128xf32>
    %27 = arith.addf %6, %26 : vector<2x128xf32>
    %28 = vector.extract_strided_slice %27 {offsets = [0, 0], sizes = [2, 32], strides = [1, 1]} : vector<2x128xf32> to vector<2x32xf32>
    %29 = arith.negf %28 : vector<2x32xf32>
    %30 = math.exp %29 : vector<2x32xf32>
    %cst_10 = arith.constant 1.000000e+00 : f32
    %31 = vector.broadcast %cst_10 : f32 to vector<2x32xf32>
    %32 = arith.addf %31, %30 : vector<2x32xf32>
    %33 = arith.divf %31, %32 : vector<2x32xf32>
    %34 = vector.extract_strided_slice %27 {offsets = [0, 32], sizes = [2, 32], strides = [1, 1]} : vector<2x128xf32> to vector<2x32xf32>
    %35 = arith.negf %34 : vector<2x32xf32>
    %36 = math.exp %35 : vector<2x32xf32>
    %cst_11 = arith.constant 1.000000e+00 : f32
    %37 = vector.broadcast %cst_11 : f32 to vector<2x32xf32>
    %38 = arith.addf %37, %36 : vector<2x32xf32>
    %39 = arith.divf %37, %38 : vector<2x32xf32>
    %40 = vector.extract_strided_slice %27 {offsets = [0, 64], sizes = [2, 32], strides = [1, 1]} : vector<2x128xf32> to vector<2x32xf32>
    %41 = math.tanh %40 : vector<2x32xf32>
    %42 = vector.extract_strided_slice %27 {offsets = [0, 96], sizes = [2, 32], strides = [1, 1]} : vector<2x128xf32> to vector<2x32xf32>
    %43 = arith.negf %42 : vector<2x32xf32>
    %44 = math.exp %43 : vector<2x32xf32>
    %cst_12 = arith.constant 1.000000e+00 : f32
    %45 = vector.broadcast %cst_12 : f32 to vector<2x32xf32>
    %46 = arith.addf %45, %44 : vector<2x32xf32>
    %47 = arith.divf %45, %46 : vector<2x32xf32>
    %48 = arith.mulf %39, %24 : vector<2x32xf32>
    %49 = arith.mulf %33, %41 : vector<2x32xf32>
    %50 = arith.addf %48, %49 : vector<2x32xf32>
    %51 = math.tanh %50 : vector<2x32xf32>
    %52 = arith.mulf %47, %51 : vector<2x32xf32>
    %53 = arith.truncf %52 : vector<2x32xf32> to vector<2x32xbf16>
    %cst_13 = arith.constant dense<0.000000e+00> : vector<2x128xf32>
    %54 = tpu.matmul %53, %22, %cst_13 {dimension_numbers = #tpu.dot_dimension_numbers<[1], [0], [0], [1], [0, 0, 1, 1], [], []>} : vector<2x32xbf16>, vector<32x128xbf16>, vector<2x128xf32> -> vector<2x128xf32>
    %55 = arith.addf %7, %54 : vector<2x128xf32>
    %56 = vector.extract_strided_slice %55 {offsets = [0, 0], sizes = [2, 32], strides = [1, 1]} : vector<2x128xf32> to vector<2x32xf32>
    %57 = arith.negf %56 : vector<2x32xf32>
    %58 = math.exp %57 : vector<2x32xf32>
    %cst_14 = arith.constant 1.000000e+00 : f32
    %59 = vector.broadcast %cst_14 : f32 to vector<2x32xf32>
    %60 = arith.addf %59, %58 : vector<2x32xf32>
    %61 = arith.divf %59, %60 : vector<2x32xf32>
    %62 = vector.extract_strided_slice %55 {offsets = [0, 32], sizes = [2, 32], strides = [1, 1]} : vector<2x128xf32> to vector<2x32xf32>
    %63 = arith.negf %62 : vector<2x32xf32>
    %64 = math.exp %63 : vector<2x32xf32>
    %cst_15 = arith.constant 1.000000e+00 : f32
    %65 = vector.broadcast %cst_15 : f32 to vector<2x32xf32>
    %66 = arith.addf %65, %64 : vector<2x32xf32>
    %67 = arith.divf %65, %66 : vector<2x32xf32>
    %68 = vector.extract_strided_slice %55 {offsets = [0, 64], sizes = [2, 32], strides = [1, 1]} : vector<2x128xf32> to vector<2x32xf32>
    %69 = math.tanh %68 : vector<2x32xf32>
    %70 = vector.extract_strided_slice %55 {offsets = [0, 96], sizes = [2, 32], strides = [1, 1]} : vector<2x128xf32> to vector<2x32xf32>
    %71 = arith.negf %70 : vector<2x32xf32>
    %72 = math.exp %71 : vector<2x32xf32>
    %cst_16 = arith.constant 1.000000e+00 : f32
    %73 = vector.broadcast %cst_16 : f32 to vector<2x32xf32>
    %74 = arith.addf %73, %72 : vector<2x32xf32>
    %75 = arith.divf %73, %74 : vector<2x32xf32>
    %76 = arith.mulf %67, %50 : vector<2x32xf32>
    %77 = arith.mulf %61, %69 : vector<2x32xf32>
    %78 = arith.addf %76, %77 : vector<2x32xf32>
    %79 = math.tanh %78 : vector<2x32xf32>
    %80 = arith.mulf %75, %79 : vector<2x32xf32>
    %81 = arith.truncf %80 : vector<2x32xf32> to vector<2x32xbf16>
    %cst_17 = arith.constant dense<0.000000e+00> : vector<2x128xf32>
    %82 = tpu.matmul %81, %22, %cst_17 {dimension_numbers = #tpu.dot_dimension_numbers<[1], [0], [0], [1], [0, 0, 1, 1], [], []>} : vector<2x32xbf16>, vector<32x128xbf16>, vector<2x128xf32> -> vector<2x128xf32>
    %83 = arith.addf %8, %82 : vector<2x128xf32>
    %84 = vector.extract_strided_slice %83 {offsets = [0, 0], sizes = [2, 32], strides = [1, 1]} : vector<2x128xf32> to vector<2x32xf32>
    %85 = arith.negf %84 : vector<2x32xf32>
    %86 = math.exp %85 : vector<2x32xf32>
    %cst_18 = arith.constant 1.000000e+00 : f32
    %87 = vector.broadcast %cst_18 : f32 to vector<2x32xf32>
    %88 = arith.addf %87, %86 : vector<2x32xf32>
    %89 = arith.divf %87, %88 : vector<2x32xf32>
    %90 = vector.extract_strided_slice %83 {offsets = [0, 32], sizes = [2, 32], strides = [1, 1]} : vector<2x128xf32> to vector<2x32xf32>
    %91 = arith.negf %90 : vector<2x32xf32>
    %92 = math.exp %91 : vector<2x32xf32>
    %cst_19 = arith.constant 1.000000e+00 : f32
    %93 = vector.broadcast %cst_19 : f32 to vector<2x32xf32>
    %94 = arith.addf %93, %92 : vector<2x32xf32>
    %95 = arith.divf %93, %94 : vector<2x32xf32>
    %96 = vector.extract_strided_slice %83 {offsets = [0, 64], sizes = [2, 32], strides = [1, 1]} : vector<2x128xf32> to vector<2x32xf32>
    %97 = math.tanh %96 : vector<2x32xf32>
    %98 = vector.extract_strided_slice %83 {offsets = [0, 96], sizes = [2, 32], strides = [1, 1]} : vector<2x128xf32> to vector<2x32xf32>
    %99 = arith.negf %98 : vector<2x32xf32>
    %100 = math.exp %99 : vector<2x32xf32>
    %cst_20 = arith.constant 1.000000e+00 : f32
    %101 = vector.broadcast %cst_20 : f32 to vector<2x32xf32>
    %102 = arith.addf %101, %100 : vector<2x32xf32>
    %103 = arith.divf %101, %102 : vector<2x32xf32>
    %104 = arith.mulf %95, %78 : vector<2x32xf32>
    %105 = arith.mulf %89, %97 : vector<2x32xf32>
    %106 = arith.addf %104, %105 : vector<2x32xf32>
    %107 = math.tanh %106 : vector<2x32xf32>
    %108 = arith.mulf %103, %107 : vector<2x32xf32>
    %109 = arith.truncf %108 : vector<2x32xf32> to vector<2x32xbf16>
    %cst_21 = arith.constant dense<0.000000e+00> : vector<2x128xf32>
    %110 = tpu.matmul %109, %22, %cst_21 {dimension_numbers = #tpu.dot_dimension_numbers<[1], [0], [0], [1], [0, 0, 1, 1], [], []>} : vector<2x32xbf16>, vector<32x128xbf16>, vector<2x128xf32> -> vector<2x128xf32>
    %111 = arith.addf %9, %110 : vector<2x128xf32>
    %112 = vector.extract_strided_slice %111 {offsets = [0, 0], sizes = [2, 32], strides = [1, 1]} : vector<2x128xf32> to vector<2x32xf32>
    %113 = arith.negf %112 : vector<2x32xf32>
    %114 = math.exp %113 : vector<2x32xf32>
    %cst_22 = arith.constant 1.000000e+00 : f32
    %115 = vector.broadcast %cst_22 : f32 to vector<2x32xf32>
    %116 = arith.addf %115, %114 : vector<2x32xf32>
    %117 = arith.divf %115, %116 : vector<2x32xf32>
    %118 = vector.extract_strided_slice %111 {offsets = [0, 32], sizes = [2, 32], strides = [1, 1]} : vector<2x128xf32> to vector<2x32xf32>
    %119 = arith.negf %118 : vector<2x32xf32>
    %120 = math.exp %119 : vector<2x32xf32>
    %cst_23 = arith.constant 1.000000e+00 : f32
    %121 = vector.broadcast %cst_23 : f32 to vector<2x32xf32>
    %122 = arith.addf %121, %120 : vector<2x32xf32>
    %123 = arith.divf %121, %122 : vector<2x32xf32>
    %124 = vector.extract_strided_slice %111 {offsets = [0, 64], sizes = [2, 32], strides = [1, 1]} : vector<2x128xf32> to vector<2x32xf32>
    %125 = math.tanh %124 : vector<2x32xf32>
    %126 = vector.extract_strided_slice %111 {offsets = [0, 96], sizes = [2, 32], strides = [1, 1]} : vector<2x128xf32> to vector<2x32xf32>
    %127 = arith.negf %126 : vector<2x32xf32>
    %128 = math.exp %127 : vector<2x32xf32>
    %cst_24 = arith.constant 1.000000e+00 : f32
    %129 = vector.broadcast %cst_24 : f32 to vector<2x32xf32>
    %130 = arith.addf %129, %128 : vector<2x32xf32>
    %131 = arith.divf %129, %130 : vector<2x32xf32>
    %132 = arith.mulf %123, %106 : vector<2x32xf32>
    %133 = arith.mulf %117, %125 : vector<2x32xf32>
    %134 = arith.addf %132, %133 : vector<2x32xf32>
    %135 = math.tanh %134 : vector<2x32xf32>
    %136 = arith.mulf %131, %135 : vector<2x32xf32>
    %137 = arith.truncf %136 : vector<2x32xf32> to vector<2x32xbf16>
    %cst_25 = arith.constant dense<0.000000e+00> : vector<2x128xf32>
    %138 = tpu.matmul %137, %22, %cst_25 {dimension_numbers = #tpu.dot_dimension_numbers<[1], [0], [0], [1], [0, 0, 1, 1], [], []>} : vector<2x32xbf16>, vector<32x128xbf16>, vector<2x128xf32> -> vector<2x128xf32>
    %139 = arith.addf %10, %138 : vector<2x128xf32>
    %140 = vector.extract_strided_slice %139 {offsets = [0, 0], sizes = [2, 32], strides = [1, 1]} : vector<2x128xf32> to vector<2x32xf32>
    %141 = arith.negf %140 : vector<2x32xf32>
    %142 = math.exp %141 : vector<2x32xf32>
    %cst_26 = arith.constant 1.000000e+00 : f32
    %143 = vector.broadcast %cst_26 : f32 to vector<2x32xf32>
    %144 = arith.addf %143, %142 : vector<2x32xf32>
    %145 = arith.divf %143, %144 : vector<2x32xf32>
    %146 = vector.extract_strided_slice %139 {offsets = [0, 32], sizes = [2, 32], strides = [1, 1]} : vector<2x128xf32> to vector<2x32xf32>
    %147 = arith.negf %146 : vector<2x32xf32>
    %148 = math.exp %147 : vector<2x32xf32>
    %cst_27 = arith.constant 1.000000e+00 : f32
    %149 = vector.broadcast %cst_27 : f32 to vector<2x32xf32>
    %150 = arith.addf %149, %148 : vector<2x32xf32>
    %151 = arith.divf %149, %150 : vector<2x32xf32>
    %152 = vector.extract_strided_slice %139 {offsets = [0, 64], sizes = [2, 32], strides = [1, 1]} : vector<2x128xf32> to vector<2x32xf32>
    %153 = math.tanh %152 : vector<2x32xf32>
    %154 = vector.extract_strided_slice %139 {offsets = [0, 96], sizes = [2, 32], strides = [1, 1]} : vector<2x128xf32> to vector<2x32xf32>
    %155 = arith.negf %154 : vector<2x32xf32>
    %156 = math.exp %155 : vector<2x32xf32>
    %cst_28 = arith.constant 1.000000e+00 : f32
    %157 = vector.broadcast %cst_28 : f32 to vector<2x32xf32>
    %158 = arith.addf %157, %156 : vector<2x32xf32>
    %159 = arith.divf %157, %158 : vector<2x32xf32>
    %160 = arith.mulf %151, %134 : vector<2x32xf32>
    %161 = arith.mulf %145, %153 : vector<2x32xf32>
    %162 = arith.addf %160, %161 : vector<2x32xf32>
    %163 = math.tanh %162 : vector<2x32xf32>
    %164 = arith.mulf %159, %163 : vector<2x32xf32>
    %165 = arith.truncf %164 : vector<2x32xf32> to vector<2x32xbf16>
    %cst_29 = arith.constant dense<0.000000e+00> : vector<2x128xf32>
    %166 = tpu.matmul %165, %22, %cst_29 {dimension_numbers = #tpu.dot_dimension_numbers<[1], [0], [0], [1], [0, 0, 1, 1], [], []>} : vector<2x32xbf16>, vector<32x128xbf16>, vector<2x128xf32> -> vector<2x128xf32>
    %167 = arith.addf %11, %166 : vector<2x128xf32>
    %168 = vector.extract_strided_slice %167 {offsets = [0, 0], sizes = [2, 32], strides = [1, 1]} : vector<2x128xf32> to vector<2x32xf32>
    %169 = arith.negf %168 : vector<2x32xf32>
    %170 = math.exp %169 : vector<2x32xf32>
    %cst_30 = arith.constant 1.000000e+00 : f32
    %171 = vector.broadcast %cst_30 : f32 to vector<2x32xf32>
    %172 = arith.addf %171, %170 : vector<2x32xf32>
    %173 = arith.divf %171, %172 : vector<2x32xf32>
    %174 = vector.extract_strided_slice %167 {offsets = [0, 32], sizes = [2, 32], strides = [1, 1]} : vector<2x128xf32> to vector<2x32xf32>
    %175 = arith.negf %174 : vector<2x32xf32>
    %176 = math.exp %175 : vector<2x32xf32>
    %cst_31 = arith.constant 1.000000e+00 : f32
    %177 = vector.broadcast %cst_31 : f32 to vector<2x32xf32>
    %178 = arith.addf %177, %176 : vector<2x32xf32>
    %179 = arith.divf %177, %178 : vector<2x32xf32>
    %180 = vector.extract_strided_slice %167 {offsets = [0, 64], sizes = [2, 32], strides = [1, 1]} : vector<2x128xf32> to vector<2x32xf32>
    %181 = math.tanh %180 : vector<2x32xf32>
    %182 = vector.extract_strided_slice %167 {offsets = [0, 96], sizes = [2, 32], strides = [1, 1]} : vector<2x128xf32> to vector<2x32xf32>
    %183 = arith.negf %182 : vector<2x32xf32>
    %184 = math.exp %183 : vector<2x32xf32>
    %cst_32 = arith.constant 1.000000e+00 : f32
    %185 = vector.broadcast %cst_32 : f32 to vector<2x32xf32>
    %186 = arith.addf %185, %184 : vector<2x32xf32>
    %187 = arith.divf %185, %186 : vector<2x32xf32>
    %188 = arith.mulf %179, %162 : vector<2x32xf32>
    %189 = arith.mulf %173, %181 : vector<2x32xf32>
    %190 = arith.addf %188, %189 : vector<2x32xf32>
    %191 = math.tanh %190 : vector<2x32xf32>
    %192 = arith.mulf %187, %191 : vector<2x32xf32>
    %193 = arith.truncf %192 : vector<2x32xf32> to vector<2x32xbf16>
    %cst_33 = arith.constant dense<0.000000e+00> : vector<2x128xf32>
    %194 = tpu.matmul %193, %22, %cst_33 {dimension_numbers = #tpu.dot_dimension_numbers<[1], [0], [0], [1], [0, 0, 1, 1], [], []>} : vector<2x32xbf16>, vector<32x128xbf16>, vector<2x128xf32> -> vector<2x128xf32>
    %195 = arith.addf %12, %194 : vector<2x128xf32>
    %196 = vector.extract_strided_slice %195 {offsets = [0, 0], sizes = [2, 32], strides = [1, 1]} : vector<2x128xf32> to vector<2x32xf32>
    %197 = arith.negf %196 : vector<2x32xf32>
    %198 = math.exp %197 : vector<2x32xf32>
    %cst_34 = arith.constant 1.000000e+00 : f32
    %199 = vector.broadcast %cst_34 : f32 to vector<2x32xf32>
    %200 = arith.addf %199, %198 : vector<2x32xf32>
    %201 = arith.divf %199, %200 : vector<2x32xf32>
    %202 = vector.extract_strided_slice %195 {offsets = [0, 32], sizes = [2, 32], strides = [1, 1]} : vector<2x128xf32> to vector<2x32xf32>
    %203 = arith.negf %202 : vector<2x32xf32>
    %204 = math.exp %203 : vector<2x32xf32>
    %cst_35 = arith.constant 1.000000e+00 : f32
    %205 = vector.broadcast %cst_35 : f32 to vector<2x32xf32>
    %206 = arith.addf %205, %204 : vector<2x32xf32>
    %207 = arith.divf %205, %206 : vector<2x32xf32>
    %208 = vector.extract_strided_slice %195 {offsets = [0, 64], sizes = [2, 32], strides = [1, 1]} : vector<2x128xf32> to vector<2x32xf32>
    %209 = math.tanh %208 : vector<2x32xf32>
    %210 = vector.extract_strided_slice %195 {offsets = [0, 96], sizes = [2, 32], strides = [1, 1]} : vector<2x128xf32> to vector<2x32xf32>
    %211 = arith.negf %210 : vector<2x32xf32>
    %212 = math.exp %211 : vector<2x32xf32>
    %cst_36 = arith.constant 1.000000e+00 : f32
    %213 = vector.broadcast %cst_36 : f32 to vector<2x32xf32>
    %214 = arith.addf %213, %212 : vector<2x32xf32>
    %215 = arith.divf %213, %214 : vector<2x32xf32>
    %216 = arith.mulf %207, %190 : vector<2x32xf32>
    %217 = arith.mulf %201, %209 : vector<2x32xf32>
    %218 = arith.addf %216, %217 : vector<2x32xf32>
    %219 = math.tanh %218 : vector<2x32xf32>
    %220 = arith.mulf %215, %219 : vector<2x32xf32>
    %221 = arith.truncf %220 : vector<2x32xf32> to vector<2x32xbf16>
    %cst_37 = arith.constant dense<0.000000e+00> : vector<2x128xf32>
    %222 = tpu.matmul %221, %22, %cst_37 {dimension_numbers = #tpu.dot_dimension_numbers<[1], [0], [0], [1], [0, 0, 1, 1], [], []>} : vector<2x32xbf16>, vector<32x128xbf16>, vector<2x128xf32> -> vector<2x128xf32>
    %223 = arith.addf %13, %222 : vector<2x128xf32>
    %224 = vector.extract_strided_slice %223 {offsets = [0, 0], sizes = [2, 32], strides = [1, 1]} : vector<2x128xf32> to vector<2x32xf32>
    %225 = arith.negf %224 : vector<2x32xf32>
    %226 = math.exp %225 : vector<2x32xf32>
    %cst_38 = arith.constant 1.000000e+00 : f32
    %227 = vector.broadcast %cst_38 : f32 to vector<2x32xf32>
    %228 = arith.addf %227, %226 : vector<2x32xf32>
    %229 = arith.divf %227, %228 : vector<2x32xf32>
    %230 = vector.extract_strided_slice %223 {offsets = [0, 32], sizes = [2, 32], strides = [1, 1]} : vector<2x128xf32> to vector<2x32xf32>
    %231 = arith.negf %230 : vector<2x32xf32>
    %232 = math.exp %231 : vector<2x32xf32>
    %cst_39 = arith.constant 1.000000e+00 : f32
    %233 = vector.broadcast %cst_39 : f32 to vector<2x32xf32>
    %234 = arith.addf %233, %232 : vector<2x32xf32>
    %235 = arith.divf %233, %234 : vector<2x32xf32>
    %236 = vector.extract_strided_slice %223 {offsets = [0, 64], sizes = [2, 32], strides = [1, 1]} : vector<2x128xf32> to vector<2x32xf32>
    %237 = math.tanh %236 : vector<2x32xf32>
    %238 = vector.extract_strided_slice %223 {offsets = [0, 96], sizes = [2, 32], strides = [1, 1]} : vector<2x128xf32> to vector<2x32xf32>
    %239 = arith.negf %238 : vector<2x32xf32>
    %240 = math.exp %239 : vector<2x32xf32>
    %cst_40 = arith.constant 1.000000e+00 : f32
    %241 = vector.broadcast %cst_40 : f32 to vector<2x32xf32>
    %242 = arith.addf %241, %240 : vector<2x32xf32>
    %243 = arith.divf %241, %242 : vector<2x32xf32>
    %244 = arith.mulf %235, %218 : vector<2x32xf32>
    %245 = arith.mulf %229, %237 : vector<2x32xf32>
    %246 = arith.addf %244, %245 : vector<2x32xf32>
    %247 = math.tanh %246 : vector<2x32xf32>
    %248 = arith.mulf %243, %247 : vector<2x32xf32>
    %c0_41 = arith.constant 0 : index
    %c0_42 = arith.constant 0 : index
    %249 = vector.load %arg3[%c0_41, %c0_42] : memref<32x128xbf16, #tpu.memory_space<vmem>>, vector<32x128xbf16>
    %cst_43 = arith.constant 0.000000e+00 : f32
    %250 = vector.broadcast %cst_43 : f32 to vector<2x32xf32>
    %cst_44 = arith.constant 0.000000e+00 : f32
    %251 = vector.broadcast %cst_44 : f32 to vector<2x32xf32>
    %252 = arith.truncf %250 : vector<2x32xf32> to vector<2x32xbf16>
    %cst_45 = arith.constant dense<0.000000e+00> : vector<2x128xf32>
    %253 = tpu.matmul %252, %249, %cst_45 {dimension_numbers = #tpu.dot_dimension_numbers<[1], [0], [0], [1], [0, 0, 1, 1], [], []>} : vector<2x32xbf16>, vector<32x128xbf16>, vector<2x128xf32> -> vector<2x128xf32>
    %254 = arith.addf %21, %253 : vector<2x128xf32>
    %255 = vector.extract_strided_slice %254 {offsets = [0, 0], sizes = [2, 32], strides = [1, 1]} : vector<2x128xf32> to vector<2x32xf32>
    %256 = arith.negf %255 : vector<2x32xf32>
    %257 = math.exp %256 : vector<2x32xf32>
    %cst_46 = arith.constant 1.000000e+00 : f32
    %258 = vector.broadcast %cst_46 : f32 to vector<2x32xf32>
    %259 = arith.addf %258, %257 : vector<2x32xf32>
    %260 = arith.divf %258, %259 : vector<2x32xf32>
    %261 = vector.extract_strided_slice %254 {offsets = [0, 32], sizes = [2, 32], strides = [1, 1]} : vector<2x128xf32> to vector<2x32xf32>
    %262 = arith.negf %261 : vector<2x32xf32>
    %263 = math.exp %262 : vector<2x32xf32>
    %cst_47 = arith.constant 1.000000e+00 : f32
    %264 = vector.broadcast %cst_47 : f32 to vector<2x32xf32>
    %265 = arith.addf %264, %263 : vector<2x32xf32>
    %266 = arith.divf %264, %265 : vector<2x32xf32>
    %267 = vector.extract_strided_slice %254 {offsets = [0, 64], sizes = [2, 32], strides = [1, 1]} : vector<2x128xf32> to vector<2x32xf32>
    %268 = math.tanh %267 : vector<2x32xf32>
    %269 = vector.extract_strided_slice %254 {offsets = [0, 96], sizes = [2, 32], strides = [1, 1]} : vector<2x128xf32> to vector<2x32xf32>
    %270 = arith.negf %269 : vector<2x32xf32>
    %271 = math.exp %270 : vector<2x32xf32>
    %cst_48 = arith.constant 1.000000e+00 : f32
    %272 = vector.broadcast %cst_48 : f32 to vector<2x32xf32>
    %273 = arith.addf %272, %271 : vector<2x32xf32>
    %274 = arith.divf %272, %273 : vector<2x32xf32>
    %275 = arith.mulf %266, %251 : vector<2x32xf32>
    %276 = arith.mulf %260, %268 : vector<2x32xf32>
    %277 = arith.addf %275, %276 : vector<2x32xf32>
    %278 = math.tanh %277 : vector<2x32xf32>
    %279 = arith.mulf %274, %278 : vector<2x32xf32>
    %280 = arith.truncf %279 : vector<2x32xf32> to vector<2x32xbf16>
    %cst_49 = arith.constant dense<0.000000e+00> : vector<2x128xf32>
    %281 = tpu.matmul %280, %249, %cst_49 {dimension_numbers = #tpu.dot_dimension_numbers<[1], [0], [0], [1], [0, 0, 1, 1], [], []>} : vector<2x32xbf16>, vector<32x128xbf16>, vector<2x128xf32> -> vector<2x128xf32>
    %282 = arith.addf %20, %281 : vector<2x128xf32>
    %283 = vector.extract_strided_slice %282 {offsets = [0, 0], sizes = [2, 32], strides = [1, 1]} : vector<2x128xf32> to vector<2x32xf32>
    %284 = arith.negf %283 : vector<2x32xf32>
    %285 = math.exp %284 : vector<2x32xf32>
    %cst_50 = arith.constant 1.000000e+00 : f32
    %286 = vector.broadcast %cst_50 : f32 to vector<2x32xf32>
    %287 = arith.addf %286, %285 : vector<2x32xf32>
    %288 = arith.divf %286, %287 : vector<2x32xf32>
    %289 = vector.extract_strided_slice %282 {offsets = [0, 32], sizes = [2, 32], strides = [1, 1]} : vector<2x128xf32> to vector<2x32xf32>
    %290 = arith.negf %289 : vector<2x32xf32>
    %291 = math.exp %290 : vector<2x32xf32>
    %cst_51 = arith.constant 1.000000e+00 : f32
    %292 = vector.broadcast %cst_51 : f32 to vector<2x32xf32>
    %293 = arith.addf %292, %291 : vector<2x32xf32>
    %294 = arith.divf %292, %293 : vector<2x32xf32>
    %295 = vector.extract_strided_slice %282 {offsets = [0, 64], sizes = [2, 32], strides = [1, 1]} : vector<2x128xf32> to vector<2x32xf32>
    %296 = math.tanh %295 : vector<2x32xf32>
    %297 = vector.extract_strided_slice %282 {offsets = [0, 96], sizes = [2, 32], strides = [1, 1]} : vector<2x128xf32> to vector<2x32xf32>
    %298 = arith.negf %297 : vector<2x32xf32>
    %299 = math.exp %298 : vector<2x32xf32>
    %cst_52 = arith.constant 1.000000e+00 : f32
    %300 = vector.broadcast %cst_52 : f32 to vector<2x32xf32>
    %301 = arith.addf %300, %299 : vector<2x32xf32>
    %302 = arith.divf %300, %301 : vector<2x32xf32>
    %303 = arith.mulf %294, %277 : vector<2x32xf32>
    %304 = arith.mulf %288, %296 : vector<2x32xf32>
    %305 = arith.addf %303, %304 : vector<2x32xf32>
    %306 = math.tanh %305 : vector<2x32xf32>
    %307 = arith.mulf %302, %306 : vector<2x32xf32>
    %308 = arith.truncf %307 : vector<2x32xf32> to vector<2x32xbf16>
    %cst_53 = arith.constant dense<0.000000e+00> : vector<2x128xf32>
    %309 = tpu.matmul %308, %249, %cst_53 {dimension_numbers = #tpu.dot_dimension_numbers<[1], [0], [0], [1], [0, 0, 1, 1], [], []>} : vector<2x32xbf16>, vector<32x128xbf16>, vector<2x128xf32> -> vector<2x128xf32>
    %310 = arith.addf %19, %309 : vector<2x128xf32>
    %311 = vector.extract_strided_slice %310 {offsets = [0, 0], sizes = [2, 32], strides = [1, 1]} : vector<2x128xf32> to vector<2x32xf32>
    %312 = arith.negf %311 : vector<2x32xf32>
    %313 = math.exp %312 : vector<2x32xf32>
    %cst_54 = arith.constant 1.000000e+00 : f32
    %314 = vector.broadcast %cst_54 : f32 to vector<2x32xf32>
    %315 = arith.addf %314, %313 : vector<2x32xf32>
    %316 = arith.divf %314, %315 : vector<2x32xf32>
    %317 = vector.extract_strided_slice %310 {offsets = [0, 32], sizes = [2, 32], strides = [1, 1]} : vector<2x128xf32> to vector<2x32xf32>
    %318 = arith.negf %317 : vector<2x32xf32>
    %319 = math.exp %318 : vector<2x32xf32>
    %cst_55 = arith.constant 1.000000e+00 : f32
    %320 = vector.broadcast %cst_55 : f32 to vector<2x32xf32>
    %321 = arith.addf %320, %319 : vector<2x32xf32>
    %322 = arith.divf %320, %321 : vector<2x32xf32>
    %323 = vector.extract_strided_slice %310 {offsets = [0, 64], sizes = [2, 32], strides = [1, 1]} : vector<2x128xf32> to vector<2x32xf32>
    %324 = math.tanh %323 : vector<2x32xf32>
    %325 = vector.extract_strided_slice %310 {offsets = [0, 96], sizes = [2, 32], strides = [1, 1]} : vector<2x128xf32> to vector<2x32xf32>
    %326 = arith.negf %325 : vector<2x32xf32>
    %327 = math.exp %326 : vector<2x32xf32>
    %cst_56 = arith.constant 1.000000e+00 : f32
    %328 = vector.broadcast %cst_56 : f32 to vector<2x32xf32>
    %329 = arith.addf %328, %327 : vector<2x32xf32>
    %330 = arith.divf %328, %329 : vector<2x32xf32>
    %331 = arith.mulf %322, %305 : vector<2x32xf32>
    %332 = arith.mulf %316, %324 : vector<2x32xf32>
    %333 = arith.addf %331, %332 : vector<2x32xf32>
    %334 = math.tanh %333 : vector<2x32xf32>
    %335 = arith.mulf %330, %334 : vector<2x32xf32>
    %336 = arith.truncf %335 : vector<2x32xf32> to vector<2x32xbf16>
    %cst_57 = arith.constant dense<0.000000e+00> : vector<2x128xf32>
    %337 = tpu.matmul %336, %249, %cst_57 {dimension_numbers = #tpu.dot_dimension_numbers<[1], [0], [0], [1], [0, 0, 1, 1], [], []>} : vector<2x32xbf16>, vector<32x128xbf16>, vector<2x128xf32> -> vector<2x128xf32>
    %338 = arith.addf %18, %337 : vector<2x128xf32>
    %339 = vector.extract_strided_slice %338 {offsets = [0, 0], sizes = [2, 32], strides = [1, 1]} : vector<2x128xf32> to vector<2x32xf32>
    %340 = arith.negf %339 : vector<2x32xf32>
    %341 = math.exp %340 : vector<2x32xf32>
    %cst_58 = arith.constant 1.000000e+00 : f32
    %342 = vector.broadcast %cst_58 : f32 to vector<2x32xf32>
    %343 = arith.addf %342, %341 : vector<2x32xf32>
    %344 = arith.divf %342, %343 : vector<2x32xf32>
    %345 = vector.extract_strided_slice %338 {offsets = [0, 32], sizes = [2, 32], strides = [1, 1]} : vector<2x128xf32> to vector<2x32xf32>
    %346 = arith.negf %345 : vector<2x32xf32>
    %347 = math.exp %346 : vector<2x32xf32>
    %cst_59 = arith.constant 1.000000e+00 : f32
    %348 = vector.broadcast %cst_59 : f32 to vector<2x32xf32>
    %349 = arith.addf %348, %347 : vector<2x32xf32>
    %350 = arith.divf %348, %349 : vector<2x32xf32>
    %351 = vector.extract_strided_slice %338 {offsets = [0, 64], sizes = [2, 32], strides = [1, 1]} : vector<2x128xf32> to vector<2x32xf32>
    %352 = math.tanh %351 : vector<2x32xf32>
    %353 = vector.extract_strided_slice %338 {offsets = [0, 96], sizes = [2, 32], strides = [1, 1]} : vector<2x128xf32> to vector<2x32xf32>
    %354 = arith.negf %353 : vector<2x32xf32>
    %355 = math.exp %354 : vector<2x32xf32>
    %cst_60 = arith.constant 1.000000e+00 : f32
    %356 = vector.broadcast %cst_60 : f32 to vector<2x32xf32>
    %357 = arith.addf %356, %355 : vector<2x32xf32>
    %358 = arith.divf %356, %357 : vector<2x32xf32>
    %359 = arith.mulf %350, %333 : vector<2x32xf32>
    %360 = arith.mulf %344, %352 : vector<2x32xf32>
    %361 = arith.addf %359, %360 : vector<2x32xf32>
    %362 = math.tanh %361 : vector<2x32xf32>
    %363 = arith.mulf %358, %362 : vector<2x32xf32>
    %364 = arith.truncf %363 : vector<2x32xf32> to vector<2x32xbf16>
    %cst_61 = arith.constant dense<0.000000e+00> : vector<2x128xf32>
    %365 = tpu.matmul %364, %249, %cst_61 {dimension_numbers = #tpu.dot_dimension_numbers<[1], [0], [0], [1], [0, 0, 1, 1], [], []>} : vector<2x32xbf16>, vector<32x128xbf16>, vector<2x128xf32> -> vector<2x128xf32>
    %366 = arith.addf %17, %365 : vector<2x128xf32>
    %367 = vector.extract_strided_slice %366 {offsets = [0, 0], sizes = [2, 32], strides = [1, 1]} : vector<2x128xf32> to vector<2x32xf32>
    %368 = arith.negf %367 : vector<2x32xf32>
    %369 = math.exp %368 : vector<2x32xf32>
    %cst_62 = arith.constant 1.000000e+00 : f32
    %370 = vector.broadcast %cst_62 : f32 to vector<2x32xf32>
    %371 = arith.addf %370, %369 : vector<2x32xf32>
    %372 = arith.divf %370, %371 : vector<2x32xf32>
    %373 = vector.extract_strided_slice %366 {offsets = [0, 32], sizes = [2, 32], strides = [1, 1]} : vector<2x128xf32> to vector<2x32xf32>
    %374 = arith.negf %373 : vector<2x32xf32>
    %375 = math.exp %374 : vector<2x32xf32>
    %cst_63 = arith.constant 1.000000e+00 : f32
    %376 = vector.broadcast %cst_63 : f32 to vector<2x32xf32>
    %377 = arith.addf %376, %375 : vector<2x32xf32>
    %378 = arith.divf %376, %377 : vector<2x32xf32>
    %379 = vector.extract_strided_slice %366 {offsets = [0, 64], sizes = [2, 32], strides = [1, 1]} : vector<2x128xf32> to vector<2x32xf32>
    %380 = math.tanh %379 : vector<2x32xf32>
    %381 = vector.extract_strided_slice %366 {offsets = [0, 96], sizes = [2, 32], strides = [1, 1]} : vector<2x128xf32> to vector<2x32xf32>
    %382 = arith.negf %381 : vector<2x32xf32>
    %383 = math.exp %382 : vector<2x32xf32>
    %cst_64 = arith.constant 1.000000e+00 : f32
    %384 = vector.broadcast %cst_64 : f32 to vector<2x32xf32>
    %385 = arith.addf %384, %383 : vector<2x32xf32>
    %386 = arith.divf %384, %385 : vector<2x32xf32>
    %387 = arith.mulf %378, %361 : vector<2x32xf32>
    %388 = arith.mulf %372, %380 : vector<2x32xf32>
    %389 = arith.addf %387, %388 : vector<2x32xf32>
    %390 = math.tanh %389 : vector<2x32xf32>
    %391 = arith.mulf %386, %390 : vector<2x32xf32>
    %392 = arith.truncf %391 : vector<2x32xf32> to vector<2x32xbf16>
    %cst_65 = arith.constant dense<0.000000e+00> : vector<2x128xf32>
    %393 = tpu.matmul %392, %249, %cst_65 {dimension_numbers = #tpu.dot_dimension_numbers<[1], [0], [0], [1], [0, 0, 1, 1], [], []>} : vector<2x32xbf16>, vector<32x128xbf16>, vector<2x128xf32> -> vector<2x128xf32>
    %394 = arith.addf %16, %393 : vector<2x128xf32>
    %395 = vector.extract_strided_slice %394 {offsets = [0, 0], sizes = [2, 32], strides = [1, 1]} : vector<2x128xf32> to vector<2x32xf32>
    %396 = arith.negf %395 : vector<2x32xf32>
    %397 = math.exp %396 : vector<2x32xf32>
    %cst_66 = arith.constant 1.000000e+00 : f32
    %398 = vector.broadcast %cst_66 : f32 to vector<2x32xf32>
    %399 = arith.addf %398, %397 : vector<2x32xf32>
    %400 = arith.divf %398, %399 : vector<2x32xf32>
    %401 = vector.extract_strided_slice %394 {offsets = [0, 32], sizes = [2, 32], strides = [1, 1]} : vector<2x128xf32> to vector<2x32xf32>
    %402 = arith.negf %401 : vector<2x32xf32>
    %403 = math.exp %402 : vector<2x32xf32>
    %cst_67 = arith.constant 1.000000e+00 : f32
    %404 = vector.broadcast %cst_67 : f32 to vector<2x32xf32>
    %405 = arith.addf %404, %403 : vector<2x32xf32>
    %406 = arith.divf %404, %405 : vector<2x32xf32>
    %407 = vector.extract_strided_slice %394 {offsets = [0, 64], sizes = [2, 32], strides = [1, 1]} : vector<2x128xf32> to vector<2x32xf32>
    %408 = math.tanh %407 : vector<2x32xf32>
    %409 = vector.extract_strided_slice %394 {offsets = [0, 96], sizes = [2, 32], strides = [1, 1]} : vector<2x128xf32> to vector<2x32xf32>
    %410 = arith.negf %409 : vector<2x32xf32>
    %411 = math.exp %410 : vector<2x32xf32>
    %cst_68 = arith.constant 1.000000e+00 : f32
    %412 = vector.broadcast %cst_68 : f32 to vector<2x32xf32>
    %413 = arith.addf %412, %411 : vector<2x32xf32>
    %414 = arith.divf %412, %413 : vector<2x32xf32>
    %415 = arith.mulf %406, %389 : vector<2x32xf32>
    %416 = arith.mulf %400, %408 : vector<2x32xf32>
    %417 = arith.addf %415, %416 : vector<2x32xf32>
    %418 = math.tanh %417 : vector<2x32xf32>
    %419 = arith.mulf %414, %418 : vector<2x32xf32>
    %420 = arith.truncf %419 : vector<2x32xf32> to vector<2x32xbf16>
    %cst_69 = arith.constant dense<0.000000e+00> : vector<2x128xf32>
    %421 = tpu.matmul %420, %249, %cst_69 {dimension_numbers = #tpu.dot_dimension_numbers<[1], [0], [0], [1], [0, 0, 1, 1], [], []>} : vector<2x32xbf16>, vector<32x128xbf16>, vector<2x128xf32> -> vector<2x128xf32>
    %422 = arith.addf %15, %421 : vector<2x128xf32>
    %423 = vector.extract_strided_slice %422 {offsets = [0, 0], sizes = [2, 32], strides = [1, 1]} : vector<2x128xf32> to vector<2x32xf32>
    %424 = arith.negf %423 : vector<2x32xf32>
    %425 = math.exp %424 : vector<2x32xf32>
    %cst_70 = arith.constant 1.000000e+00 : f32
    %426 = vector.broadcast %cst_70 : f32 to vector<2x32xf32>
    %427 = arith.addf %426, %425 : vector<2x32xf32>
    %428 = arith.divf %426, %427 : vector<2x32xf32>
    %429 = vector.extract_strided_slice %422 {offsets = [0, 32], sizes = [2, 32], strides = [1, 1]} : vector<2x128xf32> to vector<2x32xf32>
    %430 = arith.negf %429 : vector<2x32xf32>
    %431 = math.exp %430 : vector<2x32xf32>
    %cst_71 = arith.constant 1.000000e+00 : f32
    %432 = vector.broadcast %cst_71 : f32 to vector<2x32xf32>
    %433 = arith.addf %432, %431 : vector<2x32xf32>
    %434 = arith.divf %432, %433 : vector<2x32xf32>
    %435 = vector.extract_strided_slice %422 {offsets = [0, 64], sizes = [2, 32], strides = [1, 1]} : vector<2x128xf32> to vector<2x32xf32>
    %436 = math.tanh %435 : vector<2x32xf32>
    %437 = vector.extract_strided_slice %422 {offsets = [0, 96], sizes = [2, 32], strides = [1, 1]} : vector<2x128xf32> to vector<2x32xf32>
    %438 = arith.negf %437 : vector<2x32xf32>
    %439 = math.exp %438 : vector<2x32xf32>
    %cst_72 = arith.constant 1.000000e+00 : f32
    %440 = vector.broadcast %cst_72 : f32 to vector<2x32xf32>
    %441 = arith.addf %440, %439 : vector<2x32xf32>
    %442 = arith.divf %440, %441 : vector<2x32xf32>
    %443 = arith.mulf %434, %417 : vector<2x32xf32>
    %444 = arith.mulf %428, %436 : vector<2x32xf32>
    %445 = arith.addf %443, %444 : vector<2x32xf32>
    %446 = math.tanh %445 : vector<2x32xf32>
    %447 = arith.mulf %442, %446 : vector<2x32xf32>
    %448 = arith.truncf %447 : vector<2x32xf32> to vector<2x32xbf16>
    %cst_73 = arith.constant dense<0.000000e+00> : vector<2x128xf32>
    %449 = tpu.matmul %448, %249, %cst_73 {dimension_numbers = #tpu.dot_dimension_numbers<[1], [0], [0], [1], [0, 0, 1, 1], [], []>} : vector<2x32xbf16>, vector<32x128xbf16>, vector<2x128xf32> -> vector<2x128xf32>
    %450 = arith.addf %14, %449 : vector<2x128xf32>
    %451 = vector.extract_strided_slice %450 {offsets = [0, 0], sizes = [2, 32], strides = [1, 1]} : vector<2x128xf32> to vector<2x32xf32>
    %452 = arith.negf %451 : vector<2x32xf32>
    %453 = math.exp %452 : vector<2x32xf32>
    %cst_74 = arith.constant 1.000000e+00 : f32
    %454 = vector.broadcast %cst_74 : f32 to vector<2x32xf32>
    %455 = arith.addf %454, %453 : vector<2x32xf32>
    %456 = arith.divf %454, %455 : vector<2x32xf32>
    %457 = vector.extract_strided_slice %450 {offsets = [0, 32], sizes = [2, 32], strides = [1, 1]} : vector<2x128xf32> to vector<2x32xf32>
    %458 = arith.negf %457 : vector<2x32xf32>
    %459 = math.exp %458 : vector<2x32xf32>
    %cst_75 = arith.constant 1.000000e+00 : f32
    %460 = vector.broadcast %cst_75 : f32 to vector<2x32xf32>
    %461 = arith.addf %460, %459 : vector<2x32xf32>
    %462 = arith.divf %460, %461 : vector<2x32xf32>
    %463 = vector.extract_strided_slice %450 {offsets = [0, 64], sizes = [2, 32], strides = [1, 1]} : vector<2x128xf32> to vector<2x32xf32>
    %464 = math.tanh %463 : vector<2x32xf32>
    %465 = vector.extract_strided_slice %450 {offsets = [0, 96], sizes = [2, 32], strides = [1, 1]} : vector<2x128xf32> to vector<2x32xf32>
    %466 = arith.negf %465 : vector<2x32xf32>
    %467 = math.exp %466 : vector<2x32xf32>
    %cst_76 = arith.constant 1.000000e+00 : f32
    %468 = vector.broadcast %cst_76 : f32 to vector<2x32xf32>
    %469 = arith.addf %468, %467 : vector<2x32xf32>
    %470 = arith.divf %468, %469 : vector<2x32xf32>
    %471 = arith.mulf %462, %445 : vector<2x32xf32>
    %472 = arith.mulf %456, %464 : vector<2x32xf32>
    %473 = arith.addf %471, %472 : vector<2x32xf32>
    %474 = math.tanh %473 : vector<2x32xf32>
    %475 = arith.mulf %470, %474 : vector<2x32xf32>
    %476 = tpu.concatenate %52, %475 in 1 : vector<2x32xf32>, vector<2x32xf32> -> vector<2x64xf32>
    %477 = tpu.concatenate %80, %447 in 1 : vector<2x32xf32>, vector<2x32xf32> -> vector<2x64xf32>
    %478 = tpu.concatenate %108, %419 in 1 : vector<2x32xf32>, vector<2x32xf32> -> vector<2x64xf32>
    %479 = tpu.concatenate %136, %391 in 1 : vector<2x32xf32>, vector<2x32xf32> -> vector<2x64xf32>
    %480 = tpu.concatenate %164, %363 in 1 : vector<2x32xf32>, vector<2x32xf32> -> vector<2x64xf32>
    %481 = tpu.concatenate %192, %335 in 1 : vector<2x32xf32>, vector<2x32xf32> -> vector<2x64xf32>
    %482 = tpu.concatenate %220, %307 in 1 : vector<2x32xf32>, vector<2x32xf32> -> vector<2x64xf32>
    %483 = tpu.concatenate %248, %279 in 1 : vector<2x32xf32>, vector<2x32xf32> -> vector<2x64xf32>
    %484 = tpu.concatenate %476, %477, %478, %479, %480, %481, %482, %483 in 0 : vector<2x64xf32>, vector<2x64xf32>, vector<2x64xf32>, vector<2x64xf32>, vector<2x64xf32>, vector<2x64xf32>, vector<2x64xf32>, vector<2x64xf32> -> vector<16x64xf32>
    %c0_77 = arith.constant 0 : index
    %c0_78 = arith.constant 0 : index
    %485 = vector.load %arg5[%c0_77, %c0_78] : memref<64x256xf32, #tpu.memory_space<vmem>>, vector<64x256xf32>
    %cst_79 = arith.constant dense<0.000000e+00> : vector<16x256xf32>
    %486 = tpu.matmul %484, %485, %cst_79 {dimension_numbers = #tpu.dot_dimension_numbers<[1], [0], [0], [1], [0, 0, 1, 1], [], []>} : vector<16x64xf32>, vector<64x256xf32>, vector<16x256xf32> -> vector<16x256xf32>
    %c0_80 = arith.constant 0 : index
    %c0_81 = arith.constant 0 : index
    %487 = vector.load %arg8[%c0_80, %c0_81] : memref<1x256xf32, #tpu.memory_space<vmem>>, vector<1x256xf32>
    %488 = vector.broadcast %487 : vector<1x256xf32> to vector<16x256xf32>
    %489 = arith.addf %486, %488 : vector<16x256xf32>
    %490 = vector.extract_strided_slice %489 {offsets = [0, 0], sizes = [2, 128], strides = [1, 1]} : vector<16x256xf32> to vector<2x128xf32>
    %491 = vector.extract_strided_slice %489 {offsets = [2, 0], sizes = [2, 128], strides = [1, 1]} : vector<16x256xf32> to vector<2x128xf32>
    %492 = vector.extract_strided_slice %489 {offsets = [4, 0], sizes = [2, 128], strides = [1, 1]} : vector<16x256xf32> to vector<2x128xf32>
    %493 = vector.extract_strided_slice %489 {offsets = [6, 0], sizes = [2, 128], strides = [1, 1]} : vector<16x256xf32> to vector<2x128xf32>
    %494 = vector.extract_strided_slice %489 {offsets = [8, 0], sizes = [2, 128], strides = [1, 1]} : vector<16x256xf32> to vector<2x128xf32>
    %495 = vector.extract_strided_slice %489 {offsets = [10, 0], sizes = [2, 128], strides = [1, 1]} : vector<16x256xf32> to vector<2x128xf32>
    %496 = vector.extract_strided_slice %489 {offsets = [12, 0], sizes = [2, 128], strides = [1, 1]} : vector<16x256xf32> to vector<2x128xf32>
    %497 = vector.extract_strided_slice %489 {offsets = [14, 0], sizes = [2, 128], strides = [1, 1]} : vector<16x256xf32> to vector<2x128xf32>
    %498 = vector.extract_strided_slice %489 {offsets = [0, 128], sizes = [2, 128], strides = [1, 1]} : vector<16x256xf32> to vector<2x128xf32>
    %499 = vector.extract_strided_slice %489 {offsets = [2, 128], sizes = [2, 128], strides = [1, 1]} : vector<16x256xf32> to vector<2x128xf32>
    %500 = vector.extract_strided_slice %489 {offsets = [4, 128], sizes = [2, 128], strides = [1, 1]} : vector<16x256xf32> to vector<2x128xf32>
    %501 = vector.extract_strided_slice %489 {offsets = [6, 128], sizes = [2, 128], strides = [1, 1]} : vector<16x256xf32> to vector<2x128xf32>
    %502 = vector.extract_strided_slice %489 {offsets = [8, 128], sizes = [2, 128], strides = [1, 1]} : vector<16x256xf32> to vector<2x128xf32>
    %503 = vector.extract_strided_slice %489 {offsets = [10, 128], sizes = [2, 128], strides = [1, 1]} : vector<16x256xf32> to vector<2x128xf32>
    %504 = vector.extract_strided_slice %489 {offsets = [12, 128], sizes = [2, 128], strides = [1, 1]} : vector<16x256xf32> to vector<2x128xf32>
    %505 = vector.extract_strided_slice %489 {offsets = [14, 128], sizes = [2, 128], strides = [1, 1]} : vector<16x256xf32> to vector<2x128xf32>
    %c0_82 = arith.constant 0 : index
    %c0_83 = arith.constant 0 : index
    %506 = vector.load %arg6[%c0_82, %c0_83] : memref<32x128xbf16, #tpu.memory_space<vmem>>, vector<32x128xbf16>
    %cst_84 = arith.constant 0.000000e+00 : f32
    %507 = vector.broadcast %cst_84 : f32 to vector<2x32xf32>
    %cst_85 = arith.constant 0.000000e+00 : f32
    %508 = vector.broadcast %cst_85 : f32 to vector<2x32xf32>
    %509 = arith.truncf %507 : vector<2x32xf32> to vector<2x32xbf16>
    %cst_86 = arith.constant dense<0.000000e+00> : vector<2x128xf32>
    %510 = tpu.matmul %509, %506, %cst_86 {dimension_numbers = #tpu.dot_dimension_numbers<[1], [0], [0], [1], [0, 0, 1, 1], [], []>} : vector<2x32xbf16>, vector<32x128xbf16>, vector<2x128xf32> -> vector<2x128xf32>
    %511 = arith.addf %490, %510 : vector<2x128xf32>
    %512 = vector.extract_strided_slice %511 {offsets = [0, 0], sizes = [2, 32], strides = [1, 1]} : vector<2x128xf32> to vector<2x32xf32>
    %513 = arith.negf %512 : vector<2x32xf32>
    %514 = math.exp %513 : vector<2x32xf32>
    %cst_87 = arith.constant 1.000000e+00 : f32
    %515 = vector.broadcast %cst_87 : f32 to vector<2x32xf32>
    %516 = arith.addf %515, %514 : vector<2x32xf32>
    %517 = arith.divf %515, %516 : vector<2x32xf32>
    %518 = vector.extract_strided_slice %511 {offsets = [0, 32], sizes = [2, 32], strides = [1, 1]} : vector<2x128xf32> to vector<2x32xf32>
    %519 = arith.negf %518 : vector<2x32xf32>
    %520 = math.exp %519 : vector<2x32xf32>
    %cst_88 = arith.constant 1.000000e+00 : f32
    %521 = vector.broadcast %cst_88 : f32 to vector<2x32xf32>
    %522 = arith.addf %521, %520 : vector<2x32xf32>
    %523 = arith.divf %521, %522 : vector<2x32xf32>
    %524 = vector.extract_strided_slice %511 {offsets = [0, 64], sizes = [2, 32], strides = [1, 1]} : vector<2x128xf32> to vector<2x32xf32>
    %525 = math.tanh %524 : vector<2x32xf32>
    %526 = vector.extract_strided_slice %511 {offsets = [0, 96], sizes = [2, 32], strides = [1, 1]} : vector<2x128xf32> to vector<2x32xf32>
    %527 = arith.negf %526 : vector<2x32xf32>
    %528 = math.exp %527 : vector<2x32xf32>
    %cst_89 = arith.constant 1.000000e+00 : f32
    %529 = vector.broadcast %cst_89 : f32 to vector<2x32xf32>
    %530 = arith.addf %529, %528 : vector<2x32xf32>
    %531 = arith.divf %529, %530 : vector<2x32xf32>
    %532 = arith.mulf %523, %508 : vector<2x32xf32>
    %533 = arith.mulf %517, %525 : vector<2x32xf32>
    %534 = arith.addf %532, %533 : vector<2x32xf32>
    %535 = math.tanh %534 : vector<2x32xf32>
    %536 = arith.mulf %531, %535 : vector<2x32xf32>
    %537 = arith.truncf %536 : vector<2x32xf32> to vector<2x32xbf16>
    %cst_90 = arith.constant dense<0.000000e+00> : vector<2x128xf32>
    %538 = tpu.matmul %537, %506, %cst_90 {dimension_numbers = #tpu.dot_dimension_numbers<[1], [0], [0], [1], [0, 0, 1, 1], [], []>} : vector<2x32xbf16>, vector<32x128xbf16>, vector<2x128xf32> -> vector<2x128xf32>
    %539 = arith.addf %491, %538 : vector<2x128xf32>
    %540 = vector.extract_strided_slice %539 {offsets = [0, 0], sizes = [2, 32], strides = [1, 1]} : vector<2x128xf32> to vector<2x32xf32>
    %541 = arith.negf %540 : vector<2x32xf32>
    %542 = math.exp %541 : vector<2x32xf32>
    %cst_91 = arith.constant 1.000000e+00 : f32
    %543 = vector.broadcast %cst_91 : f32 to vector<2x32xf32>
    %544 = arith.addf %543, %542 : vector<2x32xf32>
    %545 = arith.divf %543, %544 : vector<2x32xf32>
    %546 = vector.extract_strided_slice %539 {offsets = [0, 32], sizes = [2, 32], strides = [1, 1]} : vector<2x128xf32> to vector<2x32xf32>
    %547 = arith.negf %546 : vector<2x32xf32>
    %548 = math.exp %547 : vector<2x32xf32>
    %cst_92 = arith.constant 1.000000e+00 : f32
    %549 = vector.broadcast %cst_92 : f32 to vector<2x32xf32>
    %550 = arith.addf %549, %548 : vector<2x32xf32>
    %551 = arith.divf %549, %550 : vector<2x32xf32>
    %552 = vector.extract_strided_slice %539 {offsets = [0, 64], sizes = [2, 32], strides = [1, 1]} : vector<2x128xf32> to vector<2x32xf32>
    %553 = math.tanh %552 : vector<2x32xf32>
    %554 = vector.extract_strided_slice %539 {offsets = [0, 96], sizes = [2, 32], strides = [1, 1]} : vector<2x128xf32> to vector<2x32xf32>
    %555 = arith.negf %554 : vector<2x32xf32>
    %556 = math.exp %555 : vector<2x32xf32>
    %cst_93 = arith.constant 1.000000e+00 : f32
    %557 = vector.broadcast %cst_93 : f32 to vector<2x32xf32>
    %558 = arith.addf %557, %556 : vector<2x32xf32>
    %559 = arith.divf %557, %558 : vector<2x32xf32>
    %560 = arith.mulf %551, %534 : vector<2x32xf32>
    %561 = arith.mulf %545, %553 : vector<2x32xf32>
    %562 = arith.addf %560, %561 : vector<2x32xf32>
    %563 = math.tanh %562 : vector<2x32xf32>
    %564 = arith.mulf %559, %563 : vector<2x32xf32>
    %565 = arith.truncf %564 : vector<2x32xf32> to vector<2x32xbf16>
    %cst_94 = arith.constant dense<0.000000e+00> : vector<2x128xf32>
    %566 = tpu.matmul %565, %506, %cst_94 {dimension_numbers = #tpu.dot_dimension_numbers<[1], [0], [0], [1], [0, 0, 1, 1], [], []>} : vector<2x32xbf16>, vector<32x128xbf16>, vector<2x128xf32> -> vector<2x128xf32>
    %567 = arith.addf %492, %566 : vector<2x128xf32>
    %568 = vector.extract_strided_slice %567 {offsets = [0, 0], sizes = [2, 32], strides = [1, 1]} : vector<2x128xf32> to vector<2x32xf32>
    %569 = arith.negf %568 : vector<2x32xf32>
    %570 = math.exp %569 : vector<2x32xf32>
    %cst_95 = arith.constant 1.000000e+00 : f32
    %571 = vector.broadcast %cst_95 : f32 to vector<2x32xf32>
    %572 = arith.addf %571, %570 : vector<2x32xf32>
    %573 = arith.divf %571, %572 : vector<2x32xf32>
    %574 = vector.extract_strided_slice %567 {offsets = [0, 32], sizes = [2, 32], strides = [1, 1]} : vector<2x128xf32> to vector<2x32xf32>
    %575 = arith.negf %574 : vector<2x32xf32>
    %576 = math.exp %575 : vector<2x32xf32>
    %cst_96 = arith.constant 1.000000e+00 : f32
    %577 = vector.broadcast %cst_96 : f32 to vector<2x32xf32>
    %578 = arith.addf %577, %576 : vector<2x32xf32>
    %579 = arith.divf %577, %578 : vector<2x32xf32>
    %580 = vector.extract_strided_slice %567 {offsets = [0, 64], sizes = [2, 32], strides = [1, 1]} : vector<2x128xf32> to vector<2x32xf32>
    %581 = math.tanh %580 : vector<2x32xf32>
    %582 = vector.extract_strided_slice %567 {offsets = [0, 96], sizes = [2, 32], strides = [1, 1]} : vector<2x128xf32> to vector<2x32xf32>
    %583 = arith.negf %582 : vector<2x32xf32>
    %584 = math.exp %583 : vector<2x32xf32>
    %cst_97 = arith.constant 1.000000e+00 : f32
    %585 = vector.broadcast %cst_97 : f32 to vector<2x32xf32>
    %586 = arith.addf %585, %584 : vector<2x32xf32>
    %587 = arith.divf %585, %586 : vector<2x32xf32>
    %588 = arith.mulf %579, %562 : vector<2x32xf32>
    %589 = arith.mulf %573, %581 : vector<2x32xf32>
    %590 = arith.addf %588, %589 : vector<2x32xf32>
    %591 = math.tanh %590 : vector<2x32xf32>
    %592 = arith.mulf %587, %591 : vector<2x32xf32>
    %593 = arith.truncf %592 : vector<2x32xf32> to vector<2x32xbf16>
    %cst_98 = arith.constant dense<0.000000e+00> : vector<2x128xf32>
    %594 = tpu.matmul %593, %506, %cst_98 {dimension_numbers = #tpu.dot_dimension_numbers<[1], [0], [0], [1], [0, 0, 1, 1], [], []>} : vector<2x32xbf16>, vector<32x128xbf16>, vector<2x128xf32> -> vector<2x128xf32>
    %595 = arith.addf %493, %594 : vector<2x128xf32>
    %596 = vector.extract_strided_slice %595 {offsets = [0, 0], sizes = [2, 32], strides = [1, 1]} : vector<2x128xf32> to vector<2x32xf32>
    %597 = arith.negf %596 : vector<2x32xf32>
    %598 = math.exp %597 : vector<2x32xf32>
    %cst_99 = arith.constant 1.000000e+00 : f32
    %599 = vector.broadcast %cst_99 : f32 to vector<2x32xf32>
    %600 = arith.addf %599, %598 : vector<2x32xf32>
    %601 = arith.divf %599, %600 : vector<2x32xf32>
    %602 = vector.extract_strided_slice %595 {offsets = [0, 32], sizes = [2, 32], strides = [1, 1]} : vector<2x128xf32> to vector<2x32xf32>
    %603 = arith.negf %602 : vector<2x32xf32>
    %604 = math.exp %603 : vector<2x32xf32>
    %cst_100 = arith.constant 1.000000e+00 : f32
    %605 = vector.broadcast %cst_100 : f32 to vector<2x32xf32>
    %606 = arith.addf %605, %604 : vector<2x32xf32>
    %607 = arith.divf %605, %606 : vector<2x32xf32>
    %608 = vector.extract_strided_slice %595 {offsets = [0, 64], sizes = [2, 32], strides = [1, 1]} : vector<2x128xf32> to vector<2x32xf32>
    %609 = math.tanh %608 : vector<2x32xf32>
    %610 = vector.extract_strided_slice %595 {offsets = [0, 96], sizes = [2, 32], strides = [1, 1]} : vector<2x128xf32> to vector<2x32xf32>
    %611 = arith.negf %610 : vector<2x32xf32>
    %612 = math.exp %611 : vector<2x32xf32>
    %cst_101 = arith.constant 1.000000e+00 : f32
    %613 = vector.broadcast %cst_101 : f32 to vector<2x32xf32>
    %614 = arith.addf %613, %612 : vector<2x32xf32>
    %615 = arith.divf %613, %614 : vector<2x32xf32>
    %616 = arith.mulf %607, %590 : vector<2x32xf32>
    %617 = arith.mulf %601, %609 : vector<2x32xf32>
    %618 = arith.addf %616, %617 : vector<2x32xf32>
    %619 = math.tanh %618 : vector<2x32xf32>
    %620 = arith.mulf %615, %619 : vector<2x32xf32>
    %621 = arith.truncf %620 : vector<2x32xf32> to vector<2x32xbf16>
    %cst_102 = arith.constant dense<0.000000e+00> : vector<2x128xf32>
    %622 = tpu.matmul %621, %506, %cst_102 {dimension_numbers = #tpu.dot_dimension_numbers<[1], [0], [0], [1], [0, 0, 1, 1], [], []>} : vector<2x32xbf16>, vector<32x128xbf16>, vector<2x128xf32> -> vector<2x128xf32>
    %623 = arith.addf %494, %622 : vector<2x128xf32>
    %624 = vector.extract_strided_slice %623 {offsets = [0, 0], sizes = [2, 32], strides = [1, 1]} : vector<2x128xf32> to vector<2x32xf32>
    %625 = arith.negf %624 : vector<2x32xf32>
    %626 = math.exp %625 : vector<2x32xf32>
    %cst_103 = arith.constant 1.000000e+00 : f32
    %627 = vector.broadcast %cst_103 : f32 to vector<2x32xf32>
    %628 = arith.addf %627, %626 : vector<2x32xf32>
    %629 = arith.divf %627, %628 : vector<2x32xf32>
    %630 = vector.extract_strided_slice %623 {offsets = [0, 32], sizes = [2, 32], strides = [1, 1]} : vector<2x128xf32> to vector<2x32xf32>
    %631 = arith.negf %630 : vector<2x32xf32>
    %632 = math.exp %631 : vector<2x32xf32>
    %cst_104 = arith.constant 1.000000e+00 : f32
    %633 = vector.broadcast %cst_104 : f32 to vector<2x32xf32>
    %634 = arith.addf %633, %632 : vector<2x32xf32>
    %635 = arith.divf %633, %634 : vector<2x32xf32>
    %636 = vector.extract_strided_slice %623 {offsets = [0, 64], sizes = [2, 32], strides = [1, 1]} : vector<2x128xf32> to vector<2x32xf32>
    %637 = math.tanh %636 : vector<2x32xf32>
    %638 = vector.extract_strided_slice %623 {offsets = [0, 96], sizes = [2, 32], strides = [1, 1]} : vector<2x128xf32> to vector<2x32xf32>
    %639 = arith.negf %638 : vector<2x32xf32>
    %640 = math.exp %639 : vector<2x32xf32>
    %cst_105 = arith.constant 1.000000e+00 : f32
    %641 = vector.broadcast %cst_105 : f32 to vector<2x32xf32>
    %642 = arith.addf %641, %640 : vector<2x32xf32>
    %643 = arith.divf %641, %642 : vector<2x32xf32>
    %644 = arith.mulf %635, %618 : vector<2x32xf32>
    %645 = arith.mulf %629, %637 : vector<2x32xf32>
    %646 = arith.addf %644, %645 : vector<2x32xf32>
    %647 = math.tanh %646 : vector<2x32xf32>
    %648 = arith.mulf %643, %647 : vector<2x32xf32>
    %649 = arith.truncf %648 : vector<2x32xf32> to vector<2x32xbf16>
    %cst_106 = arith.constant dense<0.000000e+00> : vector<2x128xf32>
    %650 = tpu.matmul %649, %506, %cst_106 {dimension_numbers = #tpu.dot_dimension_numbers<[1], [0], [0], [1], [0, 0, 1, 1], [], []>} : vector<2x32xbf16>, vector<32x128xbf16>, vector<2x128xf32> -> vector<2x128xf32>
    %651 = arith.addf %495, %650 : vector<2x128xf32>
    %652 = vector.extract_strided_slice %651 {offsets = [0, 0], sizes = [2, 32], strides = [1, 1]} : vector<2x128xf32> to vector<2x32xf32>
    %653 = arith.negf %652 : vector<2x32xf32>
    %654 = math.exp %653 : vector<2x32xf32>
    %cst_107 = arith.constant 1.000000e+00 : f32
    %655 = vector.broadcast %cst_107 : f32 to vector<2x32xf32>
    %656 = arith.addf %655, %654 : vector<2x32xf32>
    %657 = arith.divf %655, %656 : vector<2x32xf32>
    %658 = vector.extract_strided_slice %651 {offsets = [0, 32], sizes = [2, 32], strides = [1, 1]} : vector<2x128xf32> to vector<2x32xf32>
    %659 = arith.negf %658 : vector<2x32xf32>
    %660 = math.exp %659 : vector<2x32xf32>
    %cst_108 = arith.constant 1.000000e+00 : f32
    %661 = vector.broadcast %cst_108 : f32 to vector<2x32xf32>
    %662 = arith.addf %661, %660 : vector<2x32xf32>
    %663 = arith.divf %661, %662 : vector<2x32xf32>
    %664 = vector.extract_strided_slice %651 {offsets = [0, 64], sizes = [2, 32], strides = [1, 1]} : vector<2x128xf32> to vector<2x32xf32>
    %665 = math.tanh %664 : vector<2x32xf32>
    %666 = vector.extract_strided_slice %651 {offsets = [0, 96], sizes = [2, 32], strides = [1, 1]} : vector<2x128xf32> to vector<2x32xf32>
    %667 = arith.negf %666 : vector<2x32xf32>
    %668 = math.exp %667 : vector<2x32xf32>
    %cst_109 = arith.constant 1.000000e+00 : f32
    %669 = vector.broadcast %cst_109 : f32 to vector<2x32xf32>
    %670 = arith.addf %669, %668 : vector<2x32xf32>
    %671 = arith.divf %669, %670 : vector<2x32xf32>
    %672 = arith.mulf %663, %646 : vector<2x32xf32>
    %673 = arith.mulf %657, %665 : vector<2x32xf32>
    %674 = arith.addf %672, %673 : vector<2x32xf32>
    %675 = math.tanh %674 : vector<2x32xf32>
    %676 = arith.mulf %671, %675 : vector<2x32xf32>
    %677 = arith.truncf %676 : vector<2x32xf32> to vector<2x32xbf16>
    %cst_110 = arith.constant dense<0.000000e+00> : vector<2x128xf32>
    %678 = tpu.matmul %677, %506, %cst_110 {dimension_numbers = #tpu.dot_dimension_numbers<[1], [0], [0], [1], [0, 0, 1, 1], [], []>} : vector<2x32xbf16>, vector<32x128xbf16>, vector<2x128xf32> -> vector<2x128xf32>
    %679 = arith.addf %496, %678 : vector<2x128xf32>
    %680 = vector.extract_strided_slice %679 {offsets = [0, 0], sizes = [2, 32], strides = [1, 1]} : vector<2x128xf32> to vector<2x32xf32>
    %681 = arith.negf %680 : vector<2x32xf32>
    %682 = math.exp %681 : vector<2x32xf32>
    %cst_111 = arith.constant 1.000000e+00 : f32
    %683 = vector.broadcast %cst_111 : f32 to vector<2x32xf32>
    %684 = arith.addf %683, %682 : vector<2x32xf32>
    %685 = arith.divf %683, %684 : vector<2x32xf32>
    %686 = vector.extract_strided_slice %679 {offsets = [0, 32], sizes = [2, 32], strides = [1, 1]} : vector<2x128xf32> to vector<2x32xf32>
    %687 = arith.negf %686 : vector<2x32xf32>
    %688 = math.exp %687 : vector<2x32xf32>
    %cst_112 = arith.constant 1.000000e+00 : f32
    %689 = vector.broadcast %cst_112 : f32 to vector<2x32xf32>
    %690 = arith.addf %689, %688 : vector<2x32xf32>
    %691 = arith.divf %689, %690 : vector<2x32xf32>
    %692 = vector.extract_strided_slice %679 {offsets = [0, 64], sizes = [2, 32], strides = [1, 1]} : vector<2x128xf32> to vector<2x32xf32>
    %693 = math.tanh %692 : vector<2x32xf32>
    %694 = vector.extract_strided_slice %679 {offsets = [0, 96], sizes = [2, 32], strides = [1, 1]} : vector<2x128xf32> to vector<2x32xf32>
    %695 = arith.negf %694 : vector<2x32xf32>
    %696 = math.exp %695 : vector<2x32xf32>
    %cst_113 = arith.constant 1.000000e+00 : f32
    %697 = vector.broadcast %cst_113 : f32 to vector<2x32xf32>
    %698 = arith.addf %697, %696 : vector<2x32xf32>
    %699 = arith.divf %697, %698 : vector<2x32xf32>
    %700 = arith.mulf %691, %674 : vector<2x32xf32>
    %701 = arith.mulf %685, %693 : vector<2x32xf32>
    %702 = arith.addf %700, %701 : vector<2x32xf32>
    %703 = math.tanh %702 : vector<2x32xf32>
    %704 = arith.mulf %699, %703 : vector<2x32xf32>
    %705 = arith.truncf %704 : vector<2x32xf32> to vector<2x32xbf16>
    %cst_114 = arith.constant dense<0.000000e+00> : vector<2x128xf32>
    %706 = tpu.matmul %705, %506, %cst_114 {dimension_numbers = #tpu.dot_dimension_numbers<[1], [0], [0], [1], [0, 0, 1, 1], [], []>} : vector<2x32xbf16>, vector<32x128xbf16>, vector<2x128xf32> -> vector<2x128xf32>
    %707 = arith.addf %497, %706 : vector<2x128xf32>
    %708 = vector.extract_strided_slice %707 {offsets = [0, 0], sizes = [2, 32], strides = [1, 1]} : vector<2x128xf32> to vector<2x32xf32>
    %709 = arith.negf %708 : vector<2x32xf32>
    %710 = math.exp %709 : vector<2x32xf32>
    %cst_115 = arith.constant 1.000000e+00 : f32
    %711 = vector.broadcast %cst_115 : f32 to vector<2x32xf32>
    %712 = arith.addf %711, %710 : vector<2x32xf32>
    %713 = arith.divf %711, %712 : vector<2x32xf32>
    %714 = vector.extract_strided_slice %707 {offsets = [0, 32], sizes = [2, 32], strides = [1, 1]} : vector<2x128xf32> to vector<2x32xf32>
    %715 = arith.negf %714 : vector<2x32xf32>
    %716 = math.exp %715 : vector<2x32xf32>
    %cst_116 = arith.constant 1.000000e+00 : f32
    %717 = vector.broadcast %cst_116 : f32 to vector<2x32xf32>
    %718 = arith.addf %717, %716 : vector<2x32xf32>
    %719 = arith.divf %717, %718 : vector<2x32xf32>
    %720 = vector.extract_strided_slice %707 {offsets = [0, 64], sizes = [2, 32], strides = [1, 1]} : vector<2x128xf32> to vector<2x32xf32>
    %721 = math.tanh %720 : vector<2x32xf32>
    %722 = vector.extract_strided_slice %707 {offsets = [0, 96], sizes = [2, 32], strides = [1, 1]} : vector<2x128xf32> to vector<2x32xf32>
    %723 = arith.negf %722 : vector<2x32xf32>
    %724 = math.exp %723 : vector<2x32xf32>
    %cst_117 = arith.constant 1.000000e+00 : f32
    %725 = vector.broadcast %cst_117 : f32 to vector<2x32xf32>
    %726 = arith.addf %725, %724 : vector<2x32xf32>
    %727 = arith.divf %725, %726 : vector<2x32xf32>
    %728 = arith.mulf %719, %702 : vector<2x32xf32>
    %729 = arith.mulf %713, %721 : vector<2x32xf32>
    %730 = arith.addf %728, %729 : vector<2x32xf32>
    %731 = math.tanh %730 : vector<2x32xf32>
    %732 = arith.mulf %727, %731 : vector<2x32xf32>
    %c0_118 = arith.constant 0 : index
    %c0_119 = arith.constant 0 : index
    %733 = vector.load %arg7[%c0_118, %c0_119] : memref<32x128xbf16, #tpu.memory_space<vmem>>, vector<32x128xbf16>
    %cst_120 = arith.constant 0.000000e+00 : f32
    %734 = vector.broadcast %cst_120 : f32 to vector<2x32xf32>
    %cst_121 = arith.constant 0.000000e+00 : f32
    %735 = vector.broadcast %cst_121 : f32 to vector<2x32xf32>
    %736 = arith.truncf %734 : vector<2x32xf32> to vector<2x32xbf16>
    %cst_122 = arith.constant dense<0.000000e+00> : vector<2x128xf32>
    %737 = tpu.matmul %736, %733, %cst_122 {dimension_numbers = #tpu.dot_dimension_numbers<[1], [0], [0], [1], [0, 0, 1, 1], [], []>} : vector<2x32xbf16>, vector<32x128xbf16>, vector<2x128xf32> -> vector<2x128xf32>
    %738 = arith.addf %505, %737 : vector<2x128xf32>
    %739 = vector.extract_strided_slice %738 {offsets = [0, 0], sizes = [2, 32], strides = [1, 1]} : vector<2x128xf32> to vector<2x32xf32>
    %740 = arith.negf %739 : vector<2x32xf32>
    %741 = math.exp %740 : vector<2x32xf32>
    %cst_123 = arith.constant 1.000000e+00 : f32
    %742 = vector.broadcast %cst_123 : f32 to vector<2x32xf32>
    %743 = arith.addf %742, %741 : vector<2x32xf32>
    %744 = arith.divf %742, %743 : vector<2x32xf32>
    %745 = vector.extract_strided_slice %738 {offsets = [0, 32], sizes = [2, 32], strides = [1, 1]} : vector<2x128xf32> to vector<2x32xf32>
    %746 = arith.negf %745 : vector<2x32xf32>
    %747 = math.exp %746 : vector<2x32xf32>
    %cst_124 = arith.constant 1.000000e+00 : f32
    %748 = vector.broadcast %cst_124 : f32 to vector<2x32xf32>
    %749 = arith.addf %748, %747 : vector<2x32xf32>
    %750 = arith.divf %748, %749 : vector<2x32xf32>
    %751 = vector.extract_strided_slice %738 {offsets = [0, 64], sizes = [2, 32], strides = [1, 1]} : vector<2x128xf32> to vector<2x32xf32>
    %752 = math.tanh %751 : vector<2x32xf32>
    %753 = vector.extract_strided_slice %738 {offsets = [0, 96], sizes = [2, 32], strides = [1, 1]} : vector<2x128xf32> to vector<2x32xf32>
    %754 = arith.negf %753 : vector<2x32xf32>
    %755 = math.exp %754 : vector<2x32xf32>
    %cst_125 = arith.constant 1.000000e+00 : f32
    %756 = vector.broadcast %cst_125 : f32 to vector<2x32xf32>
    %757 = arith.addf %756, %755 : vector<2x32xf32>
    %758 = arith.divf %756, %757 : vector<2x32xf32>
    %759 = arith.mulf %750, %735 : vector<2x32xf32>
    %760 = arith.mulf %744, %752 : vector<2x32xf32>
    %761 = arith.addf %759, %760 : vector<2x32xf32>
    %762 = math.tanh %761 : vector<2x32xf32>
    %763 = arith.mulf %758, %762 : vector<2x32xf32>
    %764 = arith.truncf %763 : vector<2x32xf32> to vector<2x32xbf16>
    %cst_126 = arith.constant dense<0.000000e+00> : vector<2x128xf32>
    %765 = tpu.matmul %764, %733, %cst_126 {dimension_numbers = #tpu.dot_dimension_numbers<[1], [0], [0], [1], [0, 0, 1, 1], [], []>} : vector<2x32xbf16>, vector<32x128xbf16>, vector<2x128xf32> -> vector<2x128xf32>
    %766 = arith.addf %504, %765 : vector<2x128xf32>
    %767 = vector.extract_strided_slice %766 {offsets = [0, 0], sizes = [2, 32], strides = [1, 1]} : vector<2x128xf32> to vector<2x32xf32>
    %768 = arith.negf %767 : vector<2x32xf32>
    %769 = math.exp %768 : vector<2x32xf32>
    %cst_127 = arith.constant 1.000000e+00 : f32
    %770 = vector.broadcast %cst_127 : f32 to vector<2x32xf32>
    %771 = arith.addf %770, %769 : vector<2x32xf32>
    %772 = arith.divf %770, %771 : vector<2x32xf32>
    %773 = vector.extract_strided_slice %766 {offsets = [0, 32], sizes = [2, 32], strides = [1, 1]} : vector<2x128xf32> to vector<2x32xf32>
    %774 = arith.negf %773 : vector<2x32xf32>
    %775 = math.exp %774 : vector<2x32xf32>
    %cst_128 = arith.constant 1.000000e+00 : f32
    %776 = vector.broadcast %cst_128 : f32 to vector<2x32xf32>
    %777 = arith.addf %776, %775 : vector<2x32xf32>
    %778 = arith.divf %776, %777 : vector<2x32xf32>
    %779 = vector.extract_strided_slice %766 {offsets = [0, 64], sizes = [2, 32], strides = [1, 1]} : vector<2x128xf32> to vector<2x32xf32>
    %780 = math.tanh %779 : vector<2x32xf32>
    %781 = vector.extract_strided_slice %766 {offsets = [0, 96], sizes = [2, 32], strides = [1, 1]} : vector<2x128xf32> to vector<2x32xf32>
    %782 = arith.negf %781 : vector<2x32xf32>
    %783 = math.exp %782 : vector<2x32xf32>
    %cst_129 = arith.constant 1.000000e+00 : f32
    %784 = vector.broadcast %cst_129 : f32 to vector<2x32xf32>
    %785 = arith.addf %784, %783 : vector<2x32xf32>
    %786 = arith.divf %784, %785 : vector<2x32xf32>
    %787 = arith.mulf %778, %761 : vector<2x32xf32>
    %788 = arith.mulf %772, %780 : vector<2x32xf32>
    %789 = arith.addf %787, %788 : vector<2x32xf32>
    %790 = math.tanh %789 : vector<2x32xf32>
    %791 = arith.mulf %786, %790 : vector<2x32xf32>
    %792 = arith.truncf %791 : vector<2x32xf32> to vector<2x32xbf16>
    %cst_130 = arith.constant dense<0.000000e+00> : vector<2x128xf32>
    %793 = tpu.matmul %792, %733, %cst_130 {dimension_numbers = #tpu.dot_dimension_numbers<[1], [0], [0], [1], [0, 0, 1, 1], [], []>} : vector<2x32xbf16>, vector<32x128xbf16>, vector<2x128xf32> -> vector<2x128xf32>
    %794 = arith.addf %503, %793 : vector<2x128xf32>
    %795 = vector.extract_strided_slice %794 {offsets = [0, 0], sizes = [2, 32], strides = [1, 1]} : vector<2x128xf32> to vector<2x32xf32>
    %796 = arith.negf %795 : vector<2x32xf32>
    %797 = math.exp %796 : vector<2x32xf32>
    %cst_131 = arith.constant 1.000000e+00 : f32
    %798 = vector.broadcast %cst_131 : f32 to vector<2x32xf32>
    %799 = arith.addf %798, %797 : vector<2x32xf32>
    %800 = arith.divf %798, %799 : vector<2x32xf32>
    %801 = vector.extract_strided_slice %794 {offsets = [0, 32], sizes = [2, 32], strides = [1, 1]} : vector<2x128xf32> to vector<2x32xf32>
    %802 = arith.negf %801 : vector<2x32xf32>
    %803 = math.exp %802 : vector<2x32xf32>
    %cst_132 = arith.constant 1.000000e+00 : f32
    %804 = vector.broadcast %cst_132 : f32 to vector<2x32xf32>
    %805 = arith.addf %804, %803 : vector<2x32xf32>
    %806 = arith.divf %804, %805 : vector<2x32xf32>
    %807 = vector.extract_strided_slice %794 {offsets = [0, 64], sizes = [2, 32], strides = [1, 1]} : vector<2x128xf32> to vector<2x32xf32>
    %808 = math.tanh %807 : vector<2x32xf32>
    %809 = vector.extract_strided_slice %794 {offsets = [0, 96], sizes = [2, 32], strides = [1, 1]} : vector<2x128xf32> to vector<2x32xf32>
    %810 = arith.negf %809 : vector<2x32xf32>
    %811 = math.exp %810 : vector<2x32xf32>
    %cst_133 = arith.constant 1.000000e+00 : f32
    %812 = vector.broadcast %cst_133 : f32 to vector<2x32xf32>
    %813 = arith.addf %812, %811 : vector<2x32xf32>
    %814 = arith.divf %812, %813 : vector<2x32xf32>
    %815 = arith.mulf %806, %789 : vector<2x32xf32>
    %816 = arith.mulf %800, %808 : vector<2x32xf32>
    %817 = arith.addf %815, %816 : vector<2x32xf32>
    %818 = math.tanh %817 : vector<2x32xf32>
    %819 = arith.mulf %814, %818 : vector<2x32xf32>
    %820 = arith.truncf %819 : vector<2x32xf32> to vector<2x32xbf16>
    %cst_134 = arith.constant dense<0.000000e+00> : vector<2x128xf32>
    %821 = tpu.matmul %820, %733, %cst_134 {dimension_numbers = #tpu.dot_dimension_numbers<[1], [0], [0], [1], [0, 0, 1, 1], [], []>} : vector<2x32xbf16>, vector<32x128xbf16>, vector<2x128xf32> -> vector<2x128xf32>
    %822 = arith.addf %502, %821 : vector<2x128xf32>
    %823 = vector.extract_strided_slice %822 {offsets = [0, 0], sizes = [2, 32], strides = [1, 1]} : vector<2x128xf32> to vector<2x32xf32>
    %824 = arith.negf %823 : vector<2x32xf32>
    %825 = math.exp %824 : vector<2x32xf32>
    %cst_135 = arith.constant 1.000000e+00 : f32
    %826 = vector.broadcast %cst_135 : f32 to vector<2x32xf32>
    %827 = arith.addf %826, %825 : vector<2x32xf32>
    %828 = arith.divf %826, %827 : vector<2x32xf32>
    %829 = vector.extract_strided_slice %822 {offsets = [0, 32], sizes = [2, 32], strides = [1, 1]} : vector<2x128xf32> to vector<2x32xf32>
    %830 = arith.negf %829 : vector<2x32xf32>
    %831 = math.exp %830 : vector<2x32xf32>
    %cst_136 = arith.constant 1.000000e+00 : f32
    %832 = vector.broadcast %cst_136 : f32 to vector<2x32xf32>
    %833 = arith.addf %832, %831 : vector<2x32xf32>
    %834 = arith.divf %832, %833 : vector<2x32xf32>
    %835 = vector.extract_strided_slice %822 {offsets = [0, 64], sizes = [2, 32], strides = [1, 1]} : vector<2x128xf32> to vector<2x32xf32>
    %836 = math.tanh %835 : vector<2x32xf32>
    %837 = vector.extract_strided_slice %822 {offsets = [0, 96], sizes = [2, 32], strides = [1, 1]} : vector<2x128xf32> to vector<2x32xf32>
    %838 = arith.negf %837 : vector<2x32xf32>
    %839 = math.exp %838 : vector<2x32xf32>
    %cst_137 = arith.constant 1.000000e+00 : f32
    %840 = vector.broadcast %cst_137 : f32 to vector<2x32xf32>
    %841 = arith.addf %840, %839 : vector<2x32xf32>
    %842 = arith.divf %840, %841 : vector<2x32xf32>
    %843 = arith.mulf %834, %817 : vector<2x32xf32>
    %844 = arith.mulf %828, %836 : vector<2x32xf32>
    %845 = arith.addf %843, %844 : vector<2x32xf32>
    %846 = math.tanh %845 : vector<2x32xf32>
    %847 = arith.mulf %842, %846 : vector<2x32xf32>
    %848 = arith.truncf %847 : vector<2x32xf32> to vector<2x32xbf16>
    %cst_138 = arith.constant dense<0.000000e+00> : vector<2x128xf32>
    %849 = tpu.matmul %848, %733, %cst_138 {dimension_numbers = #tpu.dot_dimension_numbers<[1], [0], [0], [1], [0, 0, 1, 1], [], []>} : vector<2x32xbf16>, vector<32x128xbf16>, vector<2x128xf32> -> vector<2x128xf32>
    %850 = arith.addf %501, %849 : vector<2x128xf32>
    %851 = vector.extract_strided_slice %850 {offsets = [0, 0], sizes = [2, 32], strides = [1, 1]} : vector<2x128xf32> to vector<2x32xf32>
    %852 = arith.negf %851 : vector<2x32xf32>
    %853 = math.exp %852 : vector<2x32xf32>
    %cst_139 = arith.constant 1.000000e+00 : f32
    %854 = vector.broadcast %cst_139 : f32 to vector<2x32xf32>
    %855 = arith.addf %854, %853 : vector<2x32xf32>
    %856 = arith.divf %854, %855 : vector<2x32xf32>
    %857 = vector.extract_strided_slice %850 {offsets = [0, 32], sizes = [2, 32], strides = [1, 1]} : vector<2x128xf32> to vector<2x32xf32>
    %858 = arith.negf %857 : vector<2x32xf32>
    %859 = math.exp %858 : vector<2x32xf32>
    %cst_140 = arith.constant 1.000000e+00 : f32
    %860 = vector.broadcast %cst_140 : f32 to vector<2x32xf32>
    %861 = arith.addf %860, %859 : vector<2x32xf32>
    %862 = arith.divf %860, %861 : vector<2x32xf32>
    %863 = vector.extract_strided_slice %850 {offsets = [0, 64], sizes = [2, 32], strides = [1, 1]} : vector<2x128xf32> to vector<2x32xf32>
    %864 = math.tanh %863 : vector<2x32xf32>
    %865 = vector.extract_strided_slice %850 {offsets = [0, 96], sizes = [2, 32], strides = [1, 1]} : vector<2x128xf32> to vector<2x32xf32>
    %866 = arith.negf %865 : vector<2x32xf32>
    %867 = math.exp %866 : vector<2x32xf32>
    %cst_141 = arith.constant 1.000000e+00 : f32
    %868 = vector.broadcast %cst_141 : f32 to vector<2x32xf32>
    %869 = arith.addf %868, %867 : vector<2x32xf32>
    %870 = arith.divf %868, %869 : vector<2x32xf32>
    %871 = arith.mulf %862, %845 : vector<2x32xf32>
    %872 = arith.mulf %856, %864 : vector<2x32xf32>
    %873 = arith.addf %871, %872 : vector<2x32xf32>
    %874 = math.tanh %873 : vector<2x32xf32>
    %875 = arith.mulf %870, %874 : vector<2x32xf32>
    %876 = arith.truncf %875 : vector<2x32xf32> to vector<2x32xbf16>
    %cst_142 = arith.constant dense<0.000000e+00> : vector<2x128xf32>
    %877 = tpu.matmul %876, %733, %cst_142 {dimension_numbers = #tpu.dot_dimension_numbers<[1], [0], [0], [1], [0, 0, 1, 1], [], []>} : vector<2x32xbf16>, vector<32x128xbf16>, vector<2x128xf32> -> vector<2x128xf32>
    %878 = arith.addf %500, %877 : vector<2x128xf32>
    %879 = vector.extract_strided_slice %878 {offsets = [0, 0], sizes = [2, 32], strides = [1, 1]} : vector<2x128xf32> to vector<2x32xf32>
    %880 = arith.negf %879 : vector<2x32xf32>
    %881 = math.exp %880 : vector<2x32xf32>
    %cst_143 = arith.constant 1.000000e+00 : f32
    %882 = vector.broadcast %cst_143 : f32 to vector<2x32xf32>
    %883 = arith.addf %882, %881 : vector<2x32xf32>
    %884 = arith.divf %882, %883 : vector<2x32xf32>
    %885 = vector.extract_strided_slice %878 {offsets = [0, 32], sizes = [2, 32], strides = [1, 1]} : vector<2x128xf32> to vector<2x32xf32>
    %886 = arith.negf %885 : vector<2x32xf32>
    %887 = math.exp %886 : vector<2x32xf32>
    %cst_144 = arith.constant 1.000000e+00 : f32
    %888 = vector.broadcast %cst_144 : f32 to vector<2x32xf32>
    %889 = arith.addf %888, %887 : vector<2x32xf32>
    %890 = arith.divf %888, %889 : vector<2x32xf32>
    %891 = vector.extract_strided_slice %878 {offsets = [0, 64], sizes = [2, 32], strides = [1, 1]} : vector<2x128xf32> to vector<2x32xf32>
    %892 = math.tanh %891 : vector<2x32xf32>
    %893 = vector.extract_strided_slice %878 {offsets = [0, 96], sizes = [2, 32], strides = [1, 1]} : vector<2x128xf32> to vector<2x32xf32>
    %894 = arith.negf %893 : vector<2x32xf32>
    %895 = math.exp %894 : vector<2x32xf32>
    %cst_145 = arith.constant 1.000000e+00 : f32
    %896 = vector.broadcast %cst_145 : f32 to vector<2x32xf32>
    %897 = arith.addf %896, %895 : vector<2x32xf32>
    %898 = arith.divf %896, %897 : vector<2x32xf32>
    %899 = arith.mulf %890, %873 : vector<2x32xf32>
    %900 = arith.mulf %884, %892 : vector<2x32xf32>
    %901 = arith.addf %899, %900 : vector<2x32xf32>
    %902 = math.tanh %901 : vector<2x32xf32>
    %903 = arith.mulf %898, %902 : vector<2x32xf32>
    %904 = arith.truncf %903 : vector<2x32xf32> to vector<2x32xbf16>
    %cst_146 = arith.constant dense<0.000000e+00> : vector<2x128xf32>
    %905 = tpu.matmul %904, %733, %cst_146 {dimension_numbers = #tpu.dot_dimension_numbers<[1], [0], [0], [1], [0, 0, 1, 1], [], []>} : vector<2x32xbf16>, vector<32x128xbf16>, vector<2x128xf32> -> vector<2x128xf32>
    %906 = arith.addf %499, %905 : vector<2x128xf32>
    %907 = vector.extract_strided_slice %906 {offsets = [0, 0], sizes = [2, 32], strides = [1, 1]} : vector<2x128xf32> to vector<2x32xf32>
    %908 = arith.negf %907 : vector<2x32xf32>
    %909 = math.exp %908 : vector<2x32xf32>
    %cst_147 = arith.constant 1.000000e+00 : f32
    %910 = vector.broadcast %cst_147 : f32 to vector<2x32xf32>
    %911 = arith.addf %910, %909 : vector<2x32xf32>
    %912 = arith.divf %910, %911 : vector<2x32xf32>
    %913 = vector.extract_strided_slice %906 {offsets = [0, 32], sizes = [2, 32], strides = [1, 1]} : vector<2x128xf32> to vector<2x32xf32>
    %914 = arith.negf %913 : vector<2x32xf32>
    %915 = math.exp %914 : vector<2x32xf32>
    %cst_148 = arith.constant 1.000000e+00 : f32
    %916 = vector.broadcast %cst_148 : f32 to vector<2x32xf32>
    %917 = arith.addf %916, %915 : vector<2x32xf32>
    %918 = arith.divf %916, %917 : vector<2x32xf32>
    %919 = vector.extract_strided_slice %906 {offsets = [0, 64], sizes = [2, 32], strides = [1, 1]} : vector<2x128xf32> to vector<2x32xf32>
    %920 = math.tanh %919 : vector<2x32xf32>
    %921 = vector.extract_strided_slice %906 {offsets = [0, 96], sizes = [2, 32], strides = [1, 1]} : vector<2x128xf32> to vector<2x32xf32>
    %922 = arith.negf %921 : vector<2x32xf32>
    %923 = math.exp %922 : vector<2x32xf32>
    %cst_149 = arith.constant 1.000000e+00 : f32
    %924 = vector.broadcast %cst_149 : f32 to vector<2x32xf32>
    %925 = arith.addf %924, %923 : vector<2x32xf32>
    %926 = arith.divf %924, %925 : vector<2x32xf32>
    %927 = arith.mulf %918, %901 : vector<2x32xf32>
    %928 = arith.mulf %912, %920 : vector<2x32xf32>
    %929 = arith.addf %927, %928 : vector<2x32xf32>
    %930 = math.tanh %929 : vector<2x32xf32>
    %931 = arith.mulf %926, %930 : vector<2x32xf32>
    %932 = arith.truncf %931 : vector<2x32xf32> to vector<2x32xbf16>
    %cst_150 = arith.constant dense<0.000000e+00> : vector<2x128xf32>
    %933 = tpu.matmul %932, %733, %cst_150 {dimension_numbers = #tpu.dot_dimension_numbers<[1], [0], [0], [1], [0, 0, 1, 1], [], []>} : vector<2x32xbf16>, vector<32x128xbf16>, vector<2x128xf32> -> vector<2x128xf32>
    %934 = arith.addf %498, %933 : vector<2x128xf32>
    %935 = vector.extract_strided_slice %934 {offsets = [0, 0], sizes = [2, 32], strides = [1, 1]} : vector<2x128xf32> to vector<2x32xf32>
    %936 = arith.negf %935 : vector<2x32xf32>
    %937 = math.exp %936 : vector<2x32xf32>
    %cst_151 = arith.constant 1.000000e+00 : f32
    %938 = vector.broadcast %cst_151 : f32 to vector<2x32xf32>
    %939 = arith.addf %938, %937 : vector<2x32xf32>
    %940 = arith.divf %938, %939 : vector<2x32xf32>
    %941 = vector.extract_strided_slice %934 {offsets = [0, 32], sizes = [2, 32], strides = [1, 1]} : vector<2x128xf32> to vector<2x32xf32>
    %942 = arith.negf %941 : vector<2x32xf32>
    %943 = math.exp %942 : vector<2x32xf32>
    %cst_152 = arith.constant 1.000000e+00 : f32
    %944 = vector.broadcast %cst_152 : f32 to vector<2x32xf32>
    %945 = arith.addf %944, %943 : vector<2x32xf32>
    %946 = arith.divf %944, %945 : vector<2x32xf32>
    %947 = vector.extract_strided_slice %934 {offsets = [0, 64], sizes = [2, 32], strides = [1, 1]} : vector<2x128xf32> to vector<2x32xf32>
    %948 = math.tanh %947 : vector<2x32xf32>
    %949 = vector.extract_strided_slice %934 {offsets = [0, 96], sizes = [2, 32], strides = [1, 1]} : vector<2x128xf32> to vector<2x32xf32>
    %950 = arith.negf %949 : vector<2x32xf32>
    %951 = math.exp %950 : vector<2x32xf32>
    %cst_153 = arith.constant 1.000000e+00 : f32
    %952 = vector.broadcast %cst_153 : f32 to vector<2x32xf32>
    %953 = arith.addf %952, %951 : vector<2x32xf32>
    %954 = arith.divf %952, %953 : vector<2x32xf32>
    %955 = arith.mulf %946, %929 : vector<2x32xf32>
    %956 = arith.mulf %940, %948 : vector<2x32xf32>
    %957 = arith.addf %955, %956 : vector<2x32xf32>
    %958 = math.tanh %957 : vector<2x32xf32>
    %959 = arith.mulf %954, %958 : vector<2x32xf32>
    %960 = tpu.concatenate %732, %959 in 1 : vector<2x32xf32>, vector<2x32xf32> -> vector<2x64xf32>
    %c0_154 = arith.constant 0 : index
    %c0_155 = arith.constant 0 : index
    %961 = vector.load %arg9[%c0_154, %c0_155] : memref<64x256xf32, #tpu.memory_space<vmem>>, vector<64x256xf32>
    %cst_156 = arith.constant dense<0.000000e+00> : vector<2x256xf32>
    %962 = tpu.matmul %960, %961, %cst_156 {dimension_numbers = #tpu.dot_dimension_numbers<[1], [0], [0], [1], [0, 0, 1, 1], [], []>} : vector<2x64xf32>, vector<64x256xf32>, vector<2x256xf32> -> vector<2x256xf32>
    %c0_157 = arith.constant 0 : index
    %c0_158 = arith.constant 0 : index
    %963 = vector.load %arg12[%c0_157, %c0_158] : memref<1x256xf32, #tpu.memory_space<vmem>>, vector<1x256xf32>
    %964 = vector.broadcast %963 : vector<1x256xf32> to vector<2x256xf32>
    %965 = arith.addf %962, %964 : vector<2x256xf32>
    %966 = vector.extract_strided_slice %965 {offsets = [0, 0], sizes = [2, 128], strides = [1, 1]} : vector<2x256xf32> to vector<2x128xf32>
    %967 = vector.extract_strided_slice %965 {offsets = [0, 128], sizes = [2, 128], strides = [1, 1]} : vector<2x256xf32> to vector<2x128xf32>
    %c0_159 = arith.constant 0 : index
    %c0_160 = arith.constant 0 : index
    %968 = vector.load %arg10[%c0_159, %c0_160] : memref<32x128xbf16, #tpu.memory_space<vmem>>, vector<32x128xbf16>
    %cst_161 = arith.constant 0.000000e+00 : f32
    %969 = vector.broadcast %cst_161 : f32 to vector<2x32xf32>
    %cst_162 = arith.constant 0.000000e+00 : f32
    %970 = vector.broadcast %cst_162 : f32 to vector<2x32xf32>
    %971 = arith.truncf %969 : vector<2x32xf32> to vector<2x32xbf16>
    %cst_163 = arith.constant dense<0.000000e+00> : vector<2x128xf32>
    %972 = tpu.matmul %971, %968, %cst_163 {dimension_numbers = #tpu.dot_dimension_numbers<[1], [0], [0], [1], [0, 0, 1, 1], [], []>} : vector<2x32xbf16>, vector<32x128xbf16>, vector<2x128xf32> -> vector<2x128xf32>
    %973 = arith.addf %966, %972 : vector<2x128xf32>
    %974 = vector.extract_strided_slice %973 {offsets = [0, 0], sizes = [2, 32], strides = [1, 1]} : vector<2x128xf32> to vector<2x32xf32>
    %975 = arith.negf %974 : vector<2x32xf32>
    %976 = math.exp %975 : vector<2x32xf32>
    %cst_164 = arith.constant 1.000000e+00 : f32
    %977 = vector.broadcast %cst_164 : f32 to vector<2x32xf32>
    %978 = arith.addf %977, %976 : vector<2x32xf32>
    %979 = arith.divf %977, %978 : vector<2x32xf32>
    %980 = vector.extract_strided_slice %973 {offsets = [0, 32], sizes = [2, 32], strides = [1, 1]} : vector<2x128xf32> to vector<2x32xf32>
    %981 = arith.negf %980 : vector<2x32xf32>
    %982 = math.exp %981 : vector<2x32xf32>
    %cst_165 = arith.constant 1.000000e+00 : f32
    %983 = vector.broadcast %cst_165 : f32 to vector<2x32xf32>
    %984 = arith.addf %983, %982 : vector<2x32xf32>
    %985 = arith.divf %983, %984 : vector<2x32xf32>
    %986 = vector.extract_strided_slice %973 {offsets = [0, 64], sizes = [2, 32], strides = [1, 1]} : vector<2x128xf32> to vector<2x32xf32>
    %987 = math.tanh %986 : vector<2x32xf32>
    %988 = vector.extract_strided_slice %973 {offsets = [0, 96], sizes = [2, 32], strides = [1, 1]} : vector<2x128xf32> to vector<2x32xf32>
    %989 = arith.negf %988 : vector<2x32xf32>
    %990 = math.exp %989 : vector<2x32xf32>
    %cst_166 = arith.constant 1.000000e+00 : f32
    %991 = vector.broadcast %cst_166 : f32 to vector<2x32xf32>
    %992 = arith.addf %991, %990 : vector<2x32xf32>
    %993 = arith.divf %991, %992 : vector<2x32xf32>
    %994 = arith.mulf %985, %970 : vector<2x32xf32>
    %995 = arith.mulf %979, %987 : vector<2x32xf32>
    %996 = arith.addf %994, %995 : vector<2x32xf32>
    %997 = math.tanh %996 : vector<2x32xf32>
    %998 = arith.mulf %993, %997 : vector<2x32xf32>
    %999 = arith.truncf %998 : vector<2x32xf32> to vector<2x32xbf16>
    %cst_167 = arith.constant dense<0.000000e+00> : vector<2x128xf32>
    %1000 = tpu.matmul %999, %968, %cst_167 {dimension_numbers = #tpu.dot_dimension_numbers<[1], [0], [0], [1], [0, 0, 1, 1], [], []>} : vector<2x32xbf16>, vector<32x128xbf16>, vector<2x128xf32> -> vector<2x128xf32>
    %1001 = arith.addf %966, %1000 : vector<2x128xf32>
    %1002 = vector.extract_strided_slice %1001 {offsets = [0, 0], sizes = [2, 32], strides = [1, 1]} : vector<2x128xf32> to vector<2x32xf32>
    %1003 = arith.negf %1002 : vector<2x32xf32>
    %1004 = math.exp %1003 : vector<2x32xf32>
    %cst_168 = arith.constant 1.000000e+00 : f32
    %1005 = vector.broadcast %cst_168 : f32 to vector<2x32xf32>
    %1006 = arith.addf %1005, %1004 : vector<2x32xf32>
    %1007 = arith.divf %1005, %1006 : vector<2x32xf32>
    %1008 = vector.extract_strided_slice %1001 {offsets = [0, 32], sizes = [2, 32], strides = [1, 1]} : vector<2x128xf32> to vector<2x32xf32>
    %1009 = arith.negf %1008 : vector<2x32xf32>
    %1010 = math.exp %1009 : vector<2x32xf32>
    %cst_169 = arith.constant 1.000000e+00 : f32
    %1011 = vector.broadcast %cst_169 : f32 to vector<2x32xf32>
    %1012 = arith.addf %1011, %1010 : vector<2x32xf32>
    %1013 = arith.divf %1011, %1012 : vector<2x32xf32>
    %1014 = vector.extract_strided_slice %1001 {offsets = [0, 64], sizes = [2, 32], strides = [1, 1]} : vector<2x128xf32> to vector<2x32xf32>
    %1015 = math.tanh %1014 : vector<2x32xf32>
    %1016 = vector.extract_strided_slice %1001 {offsets = [0, 96], sizes = [2, 32], strides = [1, 1]} : vector<2x128xf32> to vector<2x32xf32>
    %1017 = arith.negf %1016 : vector<2x32xf32>
    %1018 = math.exp %1017 : vector<2x32xf32>
    %cst_170 = arith.constant 1.000000e+00 : f32
    %1019 = vector.broadcast %cst_170 : f32 to vector<2x32xf32>
    %1020 = arith.addf %1019, %1018 : vector<2x32xf32>
    %1021 = arith.divf %1019, %1020 : vector<2x32xf32>
    %1022 = arith.mulf %1013, %996 : vector<2x32xf32>
    %1023 = arith.mulf %1007, %1015 : vector<2x32xf32>
    %1024 = arith.addf %1022, %1023 : vector<2x32xf32>
    %1025 = math.tanh %1024 : vector<2x32xf32>
    %1026 = arith.mulf %1021, %1025 : vector<2x32xf32>
    %1027 = arith.truncf %1026 : vector<2x32xf32> to vector<2x32xbf16>
    %cst_171 = arith.constant dense<0.000000e+00> : vector<2x128xf32>
    %1028 = tpu.matmul %1027, %968, %cst_171 {dimension_numbers = #tpu.dot_dimension_numbers<[1], [0], [0], [1], [0, 0, 1, 1], [], []>} : vector<2x32xbf16>, vector<32x128xbf16>, vector<2x128xf32> -> vector<2x128xf32>
    %1029 = arith.addf %966, %1028 : vector<2x128xf32>
    %1030 = vector.extract_strided_slice %1029 {offsets = [0, 0], sizes = [2, 32], strides = [1, 1]} : vector<2x128xf32> to vector<2x32xf32>
    %1031 = arith.negf %1030 : vector<2x32xf32>
    %1032 = math.exp %1031 : vector<2x32xf32>
    %cst_172 = arith.constant 1.000000e+00 : f32
    %1033 = vector.broadcast %cst_172 : f32 to vector<2x32xf32>
    %1034 = arith.addf %1033, %1032 : vector<2x32xf32>
    %1035 = arith.divf %1033, %1034 : vector<2x32xf32>
    %1036 = vector.extract_strided_slice %1029 {offsets = [0, 32], sizes = [2, 32], strides = [1, 1]} : vector<2x128xf32> to vector<2x32xf32>
    %1037 = arith.negf %1036 : vector<2x32xf32>
    %1038 = math.exp %1037 : vector<2x32xf32>
    %cst_173 = arith.constant 1.000000e+00 : f32
    %1039 = vector.broadcast %cst_173 : f32 to vector<2x32xf32>
    %1040 = arith.addf %1039, %1038 : vector<2x32xf32>
    %1041 = arith.divf %1039, %1040 : vector<2x32xf32>
    %1042 = vector.extract_strided_slice %1029 {offsets = [0, 64], sizes = [2, 32], strides = [1, 1]} : vector<2x128xf32> to vector<2x32xf32>
    %1043 = math.tanh %1042 : vector<2x32xf32>
    %1044 = vector.extract_strided_slice %1029 {offsets = [0, 96], sizes = [2, 32], strides = [1, 1]} : vector<2x128xf32> to vector<2x32xf32>
    %1045 = arith.negf %1044 : vector<2x32xf32>
    %1046 = math.exp %1045 : vector<2x32xf32>
    %cst_174 = arith.constant 1.000000e+00 : f32
    %1047 = vector.broadcast %cst_174 : f32 to vector<2x32xf32>
    %1048 = arith.addf %1047, %1046 : vector<2x32xf32>
    %1049 = arith.divf %1047, %1048 : vector<2x32xf32>
    %1050 = arith.mulf %1041, %1024 : vector<2x32xf32>
    %1051 = arith.mulf %1035, %1043 : vector<2x32xf32>
    %1052 = arith.addf %1050, %1051 : vector<2x32xf32>
    %1053 = math.tanh %1052 : vector<2x32xf32>
    %1054 = arith.mulf %1049, %1053 : vector<2x32xf32>
    %1055 = arith.truncf %1054 : vector<2x32xf32> to vector<2x32xbf16>
    %cst_175 = arith.constant dense<0.000000e+00> : vector<2x128xf32>
    %1056 = tpu.matmul %1055, %968, %cst_175 {dimension_numbers = #tpu.dot_dimension_numbers<[1], [0], [0], [1], [0, 0, 1, 1], [], []>} : vector<2x32xbf16>, vector<32x128xbf16>, vector<2x128xf32> -> vector<2x128xf32>
    %1057 = arith.addf %966, %1056 : vector<2x128xf32>
    %1058 = vector.extract_strided_slice %1057 {offsets = [0, 0], sizes = [2, 32], strides = [1, 1]} : vector<2x128xf32> to vector<2x32xf32>
    %1059 = arith.negf %1058 : vector<2x32xf32>
    %1060 = math.exp %1059 : vector<2x32xf32>
    %cst_176 = arith.constant 1.000000e+00 : f32
    %1061 = vector.broadcast %cst_176 : f32 to vector<2x32xf32>
    %1062 = arith.addf %1061, %1060 : vector<2x32xf32>
    %1063 = arith.divf %1061, %1062 : vector<2x32xf32>
    %1064 = vector.extract_strided_slice %1057 {offsets = [0, 32], sizes = [2, 32], strides = [1, 1]} : vector<2x128xf32> to vector<2x32xf32>
    %1065 = arith.negf %1064 : vector<2x32xf32>
    %1066 = math.exp %1065 : vector<2x32xf32>
    %cst_177 = arith.constant 1.000000e+00 : f32
    %1067 = vector.broadcast %cst_177 : f32 to vector<2x32xf32>
    %1068 = arith.addf %1067, %1066 : vector<2x32xf32>
    %1069 = arith.divf %1067, %1068 : vector<2x32xf32>
    %1070 = vector.extract_strided_slice %1057 {offsets = [0, 64], sizes = [2, 32], strides = [1, 1]} : vector<2x128xf32> to vector<2x32xf32>
    %1071 = math.tanh %1070 : vector<2x32xf32>
    %1072 = vector.extract_strided_slice %1057 {offsets = [0, 96], sizes = [2, 32], strides = [1, 1]} : vector<2x128xf32> to vector<2x32xf32>
    %1073 = arith.negf %1072 : vector<2x32xf32>
    %1074 = math.exp %1073 : vector<2x32xf32>
    %cst_178 = arith.constant 1.000000e+00 : f32
    %1075 = vector.broadcast %cst_178 : f32 to vector<2x32xf32>
    %1076 = arith.addf %1075, %1074 : vector<2x32xf32>
    %1077 = arith.divf %1075, %1076 : vector<2x32xf32>
    %1078 = arith.mulf %1069, %1052 : vector<2x32xf32>
    %1079 = arith.mulf %1063, %1071 : vector<2x32xf32>
    %1080 = arith.addf %1078, %1079 : vector<2x32xf32>
    %1081 = math.tanh %1080 : vector<2x32xf32>
    %1082 = arith.mulf %1077, %1081 : vector<2x32xf32>
    %1083 = arith.truncf %1082 : vector<2x32xf32> to vector<2x32xbf16>
    %cst_179 = arith.constant dense<0.000000e+00> : vector<2x128xf32>
    %1084 = tpu.matmul %1083, %968, %cst_179 {dimension_numbers = #tpu.dot_dimension_numbers<[1], [0], [0], [1], [0, 0, 1, 1], [], []>} : vector<2x32xbf16>, vector<32x128xbf16>, vector<2x128xf32> -> vector<2x128xf32>
    %1085 = arith.addf %966, %1084 : vector<2x128xf32>
    %1086 = vector.extract_strided_slice %1085 {offsets = [0, 0], sizes = [2, 32], strides = [1, 1]} : vector<2x128xf32> to vector<2x32xf32>
    %1087 = arith.negf %1086 : vector<2x32xf32>
    %1088 = math.exp %1087 : vector<2x32xf32>
    %cst_180 = arith.constant 1.000000e+00 : f32
    %1089 = vector.broadcast %cst_180 : f32 to vector<2x32xf32>
    %1090 = arith.addf %1089, %1088 : vector<2x32xf32>
    %1091 = arith.divf %1089, %1090 : vector<2x32xf32>
    %1092 = vector.extract_strided_slice %1085 {offsets = [0, 32], sizes = [2, 32], strides = [1, 1]} : vector<2x128xf32> to vector<2x32xf32>
    %1093 = arith.negf %1092 : vector<2x32xf32>
    %1094 = math.exp %1093 : vector<2x32xf32>
    %cst_181 = arith.constant 1.000000e+00 : f32
    %1095 = vector.broadcast %cst_181 : f32 to vector<2x32xf32>
    %1096 = arith.addf %1095, %1094 : vector<2x32xf32>
    %1097 = arith.divf %1095, %1096 : vector<2x32xf32>
    %1098 = vector.extract_strided_slice %1085 {offsets = [0, 64], sizes = [2, 32], strides = [1, 1]} : vector<2x128xf32> to vector<2x32xf32>
    %1099 = math.tanh %1098 : vector<2x32xf32>
    %1100 = vector.extract_strided_slice %1085 {offsets = [0, 96], sizes = [2, 32], strides = [1, 1]} : vector<2x128xf32> to vector<2x32xf32>
    %1101 = arith.negf %1100 : vector<2x32xf32>
    %1102 = math.exp %1101 : vector<2x32xf32>
    %cst_182 = arith.constant 1.000000e+00 : f32
    %1103 = vector.broadcast %cst_182 : f32 to vector<2x32xf32>
    %1104 = arith.addf %1103, %1102 : vector<2x32xf32>
    %1105 = arith.divf %1103, %1104 : vector<2x32xf32>
    %1106 = arith.mulf %1097, %1080 : vector<2x32xf32>
    %1107 = arith.mulf %1091, %1099 : vector<2x32xf32>
    %1108 = arith.addf %1106, %1107 : vector<2x32xf32>
    %1109 = math.tanh %1108 : vector<2x32xf32>
    %1110 = arith.mulf %1105, %1109 : vector<2x32xf32>
    %1111 = arith.truncf %1110 : vector<2x32xf32> to vector<2x32xbf16>
    %cst_183 = arith.constant dense<0.000000e+00> : vector<2x128xf32>
    %1112 = tpu.matmul %1111, %968, %cst_183 {dimension_numbers = #tpu.dot_dimension_numbers<[1], [0], [0], [1], [0, 0, 1, 1], [], []>} : vector<2x32xbf16>, vector<32x128xbf16>, vector<2x128xf32> -> vector<2x128xf32>
    %1113 = arith.addf %966, %1112 : vector<2x128xf32>
    %1114 = vector.extract_strided_slice %1113 {offsets = [0, 0], sizes = [2, 32], strides = [1, 1]} : vector<2x128xf32> to vector<2x32xf32>
    %1115 = arith.negf %1114 : vector<2x32xf32>
    %1116 = math.exp %1115 : vector<2x32xf32>
    %cst_184 = arith.constant 1.000000e+00 : f32
    %1117 = vector.broadcast %cst_184 : f32 to vector<2x32xf32>
    %1118 = arith.addf %1117, %1116 : vector<2x32xf32>
    %1119 = arith.divf %1117, %1118 : vector<2x32xf32>
    %1120 = vector.extract_strided_slice %1113 {offsets = [0, 32], sizes = [2, 32], strides = [1, 1]} : vector<2x128xf32> to vector<2x32xf32>
    %1121 = arith.negf %1120 : vector<2x32xf32>
    %1122 = math.exp %1121 : vector<2x32xf32>
    %cst_185 = arith.constant 1.000000e+00 : f32
    %1123 = vector.broadcast %cst_185 : f32 to vector<2x32xf32>
    %1124 = arith.addf %1123, %1122 : vector<2x32xf32>
    %1125 = arith.divf %1123, %1124 : vector<2x32xf32>
    %1126 = vector.extract_strided_slice %1113 {offsets = [0, 64], sizes = [2, 32], strides = [1, 1]} : vector<2x128xf32> to vector<2x32xf32>
    %1127 = math.tanh %1126 : vector<2x32xf32>
    %1128 = vector.extract_strided_slice %1113 {offsets = [0, 96], sizes = [2, 32], strides = [1, 1]} : vector<2x128xf32> to vector<2x32xf32>
    %1129 = arith.negf %1128 : vector<2x32xf32>
    %1130 = math.exp %1129 : vector<2x32xf32>
    %cst_186 = arith.constant 1.000000e+00 : f32
    %1131 = vector.broadcast %cst_186 : f32 to vector<2x32xf32>
    %1132 = arith.addf %1131, %1130 : vector<2x32xf32>
    %1133 = arith.divf %1131, %1132 : vector<2x32xf32>
    %1134 = arith.mulf %1125, %1108 : vector<2x32xf32>
    %1135 = arith.mulf %1119, %1127 : vector<2x32xf32>
    %1136 = arith.addf %1134, %1135 : vector<2x32xf32>
    %1137 = math.tanh %1136 : vector<2x32xf32>
    %1138 = arith.mulf %1133, %1137 : vector<2x32xf32>
    %1139 = arith.truncf %1138 : vector<2x32xf32> to vector<2x32xbf16>
    %cst_187 = arith.constant dense<0.000000e+00> : vector<2x128xf32>
    %1140 = tpu.matmul %1139, %968, %cst_187 {dimension_numbers = #tpu.dot_dimension_numbers<[1], [0], [0], [1], [0, 0, 1, 1], [], []>} : vector<2x32xbf16>, vector<32x128xbf16>, vector<2x128xf32> -> vector<2x128xf32>
    %1141 = arith.addf %966, %1140 : vector<2x128xf32>
    %1142 = vector.extract_strided_slice %1141 {offsets = [0, 0], sizes = [2, 32], strides = [1, 1]} : vector<2x128xf32> to vector<2x32xf32>
    %1143 = arith.negf %1142 : vector<2x32xf32>
    %1144 = math.exp %1143 : vector<2x32xf32>
    %cst_188 = arith.constant 1.000000e+00 : f32
    %1145 = vector.broadcast %cst_188 : f32 to vector<2x32xf32>
    %1146 = arith.addf %1145, %1144 : vector<2x32xf32>
    %1147 = arith.divf %1145, %1146 : vector<2x32xf32>
    %1148 = vector.extract_strided_slice %1141 {offsets = [0, 32], sizes = [2, 32], strides = [1, 1]} : vector<2x128xf32> to vector<2x32xf32>
    %1149 = arith.negf %1148 : vector<2x32xf32>
    %1150 = math.exp %1149 : vector<2x32xf32>
    %cst_189 = arith.constant 1.000000e+00 : f32
    %1151 = vector.broadcast %cst_189 : f32 to vector<2x32xf32>
    %1152 = arith.addf %1151, %1150 : vector<2x32xf32>
    %1153 = arith.divf %1151, %1152 : vector<2x32xf32>
    %1154 = vector.extract_strided_slice %1141 {offsets = [0, 64], sizes = [2, 32], strides = [1, 1]} : vector<2x128xf32> to vector<2x32xf32>
    %1155 = math.tanh %1154 : vector<2x32xf32>
    %1156 = vector.extract_strided_slice %1141 {offsets = [0, 96], sizes = [2, 32], strides = [1, 1]} : vector<2x128xf32> to vector<2x32xf32>
    %1157 = arith.negf %1156 : vector<2x32xf32>
    %1158 = math.exp %1157 : vector<2x32xf32>
    %cst_190 = arith.constant 1.000000e+00 : f32
    %1159 = vector.broadcast %cst_190 : f32 to vector<2x32xf32>
    %1160 = arith.addf %1159, %1158 : vector<2x32xf32>
    %1161 = arith.divf %1159, %1160 : vector<2x32xf32>
    %1162 = arith.mulf %1153, %1136 : vector<2x32xf32>
    %1163 = arith.mulf %1147, %1155 : vector<2x32xf32>
    %1164 = arith.addf %1162, %1163 : vector<2x32xf32>
    %1165 = math.tanh %1164 : vector<2x32xf32>
    %1166 = arith.mulf %1161, %1165 : vector<2x32xf32>
    %1167 = arith.truncf %1166 : vector<2x32xf32> to vector<2x32xbf16>
    %cst_191 = arith.constant dense<0.000000e+00> : vector<2x128xf32>
    %1168 = tpu.matmul %1167, %968, %cst_191 {dimension_numbers = #tpu.dot_dimension_numbers<[1], [0], [0], [1], [0, 0, 1, 1], [], []>} : vector<2x32xbf16>, vector<32x128xbf16>, vector<2x128xf32> -> vector<2x128xf32>
    %1169 = arith.addf %966, %1168 : vector<2x128xf32>
    %1170 = vector.extract_strided_slice %1169 {offsets = [0, 0], sizes = [2, 32], strides = [1, 1]} : vector<2x128xf32> to vector<2x32xf32>
    %1171 = arith.negf %1170 : vector<2x32xf32>
    %1172 = math.exp %1171 : vector<2x32xf32>
    %cst_192 = arith.constant 1.000000e+00 : f32
    %1173 = vector.broadcast %cst_192 : f32 to vector<2x32xf32>
    %1174 = arith.addf %1173, %1172 : vector<2x32xf32>
    %1175 = arith.divf %1173, %1174 : vector<2x32xf32>
    %1176 = vector.extract_strided_slice %1169 {offsets = [0, 32], sizes = [2, 32], strides = [1, 1]} : vector<2x128xf32> to vector<2x32xf32>
    %1177 = arith.negf %1176 : vector<2x32xf32>
    %1178 = math.exp %1177 : vector<2x32xf32>
    %cst_193 = arith.constant 1.000000e+00 : f32
    %1179 = vector.broadcast %cst_193 : f32 to vector<2x32xf32>
    %1180 = arith.addf %1179, %1178 : vector<2x32xf32>
    %1181 = arith.divf %1179, %1180 : vector<2x32xf32>
    %1182 = vector.extract_strided_slice %1169 {offsets = [0, 64], sizes = [2, 32], strides = [1, 1]} : vector<2x128xf32> to vector<2x32xf32>
    %1183 = math.tanh %1182 : vector<2x32xf32>
    %1184 = vector.extract_strided_slice %1169 {offsets = [0, 96], sizes = [2, 32], strides = [1, 1]} : vector<2x128xf32> to vector<2x32xf32>
    %1185 = arith.negf %1184 : vector<2x32xf32>
    %1186 = math.exp %1185 : vector<2x32xf32>
    %cst_194 = arith.constant 1.000000e+00 : f32
    %1187 = vector.broadcast %cst_194 : f32 to vector<2x32xf32>
    %1188 = arith.addf %1187, %1186 : vector<2x32xf32>
    %1189 = arith.divf %1187, %1188 : vector<2x32xf32>
    %1190 = arith.mulf %1181, %1164 : vector<2x32xf32>
    %1191 = arith.mulf %1175, %1183 : vector<2x32xf32>
    %1192 = arith.addf %1190, %1191 : vector<2x32xf32>
    %1193 = math.tanh %1192 : vector<2x32xf32>
    %1194 = arith.mulf %1189, %1193 : vector<2x32xf32>
    %c0_195 = arith.constant 0 : index
    %c0_196 = arith.constant 0 : index
    %1195 = vector.load %arg11[%c0_195, %c0_196] : memref<32x128xbf16, #tpu.memory_space<vmem>>, vector<32x128xbf16>
    %cst_197 = arith.constant 0.000000e+00 : f32
    %1196 = vector.broadcast %cst_197 : f32 to vector<2x32xf32>
    %cst_198 = arith.constant 0.000000e+00 : f32
    %1197 = vector.broadcast %cst_198 : f32 to vector<2x32xf32>
    %1198 = arith.truncf %1196 : vector<2x32xf32> to vector<2x32xbf16>
    %cst_199 = arith.constant dense<0.000000e+00> : vector<2x128xf32>
    %1199 = tpu.matmul %1198, %1195, %cst_199 {dimension_numbers = #tpu.dot_dimension_numbers<[1], [0], [0], [1], [0, 0, 1, 1], [], []>} : vector<2x32xbf16>, vector<32x128xbf16>, vector<2x128xf32> -> vector<2x128xf32>
    %1200 = arith.addf %967, %1199 : vector<2x128xf32>
    %1201 = vector.extract_strided_slice %1200 {offsets = [0, 0], sizes = [2, 32], strides = [1, 1]} : vector<2x128xf32> to vector<2x32xf32>
    %1202 = arith.negf %1201 : vector<2x32xf32>
    %1203 = math.exp %1202 : vector<2x32xf32>
    %cst_200 = arith.constant 1.000000e+00 : f32
    %1204 = vector.broadcast %cst_200 : f32 to vector<2x32xf32>
    %1205 = arith.addf %1204, %1203 : vector<2x32xf32>
    %1206 = arith.divf %1204, %1205 : vector<2x32xf32>
    %1207 = vector.extract_strided_slice %1200 {offsets = [0, 32], sizes = [2, 32], strides = [1, 1]} : vector<2x128xf32> to vector<2x32xf32>
    %1208 = arith.negf %1207 : vector<2x32xf32>
    %1209 = math.exp %1208 : vector<2x32xf32>
    %cst_201 = arith.constant 1.000000e+00 : f32
    %1210 = vector.broadcast %cst_201 : f32 to vector<2x32xf32>
    %1211 = arith.addf %1210, %1209 : vector<2x32xf32>
    %1212 = arith.divf %1210, %1211 : vector<2x32xf32>
    %1213 = vector.extract_strided_slice %1200 {offsets = [0, 64], sizes = [2, 32], strides = [1, 1]} : vector<2x128xf32> to vector<2x32xf32>
    %1214 = math.tanh %1213 : vector<2x32xf32>
    %1215 = vector.extract_strided_slice %1200 {offsets = [0, 96], sizes = [2, 32], strides = [1, 1]} : vector<2x128xf32> to vector<2x32xf32>
    %1216 = arith.negf %1215 : vector<2x32xf32>
    %1217 = math.exp %1216 : vector<2x32xf32>
    %cst_202 = arith.constant 1.000000e+00 : f32
    %1218 = vector.broadcast %cst_202 : f32 to vector<2x32xf32>
    %1219 = arith.addf %1218, %1217 : vector<2x32xf32>
    %1220 = arith.divf %1218, %1219 : vector<2x32xf32>
    %1221 = arith.mulf %1212, %1197 : vector<2x32xf32>
    %1222 = arith.mulf %1206, %1214 : vector<2x32xf32>
    %1223 = arith.addf %1221, %1222 : vector<2x32xf32>
    %1224 = math.tanh %1223 : vector<2x32xf32>
    %1225 = arith.mulf %1220, %1224 : vector<2x32xf32>
    %1226 = arith.truncf %1225 : vector<2x32xf32> to vector<2x32xbf16>
    %cst_203 = arith.constant dense<0.000000e+00> : vector<2x128xf32>
    %1227 = tpu.matmul %1226, %1195, %cst_203 {dimension_numbers = #tpu.dot_dimension_numbers<[1], [0], [0], [1], [0, 0, 1, 1], [], []>} : vector<2x32xbf16>, vector<32x128xbf16>, vector<2x128xf32> -> vector<2x128xf32>
    %1228 = arith.addf %967, %1227 : vector<2x128xf32>
    %1229 = vector.extract_strided_slice %1228 {offsets = [0, 0], sizes = [2, 32], strides = [1, 1]} : vector<2x128xf32> to vector<2x32xf32>
    %1230 = arith.negf %1229 : vector<2x32xf32>
    %1231 = math.exp %1230 : vector<2x32xf32>
    %cst_204 = arith.constant 1.000000e+00 : f32
    %1232 = vector.broadcast %cst_204 : f32 to vector<2x32xf32>
    %1233 = arith.addf %1232, %1231 : vector<2x32xf32>
    %1234 = arith.divf %1232, %1233 : vector<2x32xf32>
    %1235 = vector.extract_strided_slice %1228 {offsets = [0, 32], sizes = [2, 32], strides = [1, 1]} : vector<2x128xf32> to vector<2x32xf32>
    %1236 = arith.negf %1235 : vector<2x32xf32>
    %1237 = math.exp %1236 : vector<2x32xf32>
    %cst_205 = arith.constant 1.000000e+00 : f32
    %1238 = vector.broadcast %cst_205 : f32 to vector<2x32xf32>
    %1239 = arith.addf %1238, %1237 : vector<2x32xf32>
    %1240 = arith.divf %1238, %1239 : vector<2x32xf32>
    %1241 = vector.extract_strided_slice %1228 {offsets = [0, 64], sizes = [2, 32], strides = [1, 1]} : vector<2x128xf32> to vector<2x32xf32>
    %1242 = math.tanh %1241 : vector<2x32xf32>
    %1243 = vector.extract_strided_slice %1228 {offsets = [0, 96], sizes = [2, 32], strides = [1, 1]} : vector<2x128xf32> to vector<2x32xf32>
    %1244 = arith.negf %1243 : vector<2x32xf32>
    %1245 = math.exp %1244 : vector<2x32xf32>
    %cst_206 = arith.constant 1.000000e+00 : f32
    %1246 = vector.broadcast %cst_206 : f32 to vector<2x32xf32>
    %1247 = arith.addf %1246, %1245 : vector<2x32xf32>
    %1248 = arith.divf %1246, %1247 : vector<2x32xf32>
    %1249 = arith.mulf %1240, %1223 : vector<2x32xf32>
    %1250 = arith.mulf %1234, %1242 : vector<2x32xf32>
    %1251 = arith.addf %1249, %1250 : vector<2x32xf32>
    %1252 = math.tanh %1251 : vector<2x32xf32>
    %1253 = arith.mulf %1248, %1252 : vector<2x32xf32>
    %1254 = arith.truncf %1253 : vector<2x32xf32> to vector<2x32xbf16>
    %cst_207 = arith.constant dense<0.000000e+00> : vector<2x128xf32>
    %1255 = tpu.matmul %1254, %1195, %cst_207 {dimension_numbers = #tpu.dot_dimension_numbers<[1], [0], [0], [1], [0, 0, 1, 1], [], []>} : vector<2x32xbf16>, vector<32x128xbf16>, vector<2x128xf32> -> vector<2x128xf32>
    %1256 = arith.addf %967, %1255 : vector<2x128xf32>
    %1257 = vector.extract_strided_slice %1256 {offsets = [0, 0], sizes = [2, 32], strides = [1, 1]} : vector<2x128xf32> to vector<2x32xf32>
    %1258 = arith.negf %1257 : vector<2x32xf32>
    %1259 = math.exp %1258 : vector<2x32xf32>
    %cst_208 = arith.constant 1.000000e+00 : f32
    %1260 = vector.broadcast %cst_208 : f32 to vector<2x32xf32>
    %1261 = arith.addf %1260, %1259 : vector<2x32xf32>
    %1262 = arith.divf %1260, %1261 : vector<2x32xf32>
    %1263 = vector.extract_strided_slice %1256 {offsets = [0, 32], sizes = [2, 32], strides = [1, 1]} : vector<2x128xf32> to vector<2x32xf32>
    %1264 = arith.negf %1263 : vector<2x32xf32>
    %1265 = math.exp %1264 : vector<2x32xf32>
    %cst_209 = arith.constant 1.000000e+00 : f32
    %1266 = vector.broadcast %cst_209 : f32 to vector<2x32xf32>
    %1267 = arith.addf %1266, %1265 : vector<2x32xf32>
    %1268 = arith.divf %1266, %1267 : vector<2x32xf32>
    %1269 = vector.extract_strided_slice %1256 {offsets = [0, 64], sizes = [2, 32], strides = [1, 1]} : vector<2x128xf32> to vector<2x32xf32>
    %1270 = math.tanh %1269 : vector<2x32xf32>
    %1271 = vector.extract_strided_slice %1256 {offsets = [0, 96], sizes = [2, 32], strides = [1, 1]} : vector<2x128xf32> to vector<2x32xf32>
    %1272 = arith.negf %1271 : vector<2x32xf32>
    %1273 = math.exp %1272 : vector<2x32xf32>
    %cst_210 = arith.constant 1.000000e+00 : f32
    %1274 = vector.broadcast %cst_210 : f32 to vector<2x32xf32>
    %1275 = arith.addf %1274, %1273 : vector<2x32xf32>
    %1276 = arith.divf %1274, %1275 : vector<2x32xf32>
    %1277 = arith.mulf %1268, %1251 : vector<2x32xf32>
    %1278 = arith.mulf %1262, %1270 : vector<2x32xf32>
    %1279 = arith.addf %1277, %1278 : vector<2x32xf32>
    %1280 = math.tanh %1279 : vector<2x32xf32>
    %1281 = arith.mulf %1276, %1280 : vector<2x32xf32>
    %1282 = arith.truncf %1281 : vector<2x32xf32> to vector<2x32xbf16>
    %cst_211 = arith.constant dense<0.000000e+00> : vector<2x128xf32>
    %1283 = tpu.matmul %1282, %1195, %cst_211 {dimension_numbers = #tpu.dot_dimension_numbers<[1], [0], [0], [1], [0, 0, 1, 1], [], []>} : vector<2x32xbf16>, vector<32x128xbf16>, vector<2x128xf32> -> vector<2x128xf32>
    %1284 = arith.addf %967, %1283 : vector<2x128xf32>
    %1285 = vector.extract_strided_slice %1284 {offsets = [0, 0], sizes = [2, 32], strides = [1, 1]} : vector<2x128xf32> to vector<2x32xf32>
    %1286 = arith.negf %1285 : vector<2x32xf32>
    %1287 = math.exp %1286 : vector<2x32xf32>
    %cst_212 = arith.constant 1.000000e+00 : f32
    %1288 = vector.broadcast %cst_212 : f32 to vector<2x32xf32>
    %1289 = arith.addf %1288, %1287 : vector<2x32xf32>
    %1290 = arith.divf %1288, %1289 : vector<2x32xf32>
    %1291 = vector.extract_strided_slice %1284 {offsets = [0, 32], sizes = [2, 32], strides = [1, 1]} : vector<2x128xf32> to vector<2x32xf32>
    %1292 = arith.negf %1291 : vector<2x32xf32>
    %1293 = math.exp %1292 : vector<2x32xf32>
    %cst_213 = arith.constant 1.000000e+00 : f32
    %1294 = vector.broadcast %cst_213 : f32 to vector<2x32xf32>
    %1295 = arith.addf %1294, %1293 : vector<2x32xf32>
    %1296 = arith.divf %1294, %1295 : vector<2x32xf32>
    %1297 = vector.extract_strided_slice %1284 {offsets = [0, 64], sizes = [2, 32], strides = [1, 1]} : vector<2x128xf32> to vector<2x32xf32>
    %1298 = math.tanh %1297 : vector<2x32xf32>
    %1299 = vector.extract_strided_slice %1284 {offsets = [0, 96], sizes = [2, 32], strides = [1, 1]} : vector<2x128xf32> to vector<2x32xf32>
    %1300 = arith.negf %1299 : vector<2x32xf32>
    %1301 = math.exp %1300 : vector<2x32xf32>
    %cst_214 = arith.constant 1.000000e+00 : f32
    %1302 = vector.broadcast %cst_214 : f32 to vector<2x32xf32>
    %1303 = arith.addf %1302, %1301 : vector<2x32xf32>
    %1304 = arith.divf %1302, %1303 : vector<2x32xf32>
    %1305 = arith.mulf %1296, %1279 : vector<2x32xf32>
    %1306 = arith.mulf %1290, %1298 : vector<2x32xf32>
    %1307 = arith.addf %1305, %1306 : vector<2x32xf32>
    %1308 = math.tanh %1307 : vector<2x32xf32>
    %1309 = arith.mulf %1304, %1308 : vector<2x32xf32>
    %1310 = arith.truncf %1309 : vector<2x32xf32> to vector<2x32xbf16>
    %cst_215 = arith.constant dense<0.000000e+00> : vector<2x128xf32>
    %1311 = tpu.matmul %1310, %1195, %cst_215 {dimension_numbers = #tpu.dot_dimension_numbers<[1], [0], [0], [1], [0, 0, 1, 1], [], []>} : vector<2x32xbf16>, vector<32x128xbf16>, vector<2x128xf32> -> vector<2x128xf32>
    %1312 = arith.addf %967, %1311 : vector<2x128xf32>
    %1313 = vector.extract_strided_slice %1312 {offsets = [0, 0], sizes = [2, 32], strides = [1, 1]} : vector<2x128xf32> to vector<2x32xf32>
    %1314 = arith.negf %1313 : vector<2x32xf32>
    %1315 = math.exp %1314 : vector<2x32xf32>
    %cst_216 = arith.constant 1.000000e+00 : f32
    %1316 = vector.broadcast %cst_216 : f32 to vector<2x32xf32>
    %1317 = arith.addf %1316, %1315 : vector<2x32xf32>
    %1318 = arith.divf %1316, %1317 : vector<2x32xf32>
    %1319 = vector.extract_strided_slice %1312 {offsets = [0, 32], sizes = [2, 32], strides = [1, 1]} : vector<2x128xf32> to vector<2x32xf32>
    %1320 = arith.negf %1319 : vector<2x32xf32>
    %1321 = math.exp %1320 : vector<2x32xf32>
    %cst_217 = arith.constant 1.000000e+00 : f32
    %1322 = vector.broadcast %cst_217 : f32 to vector<2x32xf32>
    %1323 = arith.addf %1322, %1321 : vector<2x32xf32>
    %1324 = arith.divf %1322, %1323 : vector<2x32xf32>
    %1325 = vector.extract_strided_slice %1312 {offsets = [0, 64], sizes = [2, 32], strides = [1, 1]} : vector<2x128xf32> to vector<2x32xf32>
    %1326 = math.tanh %1325 : vector<2x32xf32>
    %1327 = vector.extract_strided_slice %1312 {offsets = [0, 96], sizes = [2, 32], strides = [1, 1]} : vector<2x128xf32> to vector<2x32xf32>
    %1328 = arith.negf %1327 : vector<2x32xf32>
    %1329 = math.exp %1328 : vector<2x32xf32>
    %cst_218 = arith.constant 1.000000e+00 : f32
    %1330 = vector.broadcast %cst_218 : f32 to vector<2x32xf32>
    %1331 = arith.addf %1330, %1329 : vector<2x32xf32>
    %1332 = arith.divf %1330, %1331 : vector<2x32xf32>
    %1333 = arith.mulf %1324, %1307 : vector<2x32xf32>
    %1334 = arith.mulf %1318, %1326 : vector<2x32xf32>
    %1335 = arith.addf %1333, %1334 : vector<2x32xf32>
    %1336 = math.tanh %1335 : vector<2x32xf32>
    %1337 = arith.mulf %1332, %1336 : vector<2x32xf32>
    %1338 = arith.truncf %1337 : vector<2x32xf32> to vector<2x32xbf16>
    %cst_219 = arith.constant dense<0.000000e+00> : vector<2x128xf32>
    %1339 = tpu.matmul %1338, %1195, %cst_219 {dimension_numbers = #tpu.dot_dimension_numbers<[1], [0], [0], [1], [0, 0, 1, 1], [], []>} : vector<2x32xbf16>, vector<32x128xbf16>, vector<2x128xf32> -> vector<2x128xf32>
    %1340 = arith.addf %967, %1339 : vector<2x128xf32>
    %1341 = vector.extract_strided_slice %1340 {offsets = [0, 0], sizes = [2, 32], strides = [1, 1]} : vector<2x128xf32> to vector<2x32xf32>
    %1342 = arith.negf %1341 : vector<2x32xf32>
    %1343 = math.exp %1342 : vector<2x32xf32>
    %cst_220 = arith.constant 1.000000e+00 : f32
    %1344 = vector.broadcast %cst_220 : f32 to vector<2x32xf32>
    %1345 = arith.addf %1344, %1343 : vector<2x32xf32>
    %1346 = arith.divf %1344, %1345 : vector<2x32xf32>
    %1347 = vector.extract_strided_slice %1340 {offsets = [0, 32], sizes = [2, 32], strides = [1, 1]} : vector<2x128xf32> to vector<2x32xf32>
    %1348 = arith.negf %1347 : vector<2x32xf32>
    %1349 = math.exp %1348 : vector<2x32xf32>
    %cst_221 = arith.constant 1.000000e+00 : f32
    %1350 = vector.broadcast %cst_221 : f32 to vector<2x32xf32>
    %1351 = arith.addf %1350, %1349 : vector<2x32xf32>
    %1352 = arith.divf %1350, %1351 : vector<2x32xf32>
    %1353 = vector.extract_strided_slice %1340 {offsets = [0, 64], sizes = [2, 32], strides = [1, 1]} : vector<2x128xf32> to vector<2x32xf32>
    %1354 = math.tanh %1353 : vector<2x32xf32>
    %1355 = vector.extract_strided_slice %1340 {offsets = [0, 96], sizes = [2, 32], strides = [1, 1]} : vector<2x128xf32> to vector<2x32xf32>
    %1356 = arith.negf %1355 : vector<2x32xf32>
    %1357 = math.exp %1356 : vector<2x32xf32>
    %cst_222 = arith.constant 1.000000e+00 : f32
    %1358 = vector.broadcast %cst_222 : f32 to vector<2x32xf32>
    %1359 = arith.addf %1358, %1357 : vector<2x32xf32>
    %1360 = arith.divf %1358, %1359 : vector<2x32xf32>
    %1361 = arith.mulf %1352, %1335 : vector<2x32xf32>
    %1362 = arith.mulf %1346, %1354 : vector<2x32xf32>
    %1363 = arith.addf %1361, %1362 : vector<2x32xf32>
    %1364 = math.tanh %1363 : vector<2x32xf32>
    %1365 = arith.mulf %1360, %1364 : vector<2x32xf32>
    %1366 = arith.truncf %1365 : vector<2x32xf32> to vector<2x32xbf16>
    %cst_223 = arith.constant dense<0.000000e+00> : vector<2x128xf32>
    %1367 = tpu.matmul %1366, %1195, %cst_223 {dimension_numbers = #tpu.dot_dimension_numbers<[1], [0], [0], [1], [0, 0, 1, 1], [], []>} : vector<2x32xbf16>, vector<32x128xbf16>, vector<2x128xf32> -> vector<2x128xf32>
    %1368 = arith.addf %967, %1367 : vector<2x128xf32>
    %1369 = vector.extract_strided_slice %1368 {offsets = [0, 0], sizes = [2, 32], strides = [1, 1]} : vector<2x128xf32> to vector<2x32xf32>
    %1370 = arith.negf %1369 : vector<2x32xf32>
    %1371 = math.exp %1370 : vector<2x32xf32>
    %cst_224 = arith.constant 1.000000e+00 : f32
    %1372 = vector.broadcast %cst_224 : f32 to vector<2x32xf32>
    %1373 = arith.addf %1372, %1371 : vector<2x32xf32>
    %1374 = arith.divf %1372, %1373 : vector<2x32xf32>
    %1375 = vector.extract_strided_slice %1368 {offsets = [0, 32], sizes = [2, 32], strides = [1, 1]} : vector<2x128xf32> to vector<2x32xf32>
    %1376 = arith.negf %1375 : vector<2x32xf32>
    %1377 = math.exp %1376 : vector<2x32xf32>
    %cst_225 = arith.constant 1.000000e+00 : f32
    %1378 = vector.broadcast %cst_225 : f32 to vector<2x32xf32>
    %1379 = arith.addf %1378, %1377 : vector<2x32xf32>
    %1380 = arith.divf %1378, %1379 : vector<2x32xf32>
    %1381 = vector.extract_strided_slice %1368 {offsets = [0, 64], sizes = [2, 32], strides = [1, 1]} : vector<2x128xf32> to vector<2x32xf32>
    %1382 = math.tanh %1381 : vector<2x32xf32>
    %1383 = vector.extract_strided_slice %1368 {offsets = [0, 96], sizes = [2, 32], strides = [1, 1]} : vector<2x128xf32> to vector<2x32xf32>
    %1384 = arith.negf %1383 : vector<2x32xf32>
    %1385 = math.exp %1384 : vector<2x32xf32>
    %cst_226 = arith.constant 1.000000e+00 : f32
    %1386 = vector.broadcast %cst_226 : f32 to vector<2x32xf32>
    %1387 = arith.addf %1386, %1385 : vector<2x32xf32>
    %1388 = arith.divf %1386, %1387 : vector<2x32xf32>
    %1389 = arith.mulf %1380, %1363 : vector<2x32xf32>
    %1390 = arith.mulf %1374, %1382 : vector<2x32xf32>
    %1391 = arith.addf %1389, %1390 : vector<2x32xf32>
    %1392 = math.tanh %1391 : vector<2x32xf32>
    %1393 = arith.mulf %1388, %1392 : vector<2x32xf32>
    %1394 = arith.truncf %1393 : vector<2x32xf32> to vector<2x32xbf16>
    %cst_227 = arith.constant dense<0.000000e+00> : vector<2x128xf32>
    %1395 = tpu.matmul %1394, %1195, %cst_227 {dimension_numbers = #tpu.dot_dimension_numbers<[1], [0], [0], [1], [0, 0, 1, 1], [], []>} : vector<2x32xbf16>, vector<32x128xbf16>, vector<2x128xf32> -> vector<2x128xf32>
    %1396 = arith.addf %967, %1395 : vector<2x128xf32>
    %1397 = vector.extract_strided_slice %1396 {offsets = [0, 0], sizes = [2, 32], strides = [1, 1]} : vector<2x128xf32> to vector<2x32xf32>
    %1398 = arith.negf %1397 : vector<2x32xf32>
    %1399 = math.exp %1398 : vector<2x32xf32>
    %cst_228 = arith.constant 1.000000e+00 : f32
    %1400 = vector.broadcast %cst_228 : f32 to vector<2x32xf32>
    %1401 = arith.addf %1400, %1399 : vector<2x32xf32>
    %1402 = arith.divf %1400, %1401 : vector<2x32xf32>
    %1403 = vector.extract_strided_slice %1396 {offsets = [0, 32], sizes = [2, 32], strides = [1, 1]} : vector<2x128xf32> to vector<2x32xf32>
    %1404 = arith.negf %1403 : vector<2x32xf32>
    %1405 = math.exp %1404 : vector<2x32xf32>
    %cst_229 = arith.constant 1.000000e+00 : f32
    %1406 = vector.broadcast %cst_229 : f32 to vector<2x32xf32>
    %1407 = arith.addf %1406, %1405 : vector<2x32xf32>
    %1408 = arith.divf %1406, %1407 : vector<2x32xf32>
    %1409 = vector.extract_strided_slice %1396 {offsets = [0, 64], sizes = [2, 32], strides = [1, 1]} : vector<2x128xf32> to vector<2x32xf32>
    %1410 = math.tanh %1409 : vector<2x32xf32>
    %1411 = vector.extract_strided_slice %1396 {offsets = [0, 96], sizes = [2, 32], strides = [1, 1]} : vector<2x128xf32> to vector<2x32xf32>
    %1412 = arith.negf %1411 : vector<2x32xf32>
    %1413 = math.exp %1412 : vector<2x32xf32>
    %cst_230 = arith.constant 1.000000e+00 : f32
    %1414 = vector.broadcast %cst_230 : f32 to vector<2x32xf32>
    %1415 = arith.addf %1414, %1413 : vector<2x32xf32>
    %1416 = arith.divf %1414, %1415 : vector<2x32xf32>
    %1417 = arith.mulf %1408, %1391 : vector<2x32xf32>
    %1418 = arith.mulf %1402, %1410 : vector<2x32xf32>
    %1419 = arith.addf %1417, %1418 : vector<2x32xf32>
    %1420 = math.tanh %1419 : vector<2x32xf32>
    %1421 = arith.mulf %1416, %1420 : vector<2x32xf32>
    %1422 = tpu.concatenate %998, %1421 in 1 : vector<2x32xf32>, vector<2x32xf32> -> vector<2x64xf32>
    %1423 = tpu.concatenate %1026, %1393 in 1 : vector<2x32xf32>, vector<2x32xf32> -> vector<2x64xf32>
    %1424 = tpu.concatenate %1054, %1365 in 1 : vector<2x32xf32>, vector<2x32xf32> -> vector<2x64xf32>
    %1425 = tpu.concatenate %1082, %1337 in 1 : vector<2x32xf32>, vector<2x32xf32> -> vector<2x64xf32>
    %1426 = tpu.concatenate %1110, %1309 in 1 : vector<2x32xf32>, vector<2x32xf32> -> vector<2x64xf32>
    %1427 = tpu.concatenate %1138, %1281 in 1 : vector<2x32xf32>, vector<2x32xf32> -> vector<2x64xf32>
    %1428 = tpu.concatenate %1166, %1253 in 1 : vector<2x32xf32>, vector<2x32xf32> -> vector<2x64xf32>
    %1429 = tpu.concatenate %1194, %1225 in 1 : vector<2x32xf32>, vector<2x32xf32> -> vector<2x64xf32>
    %1430 = tpu.concatenate %1422, %1423, %1424, %1425, %1426, %1427, %1428, %1429 in 0 : vector<2x64xf32>, vector<2x64xf32>, vector<2x64xf32>, vector<2x64xf32>, vector<2x64xf32>, vector<2x64xf32>, vector<2x64xf32>, vector<2x64xf32> -> vector<16x64xf32>
    %c0_231 = arith.constant 0 : index
    %c0_232 = arith.constant 0 : index
    %1431 = vector.load %arg13[%c0_231, %c0_232] : memref<64x256xf32, #tpu.memory_space<vmem>>, vector<64x256xf32>
    %cst_233 = arith.constant dense<0.000000e+00> : vector<16x256xf32>
    %1432 = tpu.matmul %1430, %1431, %cst_233 {dimension_numbers = #tpu.dot_dimension_numbers<[1], [0], [0], [1], [0, 0, 1, 1], [], []>} : vector<16x64xf32>, vector<64x256xf32>, vector<16x256xf32> -> vector<16x256xf32>
    %c0_234 = arith.constant 0 : index
    %c0_235 = arith.constant 0 : index
    %1433 = vector.load %arg16[%c0_234, %c0_235] : memref<1x256xf32, #tpu.memory_space<vmem>>, vector<1x256xf32>
    %1434 = vector.broadcast %1433 : vector<1x256xf32> to vector<16x256xf32>
    %1435 = arith.addf %1432, %1434 : vector<16x256xf32>
    %1436 = vector.extract_strided_slice %1435 {offsets = [0, 0], sizes = [2, 128], strides = [1, 1]} : vector<16x256xf32> to vector<2x128xf32>
    %1437 = vector.extract_strided_slice %1435 {offsets = [2, 0], sizes = [2, 128], strides = [1, 1]} : vector<16x256xf32> to vector<2x128xf32>
    %1438 = vector.extract_strided_slice %1435 {offsets = [4, 0], sizes = [2, 128], strides = [1, 1]} : vector<16x256xf32> to vector<2x128xf32>
    %1439 = vector.extract_strided_slice %1435 {offsets = [6, 0], sizes = [2, 128], strides = [1, 1]} : vector<16x256xf32> to vector<2x128xf32>
    %1440 = vector.extract_strided_slice %1435 {offsets = [8, 0], sizes = [2, 128], strides = [1, 1]} : vector<16x256xf32> to vector<2x128xf32>
    %1441 = vector.extract_strided_slice %1435 {offsets = [10, 0], sizes = [2, 128], strides = [1, 1]} : vector<16x256xf32> to vector<2x128xf32>
    %1442 = vector.extract_strided_slice %1435 {offsets = [12, 0], sizes = [2, 128], strides = [1, 1]} : vector<16x256xf32> to vector<2x128xf32>
    %1443 = vector.extract_strided_slice %1435 {offsets = [14, 0], sizes = [2, 128], strides = [1, 1]} : vector<16x256xf32> to vector<2x128xf32>
    %1444 = vector.extract_strided_slice %1435 {offsets = [0, 128], sizes = [2, 128], strides = [1, 1]} : vector<16x256xf32> to vector<2x128xf32>
    %1445 = vector.extract_strided_slice %1435 {offsets = [2, 128], sizes = [2, 128], strides = [1, 1]} : vector<16x256xf32> to vector<2x128xf32>
    %1446 = vector.extract_strided_slice %1435 {offsets = [4, 128], sizes = [2, 128], strides = [1, 1]} : vector<16x256xf32> to vector<2x128xf32>
    %1447 = vector.extract_strided_slice %1435 {offsets = [6, 128], sizes = [2, 128], strides = [1, 1]} : vector<16x256xf32> to vector<2x128xf32>
    %1448 = vector.extract_strided_slice %1435 {offsets = [8, 128], sizes = [2, 128], strides = [1, 1]} : vector<16x256xf32> to vector<2x128xf32>
    %1449 = vector.extract_strided_slice %1435 {offsets = [10, 128], sizes = [2, 128], strides = [1, 1]} : vector<16x256xf32> to vector<2x128xf32>
    %1450 = vector.extract_strided_slice %1435 {offsets = [12, 128], sizes = [2, 128], strides = [1, 1]} : vector<16x256xf32> to vector<2x128xf32>
    %1451 = vector.extract_strided_slice %1435 {offsets = [14, 128], sizes = [2, 128], strides = [1, 1]} : vector<16x256xf32> to vector<2x128xf32>
    %c0_236 = arith.constant 0 : index
    %c0_237 = arith.constant 0 : index
    %1452 = vector.load %arg14[%c0_236, %c0_237] : memref<32x128xbf16, #tpu.memory_space<vmem>>, vector<32x128xbf16>
    %cst_238 = arith.constant 0.000000e+00 : f32
    %1453 = vector.broadcast %cst_238 : f32 to vector<2x32xf32>
    %cst_239 = arith.constant 0.000000e+00 : f32
    %1454 = vector.broadcast %cst_239 : f32 to vector<2x32xf32>
    %1455 = arith.truncf %1453 : vector<2x32xf32> to vector<2x32xbf16>
    %cst_240 = arith.constant dense<0.000000e+00> : vector<2x128xf32>
    %1456 = tpu.matmul %1455, %1452, %cst_240 {dimension_numbers = #tpu.dot_dimension_numbers<[1], [0], [0], [1], [0, 0, 1, 1], [], []>} : vector<2x32xbf16>, vector<32x128xbf16>, vector<2x128xf32> -> vector<2x128xf32>
    %1457 = arith.addf %1436, %1456 : vector<2x128xf32>
    %1458 = vector.extract_strided_slice %1457 {offsets = [0, 0], sizes = [2, 32], strides = [1, 1]} : vector<2x128xf32> to vector<2x32xf32>
    %1459 = arith.negf %1458 : vector<2x32xf32>
    %1460 = math.exp %1459 : vector<2x32xf32>
    %cst_241 = arith.constant 1.000000e+00 : f32
    %1461 = vector.broadcast %cst_241 : f32 to vector<2x32xf32>
    %1462 = arith.addf %1461, %1460 : vector<2x32xf32>
    %1463 = arith.divf %1461, %1462 : vector<2x32xf32>
    %1464 = vector.extract_strided_slice %1457 {offsets = [0, 32], sizes = [2, 32], strides = [1, 1]} : vector<2x128xf32> to vector<2x32xf32>
    %1465 = arith.negf %1464 : vector<2x32xf32>
    %1466 = math.exp %1465 : vector<2x32xf32>
    %cst_242 = arith.constant 1.000000e+00 : f32
    %1467 = vector.broadcast %cst_242 : f32 to vector<2x32xf32>
    %1468 = arith.addf %1467, %1466 : vector<2x32xf32>
    %1469 = arith.divf %1467, %1468 : vector<2x32xf32>
    %1470 = vector.extract_strided_slice %1457 {offsets = [0, 64], sizes = [2, 32], strides = [1, 1]} : vector<2x128xf32> to vector<2x32xf32>
    %1471 = math.tanh %1470 : vector<2x32xf32>
    %1472 = vector.extract_strided_slice %1457 {offsets = [0, 96], sizes = [2, 32], strides = [1, 1]} : vector<2x128xf32> to vector<2x32xf32>
    %1473 = arith.negf %1472 : vector<2x32xf32>
    %1474 = math.exp %1473 : vector<2x32xf32>
    %cst_243 = arith.constant 1.000000e+00 : f32
    %1475 = vector.broadcast %cst_243 : f32 to vector<2x32xf32>
    %1476 = arith.addf %1475, %1474 : vector<2x32xf32>
    %1477 = arith.divf %1475, %1476 : vector<2x32xf32>
    %1478 = arith.mulf %1469, %1454 : vector<2x32xf32>
    %1479 = arith.mulf %1463, %1471 : vector<2x32xf32>
    %1480 = arith.addf %1478, %1479 : vector<2x32xf32>
    %1481 = math.tanh %1480 : vector<2x32xf32>
    %1482 = arith.mulf %1477, %1481 : vector<2x32xf32>
    %1483 = arith.truncf %1482 : vector<2x32xf32> to vector<2x32xbf16>
    %cst_244 = arith.constant dense<0.000000e+00> : vector<2x128xf32>
    %1484 = tpu.matmul %1483, %1452, %cst_244 {dimension_numbers = #tpu.dot_dimension_numbers<[1], [0], [0], [1], [0, 0, 1, 1], [], []>} : vector<2x32xbf16>, vector<32x128xbf16>, vector<2x128xf32> -> vector<2x128xf32>
    %1485 = arith.addf %1437, %1484 : vector<2x128xf32>
    %1486 = vector.extract_strided_slice %1485 {offsets = [0, 0], sizes = [2, 32], strides = [1, 1]} : vector<2x128xf32> to vector<2x32xf32>
    %1487 = arith.negf %1486 : vector<2x32xf32>
    %1488 = math.exp %1487 : vector<2x32xf32>
    %cst_245 = arith.constant 1.000000e+00 : f32
    %1489 = vector.broadcast %cst_245 : f32 to vector<2x32xf32>
    %1490 = arith.addf %1489, %1488 : vector<2x32xf32>
    %1491 = arith.divf %1489, %1490 : vector<2x32xf32>
    %1492 = vector.extract_strided_slice %1485 {offsets = [0, 32], sizes = [2, 32], strides = [1, 1]} : vector<2x128xf32> to vector<2x32xf32>
    %1493 = arith.negf %1492 : vector<2x32xf32>
    %1494 = math.exp %1493 : vector<2x32xf32>
    %cst_246 = arith.constant 1.000000e+00 : f32
    %1495 = vector.broadcast %cst_246 : f32 to vector<2x32xf32>
    %1496 = arith.addf %1495, %1494 : vector<2x32xf32>
    %1497 = arith.divf %1495, %1496 : vector<2x32xf32>
    %1498 = vector.extract_strided_slice %1485 {offsets = [0, 64], sizes = [2, 32], strides = [1, 1]} : vector<2x128xf32> to vector<2x32xf32>
    %1499 = math.tanh %1498 : vector<2x32xf32>
    %1500 = vector.extract_strided_slice %1485 {offsets = [0, 96], sizes = [2, 32], strides = [1, 1]} : vector<2x128xf32> to vector<2x32xf32>
    %1501 = arith.negf %1500 : vector<2x32xf32>
    %1502 = math.exp %1501 : vector<2x32xf32>
    %cst_247 = arith.constant 1.000000e+00 : f32
    %1503 = vector.broadcast %cst_247 : f32 to vector<2x32xf32>
    %1504 = arith.addf %1503, %1502 : vector<2x32xf32>
    %1505 = arith.divf %1503, %1504 : vector<2x32xf32>
    %1506 = arith.mulf %1497, %1480 : vector<2x32xf32>
    %1507 = arith.mulf %1491, %1499 : vector<2x32xf32>
    %1508 = arith.addf %1506, %1507 : vector<2x32xf32>
    %1509 = math.tanh %1508 : vector<2x32xf32>
    %1510 = arith.mulf %1505, %1509 : vector<2x32xf32>
    %1511 = arith.truncf %1510 : vector<2x32xf32> to vector<2x32xbf16>
    %cst_248 = arith.constant dense<0.000000e+00> : vector<2x128xf32>
    %1512 = tpu.matmul %1511, %1452, %cst_248 {dimension_numbers = #tpu.dot_dimension_numbers<[1], [0], [0], [1], [0, 0, 1, 1], [], []>} : vector<2x32xbf16>, vector<32x128xbf16>, vector<2x128xf32> -> vector<2x128xf32>
    %1513 = arith.addf %1438, %1512 : vector<2x128xf32>
    %1514 = vector.extract_strided_slice %1513 {offsets = [0, 0], sizes = [2, 32], strides = [1, 1]} : vector<2x128xf32> to vector<2x32xf32>
    %1515 = arith.negf %1514 : vector<2x32xf32>
    %1516 = math.exp %1515 : vector<2x32xf32>
    %cst_249 = arith.constant 1.000000e+00 : f32
    %1517 = vector.broadcast %cst_249 : f32 to vector<2x32xf32>
    %1518 = arith.addf %1517, %1516 : vector<2x32xf32>
    %1519 = arith.divf %1517, %1518 : vector<2x32xf32>
    %1520 = vector.extract_strided_slice %1513 {offsets = [0, 32], sizes = [2, 32], strides = [1, 1]} : vector<2x128xf32> to vector<2x32xf32>
    %1521 = arith.negf %1520 : vector<2x32xf32>
    %1522 = math.exp %1521 : vector<2x32xf32>
    %cst_250 = arith.constant 1.000000e+00 : f32
    %1523 = vector.broadcast %cst_250 : f32 to vector<2x32xf32>
    %1524 = arith.addf %1523, %1522 : vector<2x32xf32>
    %1525 = arith.divf %1523, %1524 : vector<2x32xf32>
    %1526 = vector.extract_strided_slice %1513 {offsets = [0, 64], sizes = [2, 32], strides = [1, 1]} : vector<2x128xf32> to vector<2x32xf32>
    %1527 = math.tanh %1526 : vector<2x32xf32>
    %1528 = vector.extract_strided_slice %1513 {offsets = [0, 96], sizes = [2, 32], strides = [1, 1]} : vector<2x128xf32> to vector<2x32xf32>
    %1529 = arith.negf %1528 : vector<2x32xf32>
    %1530 = math.exp %1529 : vector<2x32xf32>
    %cst_251 = arith.constant 1.000000e+00 : f32
    %1531 = vector.broadcast %cst_251 : f32 to vector<2x32xf32>
    %1532 = arith.addf %1531, %1530 : vector<2x32xf32>
    %1533 = arith.divf %1531, %1532 : vector<2x32xf32>
    %1534 = arith.mulf %1525, %1508 : vector<2x32xf32>
    %1535 = arith.mulf %1519, %1527 : vector<2x32xf32>
    %1536 = arith.addf %1534, %1535 : vector<2x32xf32>
    %1537 = math.tanh %1536 : vector<2x32xf32>
    %1538 = arith.mulf %1533, %1537 : vector<2x32xf32>
    %1539 = arith.truncf %1538 : vector<2x32xf32> to vector<2x32xbf16>
    %cst_252 = arith.constant dense<0.000000e+00> : vector<2x128xf32>
    %1540 = tpu.matmul %1539, %1452, %cst_252 {dimension_numbers = #tpu.dot_dimension_numbers<[1], [0], [0], [1], [0, 0, 1, 1], [], []>} : vector<2x32xbf16>, vector<32x128xbf16>, vector<2x128xf32> -> vector<2x128xf32>
    %1541 = arith.addf %1439, %1540 : vector<2x128xf32>
    %1542 = vector.extract_strided_slice %1541 {offsets = [0, 0], sizes = [2, 32], strides = [1, 1]} : vector<2x128xf32> to vector<2x32xf32>
    %1543 = arith.negf %1542 : vector<2x32xf32>
    %1544 = math.exp %1543 : vector<2x32xf32>
    %cst_253 = arith.constant 1.000000e+00 : f32
    %1545 = vector.broadcast %cst_253 : f32 to vector<2x32xf32>
    %1546 = arith.addf %1545, %1544 : vector<2x32xf32>
    %1547 = arith.divf %1545, %1546 : vector<2x32xf32>
    %1548 = vector.extract_strided_slice %1541 {offsets = [0, 32], sizes = [2, 32], strides = [1, 1]} : vector<2x128xf32> to vector<2x32xf32>
    %1549 = arith.negf %1548 : vector<2x32xf32>
    %1550 = math.exp %1549 : vector<2x32xf32>
    %cst_254 = arith.constant 1.000000e+00 : f32
    %1551 = vector.broadcast %cst_254 : f32 to vector<2x32xf32>
    %1552 = arith.addf %1551, %1550 : vector<2x32xf32>
    %1553 = arith.divf %1551, %1552 : vector<2x32xf32>
    %1554 = vector.extract_strided_slice %1541 {offsets = [0, 64], sizes = [2, 32], strides = [1, 1]} : vector<2x128xf32> to vector<2x32xf32>
    %1555 = math.tanh %1554 : vector<2x32xf32>
    %1556 = vector.extract_strided_slice %1541 {offsets = [0, 96], sizes = [2, 32], strides = [1, 1]} : vector<2x128xf32> to vector<2x32xf32>
    %1557 = arith.negf %1556 : vector<2x32xf32>
    %1558 = math.exp %1557 : vector<2x32xf32>
    %cst_255 = arith.constant 1.000000e+00 : f32
    %1559 = vector.broadcast %cst_255 : f32 to vector<2x32xf32>
    %1560 = arith.addf %1559, %1558 : vector<2x32xf32>
    %1561 = arith.divf %1559, %1560 : vector<2x32xf32>
    %1562 = arith.mulf %1553, %1536 : vector<2x32xf32>
    %1563 = arith.mulf %1547, %1555 : vector<2x32xf32>
    %1564 = arith.addf %1562, %1563 : vector<2x32xf32>
    %1565 = math.tanh %1564 : vector<2x32xf32>
    %1566 = arith.mulf %1561, %1565 : vector<2x32xf32>
    %1567 = arith.truncf %1566 : vector<2x32xf32> to vector<2x32xbf16>
    %cst_256 = arith.constant dense<0.000000e+00> : vector<2x128xf32>
    %1568 = tpu.matmul %1567, %1452, %cst_256 {dimension_numbers = #tpu.dot_dimension_numbers<[1], [0], [0], [1], [0, 0, 1, 1], [], []>} : vector<2x32xbf16>, vector<32x128xbf16>, vector<2x128xf32> -> vector<2x128xf32>
    %1569 = arith.addf %1440, %1568 : vector<2x128xf32>
    %1570 = vector.extract_strided_slice %1569 {offsets = [0, 0], sizes = [2, 32], strides = [1, 1]} : vector<2x128xf32> to vector<2x32xf32>
    %1571 = arith.negf %1570 : vector<2x32xf32>
    %1572 = math.exp %1571 : vector<2x32xf32>
    %cst_257 = arith.constant 1.000000e+00 : f32
    %1573 = vector.broadcast %cst_257 : f32 to vector<2x32xf32>
    %1574 = arith.addf %1573, %1572 : vector<2x32xf32>
    %1575 = arith.divf %1573, %1574 : vector<2x32xf32>
    %1576 = vector.extract_strided_slice %1569 {offsets = [0, 32], sizes = [2, 32], strides = [1, 1]} : vector<2x128xf32> to vector<2x32xf32>
    %1577 = arith.negf %1576 : vector<2x32xf32>
    %1578 = math.exp %1577 : vector<2x32xf32>
    %cst_258 = arith.constant 1.000000e+00 : f32
    %1579 = vector.broadcast %cst_258 : f32 to vector<2x32xf32>
    %1580 = arith.addf %1579, %1578 : vector<2x32xf32>
    %1581 = arith.divf %1579, %1580 : vector<2x32xf32>
    %1582 = vector.extract_strided_slice %1569 {offsets = [0, 64], sizes = [2, 32], strides = [1, 1]} : vector<2x128xf32> to vector<2x32xf32>
    %1583 = math.tanh %1582 : vector<2x32xf32>
    %1584 = vector.extract_strided_slice %1569 {offsets = [0, 96], sizes = [2, 32], strides = [1, 1]} : vector<2x128xf32> to vector<2x32xf32>
    %1585 = arith.negf %1584 : vector<2x32xf32>
    %1586 = math.exp %1585 : vector<2x32xf32>
    %cst_259 = arith.constant 1.000000e+00 : f32
    %1587 = vector.broadcast %cst_259 : f32 to vector<2x32xf32>
    %1588 = arith.addf %1587, %1586 : vector<2x32xf32>
    %1589 = arith.divf %1587, %1588 : vector<2x32xf32>
    %1590 = arith.mulf %1581, %1564 : vector<2x32xf32>
    %1591 = arith.mulf %1575, %1583 : vector<2x32xf32>
    %1592 = arith.addf %1590, %1591 : vector<2x32xf32>
    %1593 = math.tanh %1592 : vector<2x32xf32>
    %1594 = arith.mulf %1589, %1593 : vector<2x32xf32>
    %1595 = arith.truncf %1594 : vector<2x32xf32> to vector<2x32xbf16>
    %cst_260 = arith.constant dense<0.000000e+00> : vector<2x128xf32>
    %1596 = tpu.matmul %1595, %1452, %cst_260 {dimension_numbers = #tpu.dot_dimension_numbers<[1], [0], [0], [1], [0, 0, 1, 1], [], []>} : vector<2x32xbf16>, vector<32x128xbf16>, vector<2x128xf32> -> vector<2x128xf32>
    %1597 = arith.addf %1441, %1596 : vector<2x128xf32>
    %1598 = vector.extract_strided_slice %1597 {offsets = [0, 0], sizes = [2, 32], strides = [1, 1]} : vector<2x128xf32> to vector<2x32xf32>
    %1599 = arith.negf %1598 : vector<2x32xf32>
    %1600 = math.exp %1599 : vector<2x32xf32>
    %cst_261 = arith.constant 1.000000e+00 : f32
    %1601 = vector.broadcast %cst_261 : f32 to vector<2x32xf32>
    %1602 = arith.addf %1601, %1600 : vector<2x32xf32>
    %1603 = arith.divf %1601, %1602 : vector<2x32xf32>
    %1604 = vector.extract_strided_slice %1597 {offsets = [0, 32], sizes = [2, 32], strides = [1, 1]} : vector<2x128xf32> to vector<2x32xf32>
    %1605 = arith.negf %1604 : vector<2x32xf32>
    %1606 = math.exp %1605 : vector<2x32xf32>
    %cst_262 = arith.constant 1.000000e+00 : f32
    %1607 = vector.broadcast %cst_262 : f32 to vector<2x32xf32>
    %1608 = arith.addf %1607, %1606 : vector<2x32xf32>
    %1609 = arith.divf %1607, %1608 : vector<2x32xf32>
    %1610 = vector.extract_strided_slice %1597 {offsets = [0, 64], sizes = [2, 32], strides = [1, 1]} : vector<2x128xf32> to vector<2x32xf32>
    %1611 = math.tanh %1610 : vector<2x32xf32>
    %1612 = vector.extract_strided_slice %1597 {offsets = [0, 96], sizes = [2, 32], strides = [1, 1]} : vector<2x128xf32> to vector<2x32xf32>
    %1613 = arith.negf %1612 : vector<2x32xf32>
    %1614 = math.exp %1613 : vector<2x32xf32>
    %cst_263 = arith.constant 1.000000e+00 : f32
    %1615 = vector.broadcast %cst_263 : f32 to vector<2x32xf32>
    %1616 = arith.addf %1615, %1614 : vector<2x32xf32>
    %1617 = arith.divf %1615, %1616 : vector<2x32xf32>
    %1618 = arith.mulf %1609, %1592 : vector<2x32xf32>
    %1619 = arith.mulf %1603, %1611 : vector<2x32xf32>
    %1620 = arith.addf %1618, %1619 : vector<2x32xf32>
    %1621 = math.tanh %1620 : vector<2x32xf32>
    %1622 = arith.mulf %1617, %1621 : vector<2x32xf32>
    %1623 = arith.truncf %1622 : vector<2x32xf32> to vector<2x32xbf16>
    %cst_264 = arith.constant dense<0.000000e+00> : vector<2x128xf32>
    %1624 = tpu.matmul %1623, %1452, %cst_264 {dimension_numbers = #tpu.dot_dimension_numbers<[1], [0], [0], [1], [0, 0, 1, 1], [], []>} : vector<2x32xbf16>, vector<32x128xbf16>, vector<2x128xf32> -> vector<2x128xf32>
    %1625 = arith.addf %1442, %1624 : vector<2x128xf32>
    %1626 = vector.extract_strided_slice %1625 {offsets = [0, 0], sizes = [2, 32], strides = [1, 1]} : vector<2x128xf32> to vector<2x32xf32>
    %1627 = arith.negf %1626 : vector<2x32xf32>
    %1628 = math.exp %1627 : vector<2x32xf32>
    %cst_265 = arith.constant 1.000000e+00 : f32
    %1629 = vector.broadcast %cst_265 : f32 to vector<2x32xf32>
    %1630 = arith.addf %1629, %1628 : vector<2x32xf32>
    %1631 = arith.divf %1629, %1630 : vector<2x32xf32>
    %1632 = vector.extract_strided_slice %1625 {offsets = [0, 32], sizes = [2, 32], strides = [1, 1]} : vector<2x128xf32> to vector<2x32xf32>
    %1633 = arith.negf %1632 : vector<2x32xf32>
    %1634 = math.exp %1633 : vector<2x32xf32>
    %cst_266 = arith.constant 1.000000e+00 : f32
    %1635 = vector.broadcast %cst_266 : f32 to vector<2x32xf32>
    %1636 = arith.addf %1635, %1634 : vector<2x32xf32>
    %1637 = arith.divf %1635, %1636 : vector<2x32xf32>
    %1638 = vector.extract_strided_slice %1625 {offsets = [0, 64], sizes = [2, 32], strides = [1, 1]} : vector<2x128xf32> to vector<2x32xf32>
    %1639 = math.tanh %1638 : vector<2x32xf32>
    %1640 = vector.extract_strided_slice %1625 {offsets = [0, 96], sizes = [2, 32], strides = [1, 1]} : vector<2x128xf32> to vector<2x32xf32>
    %1641 = arith.negf %1640 : vector<2x32xf32>
    %1642 = math.exp %1641 : vector<2x32xf32>
    %cst_267 = arith.constant 1.000000e+00 : f32
    %1643 = vector.broadcast %cst_267 : f32 to vector<2x32xf32>
    %1644 = arith.addf %1643, %1642 : vector<2x32xf32>
    %1645 = arith.divf %1643, %1644 : vector<2x32xf32>
    %1646 = arith.mulf %1637, %1620 : vector<2x32xf32>
    %1647 = arith.mulf %1631, %1639 : vector<2x32xf32>
    %1648 = arith.addf %1646, %1647 : vector<2x32xf32>
    %1649 = math.tanh %1648 : vector<2x32xf32>
    %1650 = arith.mulf %1645, %1649 : vector<2x32xf32>
    %1651 = arith.truncf %1650 : vector<2x32xf32> to vector<2x32xbf16>
    %cst_268 = arith.constant dense<0.000000e+00> : vector<2x128xf32>
    %1652 = tpu.matmul %1651, %1452, %cst_268 {dimension_numbers = #tpu.dot_dimension_numbers<[1], [0], [0], [1], [0, 0, 1, 1], [], []>} : vector<2x32xbf16>, vector<32x128xbf16>, vector<2x128xf32> -> vector<2x128xf32>
    %1653 = arith.addf %1443, %1652 : vector<2x128xf32>
    %1654 = vector.extract_strided_slice %1653 {offsets = [0, 0], sizes = [2, 32], strides = [1, 1]} : vector<2x128xf32> to vector<2x32xf32>
    %1655 = arith.negf %1654 : vector<2x32xf32>
    %1656 = math.exp %1655 : vector<2x32xf32>
    %cst_269 = arith.constant 1.000000e+00 : f32
    %1657 = vector.broadcast %cst_269 : f32 to vector<2x32xf32>
    %1658 = arith.addf %1657, %1656 : vector<2x32xf32>
    %1659 = arith.divf %1657, %1658 : vector<2x32xf32>
    %1660 = vector.extract_strided_slice %1653 {offsets = [0, 32], sizes = [2, 32], strides = [1, 1]} : vector<2x128xf32> to vector<2x32xf32>
    %1661 = arith.negf %1660 : vector<2x32xf32>
    %1662 = math.exp %1661 : vector<2x32xf32>
    %cst_270 = arith.constant 1.000000e+00 : f32
    %1663 = vector.broadcast %cst_270 : f32 to vector<2x32xf32>
    %1664 = arith.addf %1663, %1662 : vector<2x32xf32>
    %1665 = arith.divf %1663, %1664 : vector<2x32xf32>
    %1666 = vector.extract_strided_slice %1653 {offsets = [0, 64], sizes = [2, 32], strides = [1, 1]} : vector<2x128xf32> to vector<2x32xf32>
    %1667 = math.tanh %1666 : vector<2x32xf32>
    %1668 = vector.extract_strided_slice %1653 {offsets = [0, 96], sizes = [2, 32], strides = [1, 1]} : vector<2x128xf32> to vector<2x32xf32>
    %1669 = arith.negf %1668 : vector<2x32xf32>
    %1670 = math.exp %1669 : vector<2x32xf32>
    %cst_271 = arith.constant 1.000000e+00 : f32
    %1671 = vector.broadcast %cst_271 : f32 to vector<2x32xf32>
    %1672 = arith.addf %1671, %1670 : vector<2x32xf32>
    %1673 = arith.divf %1671, %1672 : vector<2x32xf32>
    %1674 = arith.mulf %1665, %1648 : vector<2x32xf32>
    %1675 = arith.mulf %1659, %1667 : vector<2x32xf32>
    %1676 = arith.addf %1674, %1675 : vector<2x32xf32>
    %1677 = math.tanh %1676 : vector<2x32xf32>
    %1678 = arith.mulf %1673, %1677 : vector<2x32xf32>
    %c0_272 = arith.constant 0 : index
    %c0_273 = arith.constant 0 : index
    %1679 = vector.load %arg15[%c0_272, %c0_273] : memref<32x128xbf16, #tpu.memory_space<vmem>>, vector<32x128xbf16>
    %cst_274 = arith.constant 0.000000e+00 : f32
    %1680 = vector.broadcast %cst_274 : f32 to vector<2x32xf32>
    %cst_275 = arith.constant 0.000000e+00 : f32
    %1681 = vector.broadcast %cst_275 : f32 to vector<2x32xf32>
    %1682 = arith.truncf %1680 : vector<2x32xf32> to vector<2x32xbf16>
    %cst_276 = arith.constant dense<0.000000e+00> : vector<2x128xf32>
    %1683 = tpu.matmul %1682, %1679, %cst_276 {dimension_numbers = #tpu.dot_dimension_numbers<[1], [0], [0], [1], [0, 0, 1, 1], [], []>} : vector<2x32xbf16>, vector<32x128xbf16>, vector<2x128xf32> -> vector<2x128xf32>
    %1684 = arith.addf %1451, %1683 : vector<2x128xf32>
    %1685 = vector.extract_strided_slice %1684 {offsets = [0, 0], sizes = [2, 32], strides = [1, 1]} : vector<2x128xf32> to vector<2x32xf32>
    %1686 = arith.negf %1685 : vector<2x32xf32>
    %1687 = math.exp %1686 : vector<2x32xf32>
    %cst_277 = arith.constant 1.000000e+00 : f32
    %1688 = vector.broadcast %cst_277 : f32 to vector<2x32xf32>
    %1689 = arith.addf %1688, %1687 : vector<2x32xf32>
    %1690 = arith.divf %1688, %1689 : vector<2x32xf32>
    %1691 = vector.extract_strided_slice %1684 {offsets = [0, 32], sizes = [2, 32], strides = [1, 1]} : vector<2x128xf32> to vector<2x32xf32>
    %1692 = arith.negf %1691 : vector<2x32xf32>
    %1693 = math.exp %1692 : vector<2x32xf32>
    %cst_278 = arith.constant 1.000000e+00 : f32
    %1694 = vector.broadcast %cst_278 : f32 to vector<2x32xf32>
    %1695 = arith.addf %1694, %1693 : vector<2x32xf32>
    %1696 = arith.divf %1694, %1695 : vector<2x32xf32>
    %1697 = vector.extract_strided_slice %1684 {offsets = [0, 64], sizes = [2, 32], strides = [1, 1]} : vector<2x128xf32> to vector<2x32xf32>
    %1698 = math.tanh %1697 : vector<2x32xf32>
    %1699 = vector.extract_strided_slice %1684 {offsets = [0, 96], sizes = [2, 32], strides = [1, 1]} : vector<2x128xf32> to vector<2x32xf32>
    %1700 = arith.negf %1699 : vector<2x32xf32>
    %1701 = math.exp %1700 : vector<2x32xf32>
    %cst_279 = arith.constant 1.000000e+00 : f32
    %1702 = vector.broadcast %cst_279 : f32 to vector<2x32xf32>
    %1703 = arith.addf %1702, %1701 : vector<2x32xf32>
    %1704 = arith.divf %1702, %1703 : vector<2x32xf32>
    %1705 = arith.mulf %1696, %1681 : vector<2x32xf32>
    %1706 = arith.mulf %1690, %1698 : vector<2x32xf32>
    %1707 = arith.addf %1705, %1706 : vector<2x32xf32>
    %1708 = math.tanh %1707 : vector<2x32xf32>
    %1709 = arith.mulf %1704, %1708 : vector<2x32xf32>
    %1710 = arith.truncf %1709 : vector<2x32xf32> to vector<2x32xbf16>
    %cst_280 = arith.constant dense<0.000000e+00> : vector<2x128xf32>
    %1711 = tpu.matmul %1710, %1679, %cst_280 {dimension_numbers = #tpu.dot_dimension_numbers<[1], [0], [0], [1], [0, 0, 1, 1], [], []>} : vector<2x32xbf16>, vector<32x128xbf16>, vector<2x128xf32> -> vector<2x128xf32>
    %1712 = arith.addf %1450, %1711 : vector<2x128xf32>
    %1713 = vector.extract_strided_slice %1712 {offsets = [0, 0], sizes = [2, 32], strides = [1, 1]} : vector<2x128xf32> to vector<2x32xf32>
    %1714 = arith.negf %1713 : vector<2x32xf32>
    %1715 = math.exp %1714 : vector<2x32xf32>
    %cst_281 = arith.constant 1.000000e+00 : f32
    %1716 = vector.broadcast %cst_281 : f32 to vector<2x32xf32>
    %1717 = arith.addf %1716, %1715 : vector<2x32xf32>
    %1718 = arith.divf %1716, %1717 : vector<2x32xf32>
    %1719 = vector.extract_strided_slice %1712 {offsets = [0, 32], sizes = [2, 32], strides = [1, 1]} : vector<2x128xf32> to vector<2x32xf32>
    %1720 = arith.negf %1719 : vector<2x32xf32>
    %1721 = math.exp %1720 : vector<2x32xf32>
    %cst_282 = arith.constant 1.000000e+00 : f32
    %1722 = vector.broadcast %cst_282 : f32 to vector<2x32xf32>
    %1723 = arith.addf %1722, %1721 : vector<2x32xf32>
    %1724 = arith.divf %1722, %1723 : vector<2x32xf32>
    %1725 = vector.extract_strided_slice %1712 {offsets = [0, 64], sizes = [2, 32], strides = [1, 1]} : vector<2x128xf32> to vector<2x32xf32>
    %1726 = math.tanh %1725 : vector<2x32xf32>
    %1727 = vector.extract_strided_slice %1712 {offsets = [0, 96], sizes = [2, 32], strides = [1, 1]} : vector<2x128xf32> to vector<2x32xf32>
    %1728 = arith.negf %1727 : vector<2x32xf32>
    %1729 = math.exp %1728 : vector<2x32xf32>
    %cst_283 = arith.constant 1.000000e+00 : f32
    %1730 = vector.broadcast %cst_283 : f32 to vector<2x32xf32>
    %1731 = arith.addf %1730, %1729 : vector<2x32xf32>
    %1732 = arith.divf %1730, %1731 : vector<2x32xf32>
    %1733 = arith.mulf %1724, %1707 : vector<2x32xf32>
    %1734 = arith.mulf %1718, %1726 : vector<2x32xf32>
    %1735 = arith.addf %1733, %1734 : vector<2x32xf32>
    %1736 = math.tanh %1735 : vector<2x32xf32>
    %1737 = arith.mulf %1732, %1736 : vector<2x32xf32>
    %1738 = arith.truncf %1737 : vector<2x32xf32> to vector<2x32xbf16>
    %cst_284 = arith.constant dense<0.000000e+00> : vector<2x128xf32>
    %1739 = tpu.matmul %1738, %1679, %cst_284 {dimension_numbers = #tpu.dot_dimension_numbers<[1], [0], [0], [1], [0, 0, 1, 1], [], []>} : vector<2x32xbf16>, vector<32x128xbf16>, vector<2x128xf32> -> vector<2x128xf32>
    %1740 = arith.addf %1449, %1739 : vector<2x128xf32>
    %1741 = vector.extract_strided_slice %1740 {offsets = [0, 0], sizes = [2, 32], strides = [1, 1]} : vector<2x128xf32> to vector<2x32xf32>
    %1742 = arith.negf %1741 : vector<2x32xf32>
    %1743 = math.exp %1742 : vector<2x32xf32>
    %cst_285 = arith.constant 1.000000e+00 : f32
    %1744 = vector.broadcast %cst_285 : f32 to vector<2x32xf32>
    %1745 = arith.addf %1744, %1743 : vector<2x32xf32>
    %1746 = arith.divf %1744, %1745 : vector<2x32xf32>
    %1747 = vector.extract_strided_slice %1740 {offsets = [0, 32], sizes = [2, 32], strides = [1, 1]} : vector<2x128xf32> to vector<2x32xf32>
    %1748 = arith.negf %1747 : vector<2x32xf32>
    %1749 = math.exp %1748 : vector<2x32xf32>
    %cst_286 = arith.constant 1.000000e+00 : f32
    %1750 = vector.broadcast %cst_286 : f32 to vector<2x32xf32>
    %1751 = arith.addf %1750, %1749 : vector<2x32xf32>
    %1752 = arith.divf %1750, %1751 : vector<2x32xf32>
    %1753 = vector.extract_strided_slice %1740 {offsets = [0, 64], sizes = [2, 32], strides = [1, 1]} : vector<2x128xf32> to vector<2x32xf32>
    %1754 = math.tanh %1753 : vector<2x32xf32>
    %1755 = vector.extract_strided_slice %1740 {offsets = [0, 96], sizes = [2, 32], strides = [1, 1]} : vector<2x128xf32> to vector<2x32xf32>
    %1756 = arith.negf %1755 : vector<2x32xf32>
    %1757 = math.exp %1756 : vector<2x32xf32>
    %cst_287 = arith.constant 1.000000e+00 : f32
    %1758 = vector.broadcast %cst_287 : f32 to vector<2x32xf32>
    %1759 = arith.addf %1758, %1757 : vector<2x32xf32>
    %1760 = arith.divf %1758, %1759 : vector<2x32xf32>
    %1761 = arith.mulf %1752, %1735 : vector<2x32xf32>
    %1762 = arith.mulf %1746, %1754 : vector<2x32xf32>
    %1763 = arith.addf %1761, %1762 : vector<2x32xf32>
    %1764 = math.tanh %1763 : vector<2x32xf32>
    %1765 = arith.mulf %1760, %1764 : vector<2x32xf32>
    %1766 = arith.truncf %1765 : vector<2x32xf32> to vector<2x32xbf16>
    %cst_288 = arith.constant dense<0.000000e+00> : vector<2x128xf32>
    %1767 = tpu.matmul %1766, %1679, %cst_288 {dimension_numbers = #tpu.dot_dimension_numbers<[1], [0], [0], [1], [0, 0, 1, 1], [], []>} : vector<2x32xbf16>, vector<32x128xbf16>, vector<2x128xf32> -> vector<2x128xf32>
    %1768 = arith.addf %1448, %1767 : vector<2x128xf32>
    %1769 = vector.extract_strided_slice %1768 {offsets = [0, 0], sizes = [2, 32], strides = [1, 1]} : vector<2x128xf32> to vector<2x32xf32>
    %1770 = arith.negf %1769 : vector<2x32xf32>
    %1771 = math.exp %1770 : vector<2x32xf32>
    %cst_289 = arith.constant 1.000000e+00 : f32
    %1772 = vector.broadcast %cst_289 : f32 to vector<2x32xf32>
    %1773 = arith.addf %1772, %1771 : vector<2x32xf32>
    %1774 = arith.divf %1772, %1773 : vector<2x32xf32>
    %1775 = vector.extract_strided_slice %1768 {offsets = [0, 32], sizes = [2, 32], strides = [1, 1]} : vector<2x128xf32> to vector<2x32xf32>
    %1776 = arith.negf %1775 : vector<2x32xf32>
    %1777 = math.exp %1776 : vector<2x32xf32>
    %cst_290 = arith.constant 1.000000e+00 : f32
    %1778 = vector.broadcast %cst_290 : f32 to vector<2x32xf32>
    %1779 = arith.addf %1778, %1777 : vector<2x32xf32>
    %1780 = arith.divf %1778, %1779 : vector<2x32xf32>
    %1781 = vector.extract_strided_slice %1768 {offsets = [0, 64], sizes = [2, 32], strides = [1, 1]} : vector<2x128xf32> to vector<2x32xf32>
    %1782 = math.tanh %1781 : vector<2x32xf32>
    %1783 = vector.extract_strided_slice %1768 {offsets = [0, 96], sizes = [2, 32], strides = [1, 1]} : vector<2x128xf32> to vector<2x32xf32>
    %1784 = arith.negf %1783 : vector<2x32xf32>
    %1785 = math.exp %1784 : vector<2x32xf32>
    %cst_291 = arith.constant 1.000000e+00 : f32
    %1786 = vector.broadcast %cst_291 : f32 to vector<2x32xf32>
    %1787 = arith.addf %1786, %1785 : vector<2x32xf32>
    %1788 = arith.divf %1786, %1787 : vector<2x32xf32>
    %1789 = arith.mulf %1780, %1763 : vector<2x32xf32>
    %1790 = arith.mulf %1774, %1782 : vector<2x32xf32>
    %1791 = arith.addf %1789, %1790 : vector<2x32xf32>
    %1792 = math.tanh %1791 : vector<2x32xf32>
    %1793 = arith.mulf %1788, %1792 : vector<2x32xf32>
    %1794 = arith.truncf %1793 : vector<2x32xf32> to vector<2x32xbf16>
    %cst_292 = arith.constant dense<0.000000e+00> : vector<2x128xf32>
    %1795 = tpu.matmul %1794, %1679, %cst_292 {dimension_numbers = #tpu.dot_dimension_numbers<[1], [0], [0], [1], [0, 0, 1, 1], [], []>} : vector<2x32xbf16>, vector<32x128xbf16>, vector<2x128xf32> -> vector<2x128xf32>
    %1796 = arith.addf %1447, %1795 : vector<2x128xf32>
    %1797 = vector.extract_strided_slice %1796 {offsets = [0, 0], sizes = [2, 32], strides = [1, 1]} : vector<2x128xf32> to vector<2x32xf32>
    %1798 = arith.negf %1797 : vector<2x32xf32>
    %1799 = math.exp %1798 : vector<2x32xf32>
    %cst_293 = arith.constant 1.000000e+00 : f32
    %1800 = vector.broadcast %cst_293 : f32 to vector<2x32xf32>
    %1801 = arith.addf %1800, %1799 : vector<2x32xf32>
    %1802 = arith.divf %1800, %1801 : vector<2x32xf32>
    %1803 = vector.extract_strided_slice %1796 {offsets = [0, 32], sizes = [2, 32], strides = [1, 1]} : vector<2x128xf32> to vector<2x32xf32>
    %1804 = arith.negf %1803 : vector<2x32xf32>
    %1805 = math.exp %1804 : vector<2x32xf32>
    %cst_294 = arith.constant 1.000000e+00 : f32
    %1806 = vector.broadcast %cst_294 : f32 to vector<2x32xf32>
    %1807 = arith.addf %1806, %1805 : vector<2x32xf32>
    %1808 = arith.divf %1806, %1807 : vector<2x32xf32>
    %1809 = vector.extract_strided_slice %1796 {offsets = [0, 64], sizes = [2, 32], strides = [1, 1]} : vector<2x128xf32> to vector<2x32xf32>
    %1810 = math.tanh %1809 : vector<2x32xf32>
    %1811 = vector.extract_strided_slice %1796 {offsets = [0, 96], sizes = [2, 32], strides = [1, 1]} : vector<2x128xf32> to vector<2x32xf32>
    %1812 = arith.negf %1811 : vector<2x32xf32>
    %1813 = math.exp %1812 : vector<2x32xf32>
    %cst_295 = arith.constant 1.000000e+00 : f32
    %1814 = vector.broadcast %cst_295 : f32 to vector<2x32xf32>
    %1815 = arith.addf %1814, %1813 : vector<2x32xf32>
    %1816 = arith.divf %1814, %1815 : vector<2x32xf32>
    %1817 = arith.mulf %1808, %1791 : vector<2x32xf32>
    %1818 = arith.mulf %1802, %1810 : vector<2x32xf32>
    %1819 = arith.addf %1817, %1818 : vector<2x32xf32>
    %1820 = math.tanh %1819 : vector<2x32xf32>
    %1821 = arith.mulf %1816, %1820 : vector<2x32xf32>
    %1822 = arith.truncf %1821 : vector<2x32xf32> to vector<2x32xbf16>
    %cst_296 = arith.constant dense<0.000000e+00> : vector<2x128xf32>
    %1823 = tpu.matmul %1822, %1679, %cst_296 {dimension_numbers = #tpu.dot_dimension_numbers<[1], [0], [0], [1], [0, 0, 1, 1], [], []>} : vector<2x32xbf16>, vector<32x128xbf16>, vector<2x128xf32> -> vector<2x128xf32>
    %1824 = arith.addf %1446, %1823 : vector<2x128xf32>
    %1825 = vector.extract_strided_slice %1824 {offsets = [0, 0], sizes = [2, 32], strides = [1, 1]} : vector<2x128xf32> to vector<2x32xf32>
    %1826 = arith.negf %1825 : vector<2x32xf32>
    %1827 = math.exp %1826 : vector<2x32xf32>
    %cst_297 = arith.constant 1.000000e+00 : f32
    %1828 = vector.broadcast %cst_297 : f32 to vector<2x32xf32>
    %1829 = arith.addf %1828, %1827 : vector<2x32xf32>
    %1830 = arith.divf %1828, %1829 : vector<2x32xf32>
    %1831 = vector.extract_strided_slice %1824 {offsets = [0, 32], sizes = [2, 32], strides = [1, 1]} : vector<2x128xf32> to vector<2x32xf32>
    %1832 = arith.negf %1831 : vector<2x32xf32>
    %1833 = math.exp %1832 : vector<2x32xf32>
    %cst_298 = arith.constant 1.000000e+00 : f32
    %1834 = vector.broadcast %cst_298 : f32 to vector<2x32xf32>
    %1835 = arith.addf %1834, %1833 : vector<2x32xf32>
    %1836 = arith.divf %1834, %1835 : vector<2x32xf32>
    %1837 = vector.extract_strided_slice %1824 {offsets = [0, 64], sizes = [2, 32], strides = [1, 1]} : vector<2x128xf32> to vector<2x32xf32>
    %1838 = math.tanh %1837 : vector<2x32xf32>
    %1839 = vector.extract_strided_slice %1824 {offsets = [0, 96], sizes = [2, 32], strides = [1, 1]} : vector<2x128xf32> to vector<2x32xf32>
    %1840 = arith.negf %1839 : vector<2x32xf32>
    %1841 = math.exp %1840 : vector<2x32xf32>
    %cst_299 = arith.constant 1.000000e+00 : f32
    %1842 = vector.broadcast %cst_299 : f32 to vector<2x32xf32>
    %1843 = arith.addf %1842, %1841 : vector<2x32xf32>
    %1844 = arith.divf %1842, %1843 : vector<2x32xf32>
    %1845 = arith.mulf %1836, %1819 : vector<2x32xf32>
    %1846 = arith.mulf %1830, %1838 : vector<2x32xf32>
    %1847 = arith.addf %1845, %1846 : vector<2x32xf32>
    %1848 = math.tanh %1847 : vector<2x32xf32>
    %1849 = arith.mulf %1844, %1848 : vector<2x32xf32>
    %1850 = arith.truncf %1849 : vector<2x32xf32> to vector<2x32xbf16>
    %cst_300 = arith.constant dense<0.000000e+00> : vector<2x128xf32>
    %1851 = tpu.matmul %1850, %1679, %cst_300 {dimension_numbers = #tpu.dot_dimension_numbers<[1], [0], [0], [1], [0, 0, 1, 1], [], []>} : vector<2x32xbf16>, vector<32x128xbf16>, vector<2x128xf32> -> vector<2x128xf32>
    %1852 = arith.addf %1445, %1851 : vector<2x128xf32>
    %1853 = vector.extract_strided_slice %1852 {offsets = [0, 0], sizes = [2, 32], strides = [1, 1]} : vector<2x128xf32> to vector<2x32xf32>
    %1854 = arith.negf %1853 : vector<2x32xf32>
    %1855 = math.exp %1854 : vector<2x32xf32>
    %cst_301 = arith.constant 1.000000e+00 : f32
    %1856 = vector.broadcast %cst_301 : f32 to vector<2x32xf32>
    %1857 = arith.addf %1856, %1855 : vector<2x32xf32>
    %1858 = arith.divf %1856, %1857 : vector<2x32xf32>
    %1859 = vector.extract_strided_slice %1852 {offsets = [0, 32], sizes = [2, 32], strides = [1, 1]} : vector<2x128xf32> to vector<2x32xf32>
    %1860 = arith.negf %1859 : vector<2x32xf32>
    %1861 = math.exp %1860 : vector<2x32xf32>
    %cst_302 = arith.constant 1.000000e+00 : f32
    %1862 = vector.broadcast %cst_302 : f32 to vector<2x32xf32>
    %1863 = arith.addf %1862, %1861 : vector<2x32xf32>
    %1864 = arith.divf %1862, %1863 : vector<2x32xf32>
    %1865 = vector.extract_strided_slice %1852 {offsets = [0, 64], sizes = [2, 32], strides = [1, 1]} : vector<2x128xf32> to vector<2x32xf32>
    %1866 = math.tanh %1865 : vector<2x32xf32>
    %1867 = vector.extract_strided_slice %1852 {offsets = [0, 96], sizes = [2, 32], strides = [1, 1]} : vector<2x128xf32> to vector<2x32xf32>
    %1868 = arith.negf %1867 : vector<2x32xf32>
    %1869 = math.exp %1868 : vector<2x32xf32>
    %cst_303 = arith.constant 1.000000e+00 : f32
    %1870 = vector.broadcast %cst_303 : f32 to vector<2x32xf32>
    %1871 = arith.addf %1870, %1869 : vector<2x32xf32>
    %1872 = arith.divf %1870, %1871 : vector<2x32xf32>
    %1873 = arith.mulf %1864, %1847 : vector<2x32xf32>
    %1874 = arith.mulf %1858, %1866 : vector<2x32xf32>
    %1875 = arith.addf %1873, %1874 : vector<2x32xf32>
    %1876 = math.tanh %1875 : vector<2x32xf32>
    %1877 = arith.mulf %1872, %1876 : vector<2x32xf32>
    %1878 = arith.truncf %1877 : vector<2x32xf32> to vector<2x32xbf16>
    %cst_304 = arith.constant dense<0.000000e+00> : vector<2x128xf32>
    %1879 = tpu.matmul %1878, %1679, %cst_304 {dimension_numbers = #tpu.dot_dimension_numbers<[1], [0], [0], [1], [0, 0, 1, 1], [], []>} : vector<2x32xbf16>, vector<32x128xbf16>, vector<2x128xf32> -> vector<2x128xf32>
    %1880 = arith.addf %1444, %1879 : vector<2x128xf32>
    %1881 = vector.extract_strided_slice %1880 {offsets = [0, 0], sizes = [2, 32], strides = [1, 1]} : vector<2x128xf32> to vector<2x32xf32>
    %1882 = arith.negf %1881 : vector<2x32xf32>
    %1883 = math.exp %1882 : vector<2x32xf32>
    %cst_305 = arith.constant 1.000000e+00 : f32
    %1884 = vector.broadcast %cst_305 : f32 to vector<2x32xf32>
    %1885 = arith.addf %1884, %1883 : vector<2x32xf32>
    %1886 = arith.divf %1884, %1885 : vector<2x32xf32>
    %1887 = vector.extract_strided_slice %1880 {offsets = [0, 32], sizes = [2, 32], strides = [1, 1]} : vector<2x128xf32> to vector<2x32xf32>
    %1888 = arith.negf %1887 : vector<2x32xf32>
    %1889 = math.exp %1888 : vector<2x32xf32>
    %cst_306 = arith.constant 1.000000e+00 : f32
    %1890 = vector.broadcast %cst_306 : f32 to vector<2x32xf32>
    %1891 = arith.addf %1890, %1889 : vector<2x32xf32>
    %1892 = arith.divf %1890, %1891 : vector<2x32xf32>
    %1893 = vector.extract_strided_slice %1880 {offsets = [0, 64], sizes = [2, 32], strides = [1, 1]} : vector<2x128xf32> to vector<2x32xf32>
    %1894 = math.tanh %1893 : vector<2x32xf32>
    %1895 = vector.extract_strided_slice %1880 {offsets = [0, 96], sizes = [2, 32], strides = [1, 1]} : vector<2x128xf32> to vector<2x32xf32>
    %1896 = arith.negf %1895 : vector<2x32xf32>
    %1897 = math.exp %1896 : vector<2x32xf32>
    %cst_307 = arith.constant 1.000000e+00 : f32
    %1898 = vector.broadcast %cst_307 : f32 to vector<2x32xf32>
    %1899 = arith.addf %1898, %1897 : vector<2x32xf32>
    %1900 = arith.divf %1898, %1899 : vector<2x32xf32>
    %1901 = arith.mulf %1892, %1875 : vector<2x32xf32>
    %1902 = arith.mulf %1886, %1894 : vector<2x32xf32>
    %1903 = arith.addf %1901, %1902 : vector<2x32xf32>
    %1904 = math.tanh %1903 : vector<2x32xf32>
    %1905 = arith.mulf %1900, %1904 : vector<2x32xf32>
    %1906 = tpu.concatenate %1482, %1905 in 1 : vector<2x32xf32>, vector<2x32xf32> -> vector<2x64xf32>
    %1907 = tpu.concatenate %1510, %1877 in 1 : vector<2x32xf32>, vector<2x32xf32> -> vector<2x64xf32>
    %1908 = tpu.concatenate %1538, %1849 in 1 : vector<2x32xf32>, vector<2x32xf32> -> vector<2x64xf32>
    %1909 = tpu.concatenate %1566, %1821 in 1 : vector<2x32xf32>, vector<2x32xf32> -> vector<2x64xf32>
    %1910 = tpu.concatenate %1594, %1793 in 1 : vector<2x32xf32>, vector<2x32xf32> -> vector<2x64xf32>
    %1911 = tpu.concatenate %1622, %1765 in 1 : vector<2x32xf32>, vector<2x32xf32> -> vector<2x64xf32>
    %1912 = tpu.concatenate %1650, %1737 in 1 : vector<2x32xf32>, vector<2x32xf32> -> vector<2x64xf32>
    %1913 = tpu.concatenate %1678, %1709 in 1 : vector<2x32xf32>, vector<2x32xf32> -> vector<2x64xf32>
    %1914 = tpu.concatenate %1906, %1907, %1908, %1909, %1910, %1911, %1912, %1913 in 0 : vector<2x64xf32>, vector<2x64xf32>, vector<2x64xf32>, vector<2x64xf32>, vector<2x64xf32>, vector<2x64xf32>, vector<2x64xf32>, vector<2x64xf32> -> vector<16x64xf32>
    %c0_308 = arith.constant 0 : index
    %c0_309 = arith.constant 0 : index
    %1915 = vector.load %arg17[%c0_308, %c0_309] : memref<64x1xf32, #tpu.memory_space<vmem>>, vector<64x1xf32>
    %cst_310 = arith.constant dense<0.000000e+00> : vector<16x1xf32>
    %1916 = tpu.matmul %1914, %1915, %cst_310 {dimension_numbers = #tpu.dot_dimension_numbers<[1], [0], [0], [1], [0, 0, 1, 1], [], []>} : vector<16x64xf32>, vector<64x1xf32>, vector<16x1xf32> -> vector<16x1xf32>
    %c0_311 = arith.constant 0 : index
    %c0_312 = arith.constant 0 : index
    %1917 = vector.load %arg18[%c0_311, %c0_312] : memref<1x1xf32, #tpu.memory_space<vmem>>, vector<1x1xf32>
    %1918 = vector.broadcast %1917 : vector<1x1xf32> to vector<16x1xf32>
    %1919 = arith.addf %1916, %1918 : vector<16x1xf32>
    %c0_313 = arith.constant 0 : index
    %c0_314 = arith.constant 0 : index
    %1920 = vector.load %arg19[%c0_313, %c0_314] : memref<16x1xf32, #tpu.memory_space<vmem>>, vector<16x1xf32>
    tpu.vector_store %arg19[%c0_313, %c0_314], %1919 {strides = array<i32>} : memref<16x1xf32, #tpu.memory_space<vmem>>, vector<16x1xf32>,
    return
  }
}

</mosaic_0001>

<bundles_post_ra>
// kernel: _lambda_.1
= control target key start
LH: loop header
LB: loop body
LE: loop exit
PB: predicated region body
PF: predicated region fallthrough
CT: control target
= control target key end

     0   :  { %s9281_s0 = inlined_call_operand.vmem [shape: f32[16,1], index: 0, kind: input, shape index: {}]   ;;  %s9282_s1 = inlined_call_operand.vmem [shape: f32[1,256], index: 1, kind: input, shape index: {}]   ;;  %s9283_s2 = inlined_call_operand.hbm [shape: bf16[32,128], index: 2, kind: input, shape index: {}]   ;;  %s9284_s3 = inlined_call_operand.hbm [shape: bf16[32,128], index: 3, kind: input, shape index: {}]   ;;  %s9285_s4 = inlined_call_operand.hbm [shape: f32[1,256], index: 4, kind: input, shape index: {}]   ;;  %s9286_s5 = inlined_call_operand.vmem [shape: f32[64,256], index: 5, kind: input, shape index: {}]   ;;  %s9287_s6 = inlined_call_operand.hbm [shape: bf16[32,128], index: 6, kind: input, shape index: {}]   ;;  %s9288_s7 = inlined_call_operand.hbm [shape: bf16[32,128], index: 7, kind: input, shape index: {}]   ;;  %s9289_s8 = inlined_call_operand.hbm [shape: f32[1,256], index: 8, kind: input, shape index: {}]   ;;  %s9290_s9 = inlined_call_operand.hbm [shape: f32[64,256], index: 9, kind: input, shape index: {}]   ;;  %s9291_s10 = inlined_call_operand.hbm [shape: bf16[32,128], index: 10, kind: input, shape index: {}]   ;;  %s9292_s11 = inlined_call_operand.hbm [shape: bf16[32,128], index: 11, kind: input, shape index: {}]   ;;  %s9293_s12 = inlined_call_operand.hbm [shape: f32[1,256], index: 12, kind: input, shape index: {}]   ;;  %s9294_s13 = inlined_call_operand.hbm [shape: f32[64,256], index: 13, kind: input, shape index: {}]   ;;  %s9295_s14 = inlined_call_operand.hbm [shape: bf16[32,128], index: 14, kind: input, shape index: {}]   ;;  %s9296_s15 = inlined_call_operand.hbm [shape: bf16[32,128], index: 15, kind: input, shape index: {}]   ;;  %s9297_s16 = inlined_call_operand.hbm [shape: f32[1,256], index: 16, kind: input, shape index: {}]   ;;  %s9298_s17 = inlined_call_operand.vmem [shape: f32[64,1], index: 17, kind: input, shape index: {}]   ;;  %s9299_s18 = inlined_call_operand.<no memory space> [shape: f32[1,1], index: 18, kind: input, shape index: {}]   ;;  %s9300_s19 = inlined_call_operand.vmem [shape: f32[16,1], index: 19, kind: output, shape index: {}]  }
   0x1   :  { %9302 = sst [smem:[#allocation33_spill]] %s9281_s0  ;;  %v24_v0 = vstv %s9299_s18 }
   0x2   :  { %9303 = sst [smem:[#allocation34_spill]] %s9282_s1  ;;  %25 = vst [vmem:[#allocation2] sm:$0x1] %v24_v0 }
   0x3   :  { %9304 = sst [smem:[#allocation35_spill]] %s9283_s2 }
   0x4   :  { %9305 = sst [smem:[#allocation36_spill]] %s9284_s3 }
   0x5   :  { %26 = vsyncpa [#allocation4], 0 }
   0x6   :  { %27 = vsyncpa [#allocation6], 0 }
   0x7   :  { %28 = vsyncpa [#allocation9], 0 }
   0x8   :  { %29 = vsyncpa [#allocation12], 0 }
   0x9   :  { %30 = vsyncpa [#allocation15], 0 }
   0xa   :  { %31 = vsyncpa [#allocation18], 0 }
   0xb   :  { %32 = vsyncpa [#allocation21], 0 }
   0xc   :  { %33 = vsyncpa [#allocation24], 0  ;;  %s7739_s20 = smov [#allocation5]   ;;  %s7740_s1 = smov [#allocation8]  }
   0xd   :  { %s55_s21 = sshll.u32 %s7739_s20, 4  ;;  %s79_s22 = sshll.u32 %s7740_s1, 4  ;;  %s56_s21 = int_to_ptr.vmem [resolvable:$true] %s55_s21  ;;  %s80_s22 = int_to_ptr.vmem [resolvable:$true] %s79_s22 }
   0xe   :  { %s7451_s2 = scalar_lea.vmem %s56_s21, 256  ;;  %p7456_p1 = scmp.lt.s32.totalorder %s56_s21, %s56_s21 }
   0xf   :  { %p7452_p0 = scmp.ne.s32.totalorder %s56_s21, %s7451_s2  ;;  %p7457_p2 = scmp.lt.s32.totalorder %s7451_s2, %s7451_s2 }
  0x11   :  { %p7458_p3 = por %p7457_p2, %p7456_p1 }
  0x13   :  { %p7459_p4 = pnand %p7458_p3, %p7452_p0 }
  0x15   :  { %7462 = shalt.err (!%p7459_p4)
}
  0x16   :  { %s7741_s18 = smov 64   ;;  %s7742_s23 = smov 4  }
  0x17   :  { %s9306_s3 = sld [smem:[#allocation36_spill]]  ;;  %s7471_s26 = scalar_lea.vmem %s80_s22, 256 }
  0x18   :  { %p7472_p5 = scmp.ne.s32.totalorder %s80_s22, %s7471_s26  ;;  %p7476_p6 = scmp.lt.s32.totalorder %s80_s22, %s80_s22 }
  0x19   :  { %p7477_p7 = scmp.lt.s32.totalorder %s7471_s26, %s7471_s26 }
  0x1b   :  { %p7478_p8 = por %p7477_p7, %p7476_p6 }
  0x1d   :  { %61 = dma.hbm_to_vmem [thread:$0]  %s9306_s3, 256, %s56_s21, [#allocation6], %s7741_s18, %s7741_s18, %s7742_s23  }
  0x1e   :  { %p7479_p9 = pnand %p7478_p8, %p7472_p5 }
  0x20   :  { %7482 = shalt.err (!%p7479_p9)
}
  0x21   :  { %85 = dma.hbm_to_vmem [thread:$0]  %s9287_s6, 256, %s80_s22, [#allocation9], %s7741_s18, %s7741_s18, %s7742_s23  }
  0x22   :  { %s7743_s29 = smov [#allocation11]   ;;  %s7744_s30 = smov [#allocation14]  }
  0x23   :  { %s104_s0 = sshll.u32 %s7743_s29, 4  ;;  %s125_s20 = sshll.u32 %s7744_s30, 4  ;;  %s105_s0 = int_to_ptr.vmem [resolvable:$true] %s104_s0  ;;  %s126_s20 = int_to_ptr.vmem [resolvable:$true] %s125_s20 }
  0x24   :  { %s7491_s21 = scalar_lea.vmem %s105_s0, 32  ;;  %p7496_p11 = scmp.lt.s32.totalorder %s105_s0, %s105_s0 }
  0x25   :  { %p7492_p10 = scmp.ne.s32.totalorder %s105_s0, %s7491_s21  ;;  %p7497_p12 = scmp.lt.s32.totalorder %s7491_s21, %s7491_s21 }
  0x27   :  { %p7498_p13 = por %p7497_p12, %p7496_p11 }
  0x29   :  { %p7499_p0 = pnand %p7498_p13, %p7492_p10 }
  0x2b   :  { %7502 = shalt.err (!%p7499_p0)
}
  0x2c   :  { %107 = dma.hbm_to_vmem [thread:$0]  %s9289_s8, 32, %s105_s0, [#allocation12]  }
  0x2d   :  { %s7511_s24 = scalar_lea.vmem %s126_s20, 256  ;;  %p7516_p2 = scmp.lt.s32.totalorder %s126_s20, %s126_s20 }
  0x2e   :  { %p7512_p1 = scmp.ne.s32.totalorder %s126_s20, %s7511_s24  ;;  %p7517_p3 = scmp.lt.s32.totalorder %s7511_s24, %s7511_s24 }
  0x30   :  { %p7518_p4 = por %p7517_p3, %p7516_p2 }
  0x32   :  { %p7519_p5 = pnand %p7518_p4, %p7512_p1 }
  0x34   :  { %7522 = shalt.err (!%p7519_p5)
}
  0x35   :  { %131 = dma.hbm_to_vmem [thread:$0]  %s9291_s10, 256, %s126_s20, [#allocation15], %s7741_s18, %s7741_s18, %s7742_s23  }
  0x36   :  { %s7745_s25 = smov [#allocation17]   ;;  %s7746_s26 = smov [#allocation20]  }
  0x37   :  { %s150_s3 = sshll.u32 %s7745_s25, 4  ;;  %s171_s27 = sshll.u32 %s7746_s26, 4  ;;  %s151_s3 = int_to_ptr.vmem [resolvable:$true] %s150_s3  ;;  %s172_s27 = int_to_ptr.vmem [resolvable:$true] %s171_s27 }
  0x38   :  { %s7531_s8 = scalar_lea.vmem %s151_s3, 32  ;;  %p7536_p7 = scmp.lt.s32.totalorder %s151_s3, %s151_s3 }
  0x39   :  { %p7532_p6 = scmp.ne.s32.totalorder %s151_s3, %s7531_s8  ;;  %p7537_p8 = scmp.lt.s32.totalorder %s7531_s8, %s7531_s8 }
  0x3b   :  { %p7538_p9 = por %p7537_p8, %p7536_p7 }
  0x3d   :  { %p7539_p10 = pnand %p7538_p9, %p7532_p6 }
  0x3f   :  { %7542 = shalt.err (!%p7539_p10)
}
  0x40   :  { %153 = dma.hbm_to_vmem [thread:$0]  %s9293_s12, 32, %s151_s3, [#allocation18]  }
  0x41   :  { %s7551_s0 = scalar_lea.vmem %s172_s27, 256  ;;  %p7556_p12 = scmp.lt.s32.totalorder %s172_s27, %s172_s27 }
  0x42   :  { %p7552_p11 = scmp.ne.s32.totalorder %s172_s27, %s7551_s0  ;;  %p7557_p13 = scmp.lt.s32.totalorder %s7551_s0, %s7551_s0 }
  0x44   :  { %p7558_p0 = por %p7557_p13, %p7556_p12 }
  0x46   :  { %p7559_p1 = pnand %p7558_p0, %p7552_p11 }
  0x48   :  { %7562 = shalt.err (!%p7559_p1)
}
  0x49   :  { %177 = dma.hbm_to_vmem [thread:$0]  %s9295_s14, 256, %s172_s27, [#allocation21], %s7741_s18, %s7741_s18, %s7742_s23  }
  0x4a   :  { %s7747_s20 = smov [#allocation3]   ;;  %s7748_s1 = smov [#allocation7]  }
  0x4b   :  { %s43_s21 = sshll.u32 %s7747_s20, 4  ;;  %s68_s2 = sshll.u32 %s7748_s1, 4  ;;  %s44_s21 = int_to_ptr.vmem [resolvable:$true] %s43_s21  ;;  %s69_s2 = int_to_ptr.vmem [resolvable:$true] %s68_s2 }
  0x4c   :  { %s7571_s12 = scalar_lea.vmem %s44_s21, 256  ;;  %p7576_p3 = scmp.lt.s32.totalorder %s44_s21, %s44_s21 }
  0x4d   :  { %p7572_p2 = scmp.ne.s32.totalorder %s44_s21, %s7571_s12  ;;  %p7577_p4 = scmp.lt.s32.totalorder %s7571_s12, %s7571_s12 }
  0x4f   :  { %p7578_p5 = por %p7577_p4, %p7576_p3 }
  0x51   :  { %p7579_p6 = pnand %p7578_p5, %p7572_p2 }
  0x53   :  { %7582 = shalt.err (!%p7579_p6)
}
  0x54   :  { %s9307_s22 = sld [smem:[#allocation35_spill]]  ;;  %s7591_s14 = scalar_lea.vmem %s69_s2, 32 }
  0x55   :  { %p7592_p7 = scmp.ne.s32.totalorder %s69_s2, %s7591_s14  ;;  %p7596_p8 = scmp.lt.s32.totalorder %s69_s2, %s69_s2 }
  0x56   :  { %p7597_p9 = scmp.lt.s32.totalorder %s7591_s14, %s7591_s14 }
  0x58   :  { %p7598_p10 = por %p7597_p9, %p7596_p8 }
  0x5a   :  { %49 = dma.hbm_to_vmem [thread:$0]  %s9307_s22, 256, %s44_s21, [#allocation4], %s7741_s18, %s7741_s18, %s7742_s23  }
  0x5b   :  { %p7599_p11 = pnand %p7598_p10, %p7592_p7 }
  0x5d   :  { %7602 = shalt.err (!%p7599_p11)
}
  0x5e   :  { %71 = dma.hbm_to_vmem [thread:$0]  %s9285_s4, 32, %s69_s2, [#allocation6]  }
  0x5f   :  { %s7749_s26 = smov [#allocation10]   ;;  %s7750_s8 = smov [#allocation13]  }
  0x60   :  { %s91_s27 = sshll.u32 %s7749_s26, 4  ;;  %s113_s28 = sshll.u32 %s7750_s8, 4  ;;  %s92_s27 = int_to_ptr.vmem [resolvable:$true] %s91_s27  ;;  %s114_s28 = int_to_ptr.vmem [resolvable:$true] %s113_s28 }
  0x61   :  { %s7611_s29 = scalar_lea.vmem %s92_s27, 256  ;;  %p7616_p13 = scmp.lt.s32.totalorder %s92_s27, %s92_s27 }
  0x62   :  { %p7612_p12 = scmp.ne.s32.totalorder %s92_s27, %s7611_s29  ;;  %p7617_p0 = scmp.lt.s32.totalorder %s7611_s29, %s7611_s29 }
  0x64   :  { %p7618_p1 = por %p7617_p0, %p7616_p13 }
  0x66   :  { %p7619_p2 = pnand %p7618_p1, %p7612_p12 }
  0x68   :  { %7622 = shalt.err (!%p7619_p2)
}
  0x69   :  { %97 = dma.hbm_to_vmem [thread:$0]  %s9288_s7, 256, %s92_s27, [#allocation9], %s7741_s18, %s7741_s18, %s7742_s23  }
  0x6a   :  { %s7631_s4 = scalar_lea.vmem %s114_s28, 2048  ;;  %p7636_p4 = scmp.lt.s32.totalorder %s114_s28, %s114_s28 }
  0x6b   :  { %p7632_p3 = scmp.ne.s32.totalorder %s114_s28, %s7631_s4  ;;  %p7637_p5 = scmp.lt.s32.totalorder %s7631_s4, %s7631_s4 }
  0x6d   :  { %p7638_p6 = por %p7637_p5, %p7636_p4 }
  0x6f   :  { %p7639_p7 = pnand %p7638_p6, %p7632_p3 }
  0x71   :  { %7642 = shalt.err (!%p7639_p7)
}
  0x72   :  { %s7751_s30 = smov 256   ;;  %s7752_s20 = smov 16  }
  0x73   :  { %119 = dma.hbm_to_vmem [thread:$0]  %s9290_s9, 2048, %s114_s28, [#allocation12], %s7751_s30, %s7751_s30, %s7752_s20  }
  0x74   :  { %s7753_s2 = smov [#allocation16]   ;;  %s7754_s24 = smov [#allocation19]  }
  0x75   :  { %s137_s12 = sshll.u32 %s7753_s2, 4  ;;  %s159_s6 = sshll.u32 %s7754_s24, 4  ;;  %s138_s12 = int_to_ptr.vmem [resolvable:$true] %s137_s12  ;;  %s160_s6 = int_to_ptr.vmem [resolvable:$true] %s159_s6 }
  0x76   :  { %s7651_s7 = scalar_lea.vmem %s138_s12, 256  ;;  %p7656_p9 = scmp.lt.s32.totalorder %s138_s12, %s138_s12 }
  0x77   :  { %p7652_p8 = scmp.ne.s32.totalorder %s138_s12, %s7651_s7  ;;  %p7657_p10 = scmp.lt.s32.totalorder %s7651_s7, %s7651_s7 }
  0x79   :  { %p7658_p11 = por %p7657_p10, %p7656_p9 }
  0x7b   :  { %p7659_p12 = pnand %p7658_p11, %p7652_p8 }
  0x7d   :  { %7662 = shalt.err (!%p7659_p12)
}
  0x7e   :  { %143 = dma.hbm_to_vmem [thread:$0]  %s9292_s11, 256, %s138_s12, [#allocation15], %s7741_s18, %s7741_s18, %s7742_s23  }
  0x7f   :  { %s7671_s9 = scalar_lea.vmem %s160_s6, 2048  ;;  %p7676_p0 = scmp.lt.s32.totalorder %s160_s6, %s160_s6 }
  0x80   :  { %p7672_p13 = scmp.ne.s32.totalorder %s160_s6, %s7671_s9  ;;  %p7677_p1 = scmp.lt.s32.totalorder %s7671_s9, %s7671_s9 }
  0x82   :  { %p7678_p2 = por %p7677_p1, %p7676_p0 }
  0x84   :  { %p7679_p3 = pnand %p7678_p2, %p7672_p13 }
  0x86   :  { %7682 = shalt.err (!%p7679_p3)
}
  0x87   :  { %165 = dma.hbm_to_vmem [thread:$0]  %s9294_s13, 2048, %s160_s6, [#allocation18], %s7751_s30, %s7751_s30, %s7752_s20  }
  0x88   :  { %s7755_s26 = smov [#allocation22]   ;;  %s7756_s8 = smov [#allocation23]  }
  0x89   :  { %s183_s27 = sshll.u32 %s7755_s26, 4  ;;  %s196_s28 = sshll.u32 %s7756_s8, 4  ;;  %s184_s27 = int_to_ptr.vmem [resolvable:$true] %s183_s27  ;;  %s197_s28 = int_to_ptr.vmem [resolvable:$true] %s196_s28 }
  0x8a   :  { %s7691_s29 = scalar_lea.vmem %s184_s27, 256  ;;  %p7696_p5 = scmp.lt.s32.totalorder %s184_s27, %s184_s27 }
  0x8b   :  { %p7692_p4 = scmp.ne.s32.totalorder %s184_s27, %s7691_s29  ;;  %p7697_p6 = scmp.lt.s32.totalorder %s7691_s29, %s7691_s29 }
  0x8d   :  { %p7698_p7 = por %p7697_p6, %p7696_p5 }
  0x8f   :  { %p7699_p8 = pnand %p7698_p7, %p7692_p4 }
  0x91   :  { %7702 = shalt.err (!%p7699_p8)
}
  0x92   :  { %189 = dma.hbm_to_vmem [thread:$0]  %s9296_s15, 256, %s184_s27, [#allocation21], %s7741_s18, %s7741_s18, %s7742_s23  }
  0x93   :  { %s7711_s13 = scalar_lea.vmem %s197_s28, 32  ;;  %p7716_p10 = scmp.lt.s32.totalorder %s197_s28, %s197_s28 }
  0x94   :  { %p7712_p9 = scmp.ne.s32.totalorder %s197_s28, %s7711_s13  ;;  %p7717_p11 = scmp.lt.s32.totalorder %s7711_s13, %s7711_s13 }
  0x96   :  { %p7718_p12 = por %p7717_p11, %p7716_p10 }
  0x98   :  { %p7719_p13 = pnand %p7718_p12, %p7712_p9 }
  0x9a   :  { %7722 = shalt.err (!%p7719_p13)
}
  0x9b   :  { %199 = dma.hbm_to_vmem [thread:$0]  %s9297_s16, 32, %s197_s28, [#allocation24]  }
  0x9c   :  { %7723 = dma.done.wait [#allocation4], 256  }
  0x9d   :  { %7724 = vsyncadd [#allocation4], 4294967040 }
  0x9e   :  { %7725 = dma.done.wait [#allocation6], 288  }
  0x9f   :  { %7726 = vsyncadd [#allocation6], 4294967008 }
  0xa0   :  { %7727 = dma.done.wait [#allocation9], 512  }
  0xa1   :  { %7728 = vsyncadd [#allocation9], 4294966784 }
  0xa2   :  { %7729 = dma.done.wait [#allocation12], 2080  }
  0xa3   :  { %7730 = vsyncadd [#allocation12], 4294965216 }
  0xa4   :  { %7731 = dma.done.wait [#allocation15], 512  }
  0xa5   :  { %7732 = vsyncadd [#allocation15], 4294966784 }
  0xa6   :  { %7733 = dma.done.wait [#allocation18], 2080  }
  0xa7   :  { %7734 = vsyncadd [#allocation18], 4294965216 }
  0xa8   :  { %7735 = dma.done.wait [#allocation21], 512  }
  0xa9   :  { %7736 = vsyncadd [#allocation21], 4294966784 }
  0xaa   :  { %7737 = dma.done.wait [#allocation24], 32  }
  0xab   :  { %7738 = vsyncadd [#allocation24], 4294967264  ;;  %v252_v1 = vlaneseq  ;;  %v7757_v2 = vmov 0.0   ;;  %vm7758_vm0 = vmmov 0   ;;  %v7938_v6 = vld [vmem:[#allocation3 + $0x8] sm:$0xff]   ;;  %s9308_s23 = sld [smem:[#allocation34_spill]] }
  0xac   :  { %6362 = vmatprep.subr.bf16.mxu0 %v7757_v2  ;;  %347 = vmatprep.mubr.f32.mxu1 %v7757_v2  ;;  %vm278_vm1 = vcmask 1040384   ;;  %s9309_s21 = sld [smem:[#allocation33_spill]]  ;;  %vm271_vm2 = vcmask 7168   ;;  %v7949_v11 = vld [vmem:[#allocation3] sm:$0xff]   ;;  %v7759_v12 = vmov 0   ;;  %s7760_s1 = smov 32  }
  0xad   :  { %v253_v3 = vshrl.u32 %v252_v1, 7  ;;  %6366 = vmatprep.mubr.msk.bf16.mxu0 %vm7758_vm0, %v7757_v2  ;;  %6363 = vmatpush3.bf16.msra.mxu0 %v7938_v6  ;;  %v7968_v13 = vld [vmem:[#allocation7] sm:$0x3]  ;;  %vm376_vm3 = vcmask 261120   ;;  %vm1695_vm4 = vcmask 1041408   ;;  %vm1697_vm5 = vcmask 1043456  }
  0xae   :  { %6364 = vmatprep.subr.bf16.mxu0 %v7757_v2  ;;  %vm1699_vm6 = vcmask 1045504   ;;  %vm1732_vm7 = vcmask 523264  }
  0xaf   :  { %v7934_v4 = vsub.s32 0, %v253_v3  ;;  %v7936_v5 = vsub.s32 1, %v253_v3 }
  0xb1   :  { %v249_v7 = vld [vmem:[%s9308_s23] sm:$0x3]  ;;  %6365 = vmatpush3.bf16.msra.mxu0 %v7949_v11  ;;  %v7972_v14 = vrot.slane %v7968_v13, %v7934_v4 }
  0xb2   :  { %v266_v8 = vrot.slane %v249_v7, %v7934_v4  ;;  %v270_v9 = vrot.slane %v249_v7, %v7936_v5  ;;  %v247_v10 = vld [vmem:[%s9309_s21] sm:$0xff]  ;;  %6370 = vmatprep.subr.bf16.mxu0 %v7757_v2  ;;  %v248_v54 = vld [vmem:[%s9309_s21 + $0x8] sm:$0xff] }
  0xb4   :  { %6012 = vmatprep.subr.msk.mxu1 %vm278_vm1, %v270_v9  ;;  %6367 = vmatmul.mubr.bf16.vlgmr.msra.gmra.mxu0 %v7759_v12 }
  0xb5   :  { %6013 = vmatpush1.msk.msra.mxu1 %vm278_vm1, %v266_v8  ;;  %6371 = vmatpush3.bf16.msra.mxu0 %v7938_v6 }
  0xb6   :  { %6014 = vmatmul.mubr.msk.f32.vlgmr.msra.gmra.mxu1 %vm271_vm2, %v247_v10  ;;  %6378 = vmatprep.subr.bf16.mxu1 %v7757_v2 }
  0xb7   :  { %6379 = vmatpush3.bf16.msra.mxu1 %v7938_v6  ;;  %353 = vmatprep.mubr.f32.mxu1 %v7757_v2 }
  0xb8   :  { %6380 = vmatprep.subr.bf16.mxu1 %v7757_v2  ;;  %6374 = vmatprep.mubr.msk.bf16.mxu0 %vm7758_vm0, %v7757_v2 }
  0xb9   :  { %6372 = vmatprep.subr.bf16.mxu0 %v7757_v2 }
  0xba   :  { %6373 = vmatpush3.bf16.msra.mxu0 %v7949_v11  ;;  %6015 = vmatmul.mubr.msk.f32.gmra.mxu1 %vm271_vm2, %v248_v54 }
  0xbb   :  { %6381 = vmatpush3.bf16.msra.mxu1 %v7949_v11  ;;  %6386 = vmatprep.subr.bf16.mxu0 %v7757_v2 }
  0xbc   :  { %6394 = vmatprep.subr.bf16.mxu1 %v7757_v2  ;;  %6382 = vmatprep.mubr.msk.bf16.mxu1 %vm7758_vm0, %v7757_v2 }
 0x174   :  { %v414_v17 = vpop.f32.mrf.mxu0 }
 0x176   :  { %v349_v15 = vpop.f32.mrf.mxu1  ;;  %v6368_v19 = vpop.f32.mrf.mxu0 }
 0x177   :  { %v7975_v16 = vadd.f32 %v349_v15, %v7972_v14 }
 0x178   :  { %v417_v20 = vpop.f32.mrf.mxu0  ;;  %v8015_v61 = vpop.f32.mrf.mxu1 }
 0x179   :  { %v420_v18 = vadd.f32 %v414_v17, %v7975_v16 }
 0x17a   :  { %v6369_v21 = vpop.f32.mrf.mxu0  ;;  %v8017_v62 = vpop.f32.mrf.mxu1 }
 0x17b   :  { %6931 = vtanh.f32 %v420_v18  ;;  %v6018_v23 = vmul.f32 -1.442695, %v420_v18 }
 0x17c   :  { %v8019_v63 = vpop.f32.mrf.mxu1 }
 0x17d   :  { %6933 = vpow2.f32 %v6018_v23 }
 0x188   :  { %v6932_v22 = vpop.eup %6931 }
 0x189   :  { %430 = vrot.lane.b32.xlu0 %v6932_v22, %s7741_s18 }
 0x18a   :  { %v6934_v24 = vpop.eup %6933 }
 0x18b   :  { %v424_v25 = vadd.f32 1.0, %v6934_v24 }
 0x18d   :  { %6935 = vrcp.f32 %v424_v25 }
 0x19a   :  { %v6936_v26 = vpop.eup %6935 }
 0x19b   :  { %v428_v29 = vmul.f32 0.0, %v6936_v26 }
 0x1fb   :  { %v431_v27 = vpop.permute.xlu0 %430 }
 0x1fc   :  { %v433_v28 = vmul.f32 %v6936_v26, %v431_v27 }
 0x1fe   :  { %435 = vrot.lane.b32.xlu0 %v433_v28, %s7760_s1 }
 0x270   :  { %v436_v30 = vpop.permute.xlu0 %435 }
 0x271   :  { %v438_v31 = vadd.f32 %v436_v30, %v428_v29 }
 0x273   :  { %6937 = vtanh.f32 %v438_v31  ;;  %v504_v50 = vrot.slane %v438_v31, 6 }
 0x280   :  { %v6938_v32 = vpop.eup %6937 }
 0x281   :  { %441 = vrot.lane.b32.xlu1 %v6938_v32, %s7741_s18 }
 0x2f3   :  { %v442_v33 = vpop.permute.xlu1 %441 }
 0x2f4   :  { %v7981_v34 = vmul.f32 %v6936_v26, %v442_v33 }
 0x2f6   :  { %v445_v35 = vpack.c.bf16 %v7981_v34, %v7981_v34 }
 0x2f8   :  { %447 = vrot.lane.b32.xlu1 %v445_v35, %s7760_s1 }
 0x36a   :  { %v448_v36 = vpop.permute.xlu1 %447 }
 0x36b   :  { %6375 = vmatmul.mubr.msk.bf16.vlgmr.msra.gmra.mxu0 %vm376_vm3, %v448_v36 }
 0x36c   :  { %6387 = vmatpush3.bf16.msra.mxu0 %v7938_v6  ;;  %6390 = vmatprep.mubr.msk.bf16.mxu0 %vm7758_vm0, %v7757_v2 }
 0x36d   :  { %6388 = vmatprep.subr.bf16.mxu0 %v7757_v2 }
 0x370   :  { %6389 = vmatpush3.bf16.msra.mxu0 %v7949_v11 }
 0x371   :  { %6402 = vmatprep.subr.bf16.mxu0 %v7757_v2 }
 0x42b   :  { %v486_v37 = vpop.f32.mrf.mxu0 }
 0x42c   :  { %v493_v38 = vrot.slane %v486_v37, 6 }
 0x42d   :  { %v6376_v39 = vpop.f32.mrf.mxu0 }
 0x42e   :  { %v495_v40 = vadd.f32 %v493_v38, %v7975_v16 }
 0x42f   :  { %v489_v41 = vpop.f32.mrf.mxu0 }
 0x430   :  { %6939 = vtanh.f32 %v495_v40  ;;  %v6020_v44 = vmul.f32 -1.442695, %v495_v40 }
 0x431   :  { %v6377_v42 = vpop.f32.mrf.mxu0 }
 0x432   :  { %6941 = vpow2.f32 %v6020_v44 }
 0x43d   :  { %v6940_v43 = vpop.eup %6939 }
 0x43e   :  { %508 = vrot.lane.b32.xlu0 %v6940_v43, %s7741_s18 }
 0x43f   :  { %v6942_v45 = vpop.eup %6941 }
 0x440   :  { %v499_v46 = vadd.f32 1.0, %v6942_v45 }
 0x442   :  { %6943 = vrcp.f32 %v499_v46 }
 0x44f   :  { %v6944_v47 = vpop.eup %6943 }
 0x450   :  { %v506_v51 = vmul.f32 %v6944_v47, %v504_v50 }
 0x4b0   :  { %v509_v48 = vpop.permute.xlu0 %508 }
 0x4b1   :  { %v511_v49 = vmul.f32 %v6944_v47, %v509_v48 }
 0x4b3   :  { %513 = vrot.lane.b32.xlu1 %v511_v49, %s7760_s1 }
 0x525   :  { %v514_v52 = vpop.permute.xlu1 %513 }
 0x526   :  { %v516_v53 = vadd.f32 %v514_v52, %v506_v51 }
 0x528   :  { %6945 = vtanh.f32 %v516_v53  ;;  %v583_v22 = vrot.slane %v516_v53, 6 }
 0x535   :  { %v6946_v55 = vpop.eup %6945 }
 0x536   :  { %519 = vrot.lane.b32.xlu0 %v6946_v55, %s7741_s18  ;;  %v8055_v55 = vadd.f32 %v8017_v62, %v7972_v14 }
 0x5a8   :  { %v520_v56 = vpop.permute.xlu0 %519 }
 0x5a9   :  { %v8003_v57 = vmul.f32 %v6944_v47, %v520_v56 }
 0x5ab   :  { %v523_v58 = vpack.c.bf16 %v8003_v57, %v8003_v57 }
 0x5ad   :  { %v525_v59 = vrot.slane %v523_v58, 1 }
 0x5af   :  { %526 = vrot.lane.b32.xlu1 %v525_v59, %s7760_s1 }
 0x621   :  { %v527_v60 = vpop.permute.xlu1 %526 }
 0x622   :  { %6383 = vmatmul.mubr.msk.bf16.vlgmr.msra.gmra.mxu1 %vm376_vm3, %v527_v60 }
 0x623   :  { %6395 = vmatpush3.bf16.msra.mxu1 %v7938_v6  ;;  %6398 = vmatprep.mubr.msk.bf16.mxu1 %vm7758_vm0, %v7757_v2 }
 0x624   :  { %6396 = vmatprep.subr.bf16.mxu1 %v7757_v2 }
 0x627   :  { %6397 = vmatpush3.bf16.msra.mxu1 %v7949_v11 }
 0x628   :  { %6410 = vmatprep.subr.bf16.mxu1 %v7757_v2 }
 0x6e2   :  { %v565_v0 = vpop.f32.mrf.mxu1 }
 0x6e3   :  { %v572_v1 = vrot.slane %v565_v0, 4 }
 0x6e4   :  { %v6384_v3 = vpop.f32.mrf.mxu1 }
 0x6e5   :  { %v574_v7 = vadd.f32 %v572_v1, %v7975_v16 }
 0x6e6   :  { %v568_v8 = vpop.f32.mrf.mxu1 }
 0x6e7   :  { %6947 = vtanh.f32 %v574_v7  ;;  %v6022_v15 = vmul.f32 -1.442695, %v574_v7 }
 0x6e8   :  { %v6385_v9 = vpop.f32.mrf.mxu1 }
 0x6e9   :  { %6949 = vpow2.f32 %v6022_v15 }
 0x6f4   :  { %v6948_v10 = vpop.eup %6947 }
 0x6f5   :  { %587 = vrot.lane.b32.xlu0 %v6948_v10, %s7741_s18 }
 0x6f6   :  { %v6950_v17 = vpop.eup %6949 }
 0x6f7   :  { %v578_v18 = vadd.f32 1.0, %v6950_v17 }
 0x6f9   :  { %6951 = vrcp.f32 %v578_v18 }
 0x706   :  { %v6952_v19 = vpop.eup %6951 }
 0x707   :  { %v585_v23 = vmul.f32 %v6952_v19, %v583_v22 }
 0x767   :  { %v588_v20 = vpop.permute.xlu0 %587 }
 0x768   :  { %v590_v21 = vmul.f32 %v6952_v19, %v588_v20 }
 0x76a   :  { %592 = vrot.lane.b32.xlu1 %v590_v21, %s7760_s1 }
 0x7dc   :  { %v593_v24 = vpop.permute.xlu1 %592 }
 0x7dd   :  { %v595_v25 = vadd.f32 %v593_v24, %v585_v23 }
 0x7df   :  { %6953 = vtanh.f32 %v595_v25  ;;  %v662_v46 = vrot.slane %v595_v25, 6 }
 0x7ec   :  { %v6954_v26 = vpop.eup %6953 }
 0x7ed   :  { %598 = vrot.lane.b32.xlu0 %v6954_v26, %s7741_s18 }
 0x85f   :  { %v599_v27 = vpop.permute.xlu0 %598 }
 0x860   :  { %v8025_v28 = vmul.f32 %v6952_v19, %v599_v27 }
 0x862   :  { %v602_v29 = vpack.c.bf16 %v8025_v28, %v8025_v28 }
 0x864   :  { %v604_v30 = vrot.slane %v602_v29, 2 }
 0x866   :  { %605 = vrot.lane.b32.xlu1 %v604_v30, %s7760_s1 }
 0x8d8   :  { %v606_v31 = vpop.permute.xlu1 %605 }
 0x8d9   :  { %6391 = vmatmul.mubr.msk.bf16.vlgmr.msra.gmra.mxu0 %vm376_vm3, %v606_v31 }
 0x8da   :  { %6403 = vmatpush3.bf16.msra.mxu0 %v7938_v6  ;;  %6406 = vmatprep.mubr.msk.bf16.mxu0 %vm7758_vm0, %v7757_v2 }
 0x8db   :  { %6404 = vmatprep.subr.bf16.mxu0 %v7757_v2 }
 0x8de   :  { %6405 = vmatpush3.bf16.msra.mxu0 %v7949_v11 }
 0x8df   :  { %6418 = vmatprep.subr.bf16.mxu0 %v7757_v2 }
 0x999   :  { %v644_v32 = vpop.f32.mrf.mxu0 }
 0x99a   :  { %v651_v33 = vrot.slane %v644_v32, 2 }
 0x99b   :  { %v6392_v35 = vpop.f32.mrf.mxu0 }
 0x99c   :  { %v653_v36 = vadd.f32 %v651_v33, %v7975_v16 }
 0x99d   :  { %v647_v37 = vpop.f32.mrf.mxu0 }
 0x99e   :  { %6955 = vtanh.f32 %v653_v36  ;;  %v6024_v40 = vmul.f32 -1.442695, %v653_v36 }
 0x99f   :  { %v6393_v38 = vpop.f32.mrf.mxu0 }
 0x9a0   :  { %6957 = vpow2.f32 %v6024_v40 }
 0x9ab   :  { %v6956_v39 = vpop.eup %6955 }
 0x9ac   :  { %666 = vrot.lane.b32.xlu0 %v6956_v39, %s7741_s18 }
 0x9ad   :  { %v6958_v41 = vpop.eup %6957 }
 0x9ae   :  { %v657_v42 = vadd.f32 1.0, %v6958_v41 }
 0x9b0   :  { %6959 = vrcp.f32 %v657_v42 }
 0x9bd   :  { %v6960_v43 = vpop.eup %6959 }
 0x9be   :  { %v664_v47 = vmul.f32 %v6960_v43, %v662_v46  ;;  %v8085_v46 = vld [vmem:[#allocation5 + $0x8] sm:$0xff]  }
 0xa1e   :  { %v667_v44 = vpop.permute.xlu0 %666 }
 0xa1f   :  { %v669_v45 = vmul.f32 %v6960_v43, %v667_v44 }
 0xa21   :  { %671 = vrot.lane.b32.xlu1 %v669_v45, %s7760_s1 }
 0xa93   :  { %v672_v48 = vpop.permute.xlu1 %671 }
 0xa94   :  { %v674_v16 = vadd.f32 %v672_v48, %v664_v47  ;;  %v8089_v48 = vld [vmem:[#allocation5] sm:$0xff]  }
 0xa96   :  { %6961 = vtanh.f32 %v674_v16  ;;  %v738_v14 = vrot.slane %v674_v16, 6 }
 0xaa3   :  { %v6962_v49 = vpop.eup %6961 }
 0xaa4   :  { %677 = vrot.lane.b32.xlu0 %v6962_v49, %s7741_s18 }
 0xb16   :  { %v678_v50 = vpop.permute.xlu0 %677 }
 0xb17   :  { %v8041_v51 = vmul.f32 %v6960_v43, %v678_v50 }
 0xb19   :  { %v681_v52 = vpack.c.bf16 %v8041_v51, %v8041_v51 }
 0xb1b   :  { %v683_v53 = vrot.slane %v681_v52, 3 }
 0xb1d   :  { %684 = vrot.lane.b32.xlu1 %v683_v53, %s7760_s1 }
 0xb8f   :  { %v685_v54 = vpop.permute.xlu1 %684 }
 0xb90   :  { %6399 = vmatmul.mubr.msk.bf16.vlgmr.msra.gmra.mxu1 %vm376_vm3, %v685_v54 }
 0xb91   :  { %6411 = vmatpush3.bf16.msra.mxu1 %v7938_v6  ;;  %6414 = vmatprep.mubr.msk.bf16.mxu1 %vm7758_vm0, %v7757_v2 }
 0xb92   :  { %6412 = vmatprep.subr.bf16.mxu1 %v7757_v2 }
 0xb95   :  { %6413 = vmatpush3.bf16.msra.mxu1 %v7949_v11 }
 0xb96   :  { %6426 = vmatprep.subr.bf16.mxu1 %v7757_v2 }
 0xc50   :  { %v723_v56 = vpop.f32.mrf.mxu1 }
 0xc51   :  { %v729_v58 = vadd.f32 %v723_v56, %v8055_v55  ;;  %v8106_v56 = vrot.slane %v7968_v13, %v7936_v5 }
 0xc52   :  { %v6400_v59 = vpop.f32.mrf.mxu1 }
 0xc53   :  { %6963 = vtanh.f32 %v729_v58  ;;  %v6026_v3 = vmul.f32 -1.442695, %v729_v58  ;;  %v8110_v59 = vadd.f32 %v8019_v63, %v8106_v56 }
 0xc54   :  { %v726_v60 = vpop.f32.mrf.mxu1 }
 0xc55   :  { %6965 = vpow2.f32 %v6026_v3 }
 0xc56   :  { %v6401_v0 = vpop.f32.mrf.mxu1 }
 0xc60   :  { %v6964_v1 = vpop.eup %6963 }
 0xc61   :  { %742 = vrot.lane.b32.xlu0 %v6964_v1, %s7741_s18 }
 0xc62   :  { %v6966_v7 = vpop.eup %6965 }
 0xc63   :  { %v733_v8 = vadd.f32 1.0, %v6966_v7 }
 0xc65   :  { %6967 = vrcp.f32 %v733_v8 }
 0xc72   :  { %v6968_v9 = vpop.eup %6967 }
 0xc73   :  { %v740_v62 = vmul.f32 %v6968_v9, %v738_v14 }
 0xcd3   :  { %v743_v10 = vpop.permute.xlu0 %742 }
 0xcd4   :  { %v745_v15 = vmul.f32 %v6968_v9, %v743_v10 }
 0xcd6   :  { %747 = vrot.lane.b32.xlu1 %v745_v15, %s7760_s1 }
 0xd48   :  { %v748_v17 = vpop.permute.xlu1 %747 }
 0xd49   :  { %v750_v18 = vadd.f32 %v748_v17, %v740_v62 }
 0xd4b   :  { %6969 = vtanh.f32 %v750_v18  ;;  %v816_v37 = vrot.slane %v750_v18, 6 }
 0xd58   :  { %v6970_v19 = vpop.eup %6969 }
 0xd59   :  { %753 = vrot.lane.b32.xlu0 %v6970_v19, %s7741_s18 }
 0xdcb   :  { %v754_v20 = vpop.permute.xlu0 %753 }
 0xdcc   :  { %v8061_v21 = vmul.f32 %v6968_v9, %v754_v20 }
 0xdce   :  { %v757_v22 = vpack.c.bf16 %v8061_v21, %v8061_v21 }
 0xdd0   :  { %759 = vrot.lane.b32.xlu1 %v757_v22, %s7760_s1 }
 0xe42   :  { %v760_v23 = vpop.permute.xlu1 %759 }
 0xe43   :  { %6407 = vmatmul.mubr.msk.bf16.vlgmr.msra.gmra.mxu0 %vm376_vm3, %v760_v23 }
 0xe44   :  { %6419 = vmatpush3.bf16.msra.mxu0 %v7938_v6  ;;  %6422 = vmatprep.mubr.msk.bf16.mxu0 %vm7758_vm0, %v7757_v2 }
 0xe45   :  { %6420 = vmatprep.subr.bf16.mxu0 %v7757_v2 }
 0xe48   :  { %6421 = vmatpush3.bf16.msra.mxu0 %v7949_v11 }
 0xe49   :  { %6434 = vmatprep.subr.bf16.mxu0 %v7757_v2 }
 0xf03   :  { %v798_v24 = vpop.f32.mrf.mxu0 }
 0xf04   :  { %v805_v25 = vrot.slane %v798_v24, 6 }
 0xf05   :  { %v6408_v26 = vpop.f32.mrf.mxu0 }
 0xf06   :  { %v807_v27 = vadd.f32 %v805_v25, %v8055_v55 }
 0xf07   :  { %v801_v29 = vpop.f32.mrf.mxu0 }
 0xf08   :  { %6971 = vtanh.f32 %v807_v27  ;;  %v6028_v6 = vmul.f32 -1.442695, %v807_v27 }
 0xf09   :  { %v6409_v30 = vpop.f32.mrf.mxu0 }
 0xf0a   :  { %6973 = vpow2.f32 %v6028_v6 }
 0xf15   :  { %v6972_v31 = vpop.eup %6971 }
 0xf16   :  { %820 = vrot.lane.b32.xlu0 %v6972_v31, %s7741_s18 }
 0xf17   :  { %v6974_v32 = vpop.eup %6973 }
 0xf18   :  { %v811_v33 = vadd.f32 1.0, %v6974_v32 }
 0xf1a   :  { %6975 = vrcp.f32 %v811_v33 }
 0xf27   :  { %v6976_v35 = vpop.eup %6975 }
 0xf28   :  { %v818_v38 = vmul.f32 %v6976_v35, %v816_v37 }
 0xf88   :  { %v821_v11 = vpop.permute.xlu0 %820 }
 0xf89   :  { %v823_v36 = vmul.f32 %v6976_v35, %v821_v11 }
 0xf8b   :  { %825 = vrot.lane.b32.xlu1 %v823_v36, %s7760_s1 }
 0xffd   :  { %v826_v39 = vpop.permute.xlu1 %825 }
 0xffe   :  { %v8076_v40 = vadd.f32 %v826_v39, %v818_v38 }
0x1000   :  { %6977 = vtanh.f32 %v8076_v40  ;;  %v895_v24 = vrot.slane %v8076_v40, 6 }
0x100d   :  { %v6978_v41 = vpop.eup %6977 }
0x100e   :  { %831 = vrot.lane.b32.xlu0 %v6978_v41, %s7741_s18 }
0x1080   :  { %v832_v42 = vpop.permute.xlu0 %831 }
0x1081   :  { %v8080_v43 = vmul.f32 %v6976_v35, %v832_v42 }
0x1083   :  { %v835_v44 = vpack.c.bf16 %v8080_v43, %v8080_v43 }
0x1085   :  { %v837_v45 = vrot.slane %v835_v44, 1 }
0x1087   :  { %838 = vrot.lane.b32.xlu1 %v837_v45, %s7760_s1 }
0x10f9   :  { %v839_v47 = vpop.permute.xlu1 %838 }
0x10fa   :  { %6415 = vmatmul.mubr.msk.bf16.vlgmr.msra.gmra.mxu1 %vm376_vm3, %v839_v47 }
0x10fb   :  { %6427 = vmatpush3.bf16.msra.mxu1 %v8085_v46  ;;  %6430 = vmatprep.mubr.msk.bf16.mxu1 %vm7758_vm0, %v7757_v2 }
0x10fc   :  { %6428 = vmatprep.subr.bf16.mxu1 %v7757_v2 }
0x10ff   :  { %6429 = vmatpush3.bf16.msra.mxu1 %v8089_v48 }
0x1100   :  { %6442 = vmatprep.subr.bf16.mxu1 %v7757_v2 }
0x1102   :  { %6431 = vmatmul.mubr.bf16.vlgmr.msra.gmra.mxu1 %v7759_v12 }
0x1103   :  { %6443 = vmatpush3.bf16.msra.mxu1 %v8085_v46  ;;  %6446 = vmatprep.mubr.msk.bf16.mxu1 %vm7758_vm0, %v7757_v2 }
0x1104   :  { %6444 = vmatprep.subr.bf16.mxu1 %v7757_v2 }
0x1107   :  { %6445 = vmatpush3.bf16.msra.mxu1 %v8089_v48 }
0x1108   :  { %6458 = vmatprep.subr.bf16.mxu1 %v7757_v2 }
0x11ba   :  { %v877_v16 = vpop.f32.mrf.mxu1 }
0x11bb   :  { %v884_v49 = vrot.slane %v877_v16, 4 }
0x11bc   :  { %v6416_v50 = vpop.f32.mrf.mxu1 }
0x11bd   :  { %v886_v52 = vadd.f32 %v884_v49, %v8055_v55 }
0x11be   :  { %v880_v53 = vpop.f32.mrf.mxu1 }
0x11bf   :  { %6979 = vtanh.f32 %v886_v52  ;;  %v6030_v13 = vmul.f32 -1.442695, %v886_v52 }
0x11c0   :  { %v6417_v54 = vpop.f32.mrf.mxu1 }
0x11c2   :  { %v1043_v58 = vpop.f32.mrf.mxu1 }
0x11c3   :  { %v1050_v60 = vrot.slane %v1043_v58, 2 }
0x11c4   :  { %v6432_v0 = vpop.f32.mrf.mxu1 }
0x11c5   :  { %v1052_v1 = vadd.f32 %v1050_v60, %v8110_v59 }
0x11c6   :  { %v1046_v3 = vpop.f32.mrf.mxu1 }
0x11c7   :  { %6981 = vtanh.f32 %v1052_v1  ;;  %v6035_v10 = vmul.f32 -1.442695, %v1052_v1 }
0x11c8   :  { %v6433_v7 = vpop.f32.mrf.mxu1  ;;  %6983 = vpow2.f32 %v6030_v13 }
0x11c9   :  { %6985 = vpow2.f32 %v6035_v10 }
0x11cc   :  { %v6980_v8 = vpop.eup %6979 }
0x11cd   :  { %899 = vrot.lane.b32.xlu0 %v6980_v8, %s7741_s18 }
0x11d4   :  { %v6982_v9 = vpop.eup %6981 }
0x11d5   :  { %1062 = vrot.lane.b32.xlu1 %v6982_v9, %s7741_s18  ;;  %v6984_v15 = vpop.eup %6983 }
0x11d6   :  { %v890_v63 = vadd.f32 1.0, %v6984_v15  ;;  %v6986_v14 = vpop.eup %6985 }
0x11d7   :  { %v1056_v62 = vadd.f32 1.0, %v6986_v14 }
0x11d8   :  { %6987 = vrcp.f32 %v890_v63 }
0x11d9   :  { %6989 = vrcp.f32 %v1056_v62 }
0x11e5   :  { %v6988_v17 = vpop.eup %6987 }
0x11e6   :  { %v6990_v20 = vpop.eup %6989  ;;  %v897_v25 = vmul.f32 %v6988_v17, %v895_v24 }
0x11e7   :  { %v1060_v29 = vmul.f32 0.0, %v6990_v20 }
0x123f   :  { %v900_v18 = vpop.permute.xlu0 %899 }
0x1240   :  { %v902_v19 = vmul.f32 %v6988_v17, %v900_v18 }
0x1242   :  { %904 = vrot.lane.b32.xlu0 %v902_v19, %s7760_s1 }
0x1247   :  { %v1063_v22 = vpop.permute.xlu1 %1062 }
0x1248   :  { %v1065_v23 = vmul.f32 %v6990_v20, %v1063_v22 }
0x124a   :  { %1067 = vrot.lane.b32.xlu1 %v1065_v23, %s7760_s1 }
0x12b4   :  { %v905_v26 = vpop.permute.xlu0 %904 }
0x12b5   :  { %v8118_v27 = vadd.f32 %v905_v26, %v897_v25 }
0x12b7   :  { %6991 = vtanh.f32 %v8118_v27 }
0x12bc   :  { %v1068_v30 = vpop.permute.xlu1 %1067 }
0x12bd   :  { %v1070_v31 = vadd.f32 %v1068_v30, %v1060_v29 }
0x12bf   :  { %6993 = vtanh.f32 %v1070_v31  ;;  %v1137_v13 = vrot.slane %v1070_v31, 2 }
0x12c4   :  { %v6992_v6 = vpop.eup %6991 }
0x12c5   :  { %910 = vrot.lane.b32.xlu0 %v6992_v6, %s7741_s18 }
0x12cc   :  { %v6994_v32 = vpop.eup %6993 }
0x12cd   :  { %1073 = vrot.lane.b32.xlu1 %v6994_v32, %s7741_s18 }
0x1337   :  { %v911_v33 = vpop.permute.xlu0 %910 }
0x1338   :  { %v8123_v35 = vmul.f32 %v6988_v17, %v911_v33 }
0x133a   :  { %v914_v11 = vpack.c.bf16 %v8123_v35, %v8123_v35 }
0x133c   :  { %v916_v36 = vrot.slane %v914_v11, 2 }
0x133e   :  { %917 = vrot.lane.b32.xlu0 %v916_v36, %s7760_s1 }
0x133f   :  { %v1074_v37 = vpop.permute.xlu1 %1073 }
0x1340   :  { %v8128_v38 = vmul.f32 %v6990_v20, %v1074_v37 }
0x1342   :  { %v1077_v39 = vpack.c.bf16 %v8128_v38, %v8128_v38 }
0x1344   :  { %v1079_v40 = vrot.slane %v1077_v39, 3 }
0x1346   :  { %1080 = vrot.lane.b32.xlu1 %v1079_v40, %s7760_s1 }
0x13b0   :  { %v918_v41 = vpop.permute.xlu0 %917 }
0x13b1   :  { %6423 = vmatmul.mubr.msk.bf16.vlgmr.msra.gmra.mxu0 %vm376_vm3, %v918_v41 }
0x13b2   :  { %6435 = vmatpush3.bf16.msra.mxu0 %v8085_v46  ;;  %6438 = vmatprep.mubr.msk.bf16.mxu0 %vm7758_vm0, %v7757_v2 }
0x13b3   :  { %6436 = vmatprep.subr.bf16.mxu0 %v7757_v2 }
0x13b6   :  { %6437 = vmatpush3.bf16.msra.mxu0 %v8089_v48 }
0x13b7   :  { %6450 = vmatprep.subr.bf16.mxu0 %v7757_v2 }
0x13b8   :  { %v1081_v42 = vpop.permute.xlu1 %1080 }
0x13b9   :  { %6439 = vmatmul.mubr.msk.bf16.vlgmr.msra.gmra.mxu0 %vm376_vm3, %v1081_v42 }
0x13ba   :  { %6451 = vmatpush3.bf16.msra.mxu0 %v8085_v46  ;;  %6454 = vmatprep.mubr.msk.bf16.mxu0 %vm7758_vm0, %v7757_v2 }
0x13bb   :  { %6452 = vmatprep.subr.bf16.mxu0 %v7757_v2 }
0x13be   :  { %6453 = vmatpush3.bf16.msra.mxu0 %v8089_v48 }
0x13bf   :  { %6466 = vmatprep.subr.bf16.mxu0 %v7757_v2 }
0x1471   :  { %v8147_v44 = vpop.f32.mrf.mxu0 }
0x1473   :  { %v6424_v45 = vpop.f32.mrf.mxu0 }
0x1475   :  { %v959_v47 = vpop.f32.mrf.mxu0 }
0x1477   :  { %v6425_v16 = vpop.f32.mrf.mxu0 }
0x1479   :  { %v1119_v49 = vpop.f32.mrf.mxu0 }
0x147a   :  { %v1126_v50 = vrot.slane %v1119_v49, 4 }
0x147b   :  { %v6440_v52 = vpop.f32.mrf.mxu0 }
0x147c   :  { %v1128_v53 = vadd.f32 %v1126_v50, %v8110_v59 }
0x147d   :  { %v1122_v54 = vpop.f32.mrf.mxu0 }
0x147e   :  { %6995 = vtanh.f32 %v1128_v53  ;;  %v6037_v0 = vmul.f32 -1.442695, %v1128_v53 }
0x147f   :  { %v6441_v58 = vpop.f32.mrf.mxu0 }
0x1480   :  { %6997 = vpow2.f32 %v6037_v0 }
0x148b   :  { %v6996_v60 = vpop.eup %6995 }
0x148c   :  { %1141 = vrot.lane.b32.xlu0 %v6996_v60, %s7741_s18 }
0x148d   :  { %v6998_v1 = vpop.eup %6997 }
0x148e   :  { %v1132_v3 = vadd.f32 1.0, %v6998_v1 }
0x1490   :  { %6999 = vrcp.f32 %v1132_v3 }
0x149d   :  { %v7000_v7 = vpop.eup %6999 }
0x149e   :  { %v1139_v10 = vmul.f32 %v7000_v7, %v1137_v13 }
0x14fe   :  { %v1142_v8 = vpop.permute.xlu0 %1141 }
0x14ff   :  { %v1144_v9 = vmul.f32 %v7000_v7, %v1142_v8 }
0x1501   :  { %1146 = vrot.lane.b32.xlu1 %v1144_v9, %s7760_s1 }
0x1573   :  { %v1147_v15 = vpop.permute.xlu1 %1146 }
0x1574   :  { %v1149_v63 = vadd.f32 %v1147_v15, %v1139_v10 }
0x1576   :  { %7001 = vtanh.f32 %v1149_v63  ;;  %v1216_v37 = vrot.slane %v1149_v63, 2 }
0x1583   :  { %v7002_v14 = vpop.eup %7001 }
0x1584   :  { %1152 = vrot.lane.b32.xlu0 %v7002_v14, %s7741_s18 }
0x15f6   :  { %v1153_v62 = vpop.permute.xlu0 %1152 }
0x15f7   :  { %v8153_v17 = vmul.f32 %v7000_v7, %v1153_v62 }
0x15f9   :  { %v1156_v18 = vpack.c.bf16 %v8153_v17, %v8153_v17 }
0x15fb   :  { %v1158_v19 = vrot.slane %v1156_v18, 2 }
0x15fd   :  { %1159 = vrot.lane.b32.xlu1 %v1158_v19, %s7760_s1 }
0x166f   :  { %v1160_v20 = vpop.permute.xlu1 %1159 }
0x1670   :  { %6447 = vmatmul.mubr.msk.bf16.vlgmr.msra.gmra.mxu1 %vm376_vm3, %v1160_v20 }
0x1671   :  { %6459 = vmatpush3.bf16.msra.mxu1 %v8085_v46  ;;  %6462 = vmatprep.mubr.msk.bf16.mxu1 %vm7758_vm0, %v7757_v2 }
0x1672   :  { %6460 = vmatprep.subr.bf16.mxu1 %v7757_v2 }
0x1675   :  { %6461 = vmatpush3.bf16.msra.mxu1 %v8089_v48 }
0x1676   :  { %6474 = vmatprep.subr.bf16.mxu1 %v7757_v2 }
0x1730   :  { %v1198_v22 = vpop.f32.mrf.mxu1 }
0x1731   :  { %v1205_v23 = vrot.slane %v1198_v22, 6 }
0x1732   :  { %v6448_v24 = vpop.f32.mrf.mxu1 }
0x1733   :  { %v1207_v25 = vadd.f32 %v1205_v23, %v8110_v59  ;;  %v8198_v23 = vadd.f32 %v8015_v61, %v8106_v56 }
0x1734   :  { %v1201_v26 = vpop.f32.mrf.mxu1 }
0x1735   :  { %7003 = vtanh.f32 %v1207_v25  ;;  %v6039_v31 = vmul.f32 -1.442695, %v1207_v25 }
0x1736   :  { %v6449_v29 = vpop.f32.mrf.mxu1 }
0x1737   :  { %7005 = vpow2.f32 %v6039_v31 }
0x1742   :  { %v7004_v30 = vpop.eup %7003 }
0x1743   :  { %1220 = vrot.lane.b32.xlu0 %v7004_v30, %s7741_s18 }
0x1744   :  { %v7006_v6 = vpop.eup %7005 }
0x1745   :  { %v1211_v32 = vadd.f32 1.0, %v7006_v6 }
0x1747   :  { %7007 = vrcp.f32 %v1211_v32 }
0x1754   :  { %v7008_v33 = vpop.eup %7007 }
0x1755   :  { %v1218_v39 = vmul.f32 %v7008_v33, %v1216_v37 }
0x17b5   :  { %v1221_v11 = vpop.permute.xlu0 %1220 }
0x17b6   :  { %v1223_v36 = vmul.f32 %v7008_v33, %v1221_v11 }
0x17b8   :  { %1225 = vrot.lane.b32.xlu1 %v1223_v36, %s7760_s1 }
0x182a   :  { %v1226_v40 = vpop.permute.xlu1 %1225 }
0x182b   :  { %v1228_v41 = vadd.f32 %v1226_v40, %v1218_v39 }
0x182d   :  { %7009 = vtanh.f32 %v1228_v41  ;;  %v1292_v10 = vrot.slane %v1228_v41, 2 }
0x183a   :  { %v7010_v42 = vpop.eup %7009 }
0x183b   :  { %1231 = vrot.lane.b32.xlu0 %v7010_v42, %s7741_s18 }
0x18ad   :  { %v1232_v45 = vpop.permute.xlu0 %1231 }
0x18ae   :  { %v8169_v47 = vmul.f32 %v7008_v33, %v1232_v45 }
0x18b0   :  { %v1235_v16 = vpack.c.bf16 %v8169_v47, %v8169_v47 }
0x18b2   :  { %v1237_v49 = vrot.slane %v1235_v16, 1 }
0x18b4   :  { %1238 = vrot.lane.b32.xlu1 %v1237_v49, %s7760_s1 }
0x1926   :  { %v1239_v50 = vpop.permute.xlu1 %1238 }
0x1927   :  { %6455 = vmatmul.mubr.msk.bf16.vlgmr.msra.gmra.mxu0 %vm376_vm3, %v1239_v50 }
0x1928   :  { %6467 = vmatpush3.bf16.msra.mxu0 %v8085_v46  ;;  %6470 = vmatprep.mubr.msk.bf16.mxu0 %vm7758_vm0, %v7757_v2 }
0x1929   :  { %6468 = vmatprep.subr.bf16.mxu0 %v7757_v2 }
0x192c   :  { %6469 = vmatpush3.bf16.msra.mxu0 %v8089_v48 }
0x192d   :  { %6482 = vmatprep.subr.bf16.mxu0 %v7757_v2 }
0x19e7   :  { %v1277_v52 = vpop.f32.mrf.mxu0 }
0x19e8   :  { %v1283_v53 = vadd.f32 %v1277_v52, %v8110_v59 }
0x19e9   :  { %v6456_v54 = vpop.f32.mrf.mxu0 }
0x19ea   :  { %7011 = vtanh.f32 %v1283_v53  ;;  %v6041_v1 = vmul.f32 -1.442695, %v1283_v53 }
0x19eb   :  { %v1280_v58 = vpop.f32.mrf.mxu0 }
0x19ec   :  { %7013 = vpow2.f32 %v6041_v1 }
0x19ed   :  { %v6457_v60 = vpop.f32.mrf.mxu0 }
0x19f7   :  { %v7012_v0 = vpop.eup %7011 }
0x19f8   :  { %1296 = vrot.lane.b32.xlu0 %v7012_v0, %s7741_s18 }
0x19f9   :  { %v7014_v3 = vpop.eup %7013 }
0x19fa   :  { %v1287_v7 = vadd.f32 1.0, %v7014_v3 }
0x19fc   :  { %7015 = vrcp.f32 %v1287_v7 }
0x1a09   :  { %v7016_v8 = vpop.eup %7015 }
0x1a0a   :  { %v1294_v15 = vmul.f32 %v7016_v8, %v1292_v10 }
0x1a6a   :  { %v1297_v9 = vpop.permute.xlu0 %1296 }
0x1a6b   :  { %v1299_v13 = vmul.f32 %v7016_v8, %v1297_v9 }
0x1a6d   :  { %1301 = vrot.lane.b32.xlu1 %v1299_v13, %s7760_s1 }
0x1adf   :  { %v1302_v59 = vpop.permute.xlu1 %1301 }
0x1ae0   :  { %v1304_v63 = vadd.f32 %v1302_v59, %v1294_v15 }
0x1ae2   :  { %7017 = vtanh.f32 %v1304_v63  ;;  %v1370_v61 = vrot.slane %v1304_v63, 2 }
0x1aef   :  { %v7018_v14 = vpop.eup %7017 }
0x1af0   :  { %1307 = vrot.lane.b32.xlu0 %v7018_v14, %s7741_s18 }
0x1b62   :  { %v1308_v62 = vpop.permute.xlu0 %1307 }
0x1b63   :  { %v8185_v18 = vmul.f32 %v7016_v8, %v1308_v62 }
0x1b65   :  { %v1311_v19 = vpack.c.bf16 %v8185_v18, %v8185_v18 }
0x1b67   :  { %1313 = vrot.lane.b32.xlu1 %v1311_v19, %s7760_s1 }
0x1bd9   :  { %v1314_v20 = vpop.permute.xlu1 %1313 }
0x1bda   :  { %6463 = vmatmul.mubr.msk.bf16.vlgmr.msra.gmra.mxu1 %vm376_vm3, %v1314_v20 }
0x1bdb   :  { %6475 = vmatpush3.bf16.msra.mxu1 %v8085_v46  ;;  %6478 = vmatprep.mubr.msk.bf16.mxu1 %vm7758_vm0, %v7757_v2 }
0x1bdc   :  { %6476 = vmatprep.subr.bf16.mxu1 %v7757_v2 }
0x1bdf   :  { %6477 = vmatpush3.bf16.msra.mxu1 %v8089_v48 }
0x1c9a   :  { %v1352_v22 = vpop.f32.mrf.mxu1 }
0x1c9b   :  { %v1359_v24 = vrot.slane %v1352_v22, 2 }
0x1c9c   :  { %v6464_v25 = vpop.f32.mrf.mxu1 }
0x1c9d   :  { %v1361_v26 = vadd.f32 %v1359_v24, %v8198_v23 }
0x1c9e   :  { %v1355_v29 = vpop.f32.mrf.mxu1 }
0x1c9f   :  { %7019 = vtanh.f32 %v1361_v26  ;;  %v6043_v6 = vmul.f32 -1.442695, %v1361_v26 }
0x1ca0   :  { %v6465_v30 = vpop.f32.mrf.mxu1 }
0x1ca1   :  { %7021 = vpow2.f32 %v6043_v6 }
0x1cac   :  { %v7020_v31 = vpop.eup %7019 }
0x1cad   :  { %1374 = vrot.lane.b32.xlu0 %v7020_v31, %s7741_s18 }
0x1cae   :  { %v7022_v32 = vpop.eup %7021 }
0x1caf   :  { %v1365_v33 = vadd.f32 1.0, %v7022_v32 }
0x1cb1   :  { %7023 = vrcp.f32 %v1365_v33 }
0x1cbe   :  { %v7024_v11 = vpop.eup %7023 }
0x1cbf   :  { %v1372_v56 = vmul.f32 %v7024_v11, %v1370_v61 }
0x1d1f   :  { %v1375_v36 = vpop.permute.xlu0 %1374 }
0x1d20   :  { %v1377_v37 = vmul.f32 %v7024_v11, %v1375_v36 }
0x1d22   :  { %1379 = vrot.lane.b32.xlu1 %v1377_v37, %s7760_s1 }
0x1d94   :  { %v1380_v39 = vpop.permute.xlu1 %1379 }
0x1d95   :  { %v1382_v40 = vadd.f32 %v1380_v39, %v1372_v56 }
0x1d97   :  { %7025 = vtanh.f32 %v1382_v40  ;;  %v1449_v13 = vrot.slane %v1382_v40, 2 }
0x1da4   :  { %v7026_v41 = vpop.eup %7025 }
0x1da5   :  { %1385 = vrot.lane.b32.xlu0 %v7026_v41, %s7741_s18 }
0x1e17   :  { %v1386_v42 = vpop.permute.xlu0 %1385 }
0x1e18   :  { %v8204_v45 = vmul.f32 %v7024_v11, %v1386_v42 }
0x1e1a   :  { %v1389_v16 = vpack.c.bf16 %v8204_v45, %v8204_v45 }
0x1e1c   :  { %v1391_v49 = vrot.slane %v1389_v16, 3 }
0x1e1e   :  { %1392 = vrot.lane.b32.xlu1 %v1391_v49, %s7760_s1 }
0x1e90   :  { %v1393_v50 = vpop.permute.xlu1 %1392 }
0x1e91   :  { %6471 = vmatmul.mubr.msk.bf16.vlgmr.msra.gmra.mxu0 %vm376_vm3, %v1393_v50 }
0x1e92   :  { %6483 = vmatpush3.bf16.msra.mxu0 %v8085_v46  ;;  %6486 = vmatprep.mubr.msk.bf16.mxu0 %vm7758_vm0, %v7757_v2 }
0x1e93   :  { %6484 = vmatprep.subr.bf16.mxu0 %v7757_v2 }
0x1e96   :  { %6485 = vmatpush3.bf16.msra.mxu0 %v8089_v48 }
0x1e97   :  { %6490 = vmatprep.subr.bf16.mxu0 %v7757_v2 }
0x1f51   :  { %v1431_v52 = vpop.f32.mrf.mxu0 }
0x1f52   :  { %v1438_v53 = vrot.slane %v1431_v52, 4 }
0x1f53   :  { %v6472_v54 = vpop.f32.mrf.mxu0 }
0x1f54   :  { %v1440_v58 = vadd.f32 %v1438_v53, %v8198_v23 }
0x1f55   :  { %v1434_v60 = vpop.f32.mrf.mxu0 }
0x1f56   :  { %7027 = vtanh.f32 %v1440_v58  ;;  %v6045_v46 = vmul.f32 -1.442695, %v1440_v58 }
0x1f57   :  { %v6473_v0 = vpop.f32.mrf.mxu0 }
0x1f58   :  { %7029 = vpow2.f32 %v6045_v46 }
0x1f63   :  { %v7028_v1 = vpop.eup %7027 }
0x1f64   :  { %1453 = vrot.lane.b32.xlu0 %v7028_v1, %s7741_s18 }
0x1f65   :  { %v7030_v3 = vpop.eup %7029 }
0x1f66   :  { %v1444_v7 = vadd.f32 1.0, %v7030_v3 }
0x1f68   :  { %7031 = vrcp.f32 %v1444_v7 }
0x1f75   :  { %v7032_v8 = vpop.eup %7031 }
0x1f76   :  { %v1451_v10 = vmul.f32 %v7032_v8, %v1449_v13 }
0x1fd6   :  { %v1454_v48 = vpop.permute.xlu0 %1453 }
0x1fd7   :  { %v1456_v9 = vmul.f32 %v7032_v8, %v1454_v48 }
0x1fd9   :  { %1458 = vrot.lane.b32.xlu1 %v1456_v9, %s7760_s1 }
0x204b   :  { %v1459_v15 = vpop.permute.xlu1 %1458 }
0x204c   :  { %v1461_v59 = vadd.f32 %v1459_v15, %v1451_v10 }
0x204e   :  { %7033 = vtanh.f32 %v1461_v59  ;;  %v1528_v56 = vrot.slane %v1461_v59, 2 }
0x205b   :  { %v7034_v63 = vpop.eup %7033 }
0x205c   :  { %1464 = vrot.lane.b32.xlu0 %v7034_v63, %s7741_s18  ;;  %v1719_v63 = vld [vmem:[%s9286_s5 + $0x78] sm:$0xff] }
0x205d   :  { %1755 = vmatprep.subr.mxu1 %v1719_v63 }
0x20ce   :  { %v1465_v14 = vpop.permute.xlu0 %1464 }
0x20cf   :  { %v8220_v62 = vmul.f32 %v7032_v8, %v1465_v14  ;;  %v8265_v14 = vld [vmem:[#allocation8 + $0x8] sm:$0xff]  }
0x20d1   :  { %v1468_v19 = vpack.c.bf16 %v8220_v62, %v8220_v62 }
0x20d3   :  { %v1470_v20 = vrot.slane %v1468_v19, 2  ;;  %v1714_v19 = vld [vmem:[%s9286_s5 + $0x50] sm:$0xff] }
0x20d5   :  { %1471 = vrot.lane.b32.xlu1 %v1470_v20, %s7760_s1 }
0x2147   :  { %v1472_v22 = vpop.permute.xlu1 %1471 }
0x2148   :  { %6479 = vmatmul.mubr.msk.bf16.vlgmr.msra.gmra.mxu1 %vm376_vm3, %v1472_v22  ;;  %v1713_v22 = vld [vmem:[%s9286_s5 + $0x48] sm:$0xff] }
0x2149   :  { %1803 = vmatprep.mubr.f32.mxu1 %v7757_v2 }
0x2208   :  { %v1510_v24 = vpop.f32.mrf.mxu1 }
0x2209   :  { %v1517_v25 = vrot.slane %v1510_v24, 6  ;;  %v8274_v24 = vld [vmem:[#allocation8] sm:$0xff]  }
0x220a   :  { %v6480_v26 = vpop.f32.mrf.mxu1 }
0x220b   :  { %v1519_v29 = vadd.f32 %v1517_v25, %v8198_v23  ;;  %v1712_v25 = vld [vmem:[%s9286_s5 + $0x40] sm:$0xff]  ;;  %v1711_v26 = vld [vmem:[%s9286_s5 + $0x38] sm:$0xff] }
0x220c   :  { %v1513_v30 = vpop.f32.mrf.mxu1 }
0x220d   :  { %7035 = vtanh.f32 %v1519_v29  ;;  %v6047_v32 = vmul.f32 -1.442695, %v1519_v29  ;;  %v1710_v29 = vld [vmem:[%s9286_s5 + $0x30] sm:$0xff]  ;;  %v1709_v30 = vld [vmem:[%s9286_s5 + $0x28] sm:$0xff] }
0x220e   :  { %v6481_v31 = vpop.f32.mrf.mxu1 }
0x220f   :  { %7037 = vpow2.f32 %v6047_v32  ;;  %v1708_v31 = vld [vmem:[%s9286_s5 + $0x20] sm:$0xff]  ;;  %v1705_v32 = vld [vmem:[%s9286_s5 + $0x8] sm:$0xff] }
0x221a   :  { %v7036_v6 = vpop.eup %7035 }
0x221b   :  { %1532 = vrot.lane.b32.xlu0 %v7036_v6, %s7741_s18  ;;  %v1707_v6 = vld [vmem:[%s9286_s5 + $0x18] sm:$0xff] }
0x221c   :  { %v7038_v33 = vpop.eup %7037 }
0x221d   :  { %v1523_v11 = vadd.f32 1.0, %v7038_v33  ;;  %v1704_v33 = vld [vmem:[%s9286_s5] sm:$0xff] }
0x221f   :  { %7039 = vrcp.f32 %v1523_v11 }
0x222c   :  { %v7040_v36 = vpop.eup %7039 }
0x222d   :  { %v1530_v39 = vmul.f32 %v7040_v36, %v1528_v56 }
0x228d   :  { %v1533_v37 = vpop.permute.xlu0 %1532 }
0x228e   :  { %v1535_v61 = vmul.f32 %v7040_v36, %v1533_v37 }
0x2290   :  { %1537 = vrot.lane.b32.xlu1 %v1535_v61, %s7760_s1 }
0x2302   :  { %v1538_v40 = vpop.permute.xlu1 %1537 }
0x2303   :  { %v1540_v41 = vadd.f32 %v1538_v40, %v1530_v39 }
0x2305   :  { %7041 = vtanh.f32 %v1540_v41 }
0x2312   :  { %v7042_v42 = vpop.eup %7041 }
0x2313   :  { %1543 = vrot.lane.b32.xlu0 %v7042_v42, %s7741_s18 }
0x2385   :  { %v1544_v16 = vpop.permute.xlu0 %1543 }
0x2386   :  { %v1546_v49 = vmul.f32 %v7040_v36, %v1544_v16 }
0x2388   :  { %v1547_v50 = vpack.c.bf16 %v1546_v49, %v1546_v49 }
0x238a   :  { %v1549_v52 = vrot.slane %v1547_v50, 1 }
0x238c   :  { %1550 = vrot.lane.b32.xlu1 %v1549_v52, %s7760_s1 }
0x23fe   :  { %v1551_v53 = vpop.permute.xlu1 %1550 }
0x23ff   :  { %6487 = vmatmul.mubr.msk.bf16.vlgmr.msra.gmra.mxu0 %vm376_vm3, %v1551_v53 }
0x2400   :  { %6494 = vmatprep.mubr.msk.bf16.mxu0 %vm7758_vm0, %v7757_v2  ;;  %6491 = vmatpush3.bf16.msra.mxu0 %v8265_v14 }
0x2401   :  { %6492 = vmatprep.subr.bf16.mxu0 %v7757_v2 }
0x2404   :  { %6493 = vmatpush3.bf16.msra.mxu0 %v8274_v24 }
0x2405   :  { %6498 = vmatprep.subr.bf16.mxu0 %v7757_v2 }
0x2407   :  { %6495 = vmatmul.mubr.bf16.vlgmr.msra.gmra.mxu0 %v7759_v12 }
0x2408   :  { %6499 = vmatpush3.bf16.msra.mxu0 %v8265_v14  ;;  %6502 = vmatprep.mubr.msk.bf16.mxu0 %vm7758_vm0, %v7757_v2 }
0x2409   :  { %6500 = vmatprep.subr.bf16.mxu0 %v7757_v2 }
0x240c   :  { %6501 = vmatpush3.bf16.msra.mxu0 %v8274_v24 }
0x240d   :  { %6514 = vmatprep.subr.bf16.mxu0 %v7757_v2 }
0x24bf   :  { %v1589_v54 = vpop.f32.mrf.mxu0 }
0x24c0   :  { %v1595_v58 = vadd.f32 %v1589_v54, %v8198_v23  ;;  %v1604_v23 = vrot.slane %v1540_v41, 2 }
0x24c1   :  { %v6488_v60 = vpop.f32.mrf.mxu0 }
0x24c2   :  { %7043 = vtanh.f32 %v1595_v58  ;;  %v6049_v3 = vmul.f32 -1.442695, %v1595_v58 }
0x24c3   :  { %v1592_v0 = vpop.f32.mrf.mxu0 }
0x24c4   :  { %7045 = vpow2.f32 %v6049_v3  ;;  %v8335_v3 = vld [vmem:[#allocation11] sm:$0x3] }
0x24c5   :  { %v6489_v1 = vpop.f32.mrf.mxu0 }
0x24c7   :  { %v1866_v37 = vpop.f32.mrf.mxu0 }
0x24c9   :  { %v6496_v61 = vpop.f32.mrf.mxu0 }
0x24cb   :  { %v1869_v56 = vpop.f32.mrf.mxu0 }
0x24cd   :  { %v6497_v39 = vpop.f32.mrf.mxu0 }
0x24cf   :  { %v7044_v46 = vpop.eup %7043 }
0x24d0   :  { %1608 = vrot.lane.b32.xlu0 %v7044_v46, %s7741_s18 }
0x24d1   :  { %v7046_v7 = vpop.eup %7045 }
0x24d2   :  { %v1599_v8 = vadd.f32 1.0, %v7046_v7  ;;  %v8339_v7 = vrot.slane %v8335_v3, %v7934_v4 }
0x24d4   :  { %7047 = vrcp.f32 %v1599_v8 }
0x24e1   :  { %v8237_v48 = vpop.eup %7047 }
0x24e2   :  { %v1606_v10 = vmul.f32 %v8237_v48, %v1604_v23 }
0x2542   :  { %v1609_v9 = vpop.permute.xlu0 %1608 }
0x2543   :  { %v1611_v13 = vmul.f32 %v8237_v48, %v1609_v9 }
0x2545   :  { %1613 = vrot.lane.b32.xlu1 %v1611_v13, %s7760_s1 }
0x2549   :  { %1624 = vrot.lane.b32.xlu1 %v7981_v34, %s7760_s1  ;;  %v1718_v34 = vld [vmem:[%s9286_s5 + $0x70] sm:$0xff] }
0x254a   :  { %1756 = vmatpush1.msra.mxu1 %v1718_v34 }
0x254d   :  { %1633 = vrot.lane.b32.xlu1 %v8003_v57, %s7760_s1  ;;  %v1717_v57 = vld [vmem:[%s9286_s5 + $0x68] sm:$0xff] }
0x254e   :  { %1757 = vmatprep.subr.mxu1 %v1717_v57  ;;  %v963_v57 = vrot.slane %v8147_v44, 2 }
0x2551   :  { %1642 = vrot.lane.b32.xlu1 %v8025_v28, %s7760_s1  ;;  %v1716_v28 = vld [vmem:[%s9286_s5 + $0x60] sm:$0xff] }
0x2552   :  { %1758 = vmatpush1.msra.mxu1 %v1716_v28 }
0x2555   :  { %1651 = vrot.lane.b32.xlu1 %v8041_v51, %s7760_s1  ;;  %v1715_v51 = vld [vmem:[%s9286_s5 + $0x58] sm:$0xff] }
0x2556   :  { %1759 = vmatprep.subr.mxu1 %v1715_v51 }
0x2557   :  { %1760 = vmatpush1.msra.mxu1 %v1714_v19 }
0x2558   :  { %1761 = vmatprep.subr.mxu1 %v1713_v22 }
0x2559   :  { %1762 = vmatpush1.msra.mxu1 %v1712_v25 }
0x255a   :  { %1763 = vmatprep.subr.mxu1 %v1711_v26 }
0x255b   :  { %1764 = vmatpush1.msra.mxu1 %v1710_v29 }
0x255c   :  { %1765 = vmatprep.subr.mxu1 %v1709_v30 }
0x255d   :  { %1766 = vmatpush1.msra.mxu1 %v1708_v31 }
0x255e   :  { %1767 = vmatprep.subr.mxu1 %v1707_v6 }
0x25b7   :  { %v1614_v15 = vpop.permute.xlu1 %1613 }
0x25b8   :  { %v1616_v59 = vadd.f32 %v1614_v15, %v1606_v10 }
0x25ba   :  { %7049 = vtanh.f32 %v1616_v59 }
0x25bb   :  { %v1625_v40 = vpop.permute.xlu1 %1624 }
0x25bf   :  { %v1634_v42 = vpop.permute.xlu1 %1633 }
0x25c7   :  { %v7050_v20 = vpop.eup %7049 }
0x25c8   :  { %1619 = vrot.lane.b32.xlu0 %v7050_v20, %s7741_s18  ;;  %v965_v20 = vadd.f32 %v963_v57, %v8055_v55  ;;  %v974_v55 = vrot.slane %v8118_v27, 6 }
0x25ca   :  { %v6032_v26 = vmul.f32 -1.442695, %v965_v20 }
0x25cc   :  { %1637 = vrot.lane.b32.xlu0 %v1546_v49, %s7741_s18  ;;  %v1643_v49 = vpop.permute.xlu1 %1642 }
0x25d0   :  { %1646 = vrot.lane.b32.xlu0 %v8220_v62, %s7741_s18  ;;  %v1706_v62 = vld [vmem:[%s9286_s5 + $0x10] sm:$0xff] }
0x25d1   :  { %1768 = vmatpush1.msra.mxu1 %v1706_v62 }
0x25d2   :  { %1769 = vmatprep.subr.mxu1 %v1705_v32 }
0x25d3   :  { %1770 = vmatpush1.msra.mxu1 %v1704_v33 }
0x25d4   :  { %6506 = vmatprep.subr.bf16.mxu1 %v7757_v2 }
0x263a   :  { %v1620_v11 = vpop.permute.xlu0 %1619 }
0x263b   :  { %v1622_v36 = vmul.f32 %v8237_v48, %v1620_v11 }
0x263d   :  { %1628 = vrot.lane.b32.xlu0 %v1622_v36, %s7741_s18 }
0x263e   :  { %v1638_v41 = vpop.permute.xlu0 %1637 }
0x263f   :  { %v1640_v52 = vsel %vm376_vm3, %v1634_v42, %v1638_v41 }
0x2641   :  { %1655 = vrot.lane.b32.xlu0 %v8204_v45, %s7741_s18  ;;  %v1652_v45 = vpop.permute.xlu1 %1651 }
0x2642   :  { %v1647_v16 = vpop.permute.xlu0 %1646 }
0x2643   :  { %v1649_v58 = vsel %vm376_vm3, %v1643_v49, %v1647_v16 }
0x26af   :  { %v1629_v50 = vpop.permute.xlu0 %1628 }
0x26b0   :  { %v1631_v53 = vsel %vm376_vm3, %v1625_v40, %v1629_v50 }
0x26b1   :  { %v1696_v54 = vsel %vm1695_vm4, %v1631_v53, %v1640_v52 }
0x26b2   :  { %v1698_v0 = vsel %vm1697_vm5, %v1696_v54, %v1649_v58 }
0x26b3   :  { %v1656_v60 = vpop.permute.xlu0 %1655 }
0x26b4   :  { %v1658_v1 = vsel %vm376_vm3, %v1652_v45, %v1656_v60 }
0x26b5   :  { %v1700_v46 = vsel %vm1699_vm6, %v1698_v0, %v1658_v1 }
0x26b6   :  { %6050 = vmatmul.mubr.msk.f32.vlgmr.msra.gmra.mxu1 %vm1732_vm7, %v1700_v46 }
0x26b7   :  { %1809 = vmatprep.mubr.f32.mxu1 %v7757_v2  ;;  %6507 = vmatpush3.bf16.msra.mxu1 %v8265_v14 }
0x26b8   :  { %6508 = vmatprep.subr.bf16.mxu1 %v7757_v2 }
0x26bb   :  { %6509 = vmatpush3.bf16.msra.mxu1 %v8274_v24 }
0x26bc   :  { %6522 = vmatprep.subr.bf16.mxu1 %v7757_v2 }
0x2776   :  { %v1805_v8 = vpop.f32.mrf.mxu1 }
0x2777   :  { %v8342_v48 = vadd.f32 %v1805_v8, %v8339_v7 }
0x2779   :  { %v1872_v9 = vadd.f32 %v1866_v37, %v8342_v48 }
0x277b   :  { %7051 = vtanh.f32 %v1872_v9  ;;  %v6054_v23 = vmul.f32 -1.442695, %v1872_v9 }
0x277d   :  { %7053 = vpow2.f32 %v6054_v23 }
0x2788   :  { %v7052_v13 = vpop.eup %7051 }
0x2789   :  { %1882 = vrot.lane.b32.xlu1 %v7052_v13, %s7741_s18 }
0x278a   :  { %v7054_v10 = vpop.eup %7053 }
0x278b   :  { %v1876_v15 = vadd.f32 1.0, %v7054_v10 }
0x278d   :  { %7055 = vrcp.f32 %v1876_v15 }
0x279a   :  { %v7056_v59 = vpop.eup %7055 }
0x279b   :  { %v1880_v28 = vmul.f32 0.0, %v7056_v59 }
0x27fb   :  { %v1883_v63 = vpop.permute.xlu1 %1882 }
0x27fc   :  { %v1885_v34 = vmul.f32 %v7056_v59, %v1883_v63 }
0x27fe   :  { %1887 = vrot.lane.b32.xlu0 %v1885_v34, %s7760_s1 }
0x2870   :  { %v1888_v51 = vpop.permute.xlu0 %1887 }
0x2871   :  { %v1890_v19 = vadd.f32 %v1888_v51, %v1880_v28 }
0x2873   :  { %7057 = vtanh.f32 %v1890_v19  ;;  %v1956_v58 = vrot.slane %v1890_v19, 6 }
0x2874   :  { %7059 = vtanh.f32 %v965_v20 }
0x2875   :  { %7061 = vpow2.f32 %v6032_v26  ;;  %v8399_v26 = vpop.f32.mrf.mxu1 }
0x2880   :  { %v7058_v22 = vpop.eup %7057 }
0x2881   :  { %1893 = vrot.lane.b32.xlu1 %v7058_v22, %s7741_s18  ;;  %v7060_v25 = vpop.eup %7059 }
0x2882   :  { %v7062_v29 = vpop.eup %7061 }
0x2883   :  { %v969_v30 = vadd.f32 1.0, %v7062_v29 }
0x2885   :  { %978 = vrot.lane.b32.xlu1 %v7060_v25, %s7741_s18  ;;  %7063 = vrcp.f32 %v969_v30 }
0x2892   :  { %v7064_v62 = vpop.eup %7063 }
0x2893   :  { %v976_v36 = vmul.f32 %v7064_v62, %v974_v55 }
0x28f3   :  { %v1894_v31 = vpop.permute.xlu1 %1893 }
0x28f4   :  { %v1896_v44 = vmul.f32 %v7056_v59, %v1894_v31 }
0x28f6   :  { %v1897_v6 = vpack.c.bf16 %v1896_v44, %v1896_v44 }
0x28f7   :  { %v979_v32 = vpop.permute.xlu1 %978 }
0x28f8   :  { %v981_v33 = vmul.f32 %v7064_v62, %v979_v32  ;;  %1899 = vrot.lane.b32.xlu0 %v1897_v6, %s7760_s1 }
0x28fa   :  { %983 = vrot.lane.b32.xlu1 %v981_v33, %s7760_s1 }
0x296a   :  { %v1900_v11 = vpop.permute.xlu0 %1899 }
0x296b   :  { %6503 = vmatmul.mubr.msk.bf16.vlgmr.msra.gmra.mxu0 %vm376_vm3, %v1900_v11 }
0x296c   :  { %v984_v37 = vpop.permute.xlu1 %983  ;;  %6515 = vmatpush3.bf16.msra.mxu0 %v8265_v14  ;;  %6518 = vmatprep.mubr.msk.bf16.mxu0 %vm7758_vm0, %v7757_v2 }
0x296d   :  { %v986_v61 = vadd.f32 %v984_v37, %v976_v36  ;;  %6516 = vmatprep.subr.bf16.mxu0 %v7757_v2 }
0x296f   :  { %7065 = vtanh.f32 %v986_v61 }
0x2970   :  { %6517 = vmatpush3.bf16.msra.mxu0 %v8274_v24 }
0x2971   :  { %6530 = vmatprep.subr.bf16.mxu0 %v7757_v2 }
0x297c   :  { %v7066_v56 = vpop.eup %7065 }
0x297d   :  { %989 = vrot.lane.b32.xlu1 %v7066_v56, %s7741_s18 }
0x2981   :  { %1660 = vrot.lane.b32.xlu1 %v8061_v21, %s7760_s1 }
0x2985   :  { %1669 = vrot.lane.b32.xlu1 %v8080_v43, %s7760_s1 }
0x2989   :  { %1678 = vrot.lane.b32.xlu1 %v8123_v35, %s7760_s1 }
0x29ef   :  { %v990_v27 = vpop.permute.xlu1 %989 }
0x29f0   :  { %v992_v39 = vmul.f32 %v7064_v62, %v990_v27 }
0x29f2   :  { %1687 = vrot.lane.b32.xlu1 %v992_v39, %s7760_s1 }
0x29f3   :  { %v1661_v8 = vpop.permute.xlu1 %1660 }
0x29f7   :  { %v1670_v59 = vpop.permute.xlu1 %1669 }
0x2a2b   :  { %v1938_v40 = vpop.f32.mrf.mxu0 }
0x2a2c   :  { %v1945_v41 = vrot.slane %v1938_v40, 6 }
0x2a2d   :  { %v6504_v42 = vpop.f32.mrf.mxu0 }
0x2a2e   :  { %v1947_v16 = vadd.f32 %v1945_v41, %v8342_v48 }
0x2a2f   :  { %v1941_v49 = vpop.f32.mrf.mxu0 }
0x2a30   :  { %7067 = vtanh.f32 %v1947_v16  ;;  %v6056_v21 = vmul.f32 -1.442695, %v1947_v16 }
0x2a31   :  { %v6505_v50 = vpop.f32.mrf.mxu0 }
0x2a32   :  { %7069 = vpow2.f32 %v6056_v21 }
0x2a3d   :  { %v7068_v52 = vpop.eup %7067 }
0x2a3e   :  { %1960 = vrot.lane.b32.xlu0 %v7068_v52, %s7741_s18 }
0x2a3f   :  { %v7070_v43 = vpop.eup %7069 }
0x2a40   :  { %v1951_v53 = vadd.f32 1.0, %v7070_v43 }
0x2a42   :  { %7071 = vrcp.f32 %v1951_v53 }
0x2a4f   :  { %v7072_v35 = vpop.eup %7071 }
0x2a50   :  { %v1958_v60 = vmul.f32 %v7072_v35, %v1956_v58 }
0x2ab0   :  { %v1961_v54 = vpop.permute.xlu0 %1960 }
0x2ab1   :  { %v1963_v45 = vmul.f32 %v7072_v35, %v1961_v54 }
0x2ab3   :  { %1965 = vrot.lane.b32.xlu0 %v1963_v45, %s7760_s1 }
0x2b25   :  { %v1966_v0 = vpop.permute.xlu0 %1965 }
0x2b26   :  { %v1968_v1 = vadd.f32 %v1966_v0, %v1958_v60 }
0x2b28   :  { %7073 = vtanh.f32 %v1968_v1  ;;  %v2035_v39 = vrot.slane %v1968_v1, 6 }
0x2b35   :  { %v7074_v46 = vpop.eup %7073 }
0x2b36   :  { %1971 = vrot.lane.b32.xlu0 %v7074_v46, %s7741_s18 }
0x2b3a   :  { %1664 = vrot.lane.b32.xlu0 %v8185_v18, %s7741_s18  ;;  %v1679_v18 = vpop.permute.xlu1 %1678 }
0x2b3e   :  { %1673 = vrot.lane.b32.xlu0 %v8169_v47, %s7741_s18  ;;  %v1688_v28 = vpop.permute.xlu1 %1687 }
0x2b42   :  { %1682 = vrot.lane.b32.xlu0 %v8153_v17, %s7741_s18 }
0x2b46   :  { %1691 = vrot.lane.b32.xlu0 %v8128_v38, %s7741_s18 }
0x2ba8   :  { %v1972_v9 = vpop.permute.xlu0 %1971 }
0x2ba9   :  { %v1974_v13 = vmul.f32 %v7072_v35, %v1972_v9 }
0x2bab   :  { %v1975_v23 = vpack.c.bf16 %v1974_v13, %v1974_v13 }
0x2bac   :  { %v1665_v10 = vpop.permute.xlu0 %1664 }
0x2bad   :  { %v1977_v15 = vrot.slane %v1975_v23, 1  ;;  %v1667_v17 = vsel %vm376_vm3, %v1661_v8, %v1665_v10 }
0x2baf   :  { %1978 = vrot.lane.b32.xlu1 %v1977_v15, %s7760_s1 }
0x2bb0   :  { %v1674_v63 = vpop.permute.xlu0 %1673 }
0x2bb1   :  { %v1676_v47 = vsel %vm376_vm3, %v1670_v59, %v1674_v63 }
0x2bb2   :  { %v1701_v38 = vsel %vm1695_vm4, %v1667_v17, %v1676_v47 }
0x2bb4   :  { %v1683_v34 = vpop.permute.xlu0 %1682 }
0x2bb5   :  { %v1685_v57 = vsel %vm376_vm3, %v1679_v18, %v1683_v34 }
0x2bb6   :  { %v1702_v19 = vsel %vm1697_vm5, %v1701_v38, %v1685_v57 }
0x2bb8   :  { %v1692_v51 = vpop.permute.xlu0 %1691 }
0x2bb9   :  { %v1694_v20 = vsel %vm376_vm3, %v1688_v28, %v1692_v51 }
0x2bba   :  { %v1703_v22 = vsel %vm1699_vm6, %v1702_v19, %v1694_v20 }
0x2bbb   :  { %6051 = vmatmul.mubr.msk.f32.gmra.mxu1 %vm1732_vm7, %v1703_v22 }
0x2bbc   :  { %6510 = vmatprep.mubr.msk.bf16.mxu1 %vm7758_vm0, %v7757_v2 }
0x2c21   :  { %v1979_v25 = vpop.permute.xlu1 %1978 }
0x2c22   :  { %6511 = vmatmul.mubr.msk.bf16.vlgmr.msra.gmra.mxu1 %vm376_vm3, %v1979_v25 }
0x2c23   :  { %6523 = vmatpush3.bf16.msra.mxu1 %v8265_v14  ;;  %6526 = vmatprep.mubr.msk.bf16.mxu1 %vm7758_vm0, %v7757_v2 }
0x2c24   :  { %6524 = vmatprep.subr.bf16.mxu1 %v7757_v2 }
0x2c27   :  { %6525 = vmatpush3.bf16.msra.mxu1 %v8274_v24 }
0x2c28   :  { %6538 = vmatprep.subr.bf16.mxu1 %v7757_v2 }
0x2c7b   :  { %v8401_v29 = vpop.f32.mrf.mxu1 }
0x2c7c   :  { %v8431_v28 = vadd.f32 %v8401_v29, %v8339_v7 }
0x2c7d   :  { %v8403_v30 = vpop.f32.mrf.mxu1 }
0x2ce2   :  { %v2017_v31 = vpop.f32.mrf.mxu1 }
0x2ce3   :  { %v2024_v44 = vrot.slane %v2017_v31, 4 }
0x2ce4   :  { %v6512_v6 = vpop.f32.mrf.mxu1 }
0x2ce5   :  { %v2026_v62 = vadd.f32 %v2024_v44, %v8342_v48 }
0x2ce6   :  { %v2020_v32 = vpop.f32.mrf.mxu1 }
0x2ce7   :  { %7075 = vtanh.f32 %v2026_v62  ;;  %v6058_v11 = vmul.f32 -1.442695, %v2026_v62 }
0x2ce8   :  { %v6513_v33 = vpop.f32.mrf.mxu1 }
0x2ce9   :  { %7077 = vpow2.f32 %v6058_v11 }
0x2cf4   :  { %v7076_v55 = vpop.eup %7075 }
0x2cf5   :  { %2039 = vrot.lane.b32.xlu0 %v7076_v55, %s7741_s18 }
0x2cf6   :  { %v7078_v36 = vpop.eup %7077 }
0x2cf7   :  { %v2030_v37 = vadd.f32 1.0, %v7078_v36 }
0x2cf9   :  { %7079 = vrcp.f32 %v2030_v37 }
0x2d06   :  { %v7080_v61 = vpop.eup %7079 }
0x2d07   :  { %v2037_v40 = vmul.f32 %v7080_v61, %v2035_v39 }
0x2d67   :  { %v2040_v56 = vpop.permute.xlu0 %2039 }
0x2d68   :  { %v2042_v27 = vmul.f32 %v7080_v61, %v2040_v56 }
0x2d6a   :  { %2044 = vrot.lane.b32.xlu1 %v2042_v27, %s7760_s1 }
0x2ddc   :  { %v2045_v41 = vpop.permute.xlu1 %2044 }
0x2ddd   :  { %v2047_v42 = vadd.f32 %v2045_v41, %v2037_v40 }
0x2ddf   :  { %7081 = vtanh.f32 %v2047_v42  ;;  %v2114_v10 = vrot.slane %v2047_v42, 6 }
0x2dec   :  { %v7082_v16 = vpop.eup %7081 }
0x2ded   :  { %2050 = vrot.lane.b32.xlu0 %v7082_v16, %s7741_s18 }
0x2e5f   :  { %v2051_v49 = vpop.permute.xlu0 %2050 }
0x2e60   :  { %v2053_v50 = vmul.f32 %v7080_v61, %v2051_v49 }
0x2e62   :  { %v2054_v52 = vpack.c.bf16 %v2053_v50, %v2053_v50 }
0x2e64   :  { %v2056_v21 = vrot.slane %v2054_v52, 2 }
0x2e66   :  { %2057 = vrot.lane.b32.xlu1 %v2056_v21, %s7760_s1 }
0x2ed8   :  { %v2058_v43 = vpop.permute.xlu1 %2057 }
0x2ed9   :  { %6519 = vmatmul.mubr.msk.bf16.vlgmr.msra.gmra.mxu0 %vm376_vm3, %v2058_v43 }
0x2eda   :  { %6531 = vmatpush3.bf16.msra.mxu0 %v8265_v14  ;;  %6534 = vmatprep.mubr.msk.bf16.mxu0 %vm7758_vm0, %v7757_v2 }
0x2edb   :  { %6532 = vmatprep.subr.bf16.mxu0 %v7757_v2 }
0x2ede   :  { %6533 = vmatpush3.bf16.msra.mxu0 %v8274_v24 }
0x2edf   :  { %6546 = vmatprep.subr.bf16.mxu0 %v7757_v2 }
0x2f99   :  { %v2096_v53 = vpop.f32.mrf.mxu0 }
0x2f9a   :  { %v2103_v35 = vrot.slane %v2096_v53, 2 }
0x2f9b   :  { %v6520_v54 = vpop.f32.mrf.mxu0 }
0x2f9c   :  { %v2105_v45 = vadd.f32 %v2103_v35, %v8342_v48 }
0x2f9d   :  { %v2099_v58 = vpop.f32.mrf.mxu0 }
0x2f9e   :  { %7083 = vtanh.f32 %v2105_v45  ;;  %v6060_v1 = vmul.f32 -1.442695, %v2105_v45 }
0x2f9f   :  { %v6521_v60 = vpop.f32.mrf.mxu0 }
0x2fa0   :  { %7085 = vpow2.f32 %v6060_v1 }
0x2fab   :  { %v7084_v0 = vpop.eup %7083 }
0x2fac   :  { %2118 = vrot.lane.b32.xlu0 %v7084_v0, %s7741_s18 }
0x2fad   :  { %v7086_v46 = vpop.eup %7085 }
0x2fae   :  { %v2109_v8 = vadd.f32 1.0, %v7086_v46 }
0x2fb0   :  { %7087 = vrcp.f32 %v2109_v8 }
0x2fbd   :  { %v7088_v9 = vpop.eup %7087 }
0x2fbe   :  { %v2116_v15 = vmul.f32 %v7088_v9, %v2114_v10 }
0x301e   :  { %v2119_v13 = vpop.permute.xlu0 %2118 }
0x301f   :  { %v2121_v23 = vmul.f32 %v7088_v9, %v2119_v13 }
0x3021   :  { %2123 = vrot.lane.b32.xlu1 %v2121_v23, %s7760_s1  ;;  %v8457_v23 = vld [vmem:[#allocation10] sm:$0xff]  }
0x3093   :  { %v2124_v59 = vpop.permute.xlu1 %2123 }
0x3094   :  { %v2126_v48 = vadd.f32 %v2124_v59, %v2116_v15 }
0x3096   :  { %7089 = vtanh.f32 %v2126_v48  ;;  %v2190_v7 = vrot.slane %v2126_v48, 6 }
0x30a3   :  { %v7090_v63 = vpop.eup %7089 }
0x30a4   :  { %2129 = vrot.lane.b32.xlu0 %v7090_v63, %s7741_s18 }
0x3116   :  { %v2130_v18 = vpop.permute.xlu0 %2129 }
0x3117   :  { %v2132_v34 = vmul.f32 %v7088_v9, %v2130_v18  ;;  %v8453_v9 = vld [vmem:[#allocation10 + $0x8] sm:$0xff]  }
0x3119   :  { %v2133_v47 = vpack.c.bf16 %v2132_v34, %v2132_v34  ;;  %v8474_v34 = vrot.slane %v8335_v3, %v7936_v5 }
0x311b   :  { %v2135_v57 = vrot.slane %v2133_v47, 3 }
0x311d   :  { %2136 = vrot.lane.b32.xlu1 %v2135_v57, %s7760_s1  ;;  %v8478_v57 = vadd.f32 %v8403_v30, %v8474_v34 }
0x318f   :  { %v2137_v17 = vpop.permute.xlu1 %2136 }
0x3190   :  { %6527 = vmatmul.mubr.msk.bf16.vlgmr.msra.gmra.mxu1 %vm376_vm3, %v2137_v17 }
0x3191   :  { %6539 = vmatpush3.bf16.msra.mxu1 %v8265_v14  ;;  %6542 = vmatprep.mubr.msk.bf16.mxu1 %vm7758_vm0, %v7757_v2 }
0x3192   :  { %6540 = vmatprep.subr.bf16.mxu1 %v7757_v2 }
0x3195   :  { %6541 = vmatpush3.bf16.msra.mxu1 %v8274_v24 }
0x3196   :  { %6554 = vmatprep.subr.bf16.mxu1 %v7757_v2 }
0x3250   :  { %v2175_v38 = vpop.f32.mrf.mxu1 }
0x3251   :  { %v2181_v51 = vadd.f32 %v2175_v38, %v8431_v28 }
0x3252   :  { %v6528_v19 = vpop.f32.mrf.mxu1 }
0x3253   :  { %7091 = vtanh.f32 %v2181_v51  ;;  %v6062_v31 = vmul.f32 -1.442695, %v2181_v51 }
0x3254   :  { %v2178_v20 = vpop.f32.mrf.mxu1 }
0x3255   :  { %7093 = vpow2.f32 %v6062_v31 }
0x3256   :  { %v6529_v22 = vpop.f32.mrf.mxu1 }
0x3260   :  { %v7092_v25 = vpop.eup %7091 }
0x3261   :  { %2194 = vrot.lane.b32.xlu0 %v7092_v25, %s7741_s18 }
0x3262   :  { %v7094_v44 = vpop.eup %7093 }
0x3263   :  { %v2185_v6 = vadd.f32 1.0, %v7094_v44 }
0x3265   :  { %7095 = vrcp.f32 %v2185_v6 }
0x3272   :  { %v7096_v62 = vpop.eup %7095 }
0x3273   :  { %v2192_v29 = vmul.f32 %v7096_v62, %v2190_v7 }
0x32d3   :  { %v2195_v32 = vpop.permute.xlu0 %2194 }
0x32d4   :  { %v2197_v33 = vmul.f32 %v7096_v62, %v2195_v32 }
0x32d6   :  { %2199 = vrot.lane.b32.xlu1 %v2197_v33, %s7760_s1 }
0x3348   :  { %v2200_v55 = vpop.permute.xlu1 %2199 }
0x3349   :  { %v2202_v11 = vadd.f32 %v2200_v55, %v2192_v29 }
0x334b   :  { %7097 = vtanh.f32 %v2202_v11  ;;  %v2268_v35 = vrot.slane %v2202_v11, 6 }
0x3358   :  { %v7098_v36 = vpop.eup %7097 }
0x3359   :  { %2205 = vrot.lane.b32.xlu0 %v7098_v36, %s7741_s18 }
0x33cb   :  { %v2206_v37 = vpop.permute.xlu0 %2205 }
0x33cc   :  { %v2208_v61 = vmul.f32 %v7096_v62, %v2206_v37 }
0x33ce   :  { %v2209_v56 = vpack.c.bf16 %v2208_v61, %v2208_v61 }
0x33d0   :  { %2211 = vrot.lane.b32.xlu1 %v2209_v56, %s7760_s1 }
0x3442   :  { %v2212_v27 = vpop.permute.xlu1 %2211 }
0x3443   :  { %6535 = vmatmul.mubr.msk.bf16.vlgmr.msra.gmra.mxu0 %vm376_vm3, %v2212_v27 }
0x3444   :  { %6547 = vmatpush3.bf16.msra.mxu0 %v8265_v14  ;;  %6550 = vmatprep.mubr.msk.bf16.mxu0 %vm7758_vm0, %v7757_v2 }
0x3445   :  { %6548 = vmatprep.subr.bf16.mxu0 %v7757_v2 }
0x3448   :  { %6549 = vmatpush3.bf16.msra.mxu0 %v8274_v24 }
0x3449   :  { %6562 = vmatprep.subr.bf16.mxu0 %v7757_v2 }
0x3503   :  { %v2250_v39 = vpop.f32.mrf.mxu0 }
0x3504   :  { %v2257_v40 = vrot.slane %v2250_v39, 6 }
0x3505   :  { %v6536_v41 = vpop.f32.mrf.mxu0 }
0x3506   :  { %v2259_v42 = vadd.f32 %v2257_v40, %v8431_v28 }
0x3507   :  { %v2253_v16 = vpop.f32.mrf.mxu0 }
0x3508   :  { %7099 = vtanh.f32 %v2259_v42  ;;  %v6064_v14 = vmul.f32 -1.442695, %v2259_v42 }
0x3509   :  { %v6537_v49 = vpop.f32.mrf.mxu0 }
0x350a   :  { %7101 = vpow2.f32 %v6064_v14 }
0x3515   :  { %v7100_v50 = vpop.eup %7099 }
0x3516   :  { %2272 = vrot.lane.b32.xlu0 %v7100_v50, %s7741_s18 }
0x3517   :  { %v7102_v52 = vpop.eup %7101 }
0x3518   :  { %v2263_v21 = vadd.f32 1.0, %v7102_v52 }
0x351a   :  { %7103 = vrcp.f32 %v2263_v21 }
0x3527   :  { %v7104_v43 = vpop.eup %7103 }
0x3528   :  { %v2270_v54 = vmul.f32 %v7104_v43, %v2268_v35 }
0x3588   :  { %v2273_v24 = vpop.permute.xlu0 %2272 }
0x3589   :  { %v2275_v53 = vmul.f32 %v7104_v43, %v2273_v24 }
0x358b   :  { %2277 = vrot.lane.b32.xlu1 %v2275_v53, %s7760_s1 }
0x35fd   :  { %v2278_v45 = vpop.permute.xlu1 %2277 }
0x35fe   :  { %v8448_v58 = vadd.f32 %v2278_v45, %v2270_v54 }
0x3600   :  { %7105 = vtanh.f32 %v8448_v58  ;;  %v2347_v36 = vrot.slane %v8448_v58, 6 }
0x360d   :  { %v7106_v60 = vpop.eup %7105 }
0x360e   :  { %2283 = vrot.lane.b32.xlu0 %v7106_v60, %s7741_s18 }
0x3680   :  { %v2284_v0 = vpop.permute.xlu0 %2283 }
0x3681   :  { %v2286_v1 = vmul.f32 %v7104_v43, %v2284_v0 }
0x3683   :  { %v2287_v46 = vpack.c.bf16 %v2286_v1, %v2286_v1 }
0x3685   :  { %v2289_v8 = vrot.slane %v2287_v46, 1 }
0x3687   :  { %2290 = vrot.lane.b32.xlu1 %v2289_v8, %s7760_s1 }
0x36f9   :  { %v2291_v13 = vpop.permute.xlu1 %2290 }
0x36fa   :  { %6543 = vmatmul.mubr.msk.bf16.vlgmr.msra.gmra.mxu1 %vm376_vm3, %v2291_v13 }
0x36fb   :  { %6555 = vmatpush3.bf16.msra.mxu1 %v8453_v9  ;;  %6558 = vmatprep.mubr.msk.bf16.mxu1 %vm7758_vm0, %v7757_v2 }
0x36fc   :  { %6556 = vmatprep.subr.bf16.mxu1 %v7757_v2 }
0x36ff   :  { %6557 = vmatpush3.bf16.msra.mxu1 %v8457_v23 }
0x3700   :  { %6570 = vmatprep.subr.bf16.mxu1 %v7757_v2 }
0x3702   :  { %6559 = vmatmul.mubr.bf16.vlgmr.msra.gmra.mxu1 %v7759_v12 }
0x3703   :  { %6571 = vmatpush3.bf16.msra.mxu1 %v8453_v9  ;;  %6574 = vmatprep.mubr.msk.bf16.mxu1 %vm7758_vm0, %v7757_v2 }
0x3704   :  { %6572 = vmatprep.subr.bf16.mxu1 %v7757_v2 }
0x3707   :  { %6573 = vmatpush3.bf16.msra.mxu1 %v8457_v23 }
0x3708   :  { %6586 = vmatprep.subr.bf16.mxu1 %v7757_v2 }
0x37ba   :  { %v2329_v10 = vpop.f32.mrf.mxu1 }
0x37bb   :  { %v2336_v15 = vrot.slane %v2329_v10, 4 }
0x37bc   :  { %v6544_v59 = vpop.f32.mrf.mxu1 }
0x37bd   :  { %v2338_v48 = vadd.f32 %v2336_v15, %v8431_v28 }
0x37be   :  { %v2332_v63 = vpop.f32.mrf.mxu1 }
0x37bf   :  { %7107 = vtanh.f32 %v2338_v48  ;;  %v6066_v3 = vmul.f32 -1.442695, %v2338_v48 }
0x37c0   :  { %v6545_v18 = vpop.f32.mrf.mxu1 }
0x37c2   :  { %v2495_v47 = vpop.f32.mrf.mxu1 }
0x37c3   :  { %v2502_v17 = vrot.slane %v2495_v47, 2 }
0x37c4   :  { %v6560_v38 = vpop.f32.mrf.mxu1 }
0x37c5   :  { %v2504_v51 = vadd.f32 %v2502_v17, %v8478_v57 }
0x37c6   :  { %v2498_v19 = vpop.f32.mrf.mxu1 }
0x37c7   :  { %7109 = vtanh.f32 %v2504_v51  ;;  %v6071_v31 = vmul.f32 -1.442695, %v2504_v51 }
0x37c8   :  { %v6561_v20 = vpop.f32.mrf.mxu1  ;;  %7111 = vpow2.f32 %v6066_v3 }
0x37c9   :  { %7113 = vpow2.f32 %v6071_v31 }
0x37cc   :  { %v7108_v22 = vpop.eup %7107 }
0x37cd   :  { %2351 = vrot.lane.b32.xlu0 %v7108_v22, %s7741_s18 }
0x37d4   :  { %v7110_v25 = vpop.eup %7109 }
0x37d5   :  { %2514 = vrot.lane.b32.xlu1 %v7110_v25, %s7741_s18  ;;  %v7112_v44 = vpop.eup %7111 }
0x37d6   :  { %v2342_v30 = vadd.f32 1.0, %v7112_v44  ;;  %v7114_v6 = vpop.eup %7113 }
0x37d7   :  { %v2508_v62 = vadd.f32 1.0, %v7114_v6 }
0x37d8   :  { %7115 = vrcp.f32 %v2342_v30 }
0x37d9   :  { %7117 = vrcp.f32 %v2508_v62 }
0x37e5   :  { %v7116_v32 = vpop.eup %7115 }
0x37e6   :  { %v7118_v29 = vpop.eup %7117  ;;  %v2349_v37 = vmul.f32 %v7116_v32, %v2347_v36 }
0x37e7   :  { %v2512_v27 = vmul.f32 0.0, %v7118_v29 }
0x383f   :  { %v2352_v33 = vpop.permute.xlu0 %2351 }
0x3840   :  { %v2354_v7 = vmul.f32 %v7116_v32, %v2352_v33 }
0x3842   :  { %2356 = vrot.lane.b32.xlu0 %v2354_v7, %s7760_s1 }
0x3847   :  { %v2515_v55 = vpop.permute.xlu1 %2514 }
0x3848   :  { %v2517_v11 = vmul.f32 %v7118_v29, %v2515_v55 }
0x384a   :  { %2519 = vrot.lane.b32.xlu1 %v2517_v11, %s7760_s1 }
0x38b4   :  { %v2357_v61 = vpop.permute.xlu0 %2356 }
0x38b5   :  { %v8486_v56 = vadd.f32 %v2357_v61, %v2349_v37 }
0x38b7   :  { %7119 = vtanh.f32 %v8486_v56 }
0x38bc   :  { %v2520_v39 = vpop.permute.xlu1 %2519 }
0x38bd   :  { %v2522_v40 = vadd.f32 %v2520_v39, %v2512_v27 }
0x38bf   :  { %7121 = vtanh.f32 %v2522_v40  ;;  %v2589_v38 = vrot.slane %v2522_v40, 2 }
0x38c4   :  { %v7120_v41 = vpop.eup %7119 }
0x38c5   :  { %2362 = vrot.lane.b32.xlu0 %v7120_v41, %s7741_s18 }
0x38cc   :  { %v7122_v42 = vpop.eup %7121 }
0x38cd   :  { %2525 = vrot.lane.b32.xlu1 %v7122_v42, %s7741_s18 }
0x3937   :  { %v2363_v16 = vpop.permute.xlu0 %2362 }
0x3938   :  { %v2365_v49 = vmul.f32 %v7116_v32, %v2363_v16 }
0x393a   :  { %v2366_v50 = vpack.c.bf16 %v2365_v49, %v2365_v49 }
0x393c   :  { %v2368_v14 = vrot.slane %v2366_v50, 2 }
0x393e   :  { %2369 = vrot.lane.b32.xlu0 %v2368_v14, %s7760_s1 }
0x393f   :  { %v2526_v52 = vpop.permute.xlu1 %2525 }
0x3940   :  { %v2528_v21 = vmul.f32 %v7118_v29, %v2526_v52 }
0x3942   :  { %v2529_v43 = vpack.c.bf16 %v2528_v21, %v2528_v21 }
0x3944   :  { %v2531_v24 = vrot.slane %v2529_v43, 3 }
0x3946   :  { %2532 = vrot.lane.b32.xlu1 %v2531_v24, %s7760_s1 }
0x39b0   :  { %v2370_v53 = vpop.permute.xlu0 %2369 }
0x39b1   :  { %6551 = vmatmul.mubr.msk.bf16.vlgmr.msra.gmra.mxu0 %vm376_vm3, %v2370_v53 }
0x39b2   :  { %6563 = vmatpush3.bf16.msra.mxu0 %v8453_v9  ;;  %6566 = vmatprep.mubr.msk.bf16.mxu0 %vm7758_vm0, %v7757_v2 }
0x39b3   :  { %6564 = vmatprep.subr.bf16.mxu0 %v7757_v2 }
0x39b6   :  { %6565 = vmatpush3.bf16.msra.mxu0 %v8457_v23 }
0x39b7   :  { %6578 = vmatprep.subr.bf16.mxu0 %v7757_v2 }
0x39b8   :  { %v2533_v35 = vpop.permute.xlu1 %2532 }
0x39b9   :  { %6567 = vmatmul.mubr.msk.bf16.vlgmr.msra.gmra.mxu0 %vm376_vm3, %v2533_v35 }
0x39ba   :  { %6579 = vmatpush3.bf16.msra.mxu0 %v8453_v9  ;;  %6582 = vmatprep.mubr.msk.bf16.mxu0 %vm7758_vm0, %v7757_v2 }
0x39bb   :  { %6580 = vmatprep.subr.bf16.mxu0 %v7757_v2 }
0x39be   :  { %6581 = vmatpush3.bf16.msra.mxu0 %v8457_v23 }
0x39bf   :  { %6594 = vmatprep.subr.bf16.mxu0 %v7757_v2 }
0x3a71   :  { %v8507_v54 = vpop.f32.mrf.mxu0 }
0x3a73   :  { %v6552_v45 = vpop.f32.mrf.mxu0 }
0x3a75   :  { %v2411_v58 = vpop.f32.mrf.mxu0 }
0x3a77   :  { %v6553_v60 = vpop.f32.mrf.mxu0 }
0x3a79   :  { %v2571_v0 = vpop.f32.mrf.mxu0 }
0x3a7a   :  { %v2578_v1 = vrot.slane %v2571_v0, 4 }
0x3a7b   :  { %v6568_v46 = vpop.f32.mrf.mxu0 }
0x3a7c   :  { %v2580_v8 = vadd.f32 %v2578_v1, %v8478_v57 }
0x3a7d   :  { %v2574_v13 = vpop.f32.mrf.mxu0 }
0x3a7e   :  { %7123 = vtanh.f32 %v2580_v8  ;;  %v6073_v59 = vmul.f32 -1.442695, %v2580_v8 }
0x3a7f   :  { %v6569_v10 = vpop.f32.mrf.mxu0 }
0x3a80   :  { %7125 = vpow2.f32 %v6073_v59 }
0x3a8b   :  { %v7124_v15 = vpop.eup %7123 }
0x3a8c   :  { %2593 = vrot.lane.b32.xlu0 %v7124_v15, %s7741_s18 }
0x3a8d   :  { %v7126_v48 = vpop.eup %7125 }
0x3a8e   :  { %v2584_v63 = vadd.f32 1.0, %v7126_v48 }
0x3a90   :  { %7127 = vrcp.f32 %v2584_v63 }
0x3a9d   :  { %v7128_v18 = vpop.eup %7127 }
0x3a9e   :  { %v2591_v51 = vmul.f32 %v7128_v18, %v2589_v38 }
0x3afe   :  { %v2594_v47 = vpop.permute.xlu0 %2593 }
0x3aff   :  { %v2596_v17 = vmul.f32 %v7128_v18, %v2594_v47 }
0x3b01   :  { %2598 = vrot.lane.b32.xlu1 %v2596_v17, %s7760_s1 }
0x3b73   :  { %v2599_v19 = vpop.permute.xlu1 %2598 }
0x3b74   :  { %v2601_v20 = vadd.f32 %v2599_v19, %v2591_v51  ;;  %v8546_v19 = vadd.f32 %v8399_v26, %v8474_v34 }
0x3b76   :  { %7129 = vtanh.f32 %v2601_v20  ;;  %v2668_v40 = vrot.slane %v2601_v20, 2 }
0x3b83   :  { %v7130_v22 = vpop.eup %7129 }
0x3b84   :  { %2604 = vrot.lane.b32.xlu0 %v7130_v22, %s7741_s18 }
0x3bf6   :  { %v2605_v25 = vpop.permute.xlu0 %2604 }
0x3bf7   :  { %v2607_v3 = vmul.f32 %v7128_v18, %v2605_v25 }
0x3bf9   :  { %v2608_v31 = vpack.c.bf16 %v2607_v3, %v2607_v3 }
0x3bfb   :  { %v2610_v44 = vrot.slane %v2608_v31, 2 }
0x3bfd   :  { %2611 = vrot.lane.b32.xlu1 %v2610_v44, %s7760_s1 }
0x3c6f   :  { %v2612_v30 = vpop.permute.xlu1 %2611 }
0x3c70   :  { %6575 = vmatmul.mubr.msk.bf16.vlgmr.msra.gmra.mxu1 %vm376_vm3, %v2612_v30 }
0x3c71   :  { %6587 = vmatpush3.bf16.msra.mxu1 %v8453_v9  ;;  %6590 = vmatprep.mubr.msk.bf16.mxu1 %vm7758_vm0, %v7757_v2 }
0x3c72   :  { %6588 = vmatprep.subr.bf16.mxu1 %v7757_v2 }
0x3c75   :  { %6589 = vmatpush3.bf16.msra.mxu1 %v8457_v23 }
0x3c76   :  { %6602 = vmatprep.subr.bf16.mxu1 %v7757_v2 }
0x3d30   :  { %v2650_v6 = vpop.f32.mrf.mxu1 }
0x3d31   :  { %v2657_v62 = vrot.slane %v2650_v6, 6 }
0x3d32   :  { %v6576_v32 = vpop.f32.mrf.mxu1 }
0x3d33   :  { %v2659_v33 = vadd.f32 %v2657_v62, %v8478_v57 }
0x3d34   :  { %v2653_v7 = vpop.f32.mrf.mxu1 }
0x3d35   :  { %7131 = vtanh.f32 %v2659_v33  ;;  %v6075_v11 = vmul.f32 -1.442695, %v2659_v33 }
0x3d36   :  { %v6577_v29 = vpop.f32.mrf.mxu1 }
0x3d37   :  { %7133 = vpow2.f32 %v6075_v11 }
0x3d42   :  { %v7132_v55 = vpop.eup %7131 }
0x3d43   :  { %2672 = vrot.lane.b32.xlu0 %v7132_v55, %s7741_s18 }
0x3d44   :  { %v7134_v36 = vpop.eup %7133 }
0x3d45   :  { %v2663_v37 = vadd.f32 1.0, %v7134_v36 }
0x3d47   :  { %7135 = vrcp.f32 %v2663_v37 }
0x3d54   :  { %v7136_v61 = vpop.eup %7135 }
0x3d55   :  { %v2670_v41 = vmul.f32 %v7136_v61, %v2668_v40 }
0x3db5   :  { %v2673_v27 = vpop.permute.xlu0 %2672 }
0x3db6   :  { %v2675_v39 = vmul.f32 %v7136_v61, %v2673_v27 }
0x3db8   :  { %2677 = vrot.lane.b32.xlu1 %v2675_v39, %s7760_s1 }
0x3e2a   :  { %v2678_v42 = vpop.permute.xlu1 %2677 }
0x3e2b   :  { %v2680_v16 = vadd.f32 %v2678_v42, %v2670_v41 }
0x3e2d   :  { %7137 = vtanh.f32 %v2680_v16  ;;  %v2744_v15 = vrot.slane %v2680_v16, 2 }
0x3e3a   :  { %v7138_v49 = vpop.eup %7137 }
0x3e3b   :  { %2683 = vrot.lane.b32.xlu0 %v7138_v49, %s7741_s18 }
0x3ead   :  { %v2684_v50 = vpop.permute.xlu0 %2683 }
0x3eae   :  { %v2686_v14 = vmul.f32 %v7136_v61, %v2684_v50 }
0x3eb0   :  { %v2687_v52 = vpack.c.bf16 %v2686_v14, %v2686_v14 }
0x3eb2   :  { %v2689_v21 = vrot.slane %v2687_v52, 1 }
0x3eb4   :  { %2690 = vrot.lane.b32.xlu1 %v2689_v21, %s7760_s1 }
0x3f26   :  { %v2691_v43 = vpop.permute.xlu1 %2690 }
0x3f27   :  { %6583 = vmatmul.mubr.msk.bf16.vlgmr.msra.gmra.mxu0 %vm376_vm3, %v2691_v43 }
0x3f28   :  { %6595 = vmatpush3.bf16.msra.mxu0 %v8453_v9  ;;  %6598 = vmatprep.mubr.msk.bf16.mxu0 %vm7758_vm0, %v7757_v2 }
0x3f29   :  { %6596 = vmatprep.subr.bf16.mxu0 %v7757_v2 }
0x3f2c   :  { %6597 = vmatpush3.bf16.msra.mxu0 %v8457_v23 }
0x3f2d   :  { %6610 = vmatprep.subr.bf16.mxu0 %v7757_v2 }
0x3fe7   :  { %v2729_v24 = vpop.f32.mrf.mxu0 }
0x3fe8   :  { %v2735_v53 = vadd.f32 %v2729_v24, %v8478_v57 }
0x3fe9   :  { %v6584_v35 = vpop.f32.mrf.mxu0 }
0x3fea   :  { %7139 = vtanh.f32 %v2735_v53  ;;  %v6077_v0 = vmul.f32 -1.442695, %v2735_v53 }
0x3feb   :  { %v2732_v45 = vpop.f32.mrf.mxu0 }
0x3fec   :  { %7141 = vpow2.f32 %v6077_v0 }
0x3fed   :  { %v6585_v58 = vpop.f32.mrf.mxu0 }
0x3ff7   :  { %v7140_v60 = vpop.eup %7139 }
0x3ff8   :  { %2748 = vrot.lane.b32.xlu0 %v7140_v60, %s7741_s18 }
0x3ff9   :  { %v7142_v1 = vpop.eup %7141 }
0x3ffa   :  { %v2739_v46 = vadd.f32 1.0, %v7142_v1 }
0x3ffc   :  { %7143 = vrcp.f32 %v2739_v46 }
0x4009   :  { %v7144_v8 = vpop.eup %7143 }
0x400a   :  { %v2746_v59 = vmul.f32 %v7144_v8, %v2744_v15 }
0x406a   :  { %v2749_v13 = vpop.permute.xlu0 %2748 }
0x406b   :  { %v2751_v10 = vmul.f32 %v7144_v8, %v2749_v13 }
0x406d   :  { %2753 = vrot.lane.b32.xlu1 %v2751_v10, %s7760_s1 }
0x40df   :  { %v2754_v57 = vpop.permute.xlu1 %2753 }
0x40e0   :  { %v2756_v48 = vadd.f32 %v2754_v57, %v2746_v59 }
0x40e2   :  { %7145 = vtanh.f32 %v2756_v48  ;;  %v2822_v26 = vrot.slane %v2756_v48, 2 }
0x40ef   :  { %v7146_v63 = vpop.eup %7145 }
0x40f0   :  { %2759 = vrot.lane.b32.xlu0 %v7146_v63, %s7741_s18 }
0x4162   :  { %v2760_v18 = vpop.permute.xlu0 %2759 }
0x4163   :  { %v2762_v47 = vmul.f32 %v7144_v8, %v2760_v18 }
0x4165   :  { %v2763_v17 = vpack.c.bf16 %v2762_v47, %v2762_v47 }
0x4167   :  { %2765 = vrot.lane.b32.xlu1 %v2763_v17, %s7760_s1 }
0x41d9   :  { %v2766_v38 = vpop.permute.xlu1 %2765 }
0x41da   :  { %6591 = vmatmul.mubr.msk.bf16.vlgmr.msra.gmra.mxu1 %vm376_vm3, %v2766_v38 }
0x41db   :  { %6603 = vmatpush3.bf16.msra.mxu1 %v8453_v9  ;;  %6606 = vmatprep.mubr.msk.bf16.mxu1 %vm7758_vm0, %v7757_v2 }
0x41dc   :  { %6604 = vmatprep.subr.bf16.mxu1 %v7757_v2 }
0x41df   :  { %6605 = vmatpush3.bf16.msra.mxu1 %v8457_v23 }
0x429a   :  { %v2804_v51 = vpop.f32.mrf.mxu1 }
0x429b   :  { %v2811_v20 = vrot.slane %v2804_v51, 2 }
0x429c   :  { %v6592_v22 = vpop.f32.mrf.mxu1 }
0x429d   :  { %v2813_v25 = vadd.f32 %v2811_v20, %v8546_v19 }
0x429e   :  { %v2807_v3 = vpop.f32.mrf.mxu1 }
0x429f   :  { %7147 = vtanh.f32 %v2813_v25  ;;  %v6079_v30 = vmul.f32 -1.442695, %v2813_v25 }
0x42a0   :  { %v6593_v31 = vpop.f32.mrf.mxu1 }
0x42a1   :  { %7149 = vpow2.f32 %v6079_v30 }
0x42ac   :  { %v7148_v44 = vpop.eup %7147 }
0x42ad   :  { %2826 = vrot.lane.b32.xlu0 %v7148_v44, %s7741_s18 }
0x42ae   :  { %v7150_v6 = vpop.eup %7149 }
0x42af   :  { %v2817_v62 = vadd.f32 1.0, %v7150_v6  ;;  %v2415_v6 = vrot.slane %v8507_v54, 2 }
0x42b1   :  { %7151 = vrcp.f32 %v2817_v62  ;;  %v2417_v62 = vadd.f32 %v2415_v6, %v8431_v28 }
0x42be   :  { %v7152_v32 = vpop.eup %7151 }
0x42bf   :  { %v2824_v34 = vmul.f32 %v7152_v32, %v2822_v26 }
0x431f   :  { %v2827_v33 = vpop.permute.xlu0 %2826 }
0x4320   :  { %v2829_v7 = vmul.f32 %v7152_v32, %v2827_v33 }
0x4322   :  { %2831 = vrot.lane.b32.xlu1 %v2829_v7, %s7760_s1 }
0x4394   :  { %v2832_v29 = vpop.permute.xlu1 %2831 }
0x4395   :  { %v2834_v55 = vadd.f32 %v2832_v29, %v2824_v34  ;;  %v6068_v29 = vmul.f32 -1.442695, %v2417_v62 }
0x4397   :  { %7153 = vtanh.f32 %v2834_v55  ;;  %v2901_v53 = vrot.slane %v2834_v55, 2 }
0x43a4   :  { %v7154_v11 = vpop.eup %7153 }
0x43a5   :  { %2837 = vrot.lane.b32.xlu0 %v7154_v11, %s7741_s18 }
0x4417   :  { %v2838_v36 = vpop.permute.xlu0 %2837 }
0x4418   :  { %v2840_v37 = vmul.f32 %v7152_v32, %v2838_v36 }
0x441a   :  { %v2841_v61 = vpack.c.bf16 %v2840_v37, %v2840_v37 }
0x441c   :  { %v2843_v27 = vrot.slane %v2841_v61, 3  ;;  %v2426_v61 = vrot.slane %v8486_v56, 6 }
0x441e   :  { %2844 = vrot.lane.b32.xlu1 %v2843_v27, %s7760_s1 }
0x4490   :  { %v2845_v39 = vpop.permute.xlu1 %2844 }
0x4491   :  { %6599 = vmatmul.mubr.msk.bf16.vlgmr.msra.gmra.mxu0 %vm376_vm3, %v2845_v39 }
0x4492   :  { %6611 = vmatpush3.bf16.msra.mxu0 %v8453_v9  ;;  %6614 = vmatprep.mubr.msk.bf16.mxu0 %vm7758_vm0, %v7757_v2 }
0x4493   :  { %6612 = vmatprep.subr.bf16.mxu0 %v7757_v2 }
0x4496   :  { %6613 = vmatpush3.bf16.msra.mxu0 %v8457_v23 }
0x4497   :  { %6618 = vmatprep.subr.bf16.mxu0 %v7757_v2 }
0x4551   :  { %v2883_v40 = vpop.f32.mrf.mxu0 }
0x4552   :  { %v2890_v41 = vrot.slane %v2883_v40, 4 }
0x4553   :  { %v6600_v42 = vpop.f32.mrf.mxu0 }
0x4554   :  { %v2892_v16 = vadd.f32 %v2890_v41, %v8546_v19 }
0x4555   :  { %v2886_v49 = vpop.f32.mrf.mxu0 }
0x4556   :  { %7155 = vtanh.f32 %v2892_v16  ;;  %v6081_v9 = vmul.f32 -1.442695, %v2892_v16 }
0x4557   :  { %v6601_v50 = vpop.f32.mrf.mxu0 }
0x4558   :  { %7157 = vpow2.f32 %v6081_v9 }
0x4563   :  { %v7156_v14 = vpop.eup %7155 }
0x4564   :  { %2905 = vrot.lane.b32.xlu0 %v7156_v14, %s7741_s18 }
0x4565   :  { %v7158_v52 = vpop.eup %7157 }
0x4566   :  { %v2896_v21 = vadd.f32 1.0, %v7158_v52 }
0x4568   :  { %7159 = vrcp.f32 %v2896_v21 }
0x4575   :  { %v7160_v43 = vpop.eup %7159 }
0x4576   :  { %v2903_v35 = vmul.f32 %v7160_v43, %v2901_v53 }
0x45d6   :  { %v2906_v23 = vpop.permute.xlu0 %2905 }
0x45d7   :  { %v2908_v24 = vmul.f32 %v7160_v43, %v2906_v23 }
0x45d9   :  { %2910 = vrot.lane.b32.xlu1 %v2908_v24, %s7760_s1 }
0x464b   :  { %v2911_v45 = vpop.permute.xlu1 %2910 }
0x464c   :  { %v2913_v58 = vadd.f32 %v2911_v45, %v2903_v35 }
0x464e   :  { %7161 = vtanh.f32 %v2913_v58  ;;  %v2980_v25 = vrot.slane %v2913_v58, 2  ;;  %v3100_v58 = vld [vmem:[#allocation13 + $0x78] sm:$0xff] }
0x464f   :  { %3133 = vmatprep.subr.mxu1 %v3100_v58 }
0x465b   :  { %v7162_v60 = vpop.eup %7161 }
0x465c   :  { %2916 = vrot.lane.b32.xlu0 %v7162_v60, %s7741_s18  ;;  %v3099_v60 = vld [vmem:[#allocation13 + $0x70] sm:$0xff] }
0x46ce   :  { %v2917_v0 = vpop.permute.xlu0 %2916 }
0x46cf   :  { %v2919_v1 = vmul.f32 %v7160_v43, %v2917_v0  ;;  %v3098_v0 = vld [vmem:[#allocation13 + $0x68] sm:$0xff] }
0x46d1   :  { %v2920_v46 = vpack.c.bf16 %v2919_v1, %v2919_v1  ;;  %v3097_v1 = vld [vmem:[#allocation13 + $0x60] sm:$0xff] }
0x46d3   :  { %v2922_v8 = vrot.slane %v2920_v46, 2  ;;  %v3096_v46 = vld [vmem:[#allocation13 + $0x58] sm:$0xff] }
0x46d5   :  { %2923 = vrot.lane.b32.xlu1 %v2922_v8, %s7760_s1  ;;  %v8588_v8 = vld [vmem:[#allocation14 + $0x8] sm:$0xff]  }
0x4747   :  { %v2924_v13 = vpop.permute.xlu1 %2923 }
0x4748   :  { %6607 = vmatmul.mubr.msk.bf16.vlgmr.msra.gmra.mxu1 %vm376_vm3, %v2924_v13  ;;  %v3095_v13 = vld [vmem:[#allocation13 + $0x50] sm:$0xff] }
0x4749   :  { %3181 = vmatprep.mubr.f32.mxu1 %v7757_v2  ;;  %3134 = vmatpush1.msra.mxu1 %v3099_v60 }
0x474a   :  { %3135 = vmatprep.subr.mxu1 %v3098_v0 }
0x474b   :  { %3136 = vmatpush1.msra.mxu1 %v3097_v1 }
0x474c   :  { %3137 = vmatprep.subr.mxu1 %v3096_v46 }
0x474d   :  { %3138 = vmatpush1.msra.mxu1 %v3095_v13 }
0x4808   :  { %v2962_v10 = vpop.f32.mrf.mxu1 }
0x4809   :  { %v2969_v15 = vrot.slane %v2962_v10, 6  ;;  %v3094_v10 = vld [vmem:[#allocation13 + $0x48] sm:$0xff] }
0x480a   :  { %v6608_v59 = vpop.f32.mrf.mxu1  ;;  %3139 = vmatprep.subr.mxu1 %v3094_v10 }
0x480b   :  { %v2971_v57 = vadd.f32 %v2969_v15, %v8546_v19  ;;  %v8591_v15 = vld [vmem:[#allocation14] sm:$0xff]  }
0x480c   :  { %v2965_v48 = vpop.f32.mrf.mxu1  ;;  %v3093_v59 = vld [vmem:[#allocation13 + $0x40] sm:$0xff] }
0x480d   :  { %7163 = vtanh.f32 %v2971_v57  ;;  %v6083_v47 = vmul.f32 -1.442695, %v2971_v57  ;;  %v3092_v57 = vld [vmem:[#allocation13 + $0x38] sm:$0xff]  ;;  %v3091_v48 = vld [vmem:[#allocation13 + $0x30] sm:$0xff]  ;;  %3140 = vmatpush1.msra.mxu1 %v3093_v59 }
0x480e   :  { %v6609_v63 = vpop.f32.mrf.mxu1  ;;  %3141 = vmatprep.subr.mxu1 %v3092_v57 }
0x480f   :  { %7165 = vpow2.f32 %v6083_v47  ;;  %v3090_v47 = vld [vmem:[#allocation13 + $0x28] sm:$0xff]  ;;  %3142 = vmatpush1.msra.mxu1 %v3091_v48 }
0x4810   :  { %3143 = vmatprep.subr.mxu1 %v3090_v47 }
0x481a   :  { %v7164_v18 = vpop.eup %7163 }
0x481b   :  { %2984 = vrot.lane.b32.xlu0 %v7164_v18, %s7741_s18 }
0x481c   :  { %v7166_v17 = vpop.eup %7165 }
0x481d   :  { %v2975_v38 = vadd.f32 1.0, %v7166_v17  ;;  %v3089_v17 = vld [vmem:[#allocation13 + $0x20] sm:$0xff] }
0x481e   :  { %3144 = vmatpush1.msra.mxu1 %v3089_v17 }
0x481f   :  { %7167 = vrcp.f32 %v2975_v38  ;;  %v3088_v38 = vld [vmem:[#allocation13 + $0x18] sm:$0xff] }
0x4820   :  { %3145 = vmatprep.subr.mxu1 %v3088_v38 }
0x482c   :  { %v7168_v51 = vpop.eup %7167 }
0x482d   :  { %v2982_v3 = vmul.f32 %v7168_v51, %v2980_v25  ;;  %v3085_v25 = vld [vmem:[#allocation13] sm:$0xff] }
0x488d   :  { %v2985_v20 = vpop.permute.xlu0 %2984 }
0x488e   :  { %v2987_v22 = vmul.f32 %v7168_v51, %v2985_v20  ;;  %v3087_v20 = vld [vmem:[#allocation13 + $0x10] sm:$0xff] }
0x488f   :  { %3146 = vmatpush1.msra.mxu1 %v3087_v20 }
0x4890   :  { %2989 = vrot.lane.b32.xlu1 %v2987_v22, %s7760_s1  ;;  %v3086_v22 = vld [vmem:[#allocation13 + $0x8] sm:$0xff] }
0x4891   :  { %3147 = vmatprep.subr.mxu1 %v3086_v22 }
0x4892   :  { %3148 = vmatpush1.msra.mxu1 %v3085_v25 }
0x4893   :  { %6634 = vmatprep.subr.bf16.mxu1 %v7757_v2 }
0x4902   :  { %v2990_v31 = vpop.permute.xlu1 %2989 }
0x4903   :  { %v2992_v44 = vadd.f32 %v2990_v31, %v2982_v3 }
0x4905   :  { %7169 = vtanh.f32 %v2992_v44  ;;  %v3056_v53 = vrot.slane %v2992_v44, 2 }
0x4906   :  { %7171 = vtanh.f32 %v2417_v62 }
0x4907   :  { %7173 = vpow2.f32 %v6068_v29  ;;  %v8616_v29 = vld [vmem:[#allocation17] sm:$0x3] }
0x4912   :  { %v7170_v30 = vpop.eup %7169 }
0x4913   :  { %2995 = vrot.lane.b32.xlu0 %v7170_v30, %s7741_s18  ;;  %v7172_v34 = vpop.eup %7171 }
0x4914   :  { %v7174_v55 = vpop.eup %7173 }
0x4915   :  { %v2421_v11 = vadd.f32 1.0, %v7174_v55  ;;  %v3106_v55 = vrot.slane %v8616_v29, %v7934_v4 }
0x4917   :  { %7175 = vrcp.f32 %v2421_v11 }
0x4924   :  { %v8578_v28 = vpop.eup %7175 }
0x4925   :  { %v2428_v27 = vmul.f32 %v8578_v28, %v2426_v61 }
0x4985   :  { %v2996_v32 = vpop.permute.xlu0 %2995 }
0x4986   :  { %v2998_v33 = vmul.f32 %v7168_v51, %v2996_v32 }
0x4988   :  { %v2999_v7 = vpack.c.bf16 %v2998_v33, %v2998_v33 }
0x498a   :  { %v3001_v26 = vrot.slane %v2999_v7, 1 }
0x498c   :  { %3002 = vrot.lane.b32.xlu1 %v3001_v26, %s7760_s1 }
0x4990   :  { %2430 = vrot.lane.b32.xlu1 %v7172_v34, %s7741_s18 }
0x49fe   :  { %v3003_v36 = vpop.permute.xlu1 %3002 }
0x49ff   :  { %6615 = vmatmul.mubr.msk.bf16.vlgmr.msra.gmra.mxu0 %vm376_vm3, %v3003_v36 }
0x4a00   :  { %6622 = vmatprep.mubr.msk.bf16.mxu0 %vm7758_vm0, %v7757_v2  ;;  %6619 = vmatpush3.bf16.msra.mxu0 %v8588_v8 }
0x4a01   :  { %6620 = vmatprep.subr.bf16.mxu0 %v7757_v2 }
0x4a02   :  { %v2431_v54 = vpop.permute.xlu1 %2430 }
0x4a03   :  { %v2433_v37 = vmul.f32 %v8578_v28, %v2431_v54 }
0x4a04   :  { %6621 = vmatpush3.bf16.msra.mxu0 %v8591_v15 }
0x4a05   :  { %2435 = vrot.lane.b32.xlu1 %v2433_v37, %s7760_s1  ;;  %6626 = vmatprep.subr.bf16.mxu0 %v7757_v2 }
0x4a07   :  { %6623 = vmatmul.mubr.bf16.vlgmr.msra.gmra.mxu0 %v7759_v12 }
0x4a08   :  { %6627 = vmatpush3.bf16.msra.mxu0 %v8588_v8  ;;  %6630 = vmatprep.mubr.msk.bf16.mxu0 %vm7758_vm0, %v7757_v2 }
0x4a09   :  { %6628 = vmatprep.subr.bf16.mxu0 %v7757_v2 }
0x4a0c   :  { %6629 = vmatpush3.bf16.msra.mxu0 %v8591_v15 }
0x4a0d   :  { %6642 = vmatprep.subr.bf16.mxu0 %v7757_v2 }
0x4a77   :  { %v2436_v39 = vpop.permute.xlu1 %2435 }
0x4a78   :  { %v2438_v40 = vadd.f32 %v2436_v39, %v2428_v27 }
0x4a7a   :  { %7177 = vtanh.f32 %v2438_v40 }
0x4a87   :  { %v7178_v41 = vpop.eup %7177 }
0x4a88   :  { %2441 = vrot.lane.b32.xlu1 %v7178_v41, %s7741_s18 }
0x4abf   :  { %v3041_v42 = vpop.f32.mrf.mxu0 }
0x4ac0   :  { %v3047_v16 = vadd.f32 %v3041_v42, %v8546_v19 }
0x4ac1   :  { %v6616_v49 = vpop.f32.mrf.mxu0 }
0x4ac2   :  { %7179 = vtanh.f32 %v3047_v16  ;;  %v6085_v52 = vmul.f32 -1.442695, %v3047_v16 }
0x4ac3   :  { %v3044_v50 = vpop.f32.mrf.mxu0 }
0x4ac4   :  { %7181 = vpow2.f32 %v6085_v52 }
0x4ac5   :  { %v6617_v14 = vpop.f32.mrf.mxu0 }
0x4ac7   :  { %v3238_v30 = vpop.f32.mrf.mxu0 }
0x4ac9   :  { %v6624_v6 = vpop.f32.mrf.mxu0 }
0x4acb   :  { %v3241_v62 = vpop.f32.mrf.mxu0 }
0x4acd   :  { %v6625_v32 = vpop.f32.mrf.mxu0 }
0x4acf   :  { %v7180_v9 = vpop.eup %7179 }
0x4ad0   :  { %3060 = vrot.lane.b32.xlu0 %v7180_v9, %s7741_s18 }
0x4ad1   :  { %v7182_v56 = vpop.eup %7181 }
0x4ad2   :  { %v3051_v21 = vadd.f32 1.0, %v7182_v56 }
0x4ad4   :  { %7183 = vrcp.f32 %v3051_v21 }
0x4ae1   :  { %v7184_v43 = vpop.eup %7183 }
0x4ae2   :  { %v3058_v35 = vmul.f32 %v7184_v43, %v3056_v53 }
0x4afa   :  { %v2442_v18 = vpop.permute.xlu1 %2441 }
0x4afb   :  { %v2444_v51 = vmul.f32 %v8578_v28, %v2442_v18 }
0x4b42   :  { %v3061_v23 = vpop.permute.xlu0 %3060 }
0x4b43   :  { %v3063_v24 = vmul.f32 %v7184_v43, %v3061_v23 }
0x4b45   :  { %3065 = vrot.lane.b32.xlu0 %v3063_v24, %s7760_s1 }
0x4bb7   :  { %v3066_v19 = vpop.permute.xlu0 %3065 }
0x4bb8   :  { %v3068_v45 = vadd.f32 %v3066_v19, %v3058_v35 }
0x4bba   :  { %7185 = vtanh.f32 %v3068_v45 }
0x4bc7   :  { %v7186_v63 = vpop.eup %7185 }
0x4bc8   :  { %3071 = vrot.lane.b32.xlu0 %v7186_v63, %s7741_s18 }
0x4bcc   :  { %3076 = vrot.lane.b32.xlu0 %v2444_v51, %s7760_s1 }
0x4c3a   :  { %v3072_v3 = vpop.permute.xlu0 %3071 }
0x4c3b   :  { %v3074_v31 = vmul.f32 %v7184_v43, %v3072_v3 }
0x4c3d   :  { %v3080_v44 = vrot.slane %v3074_v31, 2 }
0x4c3e   :  { %v3077_v33 = vpop.permute.xlu0 %3076 }
0x4c3f   :  { %3081 = vrot.lane.b32.xlu1 %v3080_v44, %s7741_s18 }
0x4cb1   :  { %v3082_v7 = vpop.permute.xlu1 %3081 }
0x4cb2   :  { %v3084_v26 = vsel %vm376_vm3, %v3077_v33, %v3082_v7 }
0x4cb3   :  { %v3114_v34 = vrot.slane %v3084_v26, 6 }
0x4cb5   :  { %6086 = vmatmul.mubr.msk.f32.vlgmr.msra.gmra.mxu1 %vm1732_vm7, %v3114_v34 }
0x4cb6   :  { %6635 = vmatpush3.bf16.msra.mxu1 %v8588_v8  ;;  %6638 = vmatprep.mubr.msk.bf16.mxu1 %vm7758_vm0, %v7757_v2 }
0x4cb7   :  { %6636 = vmatprep.subr.bf16.mxu1 %v7757_v2 }
0x4cba   :  { %6637 = vmatpush3.bf16.msra.mxu1 %v8591_v15 }
0x4cbb   :  { %6650 = vmatprep.subr.bf16.mxu1 %v7757_v2 }
0x4d75   :  { %v3183_v11 = vpop.f32.mrf.mxu1 }
0x4d76   :  { %v8620_v36 = vadd.f32 %v3183_v11, %v3106_v55 }
0x4d77   :  { %v8654_v47 = vpop.f32.mrf.mxu1 }
0x4d78   :  { %v3244_v28 = vadd.f32 %v3238_v30, %v8620_v36 }
0x4d7a   :  { %7187 = vtanh.f32 %v3244_v28  ;;  %v6089_v37 = vmul.f32 -1.442695, %v3244_v28 }
0x4d7c   :  { %7189 = vpow2.f32 %v6089_v37 }
0x4d87   :  { %v7188_v54 = vpop.eup %7187 }
0x4d88   :  { %3254 = vrot.lane.b32.xlu0 %v7188_v54, %s7741_s18 }
0x4d89   :  { %v7190_v61 = vpop.eup %7189 }
0x4d8a   :  { %v3248_v27 = vadd.f32 1.0, %v7190_v61 }
0x4d8c   :  { %7191 = vrcp.f32 %v3248_v27 }
0x4d99   :  { %v7192_v39 = vpop.eup %7191 }
0x4d9a   :  { %v3252_v42 = vmul.f32 0.0, %v7192_v39 }
0x4dfa   :  { %v3255_v40 = vpop.permute.xlu0 %3254 }
0x4dfb   :  { %v3257_v41 = vmul.f32 %v7192_v39, %v3255_v40 }
0x4dfd   :  { %3259 = vrot.lane.b32.xlu1 %v3257_v41, %s7760_s1 }
0x4e6f   :  { %v3260_v16 = vpop.permute.xlu1 %3259 }
0x4e70   :  { %v3262_v49 = vadd.f32 %v3260_v16, %v3252_v42 }
0x4e72   :  { %7193 = vtanh.f32 %v3262_v49 }
0x4e7f   :  { %v7194_v50 = vpop.eup %7193 }
0x4e80   :  { %3265 = vrot.lane.b32.xlu0 %v7194_v50, %s7741_s18 }
0x4ef2   :  { %v3266_v14 = vpop.permute.xlu0 %3265 }
0x4ef3   :  { %v8626_v9 = vmul.f32 %v7192_v39, %v3266_v14 }
0x4ef5   :  { %v3269_v52 = vpack.c.bf16 %v8626_v9, %v8626_v9 }
0x4ef7   :  { %3271 = vrot.lane.b32.xlu1 %v3269_v52, %s7760_s1 }
0x4f69   :  { %v3272_v56 = vpop.permute.xlu1 %3271 }
0x4f6a   :  { %6631 = vmatmul.mubr.msk.bf16.vlgmr.msra.gmra.mxu0 %vm376_vm3, %v3272_v56 }
0x4f6b   :  { %6643 = vmatpush3.bf16.msra.mxu0 %v8588_v8  ;;  %6646 = vmatprep.mubr.msk.bf16.mxu0 %vm7758_vm0, %v7757_v2 }
0x4f6c   :  { %6644 = vmatprep.subr.bf16.mxu0 %v7757_v2 }
0x4f6f   :  { %6645 = vmatpush3.bf16.msra.mxu0 %v8591_v15 }
0x4f70   :  { %6658 = vmatprep.subr.bf16.mxu0 %v7757_v2 }
0x502a   :  { %v3310_v21 = vpop.f32.mrf.mxu0 }
0x502b   :  { %v3316_v43 = vadd.f32 %v3310_v21, %v8620_v36 }
0x502c   :  { %v6632_v23 = vpop.f32.mrf.mxu0 }
0x502d   :  { %7195 = vtanh.f32 %v3316_v43  ;;  %v6091_v19 = vmul.f32 -1.442695, %v3316_v43 }
0x502e   :  { %v3313_v24 = vpop.f32.mrf.mxu0 }
0x502f   :  { %7197 = vpow2.f32 %v6091_v19 }
0x5030   :  { %v6633_v53 = vpop.f32.mrf.mxu0 }
0x503a   :  { %v7196_v35 = vpop.eup %7195 }
0x503b   :  { %3326 = vrot.lane.b32.xlu0 %v7196_v35, %s7741_s18 }
0x503c   :  { %v7198_v45 = vpop.eup %7197 }
0x503d   :  { %v3320_v58 = vadd.f32 1.0, %v7198_v45 }
0x503f   :  { %7199 = vrcp.f32 %v3320_v58 }
0x504c   :  { %v7200_v60 = vpop.eup %7199 }
0x504d   :  { %v3324_v46 = vmul.f32 %v7200_v60, %v3262_v49 }
0x50ad   :  { %v3327_v0 = vpop.permute.xlu0 %3326 }
0x50ae   :  { %v3329_v1 = vmul.f32 %v7200_v60, %v3327_v0 }
0x50b0   :  { %3331 = vrot.lane.b32.xlu1 %v3329_v1, %s7760_s1 }
0x5122   :  { %v3332_v13 = vpop.permute.xlu1 %3331 }
0x5123   :  { %v3334_v10 = vadd.f32 %v3332_v13, %v3324_v46 }
0x5125   :  { %7201 = vtanh.f32 %v3334_v10 }
0x5132   :  { %v7202_v59 = vpop.eup %7201 }
0x5133   :  { %3337 = vrot.lane.b32.xlu0 %v7202_v59, %s7741_s18 }
0x51a5   :  { %v3338_v57 = vpop.permute.xlu0 %3337 }
0x51a6   :  { %v8642_v48 = vmul.f32 %v7200_v60, %v3338_v57 }
0x51a8   :  { %v3341_v63 = vpack.c.bf16 %v8642_v48, %v8642_v48 }
0x51aa   :  { %3343 = vrot.lane.b32.xlu1 %v3341_v63, %s7760_s1 }
0x521c   :  { %v3344_v18 = vpop.permute.xlu1 %3343 }
0x521d   :  { %6639 = vmatmul.mubr.msk.bf16.vlgmr.msra.gmra.mxu1 %vm376_vm3, %v3344_v18 }
0x521e   :  { %6651 = vmatpush3.bf16.msra.mxu1 %v8588_v8  ;;  %6654 = vmatprep.mubr.msk.bf16.mxu1 %vm7758_vm0, %v7757_v2 }
0x521f   :  { %6652 = vmatprep.subr.bf16.mxu1 %v7757_v2 }
0x5222   :  { %6653 = vmatpush3.bf16.msra.mxu1 %v8591_v15 }
0x5223   :  { %6666 = vmatprep.subr.bf16.mxu1 %v7757_v2 }
0x52dd   :  { %v3382_v17 = vpop.f32.mrf.mxu1 }
0x52de   :  { %v3388_v38 = vadd.f32 %v3382_v17, %v8620_v36 }
0x52df   :  { %v6640_v51 = vpop.f32.mrf.mxu1 }
0x52e0   :  { %7203 = vtanh.f32 %v3388_v38  ;;  %v6093_v3 = vmul.f32 -1.442695, %v3388_v38 }
0x52e1   :  { %v3385_v20 = vpop.f32.mrf.mxu1 }
0x52e2   :  { %7205 = vpow2.f32 %v6093_v3 }
0x52e3   :  { %v6641_v22 = vpop.f32.mrf.mxu1 }
0x52ed   :  { %v7204_v25 = vpop.eup %7203 }
0x52ee   :  { %3398 = vrot.lane.b32.xlu0 %v7204_v25, %s7741_s18 }
0x52ef   :  { %v7206_v31 = vpop.eup %7205 }
0x52f0   :  { %v3392_v44 = vadd.f32 1.0, %v7206_v31 }
0x52f2   :  { %7207 = vrcp.f32 %v3392_v44 }
0x52ff   :  { %v7208_v30 = vpop.eup %7207 }
0x5300   :  { %v3396_v32 = vmul.f32 %v7208_v30, %v3334_v10 }
0x5360   :  { %v3399_v6 = vpop.permute.xlu0 %3398 }
0x5361   :  { %v3401_v62 = vmul.f32 %v7208_v30, %v3399_v6 }
0x5363   :  { %3403 = vrot.lane.b32.xlu1 %v3401_v62, %s7760_s1 }
0x53d5   :  { %v3404_v33 = vpop.permute.xlu1 %3403 }
0x53d6   :  { %v3406_v7 = vadd.f32 %v3404_v33, %v3396_v32 }
0x53d8   :  { %7209 = vtanh.f32 %v3406_v7 }
0x53e5   :  { %v7210_v26 = vpop.eup %7209 }
0x53e6   :  { %3409 = vrot.lane.b32.xlu0 %v7210_v26, %s7741_s18 }
0x5458   :  { %v3410_v34 = vpop.permute.xlu0 %3409 }
0x5459   :  { %v8660_v55 = vmul.f32 %v7208_v30, %v3410_v34 }
0x545b   :  { %v3413_v11 = vpack.c.bf16 %v8660_v55, %v8660_v55 }
0x545d   :  { %3415 = vrot.lane.b32.xlu1 %v3413_v11, %s7760_s1 }
0x54cf   :  { %v3416_v28 = vpop.permute.xlu1 %3415 }
0x54d0   :  { %6647 = vmatmul.mubr.msk.bf16.vlgmr.msra.gmra.mxu0 %vm376_vm3, %v3416_v28 }
0x54d1   :  { %6659 = vmatpush3.bf16.msra.mxu0 %v8588_v8  ;;  %6662 = vmatprep.mubr.msk.bf16.mxu0 %vm7758_vm0, %v7757_v2 }
0x54d2   :  { %6660 = vmatprep.subr.bf16.mxu0 %v7757_v2 }
0x54d5   :  { %6661 = vmatpush3.bf16.msra.mxu0 %v8591_v15 }
0x54d6   :  { %6674 = vmatprep.subr.bf16.mxu0 %v7757_v2 }
0x5590   :  { %v3454_v54 = vpop.f32.mrf.mxu0 }
0x5591   :  { %v3460_v37 = vadd.f32 %v3454_v54, %v8620_v36 }
0x5592   :  { %v6648_v61 = vpop.f32.mrf.mxu0 }
0x5593   :  { %7211 = vtanh.f32 %v3460_v37  ;;  %v6095_v41 = vmul.f32 -1.442695, %v3460_v37 }
0x5594   :  { %v3457_v27 = vpop.f32.mrf.mxu0 }
0x5595   :  { %7213 = vpow2.f32 %v6095_v41 }
0x5596   :  { %v6649_v39 = vpop.f32.mrf.mxu0 }
0x55a0   :  { %v7212_v40 = vpop.eup %7211 }
0x55a1   :  { %3470 = vrot.lane.b32.xlu0 %v7212_v40, %s7741_s18  ;;  %v8713_v40 = vld [vmem:[#allocation16 + $0x8] sm:$0xff]  }
0x55a2   :  { %v7214_v42 = vpop.eup %7213 }
0x55a3   :  { %v3464_v16 = vadd.f32 1.0, %v7214_v42  ;;  %v8717_v42 = vld [vmem:[#allocation16] sm:$0xff]  }
0x55a5   :  { %7215 = vrcp.f32 %v3464_v16 }
0x55b2   :  { %v7216_v49 = vpop.eup %7215 }
0x55b3   :  { %v3468_v52 = vmul.f32 %v7216_v49, %v3406_v7 }
0x5613   :  { %v3471_v50 = vpop.permute.xlu0 %3470 }
0x5614   :  { %v3473_v14 = vmul.f32 %v7216_v49, %v3471_v50 }
0x5616   :  { %3475 = vrot.lane.b32.xlu1 %v3473_v14, %s7760_s1  ;;  %v3110_v14 = vrot.slane %v8616_v29, %v7936_v5 }
0x5688   :  { %v3476_v56 = vpop.permute.xlu1 %3475 }
0x5689   :  { %v3478_v21 = vadd.f32 %v3476_v56, %v3468_v52 }
0x568b   :  { %7217 = vtanh.f32 %v3478_v21 }
0x5698   :  { %v7218_v43 = vpop.eup %7217 }
0x5699   :  { %3481 = vrot.lane.b32.xlu0 %v7218_v43, %s7741_s18 }
0x570b   :  { %v3482_v23 = vpop.permute.xlu0 %3481 }
0x570c   :  { %v8676_v24 = vmul.f32 %v7216_v49, %v3482_v23 }
0x570e   :  { %v3485_v53 = vpack.c.bf16 %v8676_v24, %v8676_v24 }
0x5710   :  { %3487 = vrot.lane.b32.xlu1 %v3485_v53, %s7760_s1 }
0x5782   :  { %v3488_v35 = vpop.permute.xlu1 %3487 }
0x5783   :  { %6655 = vmatmul.mubr.msk.bf16.vlgmr.msra.gmra.mxu1 %vm376_vm3, %v3488_v35 }
0x5784   :  { %6667 = vmatpush3.bf16.msra.mxu1 %v8588_v8  ;;  %6670 = vmatprep.mubr.msk.bf16.mxu1 %vm7758_vm0, %v7757_v2 }
0x5785   :  { %6668 = vmatprep.subr.bf16.mxu1 %v7757_v2 }
0x5788   :  { %6669 = vmatpush3.bf16.msra.mxu1 %v8591_v15 }
0x5789   :  { %6682 = vmatprep.subr.bf16.mxu1 %v7757_v2 }
0x5843   :  { %v3526_v19 = vpop.f32.mrf.mxu1 }
0x5844   :  { %v3532_v45 = vadd.f32 %v3526_v19, %v8620_v36 }
0x5845   :  { %v6656_v58 = vpop.f32.mrf.mxu1 }
0x5846   :  { %7219 = vtanh.f32 %v3532_v45  ;;  %v6097_v46 = vmul.f32 -1.442695, %v3532_v45 }
0x5847   :  { %v3529_v60 = vpop.f32.mrf.mxu1 }
0x5848   :  { %7221 = vpow2.f32 %v6097_v46 }
0x5849   :  { %v6657_v0 = vpop.f32.mrf.mxu1 }
0x5853   :  { %v7220_v1 = vpop.eup %7219 }
0x5854   :  { %3542 = vrot.lane.b32.xlu0 %v7220_v1, %s7741_s18 }
0x5855   :  { %v7222_v13 = vpop.eup %7221 }
0x5856   :  { %v3536_v10 = vadd.f32 1.0, %v7222_v13 }
0x5858   :  { %7223 = vrcp.f32 %v3536_v10 }
0x5865   :  { %v7224_v59 = vpop.eup %7223 }
0x5866   :  { %v3540_v18 = vmul.f32 %v7224_v59, %v3478_v21  ;;  %v8735_v21 = vadd.f32 %v8654_v47, %v3110_v14 }
0x58c6   :  { %v3543_v57 = vpop.permute.xlu0 %3542 }
0x58c7   :  { %v3545_v63 = vmul.f32 %v7224_v59, %v3543_v57 }
0x58c9   :  { %3547 = vrot.lane.b32.xlu1 %v3545_v63, %s7760_s1 }
0x593b   :  { %v3548_v17 = vpop.permute.xlu1 %3547 }
0x593c   :  { %v3550_v38 = vadd.f32 %v3548_v17, %v3540_v18 }
0x593e   :  { %7225 = vtanh.f32 %v3550_v38 }
0x594b   :  { %v7226_v51 = vpop.eup %7225 }
0x594c   :  { %3553 = vrot.lane.b32.xlu0 %v7226_v51, %s7741_s18 }
0x59be   :  { %v3554_v20 = vpop.permute.xlu0 %3553 }
0x59bf   :  { %v8692_v22 = vmul.f32 %v7224_v59, %v3554_v20 }
0x59c1   :  { %v3557_v25 = vpack.c.bf16 %v8692_v22, %v8692_v22 }
0x59c3   :  { %3559 = vrot.lane.b32.xlu1 %v3557_v25, %s7760_s1 }
0x5a35   :  { %v3560_v3 = vpop.permute.xlu1 %3559 }
0x5a36   :  { %6663 = vmatmul.mubr.msk.bf16.vlgmr.msra.gmra.mxu0 %vm376_vm3, %v3560_v3 }
0x5a37   :  { %6675 = vmatpush3.bf16.msra.mxu0 %v8588_v8  ;;  %6678 = vmatprep.mubr.msk.bf16.mxu0 %vm7758_vm0, %v7757_v2 }
0x5a38   :  { %6676 = vmatprep.subr.bf16.mxu0 %v7757_v2 }
0x5a3b   :  { %6677 = vmatpush3.bf16.msra.mxu0 %v8591_v15 }
0x5a3c   :  { %6690 = vmatprep.subr.bf16.mxu0 %v7757_v2 }
0x5af6   :  { %v3598_v31 = vpop.f32.mrf.mxu0 }
0x5af7   :  { %v3604_v44 = vadd.f32 %v3598_v31, %v8620_v36 }
0x5af8   :  { %v6664_v30 = vpop.f32.mrf.mxu0 }
0x5af9   :  { %7227 = vtanh.f32 %v3604_v44  ;;  %v6099_v8 = vmul.f32 -1.442695, %v3604_v44 }
0x5afa   :  { %v3601_v6 = vpop.f32.mrf.mxu0 }
0x5afb   :  { %7229 = vpow2.f32 %v6099_v8 }
0x5afc   :  { %v6665_v62 = vpop.f32.mrf.mxu0 }
0x5b06   :  { %v7228_v32 = vpop.eup %7227 }
0x5b07   :  { %3614 = vrot.lane.b32.xlu0 %v7228_v32, %s7741_s18 }
0x5b08   :  { %v7230_v33 = vpop.eup %7229 }
0x5b09   :  { %v3608_v7 = vadd.f32 1.0, %v7230_v33 }
0x5b0b   :  { %7231 = vrcp.f32 %v3608_v7 }
0x5b18   :  { %v7232_v26 = vpop.eup %7231 }
0x5b19   :  { %v3612_v11 = vmul.f32 %v7232_v26, %v3550_v38 }
0x5b79   :  { %v3615_v34 = vpop.permute.xlu0 %3614 }
0x5b7a   :  { %v3617_v15 = vmul.f32 %v7232_v26, %v3615_v34 }
0x5b7c   :  { %3619 = vrot.lane.b32.xlu1 %v3617_v15, %s7760_s1 }
0x5bee   :  { %v3620_v28 = vpop.permute.xlu1 %3619 }
0x5bef   :  { %v3622_v54 = vadd.f32 %v3620_v28, %v3612_v11 }
0x5bf1   :  { %7233 = vtanh.f32 %v3622_v54 }
0x5bfe   :  { %v7234_v37 = vpop.eup %7233 }
0x5bff   :  { %3625 = vrot.lane.b32.xlu0 %v7234_v37, %s7741_s18 }
0x5c71   :  { %v3626_v61 = vpop.permute.xlu0 %3625 }
0x5c72   :  { %v8708_v27 = vmul.f32 %v7232_v26, %v3626_v61 }
0x5c74   :  { %v3629_v39 = vpack.c.bf16 %v8708_v27, %v8708_v27 }
0x5c76   :  { %3631 = vrot.lane.b32.xlu1 %v3629_v39, %s7760_s1 }
0x5ce8   :  { %v3632_v41 = vpop.permute.xlu1 %3631 }
0x5ce9   :  { %6671 = vmatmul.mubr.msk.bf16.vlgmr.msra.gmra.mxu1 %vm376_vm3, %v3632_v41 }
0x5cea   :  { %6683 = vmatpush3.bf16.msra.mxu1 %v8713_v40  ;;  %6686 = vmatprep.mubr.msk.bf16.mxu1 %vm7758_vm0, %v7757_v2 }
0x5ceb   :  { %6684 = vmatprep.subr.bf16.mxu1 %v7757_v2 }
0x5cee   :  { %6685 = vmatpush3.bf16.msra.mxu1 %v8717_v42 }
0x5cef   :  { %6698 = vmatprep.subr.bf16.mxu1 %v7757_v2 }
0x5cf1   :  { %6687 = vmatmul.mubr.bf16.vlgmr.msra.gmra.mxu1 %v7759_v12 }
0x5cf2   :  { %6699 = vmatpush3.bf16.msra.mxu1 %v8713_v40  ;;  %6702 = vmatprep.mubr.msk.bf16.mxu1 %vm7758_vm0, %v7757_v2 }
0x5cf3   :  { %6700 = vmatprep.subr.bf16.mxu1 %v7757_v2 }
0x5cf6   :  { %6701 = vmatpush3.bf16.msra.mxu1 %v8717_v42 }
0x5cf7   :  { %6714 = vmatprep.subr.bf16.mxu1 %v7757_v2 }
0x5da9   :  { %v3670_v16 = vpop.f32.mrf.mxu1 }
0x5daa   :  { %v3676_v49 = vadd.f32 %v3670_v16, %v8620_v36 }
0x5dab   :  { %v6672_v50 = vpop.f32.mrf.mxu1 }
0x5dac   :  { %7235 = vtanh.f32 %v3676_v49  ;;  %v6101_v29 = vmul.f32 -1.442695, %v3676_v49 }
0x5dad   :  { %v3673_v52 = vpop.f32.mrf.mxu1 }
0x5daf   :  { %v6673_v56 = vpop.f32.mrf.mxu1 }
0x5db1   :  { %v3823_v43 = vpop.f32.mrf.mxu1 }
0x5db2   :  { %v3829_v23 = vadd.f32 %v3823_v43, %v8735_v21 }
0x5db3   :  { %v6688_v53 = vpop.f32.mrf.mxu1 }
0x5db4   :  { %7237 = vtanh.f32 %v3829_v23  ;;  %v6106_v60 = vmul.f32 -1.442695, %v3829_v23 }
0x5db5   :  { %v3826_v35 = vpop.f32.mrf.mxu1  ;;  %7239 = vpow2.f32 %v6101_v29 }
0x5db6   :  { %7241 = vpow2.f32 %v6106_v60 }
0x5db7   :  { %v6689_v19 = vpop.f32.mrf.mxu1 }
0x5db9   :  { %v7236_v45 = vpop.eup %7235 }
0x5dba   :  { %3686 = vrot.lane.b32.xlu0 %v7236_v45, %s7741_s18 }
0x5dc1   :  { %v7238_v58 = vpop.eup %7237 }
0x5dc2   :  { %3839 = vrot.lane.b32.xlu1 %v7238_v58, %s7741_s18  ;;  %v7240_v0 = vpop.eup %7239 }
0x5dc3   :  { %v3680_v47 = vadd.f32 1.0, %v7240_v0  ;;  %v7242_v1 = vpop.eup %7241 }
0x5dc4   :  { %v3833_v46 = vadd.f32 1.0, %v7242_v1 }
0x5dc5   :  { %7243 = vrcp.f32 %v3680_v47 }
0x5dc6   :  { %7245 = vrcp.f32 %v3833_v46 }
0x5dd2   :  { %v7244_v13 = vpop.eup %7243 }
0x5dd3   :  { %v7246_v57 = vpop.eup %7245  ;;  %v3684_v17 = vmul.f32 %v7244_v13, %v3622_v54 }
0x5dd4   :  { %v3837_v20 = vmul.f32 0.0, %v7246_v57 }
0x5e2c   :  { %v3687_v10 = vpop.permute.xlu0 %3686 }
0x5e2d   :  { %v3689_v59 = vmul.f32 %v7244_v13, %v3687_v10 }
0x5e2f   :  { %3691 = vrot.lane.b32.xlu0 %v3689_v59, %s7760_s1 }
0x5e34   :  { %v3840_v63 = vpop.permute.xlu1 %3839 }
0x5e35   :  { %v3842_v18 = vmul.f32 %v7246_v57, %v3840_v63 }
0x5e37   :  { %3844 = vrot.lane.b32.xlu1 %v3842_v18, %s7760_s1 }
0x5ea1   :  { %v3692_v38 = vpop.permute.xlu0 %3691 }
0x5ea2   :  { %v8742_v51 = vadd.f32 %v3692_v38, %v3684_v17 }
0x5ea4   :  { %7247 = vtanh.f32 %v8742_v51 }
0x5ea9   :  { %v3845_v25 = vpop.permute.xlu1 %3844 }
0x5eaa   :  { %v3847_v3 = vadd.f32 %v3845_v25, %v3837_v20 }
0x5eac   :  { %7249 = vtanh.f32 %v3847_v3 }
0x5eb1   :  { %v7248_v31 = vpop.eup %7247 }
0x5eb2   :  { %3697 = vrot.lane.b32.xlu0 %v7248_v31, %s7741_s18 }
0x5eb9   :  { %v7250_v44 = vpop.eup %7249 }
0x5eba   :  { %3850 = vrot.lane.b32.xlu1 %v7250_v44, %s7741_s18 }
0x5f24   :  { %v3698_v30 = vpop.permute.xlu0 %3697 }
0x5f25   :  { %v8747_v6 = vmul.f32 %v7244_v13, %v3698_v30 }
0x5f27   :  { %v3701_v62 = vpack.c.bf16 %v8747_v6, %v8747_v6 }
0x5f29   :  { %3703 = vrot.lane.b32.xlu0 %v3701_v62, %s7760_s1 }
0x5f2c   :  { %v3851_v32 = vpop.permute.xlu1 %3850 }
0x5f2d   :  { %v8752_v8 = vmul.f32 %v7246_v57, %v3851_v32 }
0x5f2f   :  { %v3854_v33 = vpack.c.bf16 %v8752_v8, %v8752_v8 }
0x5f31   :  { %3856 = vrot.lane.b32.xlu1 %v3854_v33, %s7760_s1 }
0x5f9b   :  { %v3704_v7 = vpop.permute.xlu0 %3703 }
0x5f9c   :  { %6679 = vmatmul.mubr.msk.bf16.vlgmr.msra.gmra.mxu0 %vm376_vm3, %v3704_v7 }
0x5f9d   :  { %6691 = vmatpush3.bf16.msra.mxu0 %v8713_v40  ;;  %6694 = vmatprep.mubr.msk.bf16.mxu0 %vm7758_vm0, %v7757_v2 }
0x5f9e   :  { %6692 = vmatprep.subr.bf16.mxu0 %v7757_v2 }
0x5fa1   :  { %6693 = vmatpush3.bf16.msra.mxu0 %v8717_v42 }
0x5fa2   :  { %6706 = vmatprep.subr.bf16.mxu0 %v7757_v2 }
0x5fa3   :  { %v3857_v26 = vpop.permute.xlu1 %3856 }
0x5fa4   :  { %6695 = vmatmul.mubr.msk.bf16.vlgmr.msra.gmra.mxu0 %vm376_vm3, %v3857_v26 }
0x5fa5   :  { %6707 = vmatpush3.bf16.msra.mxu0 %v8713_v40  ;;  %6710 = vmatprep.mubr.msk.bf16.mxu0 %vm7758_vm0, %v7757_v2 }
0x5fa6   :  { %6708 = vmatprep.subr.bf16.mxu0 %v7757_v2 }
0x5fa9   :  { %6709 = vmatpush3.bf16.msra.mxu0 %v8717_v42 }
0x5faa   :  { %6722 = vmatprep.subr.bf16.mxu0 %v7757_v2 }
0x605c   :  { %v8771_v34 = vpop.f32.mrf.mxu0 }
0x605e   :  { %v6680_v15 = vpop.f32.mrf.mxu0 }
0x6060   :  { %v3745_v11 = vpop.f32.mrf.mxu0 }
0x6062   :  { %v6681_v28 = vpop.f32.mrf.mxu0 }
0x6064   :  { %v3895_v54 = vpop.f32.mrf.mxu0 }
0x6065   :  { %v3901_v37 = vadd.f32 %v3895_v54, %v8735_v21 }
0x6066   :  { %v6696_v61 = vpop.f32.mrf.mxu0 }
0x6067   :  { %7251 = vtanh.f32 %v3901_v37  ;;  %v6108_v49 = vmul.f32 -1.442695, %v3901_v37 }
0x6068   :  { %v3898_v39 = vpop.f32.mrf.mxu0 }
0x6069   :  { %7253 = vpow2.f32 %v6108_v49 }
0x606a   :  { %v6697_v41 = vpop.f32.mrf.mxu0 }
0x6074   :  { %v7252_v16 = vpop.eup %7251 }
0x6075   :  { %3911 = vrot.lane.b32.xlu0 %v7252_v16, %s7741_s18 }
0x6076   :  { %v7254_v50 = vpop.eup %7253 }
0x6077   :  { %v3905_v14 = vadd.f32 1.0, %v7254_v50 }
0x6079   :  { %7255 = vrcp.f32 %v3905_v14 }
0x6086   :  { %v7256_v52 = vpop.eup %7255 }
0x6087   :  { %v3909_v23 = vmul.f32 %v7256_v52, %v3847_v3 }
0x60e7   :  { %v3912_v56 = vpop.permute.xlu0 %3911 }
0x60e8   :  { %v3914_v43 = vmul.f32 %v7256_v52, %v3912_v56 }
0x60ea   :  { %3916 = vrot.lane.b32.xlu1 %v3914_v43, %s7760_s1 }
0x615c   :  { %v3917_v53 = vpop.permute.xlu1 %3916 }
0x615d   :  { %v3919_v35 = vadd.f32 %v3917_v53, %v3909_v23 }
0x615f   :  { %7257 = vtanh.f32 %v3919_v35 }
0x616c   :  { %v7258_v19 = vpop.eup %7257 }
0x616d   :  { %3922 = vrot.lane.b32.xlu0 %v7258_v19, %s7741_s18 }
0x61df   :  { %v3923_v45 = vpop.permute.xlu0 %3922 }
0x61e0   :  { %v8777_v58 = vmul.f32 %v7256_v52, %v3923_v45 }
0x61e2   :  { %v3926_v29 = vpack.c.bf16 %v8777_v58, %v8777_v58 }
0x61e4   :  { %3928 = vrot.lane.b32.xlu1 %v3926_v29, %s7760_s1 }
0x6256   :  { %v3929_v60 = vpop.permute.xlu1 %3928 }
0x6257   :  { %6703 = vmatmul.mubr.msk.bf16.vlgmr.msra.gmra.mxu1 %vm376_vm3, %v3929_v60 }
0x6258   :  { %6715 = vmatpush3.bf16.msra.mxu1 %v8713_v40  ;;  %6718 = vmatprep.mubr.msk.bf16.mxu1 %vm7758_vm0, %v7757_v2 }
0x6259   :  { %6716 = vmatprep.subr.bf16.mxu1 %v7757_v2 }
0x625c   :  { %6717 = vmatpush3.bf16.msra.mxu1 %v8717_v42 }
0x625d   :  { %6730 = vmatprep.subr.bf16.mxu1 %v7757_v2 }
0x6317   :  { %v3967_v0 = vpop.f32.mrf.mxu1 }
0x6318   :  { %v3973_v47 = vadd.f32 %v3967_v0, %v8735_v21 }
0x6319   :  { %v6704_v1 = vpop.f32.mrf.mxu1 }
0x631a   :  { %7259 = vtanh.f32 %v3973_v47  ;;  %v6110_v59 = vmul.f32 -1.442695, %v3973_v47 }
0x631b   :  { %v3970_v46 = vpop.f32.mrf.mxu1 }
0x631c   :  { %7261 = vpow2.f32 %v6110_v59 }
0x631d   :  { %v6705_v13 = vpop.f32.mrf.mxu1 }
0x6327   :  { %v7260_v10 = vpop.eup %7259 }
0x6328   :  { %3983 = vrot.lane.b32.xlu0 %v7260_v10, %s7741_s18 }
0x6329   :  { %v7262_v57 = vpop.eup %7261 }
0x632a   :  { %v3977_v63 = vadd.f32 1.0, %v7262_v57 }
0x632c   :  { %7263 = vrcp.f32 %v3977_v63 }
0x6339   :  { %v7264_v18 = vpop.eup %7263 }
0x633a   :  { %v3981_v20 = vmul.f32 %v7264_v18, %v3919_v35 }
0x639a   :  { %v3984_v17 = vpop.permute.xlu0 %3983 }
0x639b   :  { %v3986_v38 = vmul.f32 %v7264_v18, %v3984_v17 }
0x639d   :  { %3988 = vrot.lane.b32.xlu1 %v3986_v38, %s7760_s1 }
0x640f   :  { %v3989_v25 = vpop.permute.xlu1 %3988 }
0x6410   :  { %v3991_v3 = vadd.f32 %v3989_v25, %v3981_v20 }
0x6412   :  { %7265 = vtanh.f32 %v3991_v3 }
0x641f   :  { %v7266_v31 = vpop.eup %7265 }
0x6420   :  { %3994 = vrot.lane.b32.xlu0 %v7266_v31, %s7741_s18 }
0x6492   :  { %v3995_v44 = vpop.permute.xlu0 %3994 }
0x6493   :  { %v8793_v30 = vmul.f32 %v7264_v18, %v3995_v44 }
0x6495   :  { %v3998_v62 = vpack.c.bf16 %v8793_v30, %v8793_v30 }
0x6497   :  { %4000 = vrot.lane.b32.xlu1 %v3998_v62, %s7760_s1 }
0x6509   :  { %v4001_v32 = vpop.permute.xlu1 %4000 }
0x650a   :  { %6711 = vmatmul.mubr.msk.bf16.vlgmr.msra.gmra.mxu0 %vm376_vm3, %v4001_v32 }
0x650b   :  { %6723 = vmatpush3.bf16.msra.mxu0 %v8713_v40  ;;  %6726 = vmatprep.mubr.msk.bf16.mxu0 %vm7758_vm0, %v7757_v2 }
0x650c   :  { %6724 = vmatprep.subr.bf16.mxu0 %v7757_v2 }
0x650f   :  { %6725 = vmatpush3.bf16.msra.mxu0 %v8717_v42 }
0x6510   :  { %6738 = vmatprep.subr.bf16.mxu0 %v7757_v2 }
0x65ca   :  { %v4039_v33 = vpop.f32.mrf.mxu0 }
0x65cb   :  { %v4045_v7 = vadd.f32 %v4039_v33, %v8735_v21 }
0x65cc   :  { %v6712_v26 = vpop.f32.mrf.mxu0 }
0x65cd   :  { %7267 = vtanh.f32 %v4045_v7  ;;  %v6112_v54 = vmul.f32 -1.442695, %v4045_v7 }
0x65ce   :  { %v4042_v15 = vpop.f32.mrf.mxu0 }
0x65cf   :  { %7269 = vpow2.f32 %v6112_v54 }
0x65d0   :  { %v6713_v11 = vpop.f32.mrf.mxu0 }
0x65da   :  { %v7268_v28 = vpop.eup %7267 }
0x65db   :  { %4055 = vrot.lane.b32.xlu0 %v7268_v28, %s7741_s18 }
0x65dc   :  { %v7270_v37 = vpop.eup %7269 }
0x65dd   :  { %v4049_v61 = vadd.f32 1.0, %v7270_v37 }
0x65df   :  { %7271 = vrcp.f32 %v4049_v61 }
0x65ec   :  { %v7272_v39 = vpop.eup %7271 }
0x65ed   :  { %v4053_v49 = vmul.f32 %v7272_v39, %v3991_v3 }
0x664d   :  { %v4056_v41 = vpop.permute.xlu0 %4055 }
0x664e   :  { %v4058_v16 = vmul.f32 %v7272_v39, %v4056_v41 }
0x6650   :  { %4060 = vrot.lane.b32.xlu1 %v4058_v16, %s7760_s1 }
0x66c2   :  { %v4061_v50 = vpop.permute.xlu1 %4060 }
0x66c3   :  { %v4063_v14 = vadd.f32 %v4061_v50, %v4053_v49 }
0x66c5   :  { %7273 = vtanh.f32 %v4063_v14 }
0x66d2   :  { %v7274_v52 = vpop.eup %7273 }
0x66d3   :  { %4066 = vrot.lane.b32.xlu0 %v7274_v52, %s7741_s18 }
0x6745   :  { %v4067_v56 = vpop.permute.xlu0 %4066 }
0x6746   :  { %v8809_v43 = vmul.f32 %v7272_v39, %v4067_v56 }
0x6748   :  { %v4070_v23 = vpack.c.bf16 %v8809_v43, %v8809_v43 }
0x674a   :  { %4072 = vrot.lane.b32.xlu1 %v4070_v23, %s7760_s1 }
0x67bc   :  { %v4073_v53 = vpop.permute.xlu1 %4072 }
0x67bd   :  { %6719 = vmatmul.mubr.msk.bf16.vlgmr.msra.gmra.mxu1 %vm376_vm3, %v4073_v53 }
0x67be   :  { %6731 = vmatpush3.bf16.msra.mxu1 %v8713_v40  ;;  %6734 = vmatprep.mubr.msk.bf16.mxu1 %vm7758_vm0, %v7757_v2 }
0x67bf   :  { %6732 = vmatprep.subr.bf16.mxu1 %v7757_v2 }
0x67c2   :  { %6733 = vmatpush3.bf16.msra.mxu1 %v8717_v42 }
0x687d   :  { %v4111_v35 = vpop.f32.mrf.mxu1 }
0x687e   :  { %v4117_v19 = vadd.f32 %v4111_v35, %v8735_v21 }
0x687f   :  { %v6720_v45 = vpop.f32.mrf.mxu1 }
0x6880   :  { %7275 = vtanh.f32 %v4117_v19  ;;  %v6114_v47 = vmul.f32 -1.442695, %v4117_v19 }
0x6881   :  { %v4114_v29 = vpop.f32.mrf.mxu1 }
0x6882   :  { %7277 = vpow2.f32 %v6114_v47 }
0x6883   :  { %v6721_v60 = vpop.f32.mrf.mxu1 }
0x688d   :  { %v7276_v0 = vpop.eup %7275 }
0x688e   :  { %4127 = vrot.lane.b32.xlu0 %v7276_v0, %s7741_s18 }
0x688f   :  { %v7278_v1 = vpop.eup %7277 }
0x6890   :  { %v4121_v46 = vadd.f32 1.0, %v7278_v1 }
0x6892   :  { %7279 = vrcp.f32 %v4121_v46 }
0x689f   :  { %v7280_v13 = vpop.eup %7279 }
0x68a0   :  { %v4125_v57 = vmul.f32 %v7280_v13, %v4063_v14 }
0x6900   :  { %v4128_v10 = vpop.permute.xlu0 %4127 }
0x6901   :  { %v4130_v59 = vmul.f32 %v7280_v13, %v4128_v10 }
0x6903   :  { %4132 = vrot.lane.b32.xlu1 %v4130_v59, %s7760_s1 }
0x6975   :  { %v4133_v63 = vpop.permute.xlu1 %4132 }
0x6976   :  { %v4135_v18 = vadd.f32 %v4133_v63, %v4125_v57 }
0x6978   :  { %7281 = vtanh.f32 %v4135_v18 }
0x6985   :  { %v7282_v17 = vpop.eup %7281 }
0x6986   :  { %4138 = vrot.lane.b32.xlu0 %v7282_v17, %s7741_s18 }
0x69f8   :  { %v4139_v38 = vpop.permute.xlu0 %4138 }
0x69f9   :  { %v8824_v20 = vmul.f32 %v7280_v13, %v4139_v38 }
0x69fb   :  { %v4142_v25 = vpack.c.bf16 %v8824_v20, %v8824_v20 }
0x69fd   :  { %4144 = vrot.lane.b32.xlu1 %v4142_v25, %s7760_s1 }
0x6a6f   :  { %v4145_v3 = vpop.permute.xlu1 %4144 }
0x6a70   :  { %6727 = vmatmul.mubr.msk.bf16.vlgmr.msra.gmra.mxu0 %vm376_vm3, %v4145_v3 }
0x6a71   :  { %6739 = vmatpush3.bf16.msra.mxu0 %v8713_v40  ;;  %6742 = vmatprep.mubr.msk.bf16.mxu0 %vm7758_vm0, %v7757_v2 }
0x6a72   :  { %6740 = vmatprep.subr.bf16.mxu0 %v7757_v2 }
0x6a75   :  { %6741 = vmatpush3.bf16.msra.mxu0 %v8717_v42 }
0x6a76   :  { %6746 = vmatprep.subr.bf16.mxu0 %v7757_v2 }
0x6b30   :  { %v4183_v31 = vpop.f32.mrf.mxu0 }
0x6b31   :  { %v4189_v44 = vadd.f32 %v4183_v31, %v8735_v21 }
0x6b32   :  { %v6728_v62 = vpop.f32.mrf.mxu0 }
0x6b33   :  { %7283 = vtanh.f32 %v4189_v44  ;;  %v6116_v40 = vmul.f32 -1.442695, %v4189_v44 }
0x6b34   :  { %v4186_v32 = vpop.f32.mrf.mxu0 }
0x6b35   :  { %7285 = vpow2.f32 %v6116_v40 }
0x6b36   :  { %v6729_v33 = vpop.f32.mrf.mxu0 }
0x6b40   :  { %v7284_v7 = vpop.eup %7283 }
0x6b41   :  { %4199 = vrot.lane.b32.xlu0 %v7284_v7, %s7741_s18 }
0x6b42   :  { %v7286_v26 = vpop.eup %7285 }
0x6b43   :  { %v4193_v15 = vadd.f32 1.0, %v7286_v26 }
0x6b45   :  { %7287 = vrcp.f32 %v4193_v15 }
0x6b52   :  { %v7288_v11 = vpop.eup %7287 }
0x6b53   :  { %v4197_v54 = vmul.f32 %v7288_v11, %v4135_v18 }
0x6bb3   :  { %v4200_v28 = vpop.permute.xlu0 %4199 }
0x6bb4   :  { %v4202_v42 = vmul.f32 %v7288_v11, %v4200_v28  ;;  %v4469_v28 = vld [vmem:[#allocation19 + $0x78] sm:$0xff] }
0x6bb5   :  { %4504 = vmatprep.subr.mxu1 %v4469_v28 }
0x6bb6   :  { %4204 = vrot.lane.b32.xlu1 %v4202_v42, %s7760_s1  ;;  %v4468_v42 = vld [vmem:[#allocation19 + $0x70] sm:$0xff] }
0x6c28   :  { %v4205_v37 = vpop.permute.xlu1 %4204 }
0x6c29   :  { %v4207_v61 = vadd.f32 %v4205_v37, %v4197_v54  ;;  %v4467_v54 = vld [vmem:[#allocation19 + $0x68] sm:$0xff]  ;;  %v4466_v37 = vld [vmem:[#allocation19 + $0x60] sm:$0xff] }
0x6c2b   :  { %7289 = vtanh.f32 %v4207_v61 }
0x6c38   :  { %v7290_v39 = vpop.eup %7289 }
0x6c39   :  { %4210 = vrot.lane.b32.xlu0 %v7290_v39, %s7741_s18  ;;  %v4464_v39 = vld [vmem:[#allocation19 + $0x50] sm:$0xff] }
0x6cab   :  { %v4211_v41 = vpop.permute.xlu0 %4210 }
0x6cac   :  { %v8840_v16 = vmul.f32 %v7288_v11, %v4211_v41  ;;  %v4461_v41 = vld [vmem:[#allocation19 + $0x38] sm:$0xff] }
0x6cae   :  { %v4214_v49 = vpack.c.bf16 %v8840_v16, %v8840_v16 }
0x6cb0   :  { %4216 = vrot.lane.b32.xlu1 %v4214_v49, %s7760_s1  ;;  %v8874_v49 = vld [vmem:[#allocation20] sm:$0xff]  }
0x6d22   :  { %v4217_v50 = vpop.permute.xlu1 %4216 }
0x6d23   :  { %6735 = vmatmul.mubr.msk.bf16.vlgmr.msra.gmra.mxu1 %vm376_vm3, %v4217_v50  ;;  %v4460_v50 = vld [vmem:[#allocation19 + $0x30] sm:$0xff] }
0x6d24   :  { %4552 = vmatprep.mubr.f32.mxu1 %v7757_v2  ;;  %4505 = vmatpush1.msra.mxu1 %v4468_v42 }
0x6d25   :  { %4506 = vmatprep.subr.mxu1 %v4467_v54 }
0x6d26   :  { %4507 = vmatpush1.msra.mxu1 %v4466_v37 }
0x6de3   :  { %v4255_v14 = vpop.f32.mrf.mxu1 }
0x6de4   :  { %v4261_v52 = vadd.f32 %v4255_v14, %v8735_v21  ;;  %v4459_v14 = vld [vmem:[#allocation19 + $0x28] sm:$0xff] }
0x6de5   :  { %v6736_v56 = vpop.f32.mrf.mxu1 }
0x6de6   :  { %7291 = vtanh.f32 %v4261_v52  ;;  %v6118_v19 = vmul.f32 -1.442695, %v4261_v52  ;;  %v4458_v52 = vld [vmem:[#allocation19 + $0x20] sm:$0xff]  ;;  %v4457_v56 = vld [vmem:[#allocation19 + $0x18] sm:$0xff] }
0x6de7   :  { %v4258_v23 = vpop.f32.mrf.mxu1 }
0x6de8   :  { %7293 = vpow2.f32 %v6118_v19  ;;  %v4456_v23 = vld [vmem:[#allocation19 + $0x10] sm:$0xff] }
0x6de9   :  { %v6737_v53 = vpop.f32.mrf.mxu1 }
0x6dea   :  { %v4454_v53 = vld [vmem:[#allocation19] sm:$0xff] }
0x6df3   :  { %v7292_v35 = vpop.eup %7291 }
0x6df4   :  { %4271 = vrot.lane.b32.xlu0 %v7292_v35, %s7741_s18 }
0x6df5   :  { %v7294_v45 = vpop.eup %7293 }
0x6df6   :  { %v4265_v29 = vadd.f32 1.0, %v7294_v45 }
0x6df8   :  { %7295 = vrcp.f32 %v4265_v29 }
0x6e05   :  { %v7296_v60 = vpop.eup %7295 }
0x6e06   :  { %v4269_v1 = vmul.f32 %v7296_v60, %v4207_v61  ;;  %v8866_v61 = vld [vmem:[#allocation20 + $0x8] sm:$0xff]  }
0x6e66   :  { %v4272_v0 = vpop.permute.xlu0 %4271 }
0x6e67   :  { %v4274_v47 = vmul.f32 %v7296_v60, %v4272_v0 }
0x6e69   :  { %4276 = vrot.lane.b32.xlu1 %v4274_v47, %s7760_s1 }
0x6edb   :  { %v4277_v46 = vpop.permute.xlu1 %4276 }
0x6edc   :  { %v4279_v13 = vadd.f32 %v4277_v46, %v4269_v1 }
0x6ede   :  { %7297 = vtanh.f32 %v4279_v13 }
0x6eeb   :  { %v7298_v10 = vpop.eup %7297 }
0x6eec   :  { %4282 = vrot.lane.b32.xlu0 %v7298_v10, %s7741_s18 }
0x6f5e   :  { %v4283_v59 = vpop.permute.xlu0 %4282 }
0x6f5f   :  { %v4285_v57 = vmul.f32 %v7296_v60, %v4283_v59 }
0x6f61   :  { %v4286_v63 = vpack.c.bf16 %v4285_v57, %v4285_v57 }
0x6f63   :  { %4288 = vrot.lane.b32.xlu1 %v4286_v63, %s7760_s1 }
0x6fd5   :  { %v4289_v18 = vpop.permute.xlu1 %4288 }
0x6fd6   :  { %6743 = vmatmul.mubr.msk.bf16.vlgmr.msra.gmra.mxu0 %vm376_vm3, %v4289_v18 }
0x6fd7   :  { %6750 = vmatprep.mubr.msk.bf16.mxu0 %vm7758_vm0, %v7757_v2  ;;  %6747 = vmatpush3.bf16.msra.mxu0 %v8866_v61 }
0x6fd8   :  { %6748 = vmatprep.subr.bf16.mxu0 %v7757_v2 }
0x6fdb   :  { %6749 = vmatpush3.bf16.msra.mxu0 %v8874_v49 }
0x6fdc   :  { %6754 = vmatprep.subr.bf16.mxu0 %v7757_v2 }
0x6fde   :  { %6751 = vmatmul.mubr.bf16.vlgmr.msra.gmra.mxu0 %v7759_v12 }
0x6fdf   :  { %6755 = vmatpush3.bf16.msra.mxu0 %v8866_v61  ;;  %6758 = vmatprep.mubr.msk.bf16.mxu0 %vm7758_vm0, %v7757_v2 }
0x6fe0   :  { %6756 = vmatprep.subr.bf16.mxu0 %v7757_v2 }
0x6fe3   :  { %6757 = vmatpush3.bf16.msra.mxu0 %v8874_v49 }
0x6fe4   :  { %6770 = vmatprep.subr.bf16.mxu0 %v7757_v2 }
0x7096   :  { %v4327_v17 = vpop.f32.mrf.mxu0 }
0x7097   :  { %v4333_v38 = vadd.f32 %v4327_v17, %v8735_v21 }
0x7098   :  { %v6744_v25 = vpop.f32.mrf.mxu0 }
0x7099   :  { %7299 = vtanh.f32 %v4333_v38  ;;  %v6120_v62 = vmul.f32 -1.442695, %v4333_v38 }
0x709a   :  { %v4330_v3 = vpop.f32.mrf.mxu0 }
0x709b   :  { %7301 = vpow2.f32 %v6120_v62 }
0x709c   :  { %v6745_v31 = vpop.f32.mrf.mxu0 }
0x709e   :  { %v4615_v31 = vpop.f32.mrf.mxu0 }
0x70a6   :  { %v7300_v44 = vpop.eup %7299 }
0x70a7   :  { %4343 = vrot.lane.b32.xlu0 %v7300_v44, %s7741_s18  ;;  %v6752_v44 = vpop.f32.mrf.mxu0 }
0x70a8   :  { %v7302_v32 = vpop.eup %7301 }
0x70a9   :  { %v4337_v33 = vadd.f32 1.0, %v7302_v32  ;;  %v4618_v62 = vpop.f32.mrf.mxu0 }
0x70ab   :  { %7303 = vrcp.f32 %v4337_v33  ;;  %v6753_v32 = vpop.f32.mrf.mxu0  ;;  %v8902_v33 = vld [vmem:[#allocation23] sm:$0x3] }
0x70b8   :  { %v7304_v7 = vpop.eup %7303 }
0x70b9   :  { %v4341_v21 = vmul.f32 %v7304_v7, %v4279_v13 }
0x7119   :  { %v4344_v40 = vpop.permute.xlu0 %4343 }
0x711a   :  { %v4346_v26 = vmul.f32 %v7304_v7, %v4344_v40 }
0x711c   :  { %4348 = vrot.lane.b32.xlu1 %v4346_v26, %s7760_s1 }
0x7120   :  { %4368 = vrot.lane.b32.xlu1 %v8642_v48, %s7760_s1  ;;  %v4465_v48 = vld [vmem:[#allocation19 + $0x58] sm:$0xff] }
0x7121   :  { %4508 = vmatprep.subr.mxu1 %v4465_v48 }
0x7122   :  { %4509 = vmatpush1.msra.mxu1 %v4464_v39 }
0x7124   :  { %4377 = vrot.lane.b32.xlu1 %v8660_v55, %s7760_s1 }
0x7128   :  { %4359 = vrot.lane.b32.xlu1 %v8626_v9, %s7760_s1  ;;  %v4463_v9 = vld [vmem:[#allocation19 + $0x48] sm:$0xff] }
0x7129   :  { %4510 = vmatprep.subr.mxu1 %v4463_v9  ;;  %v3748_v9 = vadd.f32 %v8771_v34, %v8620_v36 }
0x712c   :  { %4386 = vrot.lane.b32.xlu1 %v8676_v24, %s7760_s1  ;;  %v4462_v24 = vld [vmem:[#allocation19 + $0x40] sm:$0xff] }
0x712d   :  { %4511 = vmatpush1.msra.mxu1 %v4462_v24 }
0x712e   :  { %4512 = vmatprep.subr.mxu1 %v4461_v41 }
0x712f   :  { %4513 = vmatpush1.msra.mxu1 %v4460_v50  ;;  %v6103_v50 = vmul.f32 -1.442695, %v3748_v9 }
0x7130   :  { %4514 = vmatprep.subr.mxu1 %v4459_v14 }
0x7131   :  { %4515 = vmatpush1.msra.mxu1 %v4458_v52 }
0x7132   :  { %4516 = vmatprep.subr.mxu1 %v4457_v56 }
0x7133   :  { %4517 = vmatpush1.msra.mxu1 %v4456_v23 }
0x718e   :  { %v4349_v15 = vpop.permute.xlu1 %4348 }
0x718f   :  { %v4351_v11 = vadd.f32 %v4349_v15, %v4341_v21 }
0x7191   :  { %7305 = vtanh.f32 %v4351_v11 }
0x7192   :  { %v4369_v45 = vpop.permute.xlu1 %4368 }
0x7196   :  { %v4378_v60 = vpop.permute.xlu1 %4377 }
0x719a   :  { %v4360_v47 = vpop.permute.xlu1 %4359 }
0x719e   :  { %v7306_v55 = vpop.eup %7305 }
0x719f   :  { %4354 = vrot.lane.b32.xlu0 %v7306_v55, %s7741_s18 }
0x71a3   :  { %4372 = vrot.lane.b32.xlu0 %v4285_v57, %s7741_s18  ;;  %v4387_v57 = vpop.permute.xlu1 %4386 }
0x71a7   :  { %4381 = vrot.lane.b32.xlu0 %v8840_v16, %s7741_s18  ;;  %v4455_v16 = vld [vmem:[#allocation19 + $0x8] sm:$0xff] }
0x71a8   :  { %4518 = vmatprep.subr.mxu1 %v4455_v16 }
0x71a9   :  { %4519 = vmatpush1.msra.mxu1 %v4454_v53 }
0x71aa   :  { %6762 = vmatprep.subr.bf16.mxu1 %v7757_v2 }
0x7211   :  { %v4355_v35 = vpop.permute.xlu0 %4354 }
0x7212   :  { %v4357_v19 = vmul.f32 %v7304_v7, %v4355_v35  ;;  %v8906_v7 = vrot.slane %v8902_v33, %v7934_v4 }
0x7214   :  { %4363 = vrot.lane.b32.xlu0 %v4357_v19, %s7741_s18 }
0x7215   :  { %v4373_v29 = vpop.permute.xlu0 %4372 }
0x7216   :  { %v4375_v1 = vsel %vm376_vm3, %v4369_v45, %v4373_v29 }
0x7217   :  { %v4431_v10 = vrot.slane %v4375_v1, 6 }
0x7218   :  { %4390 = vrot.lane.b32.xlu0 %v8824_v20, %s7741_s18 }
0x7219   :  { %v4382_v0 = vpop.permute.xlu0 %4381 }
0x721a   :  { %v4384_v59 = vsel %vm376_vm3, %v4378_v60, %v4382_v0 }
0x721b   :  { %v4434_v17 = vrot.slane %v4384_v59, 4 }
0x7286   :  { %v4364_v46 = vpop.permute.xlu0 %4363 }
0x7287   :  { %v4366_v13 = vsel %vm376_vm3, %v4360_v47, %v4364_v46 }
0x7288   :  { %v4448_v63 = vsel %vm1695_vm4, %v4366_v13, %v4431_v10 }
0x7289   :  { %v4449_v25 = vsel %vm1697_vm5, %v4448_v63, %v4434_v17 }
0x728a   :  { %v4391_v18 = vpop.permute.xlu0 %4390 }
0x728b   :  { %v4393_v20 = vsel %vm376_vm3, %v4387_v57, %v4391_v18 }
0x728c   :  { %v4437_v38 = vrot.slane %v4393_v20, 2 }
0x728e   :  { %v4450_v3 = vsel %vm1699_vm6, %v4449_v25, %v4437_v38 }
0x728f   :  { %6121 = vmatmul.mubr.msk.f32.vlgmr.msra.gmra.mxu1 %vm1732_vm7, %v4450_v3 }
0x7290   :  { %4558 = vmatprep.mubr.f32.mxu1 %v7757_v2  ;;  %6763 = vmatpush3.bf16.msra.mxu1 %v8866_v61 }
0x7291   :  { %6764 = vmatprep.subr.bf16.mxu1 %v7757_v2 }
0x7294   :  { %6765 = vmatpush3.bf16.msra.mxu1 %v8874_v49 }
0x7295   :  { %6778 = vmatprep.subr.bf16.mxu1 %v7757_v2 }
0x734f   :  { %v4554_v40 = vpop.f32.mrf.mxu1 }
0x7350   :  { %v8909_v26 = vadd.f32 %v4554_v40, %v8906_v7 }
0x7352   :  { %v4621_v21 = vadd.f32 %v4615_v31, %v8909_v26 }
0x7354   :  { %7307 = vtanh.f32 %v4621_v21  ;;  %v6125_v11 = vmul.f32 -1.442695, %v4621_v21 }
0x7356   :  { %7309 = vpow2.f32 %v6125_v11 }
0x7361   :  { %v7308_v15 = vpop.eup %7307 }
0x7362   :  { %4631 = vrot.lane.b32.xlu1 %v7308_v15, %s7741_s18 }
0x7363   :  { %v7310_v28 = vpop.eup %7309 }
0x7364   :  { %v4625_v42 = vadd.f32 1.0, %v7310_v28 }
0x7366   :  { %7311 = vrcp.f32 %v4625_v42 }
0x7373   :  { %v7312_v54 = vpop.eup %7311 }
0x7374   :  { %v4629_v4 = vmul.f32 0.0, %v7312_v54 }
0x73d4   :  { %v4632_v37 = vpop.permute.xlu1 %4631 }
0x73d5   :  { %v4634_v48 = vmul.f32 %v7312_v54, %v4632_v37 }
0x73d7   :  { %4636 = vrot.lane.b32.xlu0 %v4634_v48, %s7760_s1 }
0x7449   :  { %v4637_v55 = vpop.permute.xlu0 %4636 }
0x744a   :  { %v4639_v39 = vadd.f32 %v4637_v55, %v4629_v4 }
0x744c   :  { %7313 = vtanh.f32 %v4639_v39  ;;  %v4705_v20 = vrot.slane %v4639_v39, 6 }
0x744d   :  { %7315 = vtanh.f32 %v3748_v9 }
0x744e   :  { %7317 = vpow2.f32 %v6103_v50 }
0x7459   :  { %v7314_v24 = vpop.eup %7313 }
0x745a   :  { %4642 = vrot.lane.b32.xlu1 %v7314_v24, %s7741_s18  ;;  %v7316_v41 = vpop.eup %7315 }
0x745b   :  { %v7318_v14 = vpop.eup %7317 }
0x745c   :  { %v3752_v52 = vadd.f32 1.0, %v7318_v14  ;;  %v8977_v14 = vpop.f32.mrf.mxu1 }
0x745e   :  { %3758 = vrot.lane.b32.xlu1 %v7316_v41, %s7741_s18  ;;  %7319 = vrcp.f32 %v3752_v52 }
0x746b   :  { %v7320_v36 = vpop.eup %7319 }
0x746c   :  { %v3756_v19 = vmul.f32 %v7320_v36, %v8742_v51 }
0x74cc   :  { %v4643_v56 = vpop.permute.xlu1 %4642 }
0x74cd   :  { %v8918_v23 = vmul.f32 %v7312_v54, %v4643_v56 }
0x74cf   :  { %v4646_v16 = vpack.c.bf16 %v8918_v23, %v8918_v23 }
0x74d0   :  { %v3759_v34 = vpop.permute.xlu1 %3758 }
0x74d1   :  { %v3761_v53 = vmul.f32 %v7320_v36, %v3759_v34  ;;  %4648 = vrot.lane.b32.xlu0 %v4646_v16, %s7760_s1 }
0x74d3   :  { %3763 = vrot.lane.b32.xlu1 %v3761_v53, %s7760_s1 }
0x7543   :  { %v4649_v35 = vpop.permute.xlu0 %4648 }
0x7544   :  { %6759 = vmatmul.mubr.msk.bf16.vlgmr.msra.gmra.mxu0 %vm376_vm3, %v4649_v35 }
0x7545   :  { %v3764_v45 = vpop.permute.xlu1 %3763  ;;  %6771 = vmatpush3.bf16.msra.mxu0 %v8866_v61  ;;  %6774 = vmatprep.mubr.msk.bf16.mxu0 %vm7758_vm0, %v7757_v2 }
0x7546   :  { %v3766_v29 = vadd.f32 %v3764_v45, %v3756_v19  ;;  %6772 = vmatprep.subr.bf16.mxu0 %v7757_v2 }
0x7548   :  { %7321 = vtanh.f32 %v3766_v29 }
0x7549   :  { %6773 = vmatpush3.bf16.msra.mxu0 %v8874_v49 }
0x754a   :  { %6786 = vmatprep.subr.bf16.mxu0 %v7757_v2 }
0x7555   :  { %v7322_v60 = vpop.eup %7321 }
0x7556   :  { %3769 = vrot.lane.b32.xlu1 %v7322_v60, %s7741_s18 }
0x755a   :  { %4404 = vrot.lane.b32.xlu1 %v8708_v27, %s7760_s1 }
0x755e   :  { %4413 = vrot.lane.b32.xlu1 %v8747_v6, %s7760_s1 }
0x7562   :  { %4395 = vrot.lane.b32.xlu1 %v8692_v22, %s7760_s1 }
0x75c8   :  { %v3770_v51 = vpop.permute.xlu1 %3769 }
0x75c9   :  { %v3772_v0 = vmul.f32 %v7320_v36, %v3770_v51 }
0x75cb   :  { %4422 = vrot.lane.b32.xlu1 %v3772_v0, %s7760_s1 }
0x75cc   :  { %v4405_v44 = vpop.permute.xlu1 %4404 }
0x75d0   :  { %v4414_v11 = vpop.permute.xlu1 %4413 }
0x75d4   :  { %v4396_v28 = vpop.permute.xlu1 %4395 }
0x7604   :  { %v4687_v47 = vpop.f32.mrf.mxu0 }
0x7605   :  { %v4694_v1 = vrot.slane %v4687_v47, 6 }
0x7606   :  { %v6760_v46 = vpop.f32.mrf.mxu0 }
0x7607   :  { %v4696_v13 = vadd.f32 %v4694_v1, %v8909_v26 }
0x7608   :  { %v4690_v10 = vpop.f32.mrf.mxu0 }
0x7609   :  { %7323 = vtanh.f32 %v4696_v13  ;;  %v6127_v27 = vmul.f32 -1.442695, %v4696_v13 }
0x760a   :  { %v6761_v59 = vpop.f32.mrf.mxu0 }
0x760b   :  { %7325 = vpow2.f32 %v6127_v27 }
0x7616   :  { %v7324_v57 = vpop.eup %7323 }
0x7617   :  { %4709 = vrot.lane.b32.xlu0 %v7324_v57, %s7741_s18 }
0x7618   :  { %v7326_v6 = vpop.eup %7325 }
0x7619   :  { %v4700_v63 = vadd.f32 1.0, %v7326_v6 }
0x761b   :  { %7327 = vrcp.f32 %v4700_v63 }
0x7628   :  { %v7328_v22 = vpop.eup %7327 }
0x7629   :  { %v4707_v38 = vmul.f32 %v7328_v22, %v4705_v20 }
0x763d   :  { %v4423_v37 = vpop.permute.xlu1 %4422 }
0x7689   :  { %v4710_v18 = vpop.permute.xlu0 %4709 }
0x768a   :  { %v4712_v17 = vmul.f32 %v7328_v22, %v4710_v18 }
0x768c   :  { %4714 = vrot.lane.b32.xlu0 %v4712_v17, %s7760_s1 }
0x76fe   :  { %v4715_v25 = vpop.permute.xlu0 %4714 }
0x76ff   :  { %v8943_v3 = vadd.f32 %v4715_v25, %v4707_v38 }
0x7701   :  { %7329 = vtanh.f32 %v8943_v3  ;;  %v4784_v46 = vrot.slane %v8943_v3, 6 }
0x770e   :  { %v7330_v31 = vpop.eup %7329 }
0x770f   :  { %4720 = vrot.lane.b32.xlu0 %v7330_v31, %s7741_s18 }
0x7713   :  { %4408 = vrot.lane.b32.xlu0 %v8793_v30, %s7741_s18 }
0x7717   :  { %4417 = vrot.lane.b32.xlu0 %v8777_v58, %s7741_s18 }
0x771b   :  { %4399 = vrot.lane.b32.xlu0 %v8809_v43, %s7741_s18 }
0x771f   :  { %4426 = vrot.lane.b32.xlu0 %v8752_v8, %s7741_s18 }
0x7781   :  { %v4721_v62 = vpop.permute.xlu0 %4720 }
0x7782   :  { %v8955_v32 = vmul.f32 %v7328_v22, %v4721_v62 }
0x7784   :  { %v4724_v40 = vpack.c.bf16 %v8955_v32, %v8955_v32 }
0x7785   :  { %v4409_v21 = vpop.permute.xlu0 %4408 }
0x7786   :  { %v4726_v15 = vrot.slane %v4724_v40, 1  ;;  %v4411_v58 = vsel %vm376_vm3, %v4405_v44, %v4409_v21 }
0x7787   :  { %v4440_v8 = vrot.slane %v4411_v58, 6 }
0x7788   :  { %4727 = vrot.lane.b32.xlu1 %v4726_v15, %s7760_s1 }
0x7789   :  { %v4418_v30 = vpop.permute.xlu0 %4417 }
0x778a   :  { %v4420_v54 = vsel %vm376_vm3, %v4414_v11, %v4418_v30 }
0x778b   :  { %v4443_v55 = vrot.slane %v4420_v54, 4 }
0x778d   :  { %v4400_v43 = vpop.permute.xlu0 %4399 }
0x778e   :  { %v4402_v42 = vsel %vm376_vm3, %v4396_v28, %v4400_v43 }
0x778f   :  { %v4451_v48 = vsel %vm1695_vm4, %v4402_v42, %v4440_v8 }
0x7790   :  { %v4452_v24 = vsel %vm1697_vm5, %v4451_v48, %v4443_v55 }
0x7791   :  { %v4427_v4 = vpop.permute.xlu0 %4426 }
0x7792   :  { %v4429_v39 = vsel %vm376_vm3, %v4423_v37, %v4427_v4 }
0x7793   :  { %v4446_v9 = vrot.slane %v4429_v39, 2 }
0x7795   :  { %v4453_v41 = vsel %vm1699_vm6, %v4452_v24, %v4446_v9 }
0x7796   :  { %6122 = vmatmul.mubr.msk.f32.gmra.mxu1 %vm1732_vm7, %v4453_v41 }
0x7797   :  { %6766 = vmatprep.mubr.msk.bf16.mxu1 %vm7758_vm0, %v7757_v2 }
0x77fa   :  { %v4728_v50 = vpop.permute.xlu1 %4727 }
0x77fb   :  { %6767 = vmatmul.mubr.msk.bf16.vlgmr.msra.gmra.mxu1 %vm376_vm3, %v4728_v50 }
0x77fc   :  { %6779 = vmatpush3.bf16.msra.mxu1 %v8866_v61  ;;  %6782 = vmatprep.mubr.msk.bf16.mxu1 %vm7758_vm0, %v7757_v2 }
0x77fd   :  { %6780 = vmatprep.subr.bf16.mxu1 %v7757_v2 }
0x7800   :  { %6781 = vmatpush3.bf16.msra.mxu1 %v8874_v49 }
0x7801   :  { %6794 = vmatprep.subr.bf16.mxu1 %v7757_v2 }
0x7856   :  { %v8979_v52 = vpop.f32.mrf.mxu1 }
0x7857   :  { %v9018_v55 = vadd.f32 %v8979_v52, %v8906_v7 }
0x7858   :  { %v8981_v56 = vpop.f32.mrf.mxu1 }
0x78bb   :  { %v4766_v16 = vpop.f32.mrf.mxu1 }
0x78bc   :  { %v4773_v36 = vrot.slane %v4766_v16, 4 }
0x78bd   :  { %v6768_v34 = vpop.f32.mrf.mxu1 }
0x78be   :  { %v4775_v53 = vadd.f32 %v4773_v36, %v8909_v26 }
0x78bf   :  { %v4769_v35 = vpop.f32.mrf.mxu1 }
0x78c0   :  { %7331 = vtanh.f32 %v4775_v53  ;;  %v6129_v29 = vmul.f32 -1.442695, %v4775_v53 }
0x78c1   :  { %v6769_v19 = vpop.f32.mrf.mxu1 }
0x78c2   :  { %7333 = vpow2.f32 %v6129_v29 }
0x78cd   :  { %v7332_v45 = vpop.eup %7331 }
0x78ce   :  { %4788 = vrot.lane.b32.xlu0 %v7332_v45, %s7741_s18 }
0x78cf   :  { %v7334_v60 = vpop.eup %7333 }
0x78d0   :  { %v4779_v51 = vadd.f32 1.0, %v7334_v60 }
0x78d2   :  { %7335 = vrcp.f32 %v4779_v51 }
0x78df   :  { %v7336_v0 = vpop.eup %7335 }
0x78e0   :  { %v4786_v13 = vmul.f32 %v7336_v0, %v4784_v46 }
0x7940   :  { %v4789_v47 = vpop.permute.xlu0 %4788 }
0x7941   :  { %v4791_v1 = vmul.f32 %v7336_v0, %v4789_v47 }
0x7943   :  { %4793 = vrot.lane.b32.xlu1 %v4791_v1, %s7760_s1 }
0x79b5   :  { %v4794_v10 = vpop.permute.xlu1 %4793 }
0x79b6   :  { %v4796_v59 = vadd.f32 %v4794_v10, %v4786_v13 }
0x79b8   :  { %7337 = vtanh.f32 %v4796_v59  ;;  %v4863_v58 = vrot.slane %v4796_v59, 6 }
0x79c5   :  { %v7338_v57 = vpop.eup %7337 }
0x79c6   :  { %4799 = vrot.lane.b32.xlu0 %v7338_v57, %s7741_s18 }
0x7a38   :  { %v4800_v27 = vpop.permute.xlu0 %4799 }
0x7a39   :  { %v8988_v6 = vmul.f32 %v7336_v0, %v4800_v27 }
0x7a3b   :  { %v4803_v63 = vpack.c.bf16 %v8988_v6, %v8988_v6 }
0x7a3d   :  { %v4805_v22 = vrot.slane %v4803_v63, 2 }
0x7a3f   :  { %4806 = vrot.lane.b32.xlu1 %v4805_v22, %s7760_s1 }
0x7ab1   :  { %v4807_v18 = vpop.permute.xlu1 %4806 }
0x7ab2   :  { %6775 = vmatmul.mubr.msk.bf16.vlgmr.msra.gmra.mxu0 %vm376_vm3, %v4807_v18 }
0x7ab3   :  { %6787 = vmatpush3.bf16.msra.mxu0 %v8866_v61  ;;  %6790 = vmatprep.mubr.msk.bf16.mxu0 %vm7758_vm0, %v7757_v2 }
0x7ab4   :  { %6788 = vmatprep.subr.bf16.mxu0 %v7757_v2 }
0x7ab7   :  { %6789 = vmatpush3.bf16.msra.mxu0 %v8874_v49 }
0x7ab8   :  { %6802 = vmatprep.subr.bf16.mxu0 %v7757_v2 }
0x7b72   :  { %v4845_v17 = vpop.f32.mrf.mxu0 }
0x7b73   :  { %v4852_v20 = vrot.slane %v4845_v17, 2 }
0x7b74   :  { %v6776_v38 = vpop.f32.mrf.mxu0 }
0x7b75   :  { %v4854_v25 = vadd.f32 %v4852_v20, %v8909_v26 }
0x7b76   :  { %v4848_v3 = vpop.f32.mrf.mxu0 }
0x7b77   :  { %7339 = vtanh.f32 %v4854_v25  ;;  %v6131_v62 = vmul.f32 -1.442695, %v4854_v25 }
0x7b78   :  { %v6777_v31 = vpop.f32.mrf.mxu0 }
0x7b79   :  { %7341 = vpow2.f32 %v6131_v62 }
0x7b84   :  { %v7340_v44 = vpop.eup %7339 }
0x7b85   :  { %4867 = vrot.lane.b32.xlu0 %v7340_v44, %s7741_s18 }
0x7b86   :  { %v7342_v40 = vpop.eup %7341 }
0x7b87   :  { %v4858_v21 = vadd.f32 1.0, %v7342_v40 }
0x7b89   :  { %7343 = vrcp.f32 %v4858_v21 }
0x7b96   :  { %v7344_v15 = vpop.eup %7343 }
0x7b97   :  { %v4865_v28 = vmul.f32 %v7344_v15, %v4863_v58 }
0x7bf7   :  { %v4868_v11 = vpop.permute.xlu0 %4867 }
0x7bf8   :  { %v4870_v30 = vmul.f32 %v7344_v15, %v4868_v11 }
0x7bfa   :  { %4872 = vrot.lane.b32.xlu1 %v4870_v30, %s7760_s1  ;;  %v9048_v30 = vld [vmem:[#allocation22 + $0x8] sm:$0xff]  }
0x7c6c   :  { %v4873_v43 = vpop.permute.xlu1 %4872 }
0x7c6d   :  { %v4875_v26 = vadd.f32 %v4873_v43, %v4865_v28  ;;  %v9052_v28 = vld [vmem:[#allocation22] sm:$0xff]  }
0x7c6f   :  { %7345 = vtanh.f32 %v4875_v26  ;;  %v4939_v7 = vrot.slane %v4875_v26, 6 }
0x7c7c   :  { %v7346_v42 = vpop.eup %7345 }
0x7c7d   :  { %4878 = vrot.lane.b32.xlu0 %v7346_v42, %s7741_s18 }
0x7cef   :  { %v4879_v8 = vpop.permute.xlu0 %4878 }
0x7cf0   :  { %v9004_v54 = vmul.f32 %v7344_v15, %v4879_v8 }
0x7cf2   :  { %v4882_v37 = vpack.c.bf16 %v9004_v54, %v9004_v54 }
0x7cf4   :  { %v4884_v48 = vrot.slane %v4882_v37, 3 }
0x7cf6   :  { %4885 = vrot.lane.b32.xlu1 %v4884_v48, %s7760_s1 }
0x7d68   :  { %v4886_v4 = vpop.permute.xlu1 %4885 }
0x7d69   :  { %6783 = vmatmul.mubr.msk.bf16.vlgmr.msra.gmra.mxu1 %vm376_vm3, %v4886_v4 }
0x7d6a   :  { %6795 = vmatpush3.bf16.msra.mxu1 %v8866_v61  ;;  %6798 = vmatprep.mubr.msk.bf16.mxu1 %vm7758_vm0, %v7757_v2 }
0x7d6b   :  { %6796 = vmatprep.subr.bf16.mxu1 %v7757_v2 }
0x7d6e   :  { %6797 = vmatpush3.bf16.msra.mxu1 %v8874_v49 }
0x7d6f   :  { %6810 = vmatprep.subr.bf16.mxu1 %v7757_v2 }
0x7e29   :  { %v4924_v39 = vpop.f32.mrf.mxu1 }
0x7e2a   :  { %v4930_v9 = vadd.f32 %v4924_v39, %v9018_v55 }
0x7e2b   :  { %v6784_v24 = vpop.f32.mrf.mxu1 }
0x7e2c   :  { %7347 = vtanh.f32 %v4930_v9  ;;  %v6133_v36 = vmul.f32 -1.442695, %v4930_v9 }
0x7e2d   :  { %v4927_v41 = vpop.f32.mrf.mxu1 }
0x7e2e   :  { %7349 = vpow2.f32 %v6133_v36 }
0x7e2f   :  { %v6785_v50 = vpop.f32.mrf.mxu1 }
0x7e39   :  { %v7348_v16 = vpop.eup %7347 }
0x7e3a   :  { %4943 = vrot.lane.b32.xlu0 %v7348_v16, %s7741_s18 }
0x7e3b   :  { %v7350_v34 = vpop.eup %7349 }
0x7e3c   :  { %v4934_v53 = vadd.f32 1.0, %v7350_v34 }
0x7e3e   :  { %7351 = vrcp.f32 %v4934_v53 }
0x7e4b   :  { %v7352_v35 = vpop.eup %7351 }
0x7e4c   :  { %v4941_v52 = vmul.f32 %v7352_v35, %v4939_v7 }
0x7eac   :  { %v4944_v19 = vpop.permute.xlu0 %4943 }
0x7ead   :  { %v4946_v45 = vmul.f32 %v7352_v35, %v4944_v19 }
0x7eaf   :  { %4948 = vrot.lane.b32.xlu1 %v4946_v45, %s7760_s1 }
0x7f21   :  { %v4949_v29 = vpop.permute.xlu1 %4948 }
0x7f22   :  { %v4951_v60 = vadd.f32 %v4949_v29, %v4941_v52 }
0x7f24   :  { %7353 = vtanh.f32 %v4951_v60  ;;  %v5017_v25 = vrot.slane %v4951_v60, 6 }
0x7f31   :  { %v7354_v51 = vpop.eup %7353 }
0x7f32   :  { %4954 = vrot.lane.b32.xlu0 %v7354_v51, %s7741_s18 }
0x7fa4   :  { %v4955_v0 = vpop.permute.xlu0 %4954 }
0x7fa5   :  { %v9024_v47 = vmul.f32 %v7352_v35, %v4955_v0 }
0x7fa7   :  { %v4958_v1 = vpack.c.bf16 %v9024_v47, %v9024_v47 }
0x7fa9   :  { %4960 = vrot.lane.b32.xlu1 %v4958_v1, %s7760_s1 }
0x801b   :  { %v4961_v46 = vpop.permute.xlu1 %4960 }
0x801c   :  { %6791 = vmatmul.mubr.msk.bf16.vlgmr.msra.gmra.mxu0 %vm376_vm3, %v4961_v46 }
0x801d   :  { %6803 = vmatpush3.bf16.msra.mxu0 %v8866_v61  ;;  %6806 = vmatprep.mubr.msk.bf16.mxu0 %vm7758_vm0, %v7757_v2 }
0x801e   :  { %6804 = vmatprep.subr.bf16.mxu0 %v7757_v2 }
0x8021   :  { %6805 = vmatpush3.bf16.msra.mxu0 %v8874_v49 }
0x8022   :  { %6818 = vmatprep.subr.bf16.mxu0 %v7757_v2 }
0x80dc   :  { %v4999_v13 = vpop.f32.mrf.mxu0 }
0x80dd   :  { %v5006_v10 = vrot.slane %v4999_v13, 6 }
0x80de   :  { %v6792_v59 = vpop.f32.mrf.mxu0 }
0x80df   :  { %v5008_v57 = vadd.f32 %v5006_v10, %v9018_v55 }
0x80e0   :  { %v5002_v27 = vpop.f32.mrf.mxu0 }
0x80e1   :  { %7355 = vtanh.f32 %v5008_v57  ;;  %v6135_v61 = vmul.f32 -1.442695, %v5008_v57 }
0x80e2   :  { %v6793_v63 = vpop.f32.mrf.mxu0 }
0x80e3   :  { %7357 = vpow2.f32 %v6135_v61 }
0x80ee   :  { %v7356_v22 = vpop.eup %7355 }
0x80ef   :  { %5021 = vrot.lane.b32.xlu0 %v7356_v22, %s7741_s18 }
0x80f0   :  { %v7358_v18 = vpop.eup %7357 }
0x80f1   :  { %v5012_v17 = vadd.f32 1.0, %v7358_v18 }
0x80f3   :  { %7359 = vrcp.f32 %v5012_v17 }
0x8100   :  { %v7360_v20 = vpop.eup %7359 }
0x8101   :  { %v5019_v3 = vmul.f32 %v7360_v20, %v5017_v25 }
0x8161   :  { %v5022_v49 = vpop.permute.xlu0 %5021 }
0x8162   :  { %v5024_v38 = vmul.f32 %v7360_v20, %v5022_v49 }
0x8164   :  { %5026 = vrot.lane.b32.xlu1 %v5024_v38, %s7760_s1 }
0x81d6   :  { %v5027_v31 = vpop.permute.xlu1 %5026 }
0x81d7   :  { %v9039_v44 = vadd.f32 %v5027_v31, %v5019_v3 }
0x81d9   :  { %7361 = vtanh.f32 %v9039_v44  ;;  %v5096_v0 = vrot.slane %v9039_v44, 6 }
0x81e6   :  { %v7362_v62 = vpop.eup %7361 }
0x81e7   :  { %5032 = vrot.lane.b32.xlu0 %v7362_v62, %s7741_s18 }
0x8259   :  { %v5033_v40 = vpop.permute.xlu0 %5032 }
0x825a   :  { %v9043_v21 = vmul.f32 %v7360_v20, %v5033_v40 }
0x825c   :  { %v5036_v15 = vpack.c.bf16 %v9043_v21, %v9043_v21 }
0x825e   :  { %v5038_v11 = vrot.slane %v5036_v15, 1 }
0x8260   :  { %5039 = vrot.lane.b32.xlu1 %v5038_v11, %s7760_s1 }
0x82d2   :  { %v5040_v58 = vpop.permute.xlu1 %5039 }
0x82d3   :  { %6799 = vmatmul.mubr.msk.bf16.vlgmr.msra.gmra.mxu1 %vm376_vm3, %v5040_v58 }
0x82d4   :  { %6811 = vmatpush3.bf16.msra.mxu1 %v9048_v30  ;;  %6814 = vmatprep.mubr.msk.bf16.mxu1 %vm7758_vm0, %v7757_v2 }
0x82d5   :  { %6812 = vmatprep.subr.bf16.mxu1 %v7757_v2 }
0x82d8   :  { %6813 = vmatpush3.bf16.msra.mxu1 %v9052_v28 }
0x82d9   :  { %6826 = vmatprep.subr.bf16.mxu1 %v7757_v2 }
0x82db   :  { %6815 = vmatmul.mubr.bf16.vlgmr.msra.gmra.mxu1 %v7759_v12  ;;  %v9069_v12 = vrot.slane %v8902_v33, %v7936_v5 }
0x82dc   :  { %6827 = vmatpush3.bf16.msra.mxu1 %v9048_v30  ;;  %6830 = vmatprep.mubr.msk.bf16.mxu1 %vm7758_vm0, %v7757_v2 }
0x82dd   :  { %6828 = vmatprep.subr.bf16.mxu1 %v7757_v2  ;;  %v9073_v39 = vadd.f32 %v8981_v56, %v9069_v12 }
0x82e0   :  { %6829 = vmatpush3.bf16.msra.mxu1 %v9052_v28 }
0x82e1   :  { %6842 = vmatprep.subr.bf16.mxu1 %v7757_v2 }
0x8393   :  { %v5078_v43 = vpop.f32.mrf.mxu1 }
0x8394   :  { %v5085_v26 = vrot.slane %v5078_v43, 4 }
0x8395   :  { %v6800_v42 = vpop.f32.mrf.mxu1 }
0x8396   :  { %v5087_v8 = vadd.f32 %v5085_v26, %v9018_v55 }
0x8397   :  { %v5081_v37 = vpop.f32.mrf.mxu1 }
0x8398   :  { %7363 = vtanh.f32 %v5087_v8  ;;  %v6137_v5 = vmul.f32 -1.442695, %v5087_v8 }
0x8399   :  { %v6801_v48 = vpop.f32.mrf.mxu1 }
0x839b   :  { %v5244_v4 = vpop.f32.mrf.mxu1 }
0x839c   :  { %v5251_v9 = vrot.slane %v5244_v4, 2 }
0x839d   :  { %v6816_v24 = vpop.f32.mrf.mxu1 }
0x839e   :  { %v5253_v41 = vadd.f32 %v5251_v9, %v9073_v39 }
0x839f   :  { %v5247_v50 = vpop.f32.mrf.mxu1 }
0x83a0   :  { %7365 = vtanh.f32 %v5253_v41  ;;  %v6142_v33 = vmul.f32 -1.442695, %v5253_v41 }
0x83a1   :  { %v6817_v16 = vpop.f32.mrf.mxu1  ;;  %7367 = vpow2.f32 %v6137_v5 }
0x83a2   :  { %7369 = vpow2.f32 %v6142_v33 }
0x83a5   :  { %v7364_v36 = vpop.eup %7363 }
0x83a6   :  { %5100 = vrot.lane.b32.xlu0 %v7364_v36, %s7741_s18 }
0x83ad   :  { %v7366_v34 = vpop.eup %7365 }
0x83ae   :  { %5263 = vrot.lane.b32.xlu1 %v7366_v34, %s7741_s18  ;;  %v7368_v53 = vpop.eup %7367 }
0x83af   :  { %v5091_v56 = vadd.f32 1.0, %v7368_v53  ;;  %v7370_v35 = vpop.eup %7369 }
0x83b0   :  { %v5257_v19 = vadd.f32 1.0, %v7370_v35 }
0x83b1   :  { %7371 = vrcp.f32 %v5091_v56 }
0x83b2   :  { %7373 = vrcp.f32 %v5257_v19 }
0x83be   :  { %v7372_v45 = vpop.eup %7371 }
0x83bf   :  { %v7374_v29 = vpop.eup %7373  ;;  %v5098_v1 = vmul.f32 %v7372_v45, %v5096_v0 }
0x83c0   :  { %v5261_v10 = vmul.f32 0.0, %v7374_v29 }
0x8418   :  { %v5101_v7 = vpop.permute.xlu0 %5100 }
0x8419   :  { %v5103_v52 = vmul.f32 %v7372_v45, %v5101_v7 }
0x841b   :  { %5105 = vrot.lane.b32.xlu0 %v5103_v52, %s7760_s1 }
0x8420   :  { %v5264_v60 = vpop.permute.xlu1 %5263 }
0x8421   :  { %v5266_v51 = vmul.f32 %v7374_v29, %v5264_v60 }
0x8423   :  { %5268 = vrot.lane.b32.xlu1 %v5266_v51, %s7760_s1 }
0x848d   :  { %v5106_v46 = vpop.permute.xlu0 %5105 }
0x848e   :  { %v9081_v13 = vadd.f32 %v5106_v46, %v5098_v1 }
0x8490   :  { %7375 = vtanh.f32 %v9081_v13 }
0x8495   :  { %v5269_v59 = vpop.permute.xlu1 %5268 }
0x8496   :  { %v5271_v57 = vadd.f32 %v5269_v59, %v5261_v10 }
0x8498   :  { %7377 = vtanh.f32 %v5271_v57  ;;  %v5338_v16 = vrot.slane %v5271_v57, 2 }
0x849d   :  { %v7376_v27 = vpop.eup %7375 }
0x849e   :  { %5111 = vrot.lane.b32.xlu0 %v7376_v27, %s7741_s18 }
0x84a5   :  { %v7378_v63 = vpop.eup %7377 }
0x84a6   :  { %5274 = vrot.lane.b32.xlu1 %v7378_v63, %s7741_s18 }
0x8510   :  { %v5112_v22 = vpop.permute.xlu0 %5111 }
0x8511   :  { %v9086_v61 = vmul.f32 %v7372_v45, %v5112_v22 }
0x8513   :  { %v5115_v18 = vpack.c.bf16 %v9086_v61, %v9086_v61 }
0x8515   :  { %v5117_v17 = vrot.slane %v5115_v18, 2 }
0x8517   :  { %5118 = vrot.lane.b32.xlu0 %v5117_v17, %s7760_s1 }
0x8518   :  { %v5275_v20 = vpop.permute.xlu1 %5274 }
0x8519   :  { %v9091_v49 = vmul.f32 %v7374_v29, %v5275_v20 }
0x851b   :  { %v5278_v38 = vpack.c.bf16 %v9091_v49, %v9091_v49 }
0x851d   :  { %v5280_v25 = vrot.slane %v5278_v38, 3 }
0x851f   :  { %5281 = vrot.lane.b32.xlu1 %v5280_v25, %s7760_s1 }
0x8589   :  { %v5119_v3 = vpop.permute.xlu0 %5118 }
0x858a   :  { %6807 = vmatmul.mubr.msk.bf16.vlgmr.msra.gmra.mxu0 %vm376_vm3, %v5119_v3 }
0x858b   :  { %6819 = vmatpush3.bf16.msra.mxu0 %v9048_v30  ;;  %6822 = vmatprep.mubr.msk.bf16.mxu0 %vm7758_vm0, %v7757_v2 }
0x858c   :  { %6820 = vmatprep.subr.bf16.mxu0 %v7757_v2 }
0x858f   :  { %6821 = vmatpush3.bf16.msra.mxu0 %v9052_v28 }
0x8590   :  { %6834 = vmatprep.subr.bf16.mxu0 %v7757_v2 }
0x8591   :  { %v5282_v31 = vpop.permute.xlu1 %5281 }
0x8592   :  { %6823 = vmatmul.mubr.msk.bf16.vlgmr.msra.gmra.mxu0 %vm376_vm3, %v5282_v31 }
0x8593   :  { %6835 = vmatpush3.bf16.msra.mxu0 %v9048_v30  ;;  %6838 = vmatprep.mubr.msk.bf16.mxu0 %vm7758_vm0, %v7757_v2 }
0x8594   :  { %6836 = vmatprep.subr.bf16.mxu0 %v7757_v2 }
0x8597   :  { %6837 = vmatpush3.bf16.msra.mxu0 %v9052_v28 }
0x8598   :  { %6850 = vmatprep.subr.bf16.mxu0 %v7757_v2 }
0x864a   :  { %v9110_v44 = vpop.f32.mrf.mxu0 }
0x864c   :  { %v6808_v62 = vpop.f32.mrf.mxu0 }
0x864e   :  { %v5160_v40 = vpop.f32.mrf.mxu0 }
0x8650   :  { %v6809_v15 = vpop.f32.mrf.mxu0 }
0x8652   :  { %v5320_v11 = vpop.f32.mrf.mxu0 }
0x8653   :  { %v5327_v58 = vrot.slane %v5320_v11, 4 }
0x8654   :  { %v6824_v43 = vpop.f32.mrf.mxu0 }
0x8655   :  { %v5329_v26 = vadd.f32 %v5327_v58, %v9073_v39 }
0x8656   :  { %v5323_v42 = vpop.f32.mrf.mxu0 }
0x8657   :  { %7379 = vtanh.f32 %v5329_v26  ;;  %v6144_v48 = vmul.f32 -1.442695, %v5329_v26 }
0x8658   :  { %v6825_v8 = vpop.f32.mrf.mxu0 }
0x8659   :  { %7381 = vpow2.f32 %v6144_v48 }
0x8664   :  { %v7380_v37 = vpop.eup %7379 }
0x8665   :  { %5342 = vrot.lane.b32.xlu0 %v7380_v37, %s7741_s18 }
0x8666   :  { %v7382_v4 = vpop.eup %7381 }
0x8667   :  { %v5333_v9 = vadd.f32 1.0, %v7382_v4 }
0x8669   :  { %7383 = vrcp.f32 %v5333_v9 }
0x8676   :  { %v7384_v24 = vpop.eup %7383 }
0x8677   :  { %v5340_v36 = vmul.f32 %v7384_v24, %v5338_v16 }
0x86d7   :  { %v5343_v41 = vpop.permute.xlu0 %5342 }
0x86d8   :  { %v5345_v50 = vmul.f32 %v7384_v24, %v5343_v41 }
0x86da   :  { %5347 = vrot.lane.b32.xlu1 %v5345_v50, %s7760_s1 }
0x874c   :  { %v5348_v34 = vpop.permute.xlu1 %5347 }
0x874d   :  { %v5350_v5 = vadd.f32 %v5348_v34, %v5340_v36 }
0x874f   :  { %7385 = vtanh.f32 %v5350_v5  ;;  %v5417_v22 = vrot.slane %v5350_v5, 2 }
0x875c   :  { %v7386_v33 = vpop.eup %7385 }
0x875d   :  { %5353 = vrot.lane.b32.xlu0 %v7386_v33, %s7741_s18 }
0x87cf   :  { %v5354_v53 = vpop.permute.xlu0 %5353 }
0x87d0   :  { %v9116_v56 = vmul.f32 %v7384_v24, %v5354_v53 }
0x87d2   :  { %v5357_v35 = vpack.c.bf16 %v9116_v56, %v9116_v56 }
0x87d4   :  { %v5359_v19 = vrot.slane %v5357_v35, 2 }
0x87d6   :  { %5360 = vrot.lane.b32.xlu1 %v5359_v19, %s7760_s1  ;;  %v9161_v19 = vadd.f32 %v8977_v14, %v9069_v12 }
0x8848   :  { %v5361_v45 = vpop.permute.xlu1 %5360 }
0x8849   :  { %6831 = vmatmul.mubr.msk.bf16.vlgmr.msra.gmra.mxu1 %vm376_vm3, %v5361_v45 }
0x884a   :  { %6843 = vmatpush3.bf16.msra.mxu1 %v9048_v30  ;;  %6846 = vmatprep.mubr.msk.bf16.mxu1 %vm7758_vm0, %v7757_v2 }
0x884b   :  { %6844 = vmatprep.subr.bf16.mxu1 %v7757_v2 }
0x884e   :  { %6845 = vmatpush3.bf16.msra.mxu1 %v9052_v28 }
0x884f   :  { %6858 = vmatprep.subr.bf16.mxu1 %v7757_v2 }
0x8909   :  { %v5399_v7 = vpop.f32.mrf.mxu1 }
0x890a   :  { %v5406_v52 = vrot.slane %v5399_v7, 6 }
0x890b   :  { %v6832_v29 = vpop.f32.mrf.mxu1 }
0x890c   :  { %v5408_v60 = vadd.f32 %v5406_v52, %v9073_v39 }
0x890d   :  { %v5402_v51 = vpop.f32.mrf.mxu1 }
0x890e   :  { %7387 = vtanh.f32 %v5408_v60  ;;  %v6146_v46 = vmul.f32 -1.442695, %v5408_v60 }
0x890f   :  { %v6833_v0 = vpop.f32.mrf.mxu1 }
0x8910   :  { %7389 = vpow2.f32 %v6146_v46 }
0x891b   :  { %v7388_v1 = vpop.eup %7387 }
0x891c   :  { %5421 = vrot.lane.b32.xlu0 %v7388_v1, %s7741_s18 }
0x891d   :  { %v7390_v10 = vpop.eup %7389 }
0x891e   :  { %v5412_v59 = vadd.f32 1.0, %v7390_v10 }
0x8920   :  { %7391 = vrcp.f32 %v5412_v59 }
0x892d   :  { %v7392_v57 = vpop.eup %7391 }
0x892e   :  { %v5419_v18 = vmul.f32 %v7392_v57, %v5417_v22 }
0x898e   :  { %v5422_v27 = vpop.permute.xlu0 %5421 }
0x898f   :  { %v5424_v63 = vmul.f32 %v7392_v57, %v5422_v27 }
0x8991   :  { %5426 = vrot.lane.b32.xlu1 %v5424_v63, %s7760_s1 }
0x8a03   :  { %v5427_v17 = vpop.permute.xlu1 %5426 }
0x8a04   :  { %v5429_v20 = vadd.f32 %v5427_v17, %v5419_v18 }
0x8a06   :  { %7393 = vtanh.f32 %v5429_v20  ;;  %v5493_v41 = vrot.slane %v5429_v20, 2 }
0x8a13   :  { %v7394_v38 = vpop.eup %7393 }
0x8a14   :  { %5432 = vrot.lane.b32.xlu0 %v7394_v38, %s7741_s18 }
0x8a86   :  { %v5433_v25 = vpop.permute.xlu0 %5432 }
0x8a87   :  { %v9132_v3 = vmul.f32 %v7392_v57, %v5433_v25 }
0x8a89   :  { %v5436_v31 = vpack.c.bf16 %v9132_v3, %v9132_v3 }
0x8a8b   :  { %v5438_v62 = vrot.slane %v5436_v31, 1 }
0x8a8d   :  { %5439 = vrot.lane.b32.xlu1 %v5438_v62, %s7760_s1 }
0x8aff   :  { %v5440_v40 = vpop.permute.xlu1 %5439 }
0x8b00   :  { %6839 = vmatmul.mubr.msk.bf16.vlgmr.msra.gmra.mxu0 %vm376_vm3, %v5440_v40 }
0x8b01   :  { %6851 = vmatpush3.bf16.msra.mxu0 %v9048_v30  ;;  %6854 = vmatprep.mubr.msk.bf16.mxu0 %vm7758_vm0, %v7757_v2 }
0x8b02   :  { %6852 = vmatprep.subr.bf16.mxu0 %v7757_v2 }
0x8b05   :  { %6853 = vmatpush3.bf16.msra.mxu0 %v9052_v28 }
0x8b06   :  { %6866 = vmatprep.subr.bf16.mxu0 %v7757_v2 }
0x8bc0   :  { %v5478_v15 = vpop.f32.mrf.mxu0 }
0x8bc1   :  { %v5484_v11 = vadd.f32 %v5478_v15, %v9073_v39 }
0x8bc2   :  { %v6840_v58 = vpop.f32.mrf.mxu0 }
0x8bc3   :  { %7395 = vtanh.f32 %v5484_v11  ;;  %v6148_v8 = vmul.f32 -1.442695, %v5484_v11 }
0x8bc4   :  { %v5481_v43 = vpop.f32.mrf.mxu0 }
0x8bc5   :  { %7397 = vpow2.f32 %v6148_v8 }
0x8bc6   :  { %v6841_v26 = vpop.f32.mrf.mxu0 }
0x8bd0   :  { %v7396_v42 = vpop.eup %7395 }
0x8bd1   :  { %5497 = vrot.lane.b32.xlu0 %v7396_v42, %s7741_s18 }
0x8bd2   :  { %v7398_v37 = vpop.eup %7397 }
0x8bd3   :  { %v5488_v48 = vadd.f32 1.0, %v7398_v37 }
0x8bd5   :  { %7399 = vrcp.f32 %v5488_v48 }
0x8be2   :  { %v7400_v4 = vpop.eup %7399 }
0x8be3   :  { %v5495_v50 = vmul.f32 %v7400_v4, %v5493_v41 }
0x8c43   :  { %v5498_v9 = vpop.permute.xlu0 %5497 }
0x8c44   :  { %v5500_v24 = vmul.f32 %v7400_v4, %v5498_v9 }
0x8c46   :  { %5502 = vrot.lane.b32.xlu1 %v5500_v24, %s7760_s1 }
0x8cb8   :  { %v5503_v39 = vpop.permute.xlu1 %5502 }
0x8cb9   :  { %v5505_v16 = vadd.f32 %v5503_v39, %v5495_v50 }
0x8cbb   :  { %7401 = vtanh.f32 %v5505_v16  ;;  %v5571_v14 = vrot.slane %v5505_v16, 2 }
0x8cc8   :  { %v7402_v36 = vpop.eup %7401 }
0x8cc9   :  { %5508 = vrot.lane.b32.xlu0 %v7402_v36, %s7741_s18 }
0x8d3b   :  { %v5509_v34 = vpop.permute.xlu0 %5508 }
0x8d3c   :  { %v9148_v5 = vmul.f32 %v7400_v4, %v5509_v34 }
0x8d3e   :  { %v5512_v33 = vpack.c.bf16 %v9148_v5, %v9148_v5 }
0x8d40   :  { %5514 = vrot.lane.b32.xlu1 %v5512_v33, %s7760_s1 }
0x8db2   :  { %v5515_v53 = vpop.permute.xlu1 %5514 }
0x8db3   :  { %6847 = vmatmul.mubr.msk.bf16.vlgmr.msra.gmra.mxu1 %vm376_vm3, %v5515_v53 }
0x8db4   :  { %6859 = vmatpush3.bf16.msra.mxu1 %v9048_v30  ;;  %6862 = vmatprep.mubr.msk.bf16.mxu1 %vm7758_vm0, %v7757_v2 }
0x8db5   :  { %6860 = vmatprep.subr.bf16.mxu1 %v7757_v2 }
0x8db8   :  { %6861 = vmatpush3.bf16.msra.mxu1 %v9052_v28 }
0x8e73   :  { %v5553_v35 = vpop.f32.mrf.mxu1 }
0x8e74   :  { %v5560_v45 = vrot.slane %v5553_v35, 2 }
0x8e75   :  { %v6848_v7 = vpop.f32.mrf.mxu1 }
0x8e76   :  { %v5562_v52 = vadd.f32 %v5560_v45, %v9161_v19 }
0x8e77   :  { %v5556_v29 = vpop.f32.mrf.mxu1 }
0x8e78   :  { %7403 = vtanh.f32 %v5562_v52  ;;  %v6150_v0 = vmul.f32 -1.442695, %v5562_v52 }
0x8e79   :  { %v6849_v60 = vpop.f32.mrf.mxu1 }
0x8e7a   :  { %7405 = vpow2.f32 %v6150_v0 }
0x8e85   :  { %v7404_v51 = vpop.eup %7403 }
0x8e86   :  { %5575 = vrot.lane.b32.xlu0 %v7404_v51, %s7741_s18 }
0x8e87   :  { %v7406_v1 = vpop.eup %7405 }
0x8e88   :  { %v5566_v46 = vadd.f32 1.0, %v7406_v1 }
0x8e8a   :  { %7407 = vrcp.f32 %v5566_v46 }
0x8e97   :  { %v7408_v10 = vpop.eup %7407 }
0x8e98   :  { %v5573_v12 = vmul.f32 %v7408_v10, %v5571_v14 }
0x8ef8   :  { %v5576_v59 = vpop.permute.xlu0 %5575 }
0x8ef9   :  { %v5578_v57 = vmul.f32 %v7408_v10, %v5576_v59 }
0x8efb   :  { %5580 = vrot.lane.b32.xlu1 %v5578_v57, %s7760_s1 }
0x8f6d   :  { %v5581_v27 = vpop.permute.xlu1 %5580 }
0x8f6e   :  { %v5583_v63 = vadd.f32 %v5581_v27, %v5573_v12  ;;  %v5164_v27 = vrot.slane %v9110_v44, 2 }
0x8f70   :  { %7409 = vtanh.f32 %v5583_v63 }
0x8f7d   :  { %v7410_v22 = vpop.eup %7409 }
0x8f7e   :  { %5586 = vrot.lane.b32.xlu0 %v7410_v22, %s7741_s18 }
0x8ff0   :  { %v5587_v18 = vpop.permute.xlu0 %5586 }
0x8ff1   :  { %v9167_v17 = vmul.f32 %v7408_v10, %v5587_v18 }
0x8ff3   :  { %v5590_v20 = vpack.c.bf16 %v9167_v17, %v9167_v17 }
0x8ff5   :  { %v5592_v38 = vrot.slane %v5590_v20, 3 }
0x8ff7   :  { %5593 = vrot.lane.b32.xlu1 %v5592_v38, %s7760_s1 }
0x9069   :  { %v5594_v25 = vpop.permute.xlu1 %5593 }
0x906a   :  { %6855 = vmatmul.mubr.msk.bf16.vlgmr.msra.gmra.mxu0 %vm376_vm3, %v5594_v25 }
0x906b   :  { %6867 = vmatpush3.bf16.msra.mxu0 %v9048_v30  ;;  %6870 = vmatprep.mubr.msk.bf16.mxu0 %vm7758_vm0, %v7757_v2 }
0x906c   :  { %6868 = vmatprep.subr.bf16.mxu0 %v7757_v2 }
0x906f   :  { %6869 = vmatpush3.bf16.msra.mxu0 %v9052_v28  ;;  %v5650_v28 = vrot.slane %v5583_v63, 2  ;;  %v5166_v63 = vadd.f32 %v5164_v27, %v9018_v55 }
0x912a   :  { %v5632_v31 = vpop.f32.mrf.mxu0 }
0x912b   :  { %v5639_v62 = vrot.slane %v5632_v31, 4  ;;  %v6139_v31 = vmul.f32 -1.442695, %v5166_v63 }
0x912c   :  { %v6856_v40 = vpop.f32.mrf.mxu0 }
0x912d   :  { %v5641_v15 = vadd.f32 %v5639_v62, %v9161_v19 }
0x912e   :  { %v5635_v11 = vpop.f32.mrf.mxu0 }
0x912f   :  { %7411 = vtanh.f32 %v5641_v15  ;;  %v6152_v26 = vmul.f32 -1.442695, %v5641_v15 }
0x9130   :  { %v6857_v58 = vpop.f32.mrf.mxu0 }
0x9131   :  { %7413 = vpow2.f32 %v6152_v26  ;;  %v5175_v58 = vrot.slane %v9081_v13, 6 }
0x913c   :  { %v7412_v43 = vpop.eup %7411 }
0x913d   :  { %5654 = vrot.lane.b32.xlu0 %v7412_v43, %s7741_s18 }
0x913e   :  { %v7414_v30 = vpop.eup %7413 }
0x913f   :  { %v5645_v42 = vadd.f32 1.0, %v7414_v30 }
0x9141   :  { %7415 = vrcp.f32 %v5645_v42 }
0x914e   :  { %v7416_v8 = vpop.eup %7415 }
0x914f   :  { %v5652_v48 = vmul.f32 %v7416_v8, %v5650_v28 }
0x91af   :  { %v5655_v2 = vpop.permute.xlu0 %5654 }
0x91b0   :  { %v5657_v37 = vmul.f32 %v7416_v8, %v5655_v2 }
0x91b2   :  { %5659 = vrot.lane.b32.xlu1 %v5657_v37, %s7760_s1 }
0x9224   :  { %v5660_v4 = vpop.permute.xlu1 %5659 }
0x9225   :  { %v5662_v9 = vadd.f32 %v5660_v4, %v5652_v48 }
0x9227   :  { %7417 = vtanh.f32 %v5662_v9  ;;  %v5729_v10 = vrot.slane %v5662_v9, 2 }
0x9234   :  { %v7418_v24 = vpop.eup %7417 }
0x9235   :  { %5665 = vrot.lane.b32.xlu0 %v7418_v24, %s7741_s18 }
0x92a7   :  { %v5666_v41 = vpop.permute.xlu0 %5665 }
0x92a8   :  { %v5668_v50 = vmul.f32 %v7416_v8, %v5666_v41 }
0x92aa   :  { %v5669_v39 = vpack.c.bf16 %v5668_v50, %v5668_v50 }
0x92ac   :  { %v5671_v16 = vrot.slane %v5669_v39, 2 }
0x92ae   :  { %5672 = vrot.lane.b32.xlu1 %v5671_v16, %s7760_s1  ;;  %v5909_v16 = vld [vmem:[%s9298_s17 + $0x38] sm:$0xff] }
0x92af   :  { %6874 = vmatprep.subr.mxu1 %v5909_v16 }
0x9320   :  { %v5673_v36 = vpop.permute.xlu1 %5672 }
0x9321   :  { %6863 = vmatmul.mubr.msk.bf16.vlgmr.msra.gmra.mxu1 %vm376_vm3, %v5673_v36  ;;  %v5908_v36 = vld [vmem:[%s9298_s17 + $0x30] sm:$0xff] }
0x9322   :  { %6875 = vmatpush3.msra.mxu1 %v5909_v16 }
0x9323   :  { %6876 = vmatprep.subr.mxu1 %v5908_v36 }
0x9324   :  { %6877 = vmatpush3.msra.mxu1 %v5908_v36 }
0x93e1   :  { %v5711_v34 = vpop.f32.mrf.mxu1 }
0x93e2   :  { %v5718_v33 = vrot.slane %v5711_v34, 6  ;;  %v5903_v34 = vld [vmem:[%s9298_s17 + $0x8] sm:$0xff] }
0x93e3   :  { %v6864_v53 = vpop.f32.mrf.mxu1 }
0x93e4   :  { %v5720_v35 = vadd.f32 %v5718_v33, %v9161_v19 }
0x93e5   :  { %v5714_v45 = vpop.f32.mrf.mxu1 }
0x93e6   :  { %7419 = vtanh.f32 %v5720_v35  ;;  %v6154_v29 = vmul.f32 -1.442695, %v5720_v35 }
0x93e7   :  { %v6865_v7 = vpop.f32.mrf.mxu1 }
0x93e8   :  { %7421 = vpow2.f32 %v6154_v29 }
0x93f3   :  { %v7420_v52 = vpop.eup %7419 }
0x93f4   :  { %5733 = vrot.lane.b32.xlu0 %v7420_v52, %s7741_s18 }
0x93f5   :  { %v7422_v60 = vpop.eup %7421 }
0x93f6   :  { %v5724_v51 = vadd.f32 1.0, %v7422_v60 }
0x93f8   :  { %7423 = vrcp.f32 %v5724_v51 }
0x9405   :  { %v7424_v0 = vpop.eup %7423 }
0x9406   :  { %v5731_v59 = vmul.f32 %v7424_v0, %v5729_v10 }
0x9466   :  { %v5734_v1 = vpop.permute.xlu0 %5733 }
0x9467   :  { %v5736_v46 = vmul.f32 %v7424_v0, %v5734_v1 }
0x9469   :  { %5738 = vrot.lane.b32.xlu1 %v5736_v46, %s7760_s1 }
0x94db   :  { %v5739_v57 = vpop.permute.xlu1 %5738 }
0x94dc   :  { %v5741_v14 = vadd.f32 %v5739_v57, %v5731_v59 }
0x94de   :  { %7425 = vtanh.f32 %v5741_v14 }
0x94df   :  { %7427 = vtanh.f32 %v5166_v63 }
0x94e0   :  { %7429 = vpow2.f32 %v6139_v31 }
0x94eb   :  { %v7426_v12 = vpop.eup %7425 }
0x94ec   :  { %5744 = vrot.lane.b32.xlu0 %v7426_v12, %s7741_s18  ;;  %v7428_v25 = vpop.eup %7427 }
0x94ed   :  { %v7430_v62 = vpop.eup %7429 }
0x94ee   :  { %v5170_v40 = vadd.f32 1.0, %v7430_v62 }
0x94f0   :  { %7431 = vrcp.f32 %v5170_v40 }
0x94fd   :  { %v9193_v44 = vpop.eup %7431 }
0x94fe   :  { %v5177_v43 = vmul.f32 %v9193_v44, %v5175_v58  ;;  %v6157_v58 = vld [vmem:[#allocation2] ss:$0 sm:$0xff] }
0x955e   :  { %v5745_v22 = vpop.permute.xlu0 %5744 }
0x955f   :  { %v5747_v18 = vmul.f32 %v7424_v0, %v5745_v22 }
0x9561   :  { %v5748_v20 = vpack.c.bf16 %v5747_v18, %v5747_v18 }
0x9563   :  { %v5750_v38 = vrot.slane %v5748_v20, 1 }
0x9565   :  { %5751 = vrot.lane.b32.xlu1 %v5750_v38, %s7760_s1 }
0x9569   :  { %5179 = vrot.lane.b32.xlu1 %v7428_v25, %s7741_s18 }
0x95d7   :  { %v5752_v15 = vpop.permute.xlu1 %5751 }
0x95d8   :  { %6871 = vmatmul.mubr.msk.bf16.vlgmr.msra.gmra.mxu0 %vm376_vm3, %v5752_v15 }
0x95db   :  { %v5180_v55 = vpop.permute.xlu1 %5179 }
0x95dc   :  { %v5182_v11 = vmul.f32 %v9193_v44, %v5180_v55 }
0x95de   :  { %5184 = vrot.lane.b32.xlu1 %v5182_v11, %s7760_s1 }
0x9650   :  { %v5185_v26 = vpop.permute.xlu1 %5184 }
0x9651   :  { %v5187_v30 = vadd.f32 %v5185_v26, %v5177_v43 }
0x9653   :  { %7433 = vtanh.f32 %v5187_v30 }
0x9660   :  { %v7434_v42 = vpop.eup %7433 }
0x9661   :  { %5190 = vrot.lane.b32.xlu1 %v7434_v42, %s7741_s18 }
0x9665   :  { %5838 = vrot.lane.b32.xlu1 %v5747_v18, %s7741_s18 }
0x9669   :  { %5847 = vrot.lane.b32.xlu1 %v5668_v50, %s7741_s18 }
0x966d   :  { %5865 = vrot.lane.b32.xlu1 %v9148_v5, %s7741_s18 }
0x9671   :  { %5874 = vrot.lane.b32.xlu1 %v9132_v3, %s7741_s18 }
0x9675   :  { %5856 = vrot.lane.b32.xlu1 %v9167_v17, %s7741_s18 }
0x9679   :  { %5883 = vrot.lane.b32.xlu1 %v9116_v56, %s7741_s18  ;;  %v5805_v56 = vrot.slane %v5741_v14, 2 }
0x9698   :  { %v5790_v13 = vpop.f32.mrf.mxu0 }
0x9699   :  { %v5796_v8 = vadd.f32 %v5790_v13, %v9161_v19 }
0x969a   :  { %v6872_v2 = vpop.f32.mrf.mxu0 }
0x969b   :  { %7435 = vtanh.f32 %v5796_v8  ;;  %v6156_v5 = vmul.f32 -1.442695, %v5796_v8 }
0x969c   :  { %v5793_v37 = vpop.f32.mrf.mxu0 }
0x969d   :  { %7437 = vpow2.f32 %v6156_v5 }
0x969e   :  { %v6873_v28 = vpop.f32.mrf.mxu0 }
0x96a8   :  { %v7436_v48 = vpop.eup %7435 }
0x96a9   :  { %5809 = vrot.lane.b32.xlu0 %v7436_v48, %s7741_s18 }
0x96aa   :  { %v7438_v4 = vpop.eup %7437 }
0x96ab   :  { %v5800_v3 = vadd.f32 1.0, %v7438_v4 }
0x96ad   :  { %7439 = vrcp.f32 %v5800_v3 }
0x96ba   :  { %v7440_v9 = vpop.eup %7439 }
0x96bb   :  { %v5807_v41 = vmul.f32 %v7440_v9, %v5805_v56 }
0x971b   :  { %v5810_v17 = vpop.permute.xlu0 %5809 }
0x971c   :  { %v5812_v24 = vmul.f32 %v7440_v9, %v5810_v17 }
0x971e   :  { %5814 = vrot.lane.b32.xlu0 %v5812_v24, %s7760_s1 }
0x9790   :  { %v5815_v19 = vpop.permute.xlu0 %5814 }
0x9791   :  { %v5817_v50 = vadd.f32 %v5815_v19, %v5807_v41 }
0x9793   :  { %7441 = vtanh.f32 %v5817_v50 }
0x97a0   :  { %v7442_v39 = vpop.eup %7441 }
0x97a1   :  { %5820 = vrot.lane.b32.xlu0 %v7442_v39, %s7741_s18 }
0x97a5   :  { %5825 = vrot.lane.b32.xlu0 %v8918_v23, %s7760_s1  ;;  %v5907_v23 = vld [vmem:[%s9298_s17 + $0x28] sm:$0xff] }
0x97a6   :  { %6878 = vmatprep.subr.mxu1 %v5907_v23 }
0x97a7   :  { %6879 = vmatpush3.msra.mxu1 %v5907_v23 }
0x97a9   :  { %5834 = vrot.lane.b32.xlu0 %v8955_v32, %s7760_s1  ;;  %v5906_v32 = vld [vmem:[%s9298_s17 + $0x20] sm:$0xff] }
0x97aa   :  { %6880 = vmatprep.subr.mxu1 %v5906_v32 }
0x97ab   :  { %6881 = vmatpush3.msra.mxu1 %v5906_v32 }
0x97ad   :  { %5843 = vrot.lane.b32.xlu0 %v8988_v6, %s7760_s1  ;;  %v5905_v6 = vld [vmem:[%s9298_s17 + $0x18] sm:$0xff] }
0x97ae   :  { %6882 = vmatprep.subr.mxu1 %v5905_v6 }
0x97af   :  { %6883 = vmatpush3.msra.mxu1 %v5905_v6 }
0x97b1   :  { %5861 = vrot.lane.b32.xlu0 %v9024_v47, %s7760_s1  ;;  %v5191_v47 = vpop.permute.xlu1 %5190 }
0x97b5   :  { %5870 = vrot.lane.b32.xlu0 %v9043_v21, %s7760_s1  ;;  %v5193_v21 = vmul.f32 %v9193_v44, %v5191_v47  ;;  %v5839_v45 = vpop.permute.xlu1 %5838 }
0x97b9   :  { %5852 = vrot.lane.b32.xlu0 %v9004_v54, %s7760_s1  ;;  %v5904_v54 = vld [vmem:[%s9298_s17 + $0x10] sm:$0xff]  ;;  %v5848_v52 = vpop.permute.xlu1 %5847 }
0x97ba   :  { %6884 = vmatprep.subr.mxu1 %v5904_v54 }
0x97bb   :  { %6885 = vmatpush3.msra.mxu1 %v5904_v54 }
0x97bc   :  { %6886 = vmatprep.subr.mxu1 %v5903_v34 }
0x97bd   :  { %5879 = vrot.lane.b32.xlu0 %v9086_v61, %s7760_s1  ;;  %6887 = vmatpush3.msra.mxu1 %v5903_v34  ;;  %v5902_v61 = vld [vmem:[%s9298_s17] sm:$0xff]  ;;  %v5866_v60 = vpop.permute.xlu1 %5865 }
0x97be   :  { %6888 = vmatprep.subr.mxu1 %v5902_v61 }
0x97bf   :  { %6889 = vmatpush3.msra.mxu1 %v5902_v61 }
0x97c1   :  { %5888 = vrot.lane.b32.xlu0 %v5193_v21, %s7760_s1  ;;  %v5875_v0 = vpop.permute.xlu1 %5874 }
0x97c5   :  { %v5857_v46 = vpop.permute.xlu1 %5856 }
0x97c9   :  { %v5884_v59 = vpop.permute.xlu1 %5883 }
0x9813   :  { %v5821_v33 = vpop.permute.xlu0 %5820 }
0x9814   :  { %v5823_v53 = vmul.f32 %v7440_v9, %v5821_v33 }
0x9816   :  { %5829 = vrot.lane.b32.xlu1 %v5823_v53, %s7741_s18 }
0x9817   :  { %v5826_v35 = vpop.permute.xlu0 %5825 }
0x981a   :  { %5892 = vrot.lane.b32.xlu1 %v9091_v49, %s7741_s18 }
0x981b   :  { %v5835_v7 = vpop.permute.xlu0 %5834 }
0x981c   :  { %v5841_v12 = vsel %vm376_vm3, %v5835_v7, %v5839_v45 }
0x981f   :  { %v5844_v29 = vpop.permute.xlu0 %5843 }
0x9820   :  { %v5850_v63 = vsel %vm376_vm3, %v5844_v29, %v5848_v52 }
0x9823   :  { %v5862_v51 = vpop.permute.xlu0 %5861 }
0x9824   :  { %v5868_v20 = vsel %vm376_vm3, %v5862_v51, %v5866_v60 }
0x9827   :  { %v5871_v1 = vpop.permute.xlu0 %5870 }
0x9828   :  { %v5877_v27 = vsel %vm376_vm3, %v5871_v1, %v5875_v0 }
0x9829   :  { %v5899_v31 = vsel %vm1695_vm4, %v5868_v20, %v5877_v27 }
0x982b   :  { %v5853_v10 = vpop.permute.xlu0 %5852 }
0x982c   :  { %v5859_v38 = vsel %vm376_vm3, %v5853_v10, %v5857_v46 }
0x982f   :  { %v5880_v57 = vpop.permute.xlu0 %5879 }
0x9830   :  { %v5886_v22 = vsel %vm376_vm3, %v5880_v57, %v5884_v59 }
0x9831   :  { %v5900_v44 = vsel %vm1697_vm5, %v5899_v31, %v5886_v22 }
0x9833   :  { %v5889_v62 = vpop.permute.xlu0 %5888 }
0x9888   :  { %v5830_v14 = vpop.permute.xlu1 %5829 }
0x9889   :  { %v5832_v49 = vsel %vm376_vm3, %v5826_v35, %v5830_v14 }
0x988a   :  { %v5896_v18 = vsel %vm1695_vm4, %v5832_v49, %v5841_v12 }
0x988b   :  { %v5897_v25 = vsel %vm1697_vm5, %v5896_v18, %v5850_v63 }
0x988c   :  { %v5893_v40 = vpop.permute.xlu1 %5892  ;;  %v5898_v15 = vsel %vm1699_vm6, %v5897_v25, %v5859_v38 }
0x988d   :  { %v5895_v55 = vsel %vm376_vm3, %v5889_v62, %v5893_v40  ;;  %6890 = vmatprep.mubr.msk.f32.mxu1 %vm1732_vm7, %v5898_v15 }
0x988e   :  { %v5901_v11 = vsel %vm1699_vm6, %v5900_v44, %v5895_v55 }
0x988f   :  { %6891 = vmatmul.mubr.msk.f32.vlgmr.msra.gmra.mxu1 %vm1732_vm7, %v5901_v11 }
0x994f   :  { %v6892_v43 = vpop.f32.mrf.mxu1 }
0x9950   :  { %v5995_v26 = vadd.f32 %v6892_v43, %v6157_v58 }
0x9951   :  { %v5989_v30 = vpop.f32.mrf.mxu1 }
0x9952   :  { %5999 = vst.msk [vmem:[%s9300_s19 + $0x8] sm:$0xff] %vm271_vm2, %v5995_v26  ;;  %v5990_v42 = vadd.f32 %v6157_v58, %v5989_v30 }
0x9954   :  { %5998 = vst.msk [vmem:[%s9300_s19] sm:$0xff] %vm271_vm2, %v5990_v42 }
0x9955   :  { %6004 = vsyncpa [#allocation4], 1 }
0x9956   :  { %6005 = vsyncpa [#allocation6], 1 }
0x9957   :  { %6006 = vsyncpa [#allocation9], 1 }
0x9958   :  { %6007 = vsyncpa [#allocation12], 1 }
0x9959   :  { %6008 = vsyncpa [#allocation15], 1 }
0x995a   :  { %6009 = vsyncpa [#allocation18], 1 }
0x995b   :  { %6010 = vsyncpa [#allocation21], 1 }
0x995c   :  { %6011 = vsyncpa [#allocation24], 1 }

</bundles_post_ra>
